<compile_context>
chip_gen: v6e
topology: v6e:2x2x1
jax: 0.10.0
libtpu: 0.0.40
codegen_flags: <defaults>
</compile_context>

<pallas_src>
import functools
import math

import numpy as np

import jax
import jax.numpy as jnp
from jax import lax
from jax.experimental import pallas as pl
from jax.experimental.pallas import tpu as pltpu

LN1_EPS = 1e-6      # VSSBlock norm_layer = partial(nn.LayerNorm, eps=1e-6)
OUTNORM_EPS = 1e-5  # SS2D out_norm = nn.LayerNorm default
IN_EPS = 1e-5       # nn.InstanceNorm2d default

_DEFAULT_TN = 1024  # token rows per grid step (review: 512-2048, adaptive below)


# ----------------------------------------------------------------------------
# small numerics helpers (used identically inside kernels and in the reference)
# ----------------------------------------------------------------------------
def _silu(x):
    return x * (1.0 / (1.0 + jnp.exp(-x)))


def _softplus(x):
    # stable softplus built only from exp/log/abs/max (safe to lower in Mosaic)
    return jnp.maximum(x, 0.0) + jnp.log(1.0 + jnp.exp(-jnp.abs(x)))


def _round_up(x, m):
    return ((x + m - 1) // m) * m


def _pick_tn(n, tn):
    # adaptive tile: as large as the token count allows, multiple of 8 sublanes
    return min(_round_up(n, 8), _round_up(tn, 8))


def _pad_rows(x2, n_pad):
    n = x2.shape[0]
    if n_pad == n:
        return x2
    return jnp.concatenate(
        [x2, jnp.zeros((n_pad - n, x2.shape[1]), x2.dtype)], axis=0)


# ----------------------------------------------------------------------------
# K1: LayerNorm + Linear (ln_1 + in_proj), token-tiled
# ----------------------------------------------------------------------------
def _ln_linear_kernel(x_ref, g_ref, b_ref, w_ref, o_ref, *, eps):
    x = x_ref[...].astype(jnp.float32)
    mu = jnp.mean(x, axis=-1, keepdims=True)
    d = x - mu
    var = jnp.mean(d * d, axis=-1, keepdims=True)
    xn = d * lax.rsqrt(var + eps)
    xn = xn * g_ref[...].astype(jnp.float32) + b_ref[...].astype(jnp.float32)
    o_ref[...] = jnp.dot(xn, w_ref[...].astype(jnp.float32),
                         preferred_element_type=jnp.float32).astype(o_ref.dtype)


def ln_linear_pallas(x2, gamma, beta, w, *, eps, tn=_DEFAULT_TN):
    n, cin = x2.shape
    cout = w.shape[1]
    tn = _pick_tn(n, tn)
    n_pad = _round_up(n, tn)
    xp = _pad_rows(x2, n_pad)
    out = pl.pallas_call(
        functools.partial(_ln_linear_kernel, eps=eps),
        out_shape=jax.ShapeDtypeStruct((n_pad, cout), x2.dtype),
        grid_spec=pltpu.PrefetchScalarGridSpec(
            num_scalar_prefetch=0,
            grid=(n_pad // tn,),
            in_specs=[
                pl.BlockSpec((tn, cin), lambda i: (i, 0)),
                pl.BlockSpec((1, cin), lambda i: (0, 0)),
                pl.BlockSpec((1, cin), lambda i: (0, 0)),
                pl.BlockSpec((cin, cout), lambda i: (0, 0)),
            ],
            out_specs=pl.BlockSpec((tn, cout), lambda i: (i, 0)),
        ),
        compiler_params=pltpu.CompilerParams(dimension_semantics=("parallel",)),
    )(xp, gamma.reshape(1, cin), beta.reshape(1, cin), w)
    return out[:n]


def ln_linear_ref(x2, gamma, beta, w, *, eps):
    x = x2.astype(jnp.float32)
    mu = jnp.mean(x, axis=-1, keepdims=True)
    d = x - mu
    var = jnp.mean(d * d, axis=-1, keepdims=True)
    xn = d * lax.rsqrt(var + eps) * gamma + beta
    return jnp.dot(xn, w, precision=lax.Precision.HIGHEST).astype(x2.dtype)


# ----------------------------------------------------------------------------
# K3: LayerNorm + SiLU(z) gate + Linear (out_norm + gate + out_proj)
# ----------------------------------------------------------------------------
def _ln_gate_linear_kernel(y_ref, z_ref, g_ref, b_ref, w_ref, o_ref, *, eps):
    y = y_ref[...].astype(jnp.float32)
    z = z_ref[...].astype(jnp.float32)
    mu = jnp.mean(y, axis=-1, keepdims=True)
    d = y - mu
    var = jnp.mean(d * d, axis=-1, keepdims=True)
    yn = d * lax.rsqrt(var + eps)
    yn = yn * g_ref[...].astype(jnp.float32) + b_ref[...].astype(jnp.float32)
    gated = yn * _silu(z)
    o_ref[...] = jnp.dot(gated, w_ref[...].astype(jnp.float32),
                         preferred_element_type=jnp.float32).astype(o_ref.dtype)


def ln_gate_linear_pallas(y2, z2, gamma, beta, w, *, eps, tn=_DEFAULT_TN):
    n, din = y2.shape
    cout = w.shape[1]
    tn = _pick_tn(n, tn)
    n_pad = _round_up(n, tn)
    yp = _pad_rows(y2, n_pad)
    zp = _pad_rows(z2, n_pad)
    out = pl.pallas_call(
        functools.partial(_ln_gate_linear_kernel, eps=eps),
        out_shape=jax.ShapeDtypeStruct((n_pad, cout), y2.dtype),
        grid_spec=pltpu.PrefetchScalarGridSpec(
            num_scalar_prefetch=0,
            grid=(n_pad // tn,),
            in_specs=[
                pl.BlockSpec((tn, din), lambda i: (i, 0)),
                pl.BlockSpec((tn, din), lambda i: (i, 0)),
                pl.BlockSpec((1, din), lambda i: (0, 0)),
                pl.BlockSpec((1, din), lambda i: (0, 0)),
                pl.BlockSpec((din, cout), lambda i: (0, 0)),
            ],
            out_specs=pl.BlockSpec((tn, cout), lambda i: (i, 0)),
        ),
        compiler_params=pltpu.CompilerParams(dimension_semantics=("parallel",)),
    )(yp, zp, gamma.reshape(1, din), beta.reshape(1, din), w)
    return out[:n]


def ln_gate_linear_ref(y2, z2, gamma, beta, w, *, eps):
    y = y2.astype(jnp.float32)
    mu = jnp.mean(y, axis=-1, keepdims=True)
    d = y - mu
    var = jnp.mean(d * d, axis=-1, keepdims=True)
    yn = d * lax.rsqrt(var + eps) * gamma + beta
    gated = yn * _silu(z2.astype(jnp.float32))
    return jnp.dot(gated, w, precision=lax.Precision.HIGHEST).astype(y2.dtype)


# ----------------------------------------------------------------------------
# K6: final 1x1 conv + bias + residual add, token-tiled
# ----------------------------------------------------------------------------
def _linear_bias_res_kernel(x_ref, w_ref, b_ref, r_ref, o_ref):
    x = x_ref[...].astype(jnp.float32)
    y = jnp.dot(x, w_ref[...].astype(jnp.float32),
                preferred_element_type=jnp.float32)
    y = y + b_ref[...].astype(jnp.float32) + r_ref[...].astype(jnp.float32)
    o_ref[...] = y.astype(o_ref.dtype)


def linear_bias_res_pallas(x2, w, bias, res2, *, tn=_DEFAULT_TN):
    n, cin = x2.shape
    cout = w.shape[1]
    tn = _pick_tn(n, tn)
    n_pad = _round_up(n, tn)
    xp = _pad_rows(x2, n_pad)
    rp = _pad_rows(res2, n_pad)
    out = pl.pallas_call(
        _linear_bias_res_kernel,
        out_shape=jax.ShapeDtypeStruct((n_pad, cout), res2.dtype),
        grid_spec=pltpu.PrefetchScalarGridSpec(
            num_scalar_prefetch=0,
            grid=(n_pad // tn,),
            in_specs=[
                pl.BlockSpec((tn, cin), lambda i: (i, 0)),
                pl.BlockSpec((cin, cout), lambda i: (0, 0)),
                pl.BlockSpec((1, cout), lambda i: (0, 0)),
                pl.BlockSpec((tn, cout), lambda i: (i, 0)),
            ],
            out_specs=pl.BlockSpec((tn, cout), lambda i: (i, 0)),
        ),
        compiler_params=pltpu.CompilerParams(dimension_semantics=("parallel",)),
    )(xp, w, bias.reshape(1, cout), rp)
    return out[:n]


def linear_bias_res_ref(x2, w, bias, res2):
    y = jnp.dot(x2.astype(jnp.float32), w, precision=lax.Precision.HIGHEST)
    return (y + bias + res2.astype(jnp.float32)).astype(res2.dtype)


# ----------------------------------------------------------------------------
# K4 / K5: 1x1 conv + InstanceNorm + SiLU, and InstanceNorm + SiLU (per image)
# ----------------------------------------------------------------------------
def _pw_in_silu_kernel(x_ref, w_ref, b_ref, o_ref, *, eps):
    x = x_ref[0].astype(jnp.float32)                              # (L, Cin)
    y = jnp.dot(x, w_ref[...].astype(jnp.float32),
                preferred_element_type=jnp.float32)
    y = y + b_ref[...].astype(jnp.float32)                        # (L, Cout)
    mu = jnp.mean(y, axis=0, keepdims=True)
    d = y - mu
    var = jnp.mean(d * d, axis=0, keepdims=True)
    yn = d * lax.rsqrt(var + eps)
    o_ref[0] = _silu(yn).astype(o_ref.dtype)


def pw_in_silu_pallas(x_bld, w, bias, *, eps):
    B, L, cin = x_bld.shape
    cout = w.shape[1]
    return pl.pallas_call(
        functools.partial(_pw_in_silu_kernel, eps=eps),
        out_shape=jax.ShapeDtypeStruct((B, L, cout), x_bld.dtype),
        grid_spec=pltpu.PrefetchScalarGridSpec(
            num_scalar_prefetch=0,
            grid=(B,),
            in_specs=[
                pl.BlockSpec((1, L, cin), lambda i: (i, 0, 0)),
                pl.BlockSpec((cin, cout), lambda i: (0, 0)),
                pl.BlockSpec((1, cout), lambda i: (0, 0)),
            ],
            out_specs=pl.BlockSpec((1, L, cout), lambda i: (i, 0, 0)),
        ),
        compiler_params=pltpu.CompilerParams(dimension_semantics=("parallel",)),
    )(x_bld, w, bias.reshape(1, cout))


def pw_in_silu_ref(x_bld, w, bias, *, eps):
    y = jnp.einsum("blc,cd->bld", x_bld.astype(jnp.float32), w,
                   precision=lax.Precision.HIGHEST) + bias
    mu = jnp.mean(y, axis=1, keepdims=True)
    d = y - mu
    var = jnp.mean(d * d, axis=1, keepdims=True)
    return _silu(d * lax.rsqrt(var + eps)).astype(x_bld.dtype)


def _in_silu_kernel(x_ref, o_ref, *, eps):
    x = x_ref[0].astype(jnp.float32)
    mu = jnp.mean(x, axis=0, keepdims=True)
    d = x - mu
    var = jnp.mean(d * d, axis=0, keepdims=True)
    xn = d * lax.rsqrt(var + eps)
    o_ref[0] = _silu(xn).astype(o_ref.dtype)


def in_silu_pallas(x_bld, *, eps):
    B, L, c = x_bld.shape
    return pl.pallas_call(
        functools.partial(_in_silu_kernel, eps=eps),
        out_shape=jax.ShapeDtypeStruct((B, L, c), x_bld.dtype),
        grid_spec=pltpu.PrefetchScalarGridSpec(
            num_scalar_prefetch=0,
            grid=(B,),
            in_specs=[pl.BlockSpec((1, L, c), lambda i: (i, 0, 0))],
            out_specs=pl.BlockSpec((1, L, c), lambda i: (i, 0, 0)),
        ),
        compiler_params=pltpu.CompilerParams(dimension_semantics=("parallel",)),
    )(x_bld)


def in_silu_ref(x_bld, *, eps):
    x = x_bld.astype(jnp.float32)
    mu = jnp.mean(x, axis=1, keepdims=True)
    d = x - mu
    var = jnp.mean(d * d, axis=1, keepdims=True)
    return _silu(d * lax.rsqrt(var + eps)).astype(x_bld.dtype)


# ----------------------------------------------------------------------------
# K2: fused x_proj + dt_proj + softplus + selective scan, per (batch, direction)
# ----------------------------------------------------------------------------
def _ssm_scan_kernel(xs_ref, wdbl_ref, dtw_ref, dtb_ref, alog_ref, d_ref, o_ref,
                     da_scr, dbu_scr, hall_scr, *, dt_rank, d_state):
    L = xs_ref.shape[2]
    din = xs_ref.shape[3]
    u = xs_ref[0, 0].astype(jnp.float32)                            # (L, Din)

    # x_proj: (L, Din) @ (Din, R + 2*N) -> [dt_r | B | C]
    x_dbl = jnp.dot(u, wdbl_ref[0].astype(jnp.float32),
                    preferred_element_type=jnp.float32)             # (L, R+2N)
    dt_r = x_dbl[:, :dt_rank]                                       # (L, R)
    b_mat = x_dbl[:, dt_rank:dt_rank + d_state]                     # (L, N)
    c_mat = x_dbl[:, dt_rank + d_state:dt_rank + 2 * d_state]       # (L, N)

    # dt_proj, then delta = softplus(dt + bias)
    dt = jnp.dot(dt_r, dtw_ref[0].astype(jnp.float32),
                 preferred_element_type=jnp.float32)                # (L, Din)
    delta = _softplus(dt + dtb_ref[0].astype(jnp.float32))          # (L, Din)

    a_neg = -jnp.exp(alog_ref[0].astype(jnp.float32))               # (N, Din)
    da_scr[...] = jnp.exp(delta[:, None, :] * a_neg[None, :, :])    # (L, N, Din)
    dbu_scr[...] = (delta * u)[:, None, :] * b_mat[:, :, None]      # (L, N, Din)

    # sequential recurrence over L; per-step state h is (N, Din)
    def step(l, h):
        h = da_scr[l] * h + dbu_scr[l]
        hall_scr[l] = h
        return h

    lax.fori_loop(0, L, step, jnp.zeros((d_state, din), jnp.float32))

    y = jnp.sum(hall_scr[...] * c_mat[:, :, None], axis=1)          # (L, Din)
    y = y + u * d_ref[0].astype(jnp.float32)                        # D skip
    o_ref[0, 0] = y.astype(o_ref.dtype)


def ssm_core_pallas(xs_bkld, xproj_t, dtw_t, dt_bias, A_logs_t, Ds):
    B, K, L, din = xs_bkld.shape
    n_state = A_logs_t.shape[1]
    dt_rank = dtw_t.shape[1]
    c_dbl = xproj_t.shape[2]
    kernel = functools.partial(_ssm_scan_kernel, dt_rank=dt_rank, d_state=n_state)
    return pl.pallas_call(
        kernel,
        out_shape=jax.ShapeDtypeStruct((B, K, L, din), jnp.float32),
        grid_spec=pltpu.PrefetchScalarGridSpec(
            num_scalar_prefetch=0,
            grid=(B, K),
            in_specs=[
                pl.BlockSpec((1, 1, L, din), lambda b, k: (b, k, 0, 0)),
                pl.BlockSpec((1, din, c_dbl), lambda b, k: (k, 0, 0)),
                pl.BlockSpec((1, dt_rank, din), lambda b, k: (k, 0, 0)),
                pl.BlockSpec((1, 1, din), lambda b, k: (k, 0, 0)),
                pl.BlockSpec((1, n_state, din), lambda b, k: (k, 0, 0)),
                pl.BlockSpec((1, 1, din), lambda b, k: (k, 0, 0)),
            ],
            out_specs=pl.BlockSpec((1, 1, L, din), lambda b, k: (b, k, 0, 0)),
            scratch_shapes=[
                pltpu.VMEM((L, n_state, din), jnp.float32),   # exp(delta*A)
                pltpu.VMEM((L, n_state, din), jnp.float32),   # delta*u*B
                pltpu.VMEM((L, n_state, din), jnp.float32),   # all states h_l
            ],
        ),
        compiler_params=pltpu.CompilerParams(
            dimension_semantics=("parallel", "parallel")),
    )(xs_bkld.astype(jnp.float32), xproj_t, dtw_t, dt_bias, A_logs_t, Ds)


def ssm_core_ref(xs_bkld, xproj_t, dtw_t, dt_bias, A_logs_t, Ds):
    B, K, L, din = xs_bkld.shape
    n_state = A_logs_t.shape[1]
    dt_rank = dtw_t.shape[1]
    xs = xs_bkld.astype(jnp.float32)
    x_dbl = jnp.einsum("bkld,kdc->bklc", xs, xproj_t,
                       precision=lax.Precision.HIGHEST)
    dt_r = x_dbl[..., :dt_rank]
    b_mat = x_dbl[..., dt_rank:dt_rank + n_state]
    c_mat = x_dbl[..., dt_rank + n_state:dt_rank + 2 * n_state]
    dt = jnp.einsum("bklr,krd->bkld", dt_r, dtw_t,
                    precision=lax.Precision.HIGHEST)
    delta = _softplus(dt + dt_bias[None])                           # (B,K,L,Din)
    a_neg = -jnp.exp(A_logs_t)                                      # (K,N,Din)
    da = jnp.exp(delta[:, :, :, None, :] * a_neg[None, :, None, :, :])
    dbu = (delta * xs)[:, :, :, None, :] * b_mat[..., None]

    def step(h, ab):
        a, b = ab
        h = a * h + b
        return h, h

    _, hs = lax.scan(step, jnp.zeros((B, K, n_state, din), jnp.float32),
                     (jnp.moveaxis(da, 2, 0), jnp.moveaxis(dbu, 2, 0)))
    hs = jnp.moveaxis(hs, 0, 2)                                     # (B,K,L,N,Din)
    y = jnp.sum(hs * c_mat[..., None], axis=-2) + xs * Ds[None]
    return y


# ----------------------------------------------------------------------------
# XLA glue: depthwise convs and multi-direction scan index shuffling
# ----------------------------------------------------------------------------
def _dwconv_nhwc(x, w, bias=None):
    out = lax.conv_general_dilated(
        x, w, window_strides=(1, 1), padding="SAME",
        dimension_numbers=("NHWC", "HWIO", "NHWC"),
        feature_group_count=x.shape[-1])
    if bias is not None:
        out = out + bias
    return out


def _scan_perms(size):
    # scan_type='scan': boustrophedon ordering (reverse every odd row)
    idx = np.arange(size * size).reshape(size, size).copy()
    idx[1::2] = idx[1::2, ::-1]
    flat = idx.reshape(-1)
    inv = np.argsort(flat)
    return jnp.asarray(flat, dtype=jnp.int32), jnp.asarray(inv, dtype=jnp.int32)


def _build_directions(x_chw, flat_idx):
    # x_chw: (B, D, H, W) -> (B, K=8, D, L) in scan order
    B, D, H, W = x_chw.shape
    L = H * W
    enc = lambda t: t[..., flat_idx]
    x0 = x_chw.reshape(B, D, L)
    x1 = jnp.swapaxes(x_chw, 2, 3).reshape(B, D, L)
    xr = jnp.rot90(x_chw, k=1, axes=(2, 3))
    x2 = xr.reshape(B, D, L)
    x3 = jnp.swapaxes(xr, 2, 3).reshape(B, D, L)
    xs4 = jnp.stack([enc(x0), enc(x1), enc(x2), enc(x3)], axis=1)   # (B,4,D,L)
    return jnp.concatenate([xs4, jnp.flip(xs4, axis=-1)], axis=1)   # (B,8,D,L)


def _merge_directions(out_y, inv_idx, H, W):
    # out_y: (B, K=8, D, L) -> (B, L, D)
    B, K, D, L = out_y.shape
    dec = lambda t: t[..., inv_idx]
    fwd = out_y[:, :K // 2]
    inv = jnp.flip(out_y[:, K // 2:], axis=-1)
    ys = [dec(fwd[:, 0]), dec(inv[:, 0])]
    for src in (fwd[:, 1], inv[:, 1]):
        t = dec(src).reshape(B, D, W, H)
        ys.append(jnp.swapaxes(t, 2, 3).reshape(B, D, L))
    for src in (fwd[:, 2], inv[:, 2]):
        t = dec(src).reshape(B, D, W, H)
        ys.append(jnp.rot90(t, k=3, axes=(2, 3)).reshape(B, D, L))
    for src in (fwd[:, 3], inv[:, 3]):
        t = dec(src).reshape(B, D, W, H)
        ys.append(jnp.rot90(jnp.swapaxes(t, 2, 3), k=3, axes=(2, 3)).reshape(B, D, L))
    y = ys[0]
    for t in ys[1:]:
        y = y + t
    return jnp.swapaxes(y, 1, 2)


# ----------------------------------------------------------------------------
# module forward (Pallas or pure-JAX reference path for the kernelized ops)
# ----------------------------------------------------------------------------
def _vss_block(x, p, flat_idx, inv_idx, use_pallas):
    B, H, W, C = x.shape
    L = H * W
    N = B * L
    d_inner = p["out_proj_w"].shape[0]

    xt = x.reshape(N, C)
    if use_pallas:
        xz = ln_linear_pallas(xt, p["ln1_g"], p["ln1_b"], p["in_proj_w"], eps=LN1_EPS)
    else:
        xz = ln_linear_ref(xt, p["ln1_g"], p["ln1_b"], p["in_proj_w"], eps=LN1_EPS)
    x_in, z = xz[:, :d_inner], xz[:, d_inner:]

    # TODO(synk): depthwise 3x3 conv stays in XLA (lax.conv_general_dilated).
    x_sp = _dwconv_nhwc(x_in.reshape(B, H, W, d_inner), p["conv_w"], bias=p["conv_b"])
    x_sp = _silu(x_sp)

    # TODO(synk): multi-direction scan ordering is pure index shuffling (XLA glue).
    x_chw = jnp.transpose(x_sp, (0, 3, 1, 2))                 # (B, Din, H, W)
    xs8 = _build_directions(x_chw, flat_idx)                  # (B, 8, Din, L)
    xs_bkld = jnp.transpose(xs8, (0, 1, 3, 2))                # (B, 8, L, Din)

    if use_pallas:
        out_y = ssm_core_pallas(xs_bkld, p["xproj_t"], p["dtw_t"], p["dt_bias"],
                                p["A_logs_t"], p["Ds"])
    else:
        out_y = ssm_core_ref(xs_bkld, p["xproj_t"], p["dtw_t"], p["dt_bias"],
                             p["A_logs_t"], p["Ds"])

    y_bld = _merge_directions(jnp.transpose(out_y, (0, 1, 3, 2)), inv_idx, H, W)
    y2 = y_bld.reshape(N, d_inner).astype(x.dtype)

    if use_pallas:
        out = ln_gate_linear_pallas(y2, z, p["outnorm_g"], p["outnorm_b"],
                                    p["out_proj_w"], eps=OUTNORM_EPS)
    else:
        out = ln_gate_linear_ref(y2, z, p["outnorm_g"], p["outnorm_b"],
                                 p["out_proj_w"], eps=OUTNORM_EPS)
    return x + out.reshape(B, H, W, C)


def convbnssm_forward(params, x, *, use_pallas=True):
    B, H, W, C = x.shape
    L = H * W
    N = B * L
    flat_idx = params["scan_flat"]
    inv_idx = params["scan_inv"]

    out_ssm = x
    for blk in params["blocks"]:
        out_ssm = _vss_block(out_ssm, blk, flat_idx, inv_idx, use_pallas)

    x_bld = x.reshape(B, L, C)

    def branch(pw1_w, pw1_b, dw_w, pw2_w, pw2_b):
        if use_pallas:
            t = pw_in_silu_pallas(x_bld, pw1_w, pw1_b, eps=IN_EPS)
        else:
            t = pw_in_silu_ref(x_bld, pw1_w, pw1_b, eps=IN_EPS)
        # TODO(synk): depthwise 5x5/7x7 convs stay in XLA.
        t = _dwconv_nhwc(t.reshape(B, H, W, C), dw_w).reshape(B, L, C)
        if use_pallas:
            t = in_silu_pallas(t, eps=IN_EPS)
            t = pw_in_silu_pallas(t, pw2_w, pw2_b, eps=IN_EPS)
        else:
            t = in_silu_ref(t, eps=IN_EPS)
            t = pw_in_silu_ref(t, pw2_w, pw2_b, eps=IN_EPS)
        return t

    out_77 = branch(params["w_1b3"], params["b_1b3"], params["w_77"],
                    params["w_1a3"], params["b_1a3"])
    out_55 = branch(params["w_1b5"], params["b_1b5"], params["w_55"],
                    params["w_1a5"], params["b_1a5"])

    cat = jnp.concatenate([out_ssm.reshape(B, L, C), out_55, out_77], axis=-1)
    if use_pallas:
        out = linear_bias_res_pallas(cat.reshape(N, 3 * C), params["w_final"],
                                     params["b_final"], x.reshape(N, C))
    else:
        out = linear_bias_res_ref(cat.reshape(N, 3 * C), params["w_final"],
                                  params["b_final"], x.reshape(N, C))
    return out.reshape(B, H, W, C)


# ----------------------------------------------------------------------------
# deterministic parameter construction
# ----------------------------------------------------------------------------
def make_params(key, *, hidden, d_state, depth, num_direction, size):
    d_inner = 2 * hidden
    dt_rank = max(1, math.ceil(hidden / 16))
    c_dbl = dt_rank + 2 * d_state
    K = num_direction
    keys = iter(jax.random.split(key, depth * 16 + 16))

    def rnd(shape, scale):
        return jax.random.normal(next(keys), shape, dtype=jnp.float32) * scale

    blocks = []
    for _ in range(depth):
        blocks.append(dict(
            ln1_g=1.0 + rnd((hidden,), 0.05),
            ln1_b=rnd((hidden,), 0.05),
            in_proj_w=rnd((hidden, 2 * d_inner), hidden ** -0.5),
            conv_w=rnd((3, 3, 1, d_inner), 0.3),
            conv_b=rnd((d_inner,), 0.05),
            xproj_t=rnd((K, d_inner, c_dbl), d_inner ** -0.5),
            dtw_t=rnd((K, dt_rank, d_inner), dt_rank ** -0.5),
            dt_bias=rnd((K, 1, d_inner), 0.5),
            A_logs_t=jnp.tile(
                jnp.log(jnp.arange(1, d_state + 1, dtype=jnp.float32))[None, :, None],
                (K, 1, d_inner)),
            Ds=jnp.ones((K, 1, d_inner), jnp.float32),
            outnorm_g=1.0 + rnd((d_inner,), 0.05),
            outnorm_b=rnd((d_inner,), 0.05),
            out_proj_w=rnd((d_inner, hidden), d_inner ** -0.5),
        ))

    flat, inv = _scan_perms(size)
    return dict(
        blocks=blocks,
        scan_flat=flat,
        scan_inv=inv,
        w_1b3=rnd((hidden, hidden), hidden ** -0.5), b_1b3=rnd((hidden,), 0.05),
        w_1a3=rnd((hidden, hidden), hidden ** -0.5), b_1a3=rnd((hidden,), 0.05),
        w_1b5=rnd((hidden, hidden), hidden ** -0.5), b_1b5=rnd((hidden,), 0.05),
        w_1a5=rnd((hidden, hidden), hidden ** -0.5), b_1a5=rnd((hidden,), 0.05),
        w_77=rnd((7, 7, 1, hidden), 1.0 / 7.0),
        w_55=rnd((5, 5, 1, hidden), 1.0 / 5.0),
        w_final=rnd((3 * hidden, hidden), (3 * hidden) ** -0.5),
        b_final=rnd((hidden,), 0.05),
    )


if __name__ == "__main__":
    hidden = 32
    size = 8          # SCANS size must equal spatial H = W
    batch = 2
    depth = 2
    d_state = 16
    num_direction = 8

    key = jax.random.PRNGKey(0)
    kp, kx = jax.random.split(key)
    params = make_params(kp, hidden=hidden, d_state=d_state, depth=depth,
                         num_direction=num_direction, size=size)
    x = jax.random.normal(kx, (batch, size, size, hidden), dtype=jnp.float32)

    fwd_pallas = jax.jit(functools.partial(convbnssm_forward, use_pallas=True))
    fwd_ref = jax.jit(functools.partial(convbnssm_forward, use_pallas=False))

    out = jax.block_until_ready(fwd_pallas(params, x))
    ref = jax.block_until_ready(fwd_ref(params, x))

    assert out.shape == x.shape, out.shape
    assert bool(jnp.all(jnp.isfinite(out))), "non-finite output"
    max_err = float(jnp.max(jnp.abs(out - ref)))
    assert jnp.allclose(out, ref, atol=2e-3, rtol=2e-3), f"mismatch, max err {max_err}"

    print("KERNEL_OK")
</pallas_src>

<mosaic_0001>
module attributes {stable_mosaic.version = 11 : i64} {
  func.func @_in_silu_kernel(%arg0: i32, %arg1: memref<1x64x32xf32, #tpu.memory_space<vmem>>, %arg2: memref<1x64x32xf32, #tpu.memory_space<vmem>>) attributes {dimension_semantics = [#tpu.dimension_semantics<parallel>], iteration_bounds = array<i64: 2>, scalar_prefetch = 0 : i64, scratch_operands = 0 : i64, tpu.core_type = #tpu.core_type<tc>, window_params = [{transform_indices = @transform_0, window_bounds = array<i64: 1, 64, 32>}, {transform_indices = @transform_1, window_bounds = array<i64: 1, 64, 32>}]} {
    %c0 = arith.constant 0 : index
    %c0_0 = arith.constant 0 : index
    %c0_1 = arith.constant 0 : index
    %0 = vector.load %arg1[%c0, %c0_0, %c0_1] : memref<1x64x32xf32, #tpu.memory_space<vmem>>, vector<1x64x32xf32>
    %1 = vector.shape_cast %0 : vector<1x64x32xf32> to vector<64x32xf32>
    %cst = arith.constant dense<0.000000e+00> : vector<32xf32>
    %2 = vector.multi_reduction <add>, %1, %cst [0] : vector<64x32xf32> to vector<32xf32>
    %3 = vector.shape_cast %2 : vector<32xf32> to vector<1x32xf32>
    %cst_2 = arith.constant 6.400000e+01 : f32
    %4 = vector.broadcast %cst_2 : f32 to vector<1x32xf32>
    %5 = arith.divf %3, %4 : vector<1x32xf32>
    %6 = vector.broadcast %5 : vector<1x32xf32> to vector<64x32xf32>
    %7 = arith.subf %1, %6 : vector<64x32xf32>
    %8 = arith.mulf %7, %7 : vector<64x32xf32>
    %cst_3 = arith.constant dense<0.000000e+00> : vector<32xf32>
    %9 = vector.multi_reduction <add>, %8, %cst_3 [0] : vector<64x32xf32> to vector<32xf32>
    %10 = vector.shape_cast %9 : vector<32xf32> to vector<1x32xf32>
    %cst_4 = arith.constant 6.400000e+01 : f32
    %11 = vector.broadcast %cst_4 : f32 to vector<1x32xf32>
    %12 = arith.divf %10, %11 : vector<1x32xf32>
    %cst_5 = arith.constant 9.99999974E-6 : f32
    %13 = vector.broadcast %cst_5 : f32 to vector<1x32xf32>
    %14 = arith.addf %12, %13 : vector<1x32xf32>
    %15 = math.rsqrt %14 : vector<1x32xf32>
    %16 = vector.broadcast %15 : vector<1x32xf32> to vector<64x32xf32>
    %17 = arith.mulf %7, %16 : vector<64x32xf32>
    %cst_6 = arith.constant 0.000000e+00 : f32
    %18 = vector.broadcast %cst_6 : f32 to vector<64x32xf32>
    %19 = arith.subf %18, %17 : vector<64x32xf32>
    %20 = math.exp %19 : vector<64x32xf32>
    %cst_7 = arith.constant 1.000000e+00 : f32
    %21 = vector.broadcast %cst_7 : f32 to vector<64x32xf32>
    %22 = arith.addf %21, %20 : vector<64x32xf32>
    %cst_8 = arith.constant 1.000000e+00 : f32
    %23 = vector.broadcast %cst_8 : f32 to vector<64x32xf32>
    %24 = arith.divf %23, %22 : vector<64x32xf32>
    %25 = arith.mulf %17, %24 : vector<64x32xf32>
    %c0_9 = arith.constant 0 : index
    %c0_10 = arith.constant 0 : index
    %c0_11 = arith.constant 0 : index
    %26 = vector.load %arg2[%c0_9, %c0_10, %c0_11] : memref<1x64x32xf32, #tpu.memory_space<vmem>>, vector<1x64x32xf32>
    %27 = vector.shape_cast %26 : vector<1x64x32xf32> to vector<64x32xf32>
    %28 = vector.shape_cast %25 : vector<64x32xf32> to vector<1x64x32xf32>
    tpu.vector_store %arg2[%c0_9, %c0_10, %c0_11], %28 {strides = array<i32>} : memref<1x64x32xf32, #tpu.memory_space<vmem>>, vector<1x64x32xf32>,
    return
  }
  func.func @transform_0(%arg0: i32) -> (i32, i32, i32) {
    %c0_i32 = arith.constant 0 : i32
    %c0_i32_0 = arith.constant 0 : i32
    %c0_i32_1 = arith.constant 0 : i32
    return %arg0, %c0_i32, %c0_i32_0 : i32, i32, i32
  }
  func.func @transform_1(%arg0: i32) -> (i32, i32, i32) {
    %c0_i32 = arith.constant 0 : i32
    %c0_i32_0 = arith.constant 0 : i32
    %c0_i32_1 = arith.constant 0 : i32
    return %arg0, %c0_i32, %c0_i32_0 : i32, i32, i32
  }
}

module attributes {stable_mosaic.version = 11 : i64} {
  func.func @_pw_in_silu_kernel(%arg0: i32, %arg1: memref<1x64x32xf32, #tpu.memory_space<vmem>>, %arg2: memref<32x32xf32, #tpu.memory_space<vmem>>, %arg3: memref<1x32xf32, #tpu.memory_space<vmem>>, %arg4: memref<1x64x32xf32, #tpu.memory_space<vmem>>) attributes {dimension_semantics = [#tpu.dimension_semantics<parallel>], iteration_bounds = array<i64: 2>, scalar_prefetch = 0 : i64, scratch_operands = 0 : i64, tpu.core_type = #tpu.core_type<tc>, window_params = [{transform_indices = @transform_0, window_bounds = array<i64: 1, 64, 32>}, {pipeline_mode = #tpu.pipeline_mode<synchronous>, transform_indices = @transform_1, window_bounds = array<i64: 32, 32>}, {pipeline_mode = #tpu.pipeline_mode<synchronous>, transform_indices = @transform_2, window_bounds = array<i64: 1, 32>}, {transform_indices = @transform_3, window_bounds = array<i64: 1, 64, 32>}]} {
    %c0 = arith.constant 0 : index
    %c0_0 = arith.constant 0 : index
    %c0_1 = arith.constant 0 : index
    %0 = vector.load %arg1[%c0, %c0_0, %c0_1] : memref<1x64x32xf32, #tpu.memory_space<vmem>>, vector<1x64x32xf32>
    %1 = vector.shape_cast %0 : vector<1x64x32xf32> to vector<64x32xf32>
    %c0_2 = arith.constant 0 : index
    %c0_3 = arith.constant 0 : index
    %2 = vector.load %arg2[%c0_2, %c0_3] : memref<32x32xf32, #tpu.memory_space<vmem>>, vector<32x32xf32>
    %cst = arith.constant dense<0.000000e+00> : vector<64x32xf32>
    %3 = tpu.matmul %1, %2, %cst {dimension_numbers = #tpu.dot_dimension_numbers<[1], [0], [0], [1], [0, 0, 1, 1], [], []>} : vector<64x32xf32>, vector<32x32xf32>, vector<64x32xf32> -> vector<64x32xf32>
    %c0_4 = arith.constant 0 : index
    %c0_5 = arith.constant 0 : index
    %4 = vector.load %arg3[%c0_4, %c0_5] : memref<1x32xf32, #tpu.memory_space<vmem>>, vector<1x32xf32>
    %5 = vector.broadcast %4 : vector<1x32xf32> to vector<64x32xf32>
    %6 = arith.addf %3, %5 : vector<64x32xf32>
    %cst_6 = arith.constant dense<0.000000e+00> : vector<32xf32>
    %7 = vector.multi_reduction <add>, %6, %cst_6 [0] : vector<64x32xf32> to vector<32xf32>
    %8 = vector.shape_cast %7 : vector<32xf32> to vector<1x32xf32>
    %cst_7 = arith.constant 6.400000e+01 : f32
    %9 = vector.broadcast %cst_7 : f32 to vector<1x32xf32>
    %10 = arith.divf %8, %9 : vector<1x32xf32>
    %11 = vector.broadcast %10 : vector<1x32xf32> to vector<64x32xf32>
    %12 = arith.subf %6, %11 : vector<64x32xf32>
    %13 = arith.mulf %12, %12 : vector<64x32xf32>
    %cst_8 = arith.constant dense<0.000000e+00> : vector<32xf32>
    %14 = vector.multi_reduction <add>, %13, %cst_8 [0] : vector<64x32xf32> to vector<32xf32>
    %15 = vector.shape_cast %14 : vector<32xf32> to vector<1x32xf32>
    %cst_9 = arith.constant 6.400000e+01 : f32
    %16 = vector.broadcast %cst_9 : f32 to vector<1x32xf32>
    %17 = arith.divf %15, %16 : vector<1x32xf32>
    %cst_10 = arith.constant 9.99999974E-6 : f32
    %18 = vector.broadcast %cst_10 : f32 to vector<1x32xf32>
    %19 = arith.addf %17, %18 : vector<1x32xf32>
    %20 = math.rsqrt %19 : vector<1x32xf32>
    %21 = vector.broadcast %20 : vector<1x32xf32> to vector<64x32xf32>
    %22 = arith.mulf %12, %21 : vector<64x32xf32>
    %cst_11 = arith.constant 0.000000e+00 : f32
    %23 = vector.broadcast %cst_11 : f32 to vector<64x32xf32>
    %24 = arith.subf %23, %22 : vector<64x32xf32>
    %25 = math.exp %24 : vector<64x32xf32>
    %cst_12 = arith.constant 1.000000e+00 : f32
    %26 = vector.broadcast %cst_12 : f32 to vector<64x32xf32>
    %27 = arith.addf %26, %25 : vector<64x32xf32>
    %cst_13 = arith.constant 1.000000e+00 : f32
    %28 = vector.broadcast %cst_13 : f32 to vector<64x32xf32>
    %29 = arith.divf %28, %27 : vector<64x32xf32>
    %30 = arith.mulf %22, %29 : vector<64x32xf32>
    %c0_14 = arith.constant 0 : index
    %c0_15 = arith.constant 0 : index
    %c0_16 = arith.constant 0 : index
    %31 = vector.load %arg4[%c0_14, %c0_15, %c0_16] : memref<1x64x32xf32, #tpu.memory_space<vmem>>, vector<1x64x32xf32>
    %32 = vector.shape_cast %31 : vector<1x64x32xf32> to vector<64x32xf32>
    %33 = vector.shape_cast %30 : vector<64x32xf32> to vector<1x64x32xf32>
    tpu.vector_store %arg4[%c0_14, %c0_15, %c0_16], %33 {strides = array<i32>} : memref<1x64x32xf32, #tpu.memory_space<vmem>>, vector<1x64x32xf32>,
    return
  }
  func.func @transform_0(%arg0: i32) -> (i32, i32, i32) {
    %c0_i32 = arith.constant 0 : i32
    %c0_i32_0 = arith.constant 0 : i32
    %c0_i32_1 = arith.constant 0 : i32
    return %arg0, %c0_i32, %c0_i32_0 : i32, i32, i32
  }
  func.func @transform_1(%arg0: i32) -> (i32, i32) {
    %c0_i32 = arith.constant 0 : i32
    %c0_i32_0 = arith.constant 0 : i32
    %c0_i32_1 = arith.constant 0 : i32
    return %c0_i32, %c0_i32_0 : i32, i32
  }
  func.func @transform_2(%arg0: i32) -> (i32, i32) {
    %c0_i32 = arith.constant 0 : i32
    %c0_i32_0 = arith.constant 0 : i32
    %c0_i32_1 = arith.constant 0 : i32
    return %c0_i32, %c0_i32_0 : i32, i32
  }
  func.func @transform_3(%arg0: i32) -> (i32, i32, i32) {
    %c0_i32 = arith.constant 0 : i32
    %c0_i32_0 = arith.constant 0 : i32
    %c0_i32_1 = arith.constant 0 : i32
    return %arg0, %c0_i32, %c0_i32_0 : i32, i32, i32
  }
}

module attributes {stable_mosaic.version = 11 : i64} {
  func.func @_pw_in_silu_kernel(%arg0: i32, %arg1: memref<1x64x32xf32, #tpu.memory_space<vmem>>, %arg2: memref<32x32xf32, #tpu.memory_space<vmem>>, %arg3: memref<1x32xf32, #tpu.memory_space<vmem>>, %arg4: memref<1x64x32xf32, #tpu.memory_space<vmem>>) attributes {dimension_semantics = [#tpu.dimension_semantics<parallel>], iteration_bounds = array<i64: 2>, scalar_prefetch = 0 : i64, scratch_operands = 0 : i64, tpu.core_type = #tpu.core_type<tc>, window_params = [{transform_indices = @transform_0, window_bounds = array<i64: 1, 64, 32>}, {pipeline_mode = #tpu.pipeline_mode<synchronous>, transform_indices = @transform_1, window_bounds = array<i64: 32, 32>}, {pipeline_mode = #tpu.pipeline_mode<synchronous>, transform_indices = @transform_2, window_bounds = array<i64: 1, 32>}, {transform_indices = @transform_3, window_bounds = array<i64: 1, 64, 32>}]} {
    %c0 = arith.constant 0 : index
    %c0_0 = arith.constant 0 : index
    %c0_1 = arith.constant 0 : index
    %0 = vector.load %arg1[%c0, %c0_0, %c0_1] : memref<1x64x32xf32, #tpu.memory_space<vmem>>, vector<1x64x32xf32>
    %1 = vector.shape_cast %0 : vector<1x64x32xf32> to vector<64x32xf32>
    %c0_2 = arith.constant 0 : index
    %c0_3 = arith.constant 0 : index
    %2 = vector.load %arg2[%c0_2, %c0_3] : memref<32x32xf32, #tpu.memory_space<vmem>>, vector<32x32xf32>
    %cst = arith.constant dense<0.000000e+00> : vector<64x32xf32>
    %3 = tpu.matmul %1, %2, %cst {dimension_numbers = #tpu.dot_dimension_numbers<[1], [0], [0], [1], [0, 0, 1, 1], [], []>} : vector<64x32xf32>, vector<32x32xf32>, vector<64x32xf32> -> vector<64x32xf32>
    %c0_4 = arith.constant 0 : index
    %c0_5 = arith.constant 0 : index
    %4 = vector.load %arg3[%c0_4, %c0_5] : memref<1x32xf32, #tpu.memory_space<vmem>>, vector<1x32xf32>
    %5 = vector.broadcast %4 : vector<1x32xf32> to vector<64x32xf32>
    %6 = arith.addf %3, %5 : vector<64x32xf32>
    %cst_6 = arith.constant dense<0.000000e+00> : vector<32xf32>
    %7 = vector.multi_reduction <add>, %6, %cst_6 [0] : vector<64x32xf32> to vector<32xf32>
    %8 = vector.shape_cast %7 : vector<32xf32> to vector<1x32xf32>
    %cst_7 = arith.constant 6.400000e+01 : f32
    %9 = vector.broadcast %cst_7 : f32 to vector<1x32xf32>
    %10 = arith.divf %8, %9 : vector<1x32xf32>
    %11 = vector.broadcast %10 : vector<1x32xf32> to vector<64x32xf32>
    %12 = arith.subf %6, %11 : vector<64x32xf32>
    %13 = arith.mulf %12, %12 : vector<64x32xf32>
    %cst_8 = arith.constant dense<0.000000e+00> : vector<32xf32>
    %14 = vector.multi_reduction <add>, %13, %cst_8 [0] : vector<64x32xf32> to vector<32xf32>
    %15 = vector.shape_cast %14 : vector<32xf32> to vector<1x32xf32>
    %cst_9 = arith.constant 6.400000e+01 : f32
    %16 = vector.broadcast %cst_9 : f32 to vector<1x32xf32>
    %17 = arith.divf %15, %16 : vector<1x32xf32>
    %cst_10 = arith.constant 9.99999974E-6 : f32
    %18 = vector.broadcast %cst_10 : f32 to vector<1x32xf32>
    %19 = arith.addf %17, %18 : vector<1x32xf32>
    %20 = math.rsqrt %19 : vector<1x32xf32>
    %21 = vector.broadcast %20 : vector<1x32xf32> to vector<64x32xf32>
    %22 = arith.mulf %12, %21 : vector<64x32xf32>
    %cst_11 = arith.constant 0.000000e+00 : f32
    %23 = vector.broadcast %cst_11 : f32 to vector<64x32xf32>
    %24 = arith.subf %23, %22 : vector<64x32xf32>
    %25 = math.exp %24 : vector<64x32xf32>
    %cst_12 = arith.constant 1.000000e+00 : f32
    %26 = vector.broadcast %cst_12 : f32 to vector<64x32xf32>
    %27 = arith.addf %26, %25 : vector<64x32xf32>
    %cst_13 = arith.constant 1.000000e+00 : f32
    %28 = vector.broadcast %cst_13 : f32 to vector<64x32xf32>
    %29 = arith.divf %28, %27 : vector<64x32xf32>
    %30 = arith.mulf %22, %29 : vector<64x32xf32>
    %c0_14 = arith.constant 0 : index
    %c0_15 = arith.constant 0 : index
    %c0_16 = arith.constant 0 : index
    %31 = vector.load %arg4[%c0_14, %c0_15, %c0_16] : memref<1x64x32xf32, #tpu.memory_space<vmem>>, vector<1x64x32xf32>
    %32 = vector.shape_cast %31 : vector<1x64x32xf32> to vector<64x32xf32>
    %33 = vector.shape_cast %30 : vector<64x32xf32> to vector<1x64x32xf32>
    tpu.vector_store %arg4[%c0_14, %c0_15, %c0_16], %33 {strides = array<i32>} : memref<1x64x32xf32, #tpu.memory_space<vmem>>, vector<1x64x32xf32>,
    return
  }
  func.func @transform_0(%arg0: i32) -> (i32, i32, i32) {
    %c0_i32 = arith.constant 0 : i32
    %c0_i32_0 = arith.constant 0 : i32
    %c0_i32_1 = arith.constant 0 : i32
    return %arg0, %c0_i32, %c0_i32_0 : i32, i32, i32
  }
  func.func @transform_1(%arg0: i32) -> (i32, i32) {
    %c0_i32 = arith.constant 0 : i32
    %c0_i32_0 = arith.constant 0 : i32
    %c0_i32_1 = arith.constant 0 : i32
    return %c0_i32, %c0_i32_0 : i32, i32
  }
  func.func @transform_2(%arg0: i32) -> (i32, i32) {
    %c0_i32 = arith.constant 0 : i32
    %c0_i32_0 = arith.constant 0 : i32
    %c0_i32_1 = arith.constant 0 : i32
    return %c0_i32, %c0_i32_0 : i32, i32
  }
  func.func @transform_3(%arg0: i32) -> (i32, i32, i32) {
    %c0_i32 = arith.constant 0 : i32
    %c0_i32_0 = arith.constant 0 : i32
    %c0_i32_1 = arith.constant 0 : i32
    return %arg0, %c0_i32, %c0_i32_0 : i32, i32, i32
  }
}

module attributes {stable_mosaic.version = 11 : i64} {
  func.func @_ln_linear_kernel(%arg0: i32, %arg1: memref<128x32xf32, #tpu.memory_space<vmem>>, %arg2: memref<1x32xf32, #tpu.memory_space<vmem>>, %arg3: memref<1x32xf32, #tpu.memory_space<vmem>>, %arg4: memref<32x128xf32, #tpu.memory_space<vmem>>, %arg5: memref<128x128xf32, #tpu.memory_space<vmem>>) attributes {dimension_semantics = [#tpu.dimension_semantics<parallel>], iteration_bounds = array<i64: 1>, scalar_prefetch = 0 : i64, scratch_operands = 0 : i64, tpu.core_type = #tpu.core_type<tc>, window_params = [{transform_indices = @transform_0, window_bounds = array<i64: 128, 32>}, {pipeline_mode = #tpu.pipeline_mode<synchronous>, transform_indices = @transform_1, window_bounds = array<i64: 1, 32>}, {pipeline_mode = #tpu.pipeline_mode<synchronous>, transform_indices = @transform_2, window_bounds = array<i64: 1, 32>}, {pipeline_mode = #tpu.pipeline_mode<synchronous>, transform_indices = @transform_3, window_bounds = array<i64: 32, 128>}, {transform_indices = @transform_4, window_bounds = array<i64: 128, 128>}]} {
    %c0 = arith.constant 0 : index
    %c0_0 = arith.constant 0 : index
    %0 = vector.load %arg1[%c0, %c0_0] : memref<128x32xf32, #tpu.memory_space<vmem>>, vector<128x32xf32>
    %cst = arith.constant dense<0.000000e+00> : vector<128xf32>
    %1 = vector.multi_reduction <add>, %0, %cst [1] : vector<128x32xf32> to vector<128xf32>
    %2 = vector.shape_cast %1 : vector<128xf32> to vector<128x1xf32>
    %cst_1 = arith.constant 3.200000e+01 : f32
    %3 = vector.broadcast %cst_1 : f32 to vector<128x1xf32>
    %4 = arith.divf %2, %3 : vector<128x1xf32>
    %5 = vector.broadcast %4 : vector<128x1xf32> to vector<128x32xf32>
    %6 = arith.subf %0, %5 : vector<128x32xf32>
    %7 = arith.mulf %6, %6 : vector<128x32xf32>
    %cst_2 = arith.constant dense<0.000000e+00> : vector<128xf32>
    %8 = vector.multi_reduction <add>, %7, %cst_2 [1] : vector<128x32xf32> to vector<128xf32>
    %9 = vector.shape_cast %8 : vector<128xf32> to vector<128x1xf32>
    %cst_3 = arith.constant 3.200000e+01 : f32
    %10 = vector.broadcast %cst_3 : f32 to vector<128x1xf32>
    %11 = arith.divf %9, %10 : vector<128x1xf32>
    %cst_4 = arith.constant 9.99999997E-7 : f32
    %12 = vector.broadcast %cst_4 : f32 to vector<128x1xf32>
    %13 = arith.addf %11, %12 : vector<128x1xf32>
    %14 = math.rsqrt %13 : vector<128x1xf32>
    %15 = vector.broadcast %14 : vector<128x1xf32> to vector<128x32xf32>
    %16 = arith.mulf %6, %15 : vector<128x32xf32>
    %c0_5 = arith.constant 0 : index
    %c0_6 = arith.constant 0 : index
    %17 = vector.load %arg2[%c0_5, %c0_6] : memref<1x32xf32, #tpu.memory_space<vmem>>, vector<1x32xf32>
    %18 = vector.broadcast %17 : vector<1x32xf32> to vector<128x32xf32>
    %19 = arith.mulf %16, %18 : vector<128x32xf32>
    %c0_7 = arith.constant 0 : index
    %c0_8 = arith.constant 0 : index
    %20 = vector.load %arg3[%c0_7, %c0_8] : memref<1x32xf32, #tpu.memory_space<vmem>>, vector<1x32xf32>
    %21 = vector.broadcast %20 : vector<1x32xf32> to vector<128x32xf32>
    %22 = arith.addf %19, %21 : vector<128x32xf32>
    %c0_9 = arith.constant 0 : index
    %c0_10 = arith.constant 0 : index
    %23 = vector.load %arg4[%c0_9, %c0_10] : memref<32x128xf32, #tpu.memory_space<vmem>>, vector<32x128xf32>
    %cst_11 = arith.constant dense<0.000000e+00> : vector<128x128xf32>
    %24 = tpu.matmul %22, %23, %cst_11 {dimension_numbers = #tpu.dot_dimension_numbers<[1], [0], [0], [1], [0, 0, 1, 1], [], []>} : vector<128x32xf32>, vector<32x128xf32>, vector<128x128xf32> -> vector<128x128xf32>
    %c0_12 = arith.constant 0 : index
    %c0_13 = arith.constant 0 : index
    %25 = vector.load %arg5[%c0_12, %c0_13] : memref<128x128xf32, #tpu.memory_space<vmem>>, vector<128x128xf32>
    tpu.vector_store %arg5[%c0_12, %c0_13], %24 {strides = array<i32>} : memref<128x128xf32, #tpu.memory_space<vmem>>, vector<128x128xf32>,
    return
  }
  func.func @transform_0(%arg0: i32) -> (i32, i32) {
    %c0_i32 = arith.constant 0 : i32
    %c0_i32_0 = arith.constant 0 : i32
    return %arg0, %c0_i32 : i32, i32
  }
  func.func @transform_1(%arg0: i32) -> (i32, i32) {
    %c0_i32 = arith.constant 0 : i32
    %c0_i32_0 = arith.constant 0 : i32
    %c0_i32_1 = arith.constant 0 : i32
    return %c0_i32, %c0_i32_0 : i32, i32
  }
  func.func @transform_2(%arg0: i32) -> (i32, i32) {
    %c0_i32 = arith.constant 0 : i32
    %c0_i32_0 = arith.constant 0 : i32
    %c0_i32_1 = arith.constant 0 : i32
    return %c0_i32, %c0_i32_0 : i32, i32
  }
  func.func @transform_3(%arg0: i32) -> (i32, i32) {
    %c0_i32 = arith.constant 0 : i32
    %c0_i32_0 = arith.constant 0 : i32
    %c0_i32_1 = arith.constant 0 : i32
    return %c0_i32, %c0_i32_0 : i32, i32
  }
  func.func @transform_4(%arg0: i32) -> (i32, i32) {
    %c0_i32 = arith.constant 0 : i32
    %c0_i32_0 = arith.constant 0 : i32
    return %arg0, %c0_i32 : i32, i32
  }
}

module attributes {stable_mosaic.version = 11 : i64} {
  func.func @_ssm_scan_kernel(%arg0: i32, %arg1: i32, %arg2: memref<1x1x64x64xf32, #tpu.memory_space<vmem>>, %arg3: memref<1x64x34xf32, #tpu.memory_space<vmem>>, %arg4: memref<1x2x64xf32, #tpu.memory_space<vmem>>, %arg5: memref<1x1x64xf32, #tpu.memory_space<vmem>>, %arg6: memref<1x16x64xf32, #tpu.memory_space<vmem>>, %arg7: memref<1x1x64xf32, #tpu.memory_space<vmem>>, %arg8: memref<1x1x64x64xf32, #tpu.memory_space<vmem>>, %arg9: memref<64x16x64xf32, #tpu.memory_space<vmem>>, %arg10: memref<64x16x64xf32, #tpu.memory_space<vmem>>, %arg11: memref<64x16x64xf32, #tpu.memory_space<vmem>>) attributes {dimension_semantics = [#tpu.dimension_semantics<parallel>, #tpu.dimension_semantics<parallel>], iteration_bounds = array<i64: 2, 8>, scalar_prefetch = 0 : i64, scratch_operands = 3 : i64, tpu.core_type = #tpu.core_type<tc>, window_params = [{transform_indices = @transform_0, window_bounds = array<i64: 1, 1, 64, 64>}, {transform_indices = @transform_1, window_bounds = array<i64: 1, 64, 34>}, {transform_indices = @transform_2, window_bounds = array<i64: 1, 2, 64>}, {transform_indices = @transform_3, window_bounds = array<i64: 1, 1, 64>}, {transform_indices = @transform_4, window_bounds = array<i64: 1, 16, 64>}, {transform_indices = @transform_5, window_bounds = array<i64: 1, 1, 64>}, {transform_indices = @transform_6, window_bounds = array<i64: 1, 1, 64, 64>}]} {
    %c0 = arith.constant 0 : index
    %c0_0 = arith.constant 0 : index
    %c0_1 = arith.constant 0 : index
    %c0_2 = arith.constant 0 : index
    %0 = vector.load %arg2[%c0, %c0_0, %c0_1, %c0_2] : memref<1x1x64x64xf32, #tpu.memory_space<vmem>>, vector<1x1x64x64xf32>
    %1 = vector.shape_cast %0 : vector<1x1x64x64xf32> to vector<64x64xf32>
    %c0_3 = arith.constant 0 : index
    %c0_4 = arith.constant 0 : index
    %c0_5 = arith.constant 0 : index
    %2 = vector.load %arg3[%c0_3, %c0_4, %c0_5] : memref<1x64x34xf32, #tpu.memory_space<vmem>>, vector<1x64x34xf32>
    %3 = vector.shape_cast %2 : vector<1x64x34xf32> to vector<64x34xf32>
    %cst = arith.constant dense<0.000000e+00> : vector<64x34xf32>
    %4 = tpu.matmul %1, %3, %cst {dimension_numbers = #tpu.dot_dimension_numbers<[1], [0], [0], [1], [0, 0, 1, 1], [], []>} : vector<64x64xf32>, vector<64x34xf32>, vector<64x34xf32> -> vector<64x34xf32>
    %5 = vector.extract_strided_slice %4 {offsets = [0, 0], sizes = [64, 2], strides = [1, 1]} : vector<64x34xf32> to vector<64x2xf32>
    %6 = vector.extract_strided_slice %4 {offsets = [0, 2], sizes = [64, 16], strides = [1, 1]} : vector<64x34xf32> to vector<64x16xf32>
    %7 = vector.extract_strided_slice %4 {offsets = [0, 18], sizes = [64, 16], strides = [1, 1]} : vector<64x34xf32> to vector<64x16xf32>
    %c0_6 = arith.constant 0 : index
    %c0_7 = arith.constant 0 : index
    %c0_8 = arith.constant 0 : index
    %8 = vector.load %arg4[%c0_6, %c0_7, %c0_8] : memref<1x2x64xf32, #tpu.memory_space<vmem>>, vector<1x2x64xf32>
    %9 = vector.shape_cast %8 : vector<1x2x64xf32> to vector<2x64xf32>
    %cst_9 = arith.constant dense<0.000000e+00> : vector<64x64xf32>
    %10 = tpu.matmul %5, %9, %cst_9 {dimension_numbers = #tpu.dot_dimension_numbers<[1], [0], [0], [1], [0, 0, 1, 1], [], []>} : vector<64x2xf32>, vector<2x64xf32>, vector<64x64xf32> -> vector<64x64xf32>
    %c0_10 = arith.constant 0 : index
    %c0_11 = arith.constant 0 : index
    %c0_12 = arith.constant 0 : index
    %11 = vector.load %arg5[%c0_10, %c0_11, %c0_12] : memref<1x1x64xf32, #tpu.memory_space<vmem>>, vector<1x1x64xf32>
    %12 = vector.shape_cast %11 : vector<1x1x64xf32> to vector<1x64xf32>
    %13 = vector.broadcast %12 : vector<1x64xf32> to vector<64x64xf32>
    %14 = arith.addf %10, %13 : vector<64x64xf32>
    %cst_13 = arith.constant 0.000000e+00 : f32
    %15 = vector.broadcast %cst_13 : f32 to vector<64x64xf32>
    %16 = arith.maximumf %14, %15 : vector<64x64xf32>
    %17 = math.absf %14 : vector<64x64xf32>
    %cst_14 = arith.constant 0.000000e+00 : f32
    %18 = vector.broadcast %cst_14 : f32 to vector<64x64xf32>
    %19 = arith.subf %18, %17 : vector<64x64xf32>
    %20 = math.exp %19 : vector<64x64xf32>
    %cst_15 = arith.constant 1.000000e+00 : f32
    %21 = vector.broadcast %cst_15 : f32 to vector<64x64xf32>
    %22 = arith.addf %21, %20 : vector<64x64xf32>
    %23 = math.log %22 : vector<64x64xf32>
    %24 = arith.addf %16, %23 : vector<64x64xf32>
    %c0_16 = arith.constant 0 : index
    %c0_17 = arith.constant 0 : index
    %c0_18 = arith.constant 0 : index
    %25 = vector.load %arg6[%c0_16, %c0_17, %c0_18] : memref<1x16x64xf32, #tpu.memory_space<vmem>>, vector<1x16x64xf32>
    %26 = vector.shape_cast %25 : vector<1x16x64xf32> to vector<16x64xf32>
    %27 = math.exp %26 : vector<16x64xf32>
    %cst_19 = arith.constant 0.000000e+00 : f32
    %28 = vector.broadcast %cst_19 : f32 to vector<16x64xf32>
    %29 = arith.subf %28, %27 : vector<16x64xf32>
    %30 = vector.shape_cast %24 : vector<64x64xf32> to vector<64x1x64xf32>
    %31 = vector.shape_cast %29 : vector<16x64xf32> to vector<1x16x64xf32>
    %32 = vector.broadcast %30 : vector<64x1x64xf32> to vector<64x16x64xf32>
    %33 = vector.broadcast %31 : vector<1x16x64xf32> to vector<64x16x64xf32>
    %34 = arith.mulf %32, %33 : vector<64x16x64xf32>
    %35 = math.exp %34 : vector<64x16x64xf32>
    %c0_20 = arith.constant 0 : index
    %c0_21 = arith.constant 0 : index
    %c0_22 = arith.constant 0 : index
    %36 = vector.load %arg9[%c0_20, %c0_21, %c0_22] : memref<64x16x64xf32, #tpu.memory_space<vmem>>, vector<64x16x64xf32>
    tpu.vector_store %arg9[%c0_20, %c0_21, %c0_22], %35 {strides = array<i32>} : memref<64x16x64xf32, #tpu.memory_space<vmem>>, vector<64x16x64xf32>,
    %37 = arith.mulf %24, %1 : vector<64x64xf32>
    %38 = vector.shape_cast %37 : vector<64x64xf32> to vector<64x1x64xf32>
    %39 = vector.shape_cast %6 : vector<64x16xf32> to vector<64x16x1xf32>
    %40 = vector.broadcast %38 : vector<64x1x64xf32> to vector<64x16x64xf32>
    %41 = vector.broadcast %39 : vector<64x16x1xf32> to vector<64x16x64xf32>
    %42 = arith.mulf %40, %41 : vector<64x16x64xf32>
    %c0_23 = arith.constant 0 : index
    %c0_24 = arith.constant 0 : index
    %c0_25 = arith.constant 0 : index
    %43 = vector.load %arg10[%c0_23, %c0_24, %c0_25] : memref<64x16x64xf32, #tpu.memory_space<vmem>>, vector<64x16x64xf32>
    tpu.vector_store %arg10[%c0_23, %c0_24, %c0_25], %42 {strides = array<i32>} : memref<64x16x64xf32, #tpu.memory_space<vmem>>, vector<64x16x64xf32>,
    %cst_26 = arith.constant 0.000000e+00 : f32
    %44 = vector.broadcast %cst_26 : f32 to vector<16x64xf32>
    %c0_i32 = arith.constant 0 : i32
    %c64_i32 = arith.constant 64 : i32
    %45 = arith.addi %c0_i32, %c64_i32 : i32
    %c1_i32 = arith.constant 1 : i32
    %46 = scf.for %arg12 = %c0_i32 to %45 step %c1_i32 iter_args(%arg13 = %44) -> (vector<16x64xf32>)  : i32 {
      %60 = arith.index_cast %arg12 : i32 to index
      %c0_39 = arith.constant 0 : index
      %c0_40 = arith.constant 0 : index
      %61 = vector.load %arg9[%60, %c0_39, %c0_40] : memref<64x16x64xf32, #tpu.memory_space<vmem>>, vector<1x16x64xf32>
      %62 = vector.shape_cast %61 : vector<1x16x64xf32> to vector<16x64xf32>
      %63 = arith.mulf %62, %arg13 : vector<16x64xf32>
      %64 = arith.index_cast %arg12 : i32 to index
      %c0_41 = arith.constant 0 : index
      %c0_42 = arith.constant 0 : index
      %65 = vector.load %arg10[%64, %c0_41, %c0_42] : memref<64x16x64xf32, #tpu.memory_space<vmem>>, vector<1x16x64xf32>
      %66 = vector.shape_cast %65 : vector<1x16x64xf32> to vector<16x64xf32>
      %67 = arith.addf %63, %66 : vector<16x64xf32>
      %68 = arith.index_cast %arg12 : i32 to index
      %c0_43 = arith.constant 0 : index
      %c0_44 = arith.constant 0 : index
      %69 = vector.load %arg11[%68, %c0_43, %c0_44] : memref<64x16x64xf32, #tpu.memory_space<vmem>>, vector<1x16x64xf32>
      %70 = vector.shape_cast %69 : vector<1x16x64xf32> to vector<16x64xf32>
      %71 = vector.shape_cast %67 : vector<16x64xf32> to vector<1x16x64xf32>
      tpu.vector_store %arg11[%68, %c0_43, %c0_44], %71 {strides = array<i32>} : memref<64x16x64xf32, #tpu.memory_space<vmem>>, vector<1x16x64xf32>,
      scf.yield %67 : vector<16x64xf32>
    }
    %c64_i32_27 = arith.constant 64 : i32
    %c0_28 = arith.constant 0 : index
    %c0_29 = arith.constant 0 : index
    %c0_30 = arith.constant 0 : index
    %47 = vector.load %arg11[%c0_28, %c0_29, %c0_30] : memref<64x16x64xf32, #tpu.memory_space<vmem>>, vector<64x16x64xf32>
    %48 = vector.shape_cast %7 : vector<64x16xf32> to vector<64x16x1xf32>
    %49 = vector.broadcast %48 : vector<64x16x1xf32> to vector<64x16x64xf32>
    %50 = arith.mulf %47, %49 : vector<64x16x64xf32>
    %cst_31 = arith.constant dense<0.000000e+00> : vector<64x64xf32>
    %51 = vector.multi_reduction <add>, %50, %cst_31 [1] : vector<64x16x64xf32> to vector<64x64xf32>
    %c0_32 = arith.constant 0 : index
    %c0_33 = arith.constant 0 : index
    %c0_34 = arith.constant 0 : index
    %52 = vector.load %arg7[%c0_32, %c0_33, %c0_34] : memref<1x1x64xf32, #tpu.memory_space<vmem>>, vector<1x1x64xf32>
    %53 = vector.shape_cast %52 : vector<1x1x64xf32> to vector<1x64xf32>
    %54 = vector.broadcast %53 : vector<1x64xf32> to vector<64x64xf32>
    %55 = arith.mulf %1, %54 : vector<64x64xf32>
    %56 = arith.addf %51, %55 : vector<64x64xf32>
    %c0_35 = arith.constant 0 : index
    %c0_36 = arith.constant 0 : index
    %c0_37 = arith.constant 0 : index
    %c0_38 = arith.constant 0 : index
    %57 = vector.load %arg8[%c0_35, %c0_36, %c0_37, %c0_38] : memref<1x1x64x64xf32, #tpu.memory_space<vmem>>, vector<1x1x64x64xf32>
    %58 = vector.shape_cast %57 : vector<1x1x64x64xf32> to vector<64x64xf32>
    %59 = vector.shape_cast %56 : vector<64x64xf32> to vector<1x1x64x64xf32>
    tpu.vector_store %arg8[%c0_35, %c0_36, %c0_37, %c0_38], %59 {strides = array<i32>} : memref<1x1x64x64xf32, #tpu.memory_space<vmem>>, vector<1x1x64x64xf32>,
    return
  }
  func.func @transform_0(%arg0: i32, %arg1: i32) -> (i32, i32, i32, i32) {
    %c0_i32 = arith.constant 0 : i32
    %c0_i32_0 = arith.constant 0 : i32
    %c0_i32_1 = arith.constant 0 : i32
    return %arg0, %arg1, %c0_i32, %c0_i32_0 : i32, i32, i32, i32
  }
  func.func @transform_1(%arg0: i32, %arg1: i32) -> (i32, i32, i32) {
    %c0_i32 = arith.constant 0 : i32
    %c0_i32_0 = arith.constant 0 : i32
    %c0_i32_1 = arith.constant 0 : i32
    return %arg1, %c0_i32, %c0_i32_0 : i32, i32, i32
  }
  func.func @transform_2(%arg0: i32, %arg1: i32) -> (i32, i32, i32) {
    %c0_i32 = arith.constant 0 : i32
    %c0_i32_0 = arith.constant 0 : i32
    %c0_i32_1 = arith.constant 0 : i32
    return %arg1, %c0_i32, %c0_i32_0 : i32, i32, i32
  }
  func.func @transform_3(%arg0: i32, %arg1: i32) -> (i32, i32, i32) {
    %c0_i32 = arith.constant 0 : i32
    %c0_i32_0 = arith.constant 0 : i32
    %c0_i32_1 = arith.constant 0 : i32
    return %arg1, %c0_i32, %c0_i32_0 : i32, i32, i32
  }
  func.func @transform_4(%arg0: i32, %arg1: i32) -> (i32, i32, i32) {
    %c0_i32 = arith.constant 0 : i32
    %c0_i32_0 = arith.constant 0 : i32
    %c0_i32_1 = arith.constant 0 : i32
    return %arg1, %c0_i32, %c0_i32_0 : i32, i32, i32
  }
  func.func @transform_5(%arg0: i32, %arg1: i32) -> (i32, i32, i32) {
    %c0_i32 = arith.constant 0 : i32
    %c0_i32_0 = arith.constant 0 : i32
    %c0_i32_1 = arith.constant 0 : i32
    return %arg1, %c0_i32, %c0_i32_0 : i32, i32, i32
  }
  func.func @transform_6(%arg0: i32, %arg1: i32) -> (i32, i32, i32, i32) {
    %c0_i32 = arith.constant 0 : i32
    %c0_i32_0 = arith.constant 0 : i32
    %c0_i32_1 = arith.constant 0 : i32
    return %arg0, %arg1, %c0_i32, %c0_i32_0 : i32, i32, i32, i32
  }
}

module attributes {stable_mosaic.version = 11 : i64} {
  func.func @_ln_gate_linear_kernel(%arg0: i32, %arg1: memref<128x64xf32, #tpu.memory_space<vmem>>, %arg2: memref<128x64xf32, #tpu.memory_space<vmem>>, %arg3: memref<1x64xf32, #tpu.memory_space<vmem>>, %arg4: memref<1x64xf32, #tpu.memory_space<vmem>>, %arg5: memref<64x32xf32, #tpu.memory_space<vmem>>, %arg6: memref<128x32xf32, #tpu.memory_space<vmem>>) attributes {dimension_semantics = [#tpu.dimension_semantics<parallel>], iteration_bounds = array<i64: 1>, scalar_prefetch = 0 : i64, scratch_operands = 0 : i64, tpu.core_type = #tpu.core_type<tc>, window_params = [{transform_indices = @transform_0, window_bounds = array<i64: 128, 64>}, {transform_indices = @transform_1, window_bounds = array<i64: 128, 64>}, {pipeline_mode = #tpu.pipeline_mode<synchronous>, transform_indices = @transform_2, window_bounds = array<i64: 1, 64>}, {pipeline_mode = #tpu.pipeline_mode<synchronous>, transform_indices = @transform_3, window_bounds = array<i64: 1, 64>}, {pipeline_mode = #tpu.pipeline_mode<synchronous>, transform_indices = @transform_4, window_bounds = array<i64: 64, 32>}, {transform_indices = @transform_5, window_bounds = array<i64: 128, 32>}]} {
    %c0 = arith.constant 0 : index
    %c0_0 = arith.constant 0 : index
    %0 = vector.load %arg1[%c0, %c0_0] : memref<128x64xf32, #tpu.memory_space<vmem>>, vector<128x64xf32>
    %c0_1 = arith.constant 0 : index
    %c0_2 = arith.constant 0 : index
    %1 = vector.load %arg2[%c0_1, %c0_2] : memref<128x64xf32, #tpu.memory_space<vmem>>, vector<128x64xf32>
    %cst = arith.constant dense<0.000000e+00> : vector<128xf32>
    %2 = vector.multi_reduction <add>, %0, %cst [1] : vector<128x64xf32> to vector<128xf32>
    %3 = vector.shape_cast %2 : vector<128xf32> to vector<128x1xf32>
    %cst_3 = arith.constant 6.400000e+01 : f32
    %4 = vector.broadcast %cst_3 : f32 to vector<128x1xf32>
    %5 = arith.divf %3, %4 : vector<128x1xf32>
    %6 = vector.broadcast %5 : vector<128x1xf32> to vector<128x64xf32>
    %7 = arith.subf %0, %6 : vector<128x64xf32>
    %8 = arith.mulf %7, %7 : vector<128x64xf32>
    %cst_4 = arith.constant dense<0.000000e+00> : vector<128xf32>
    %9 = vector.multi_reduction <add>, %8, %cst_4 [1] : vector<128x64xf32> to vector<128xf32>
    %10 = vector.shape_cast %9 : vector<128xf32> to vector<128x1xf32>
    %cst_5 = arith.constant 6.400000e+01 : f32
    %11 = vector.broadcast %cst_5 : f32 to vector<128x1xf32>
    %12 = arith.divf %10, %11 : vector<128x1xf32>
    %cst_6 = arith.constant 9.99999974E-6 : f32
    %13 = vector.broadcast %cst_6 : f32 to vector<128x1xf32>
    %14 = arith.addf %12, %13 : vector<128x1xf32>
    %15 = math.rsqrt %14 : vector<128x1xf32>
    %16 = vector.broadcast %15 : vector<128x1xf32> to vector<128x64xf32>
    %17 = arith.mulf %7, %16 : vector<128x64xf32>
    %c0_7 = arith.constant 0 : index
    %c0_8 = arith.constant 0 : index
    %18 = vector.load %arg3[%c0_7, %c0_8] : memref<1x64xf32, #tpu.memory_space<vmem>>, vector<1x64xf32>
    %19 = vector.broadcast %18 : vector<1x64xf32> to vector<128x64xf32>
    %20 = arith.mulf %17, %19 : vector<128x64xf32>
    %c0_9 = arith.constant 0 : index
    %c0_10 = arith.constant 0 : index
    %21 = vector.load %arg4[%c0_9, %c0_10] : memref<1x64xf32, #tpu.memory_space<vmem>>, vector<1x64xf32>
    %22 = vector.broadcast %21 : vector<1x64xf32> to vector<128x64xf32>
    %23 = arith.addf %20, %22 : vector<128x64xf32>
    %cst_11 = arith.constant 0.000000e+00 : f32
    %24 = vector.broadcast %cst_11 : f32 to vector<128x64xf32>
    %25 = arith.subf %24, %1 : vector<128x64xf32>
    %26 = math.exp %25 : vector<128x64xf32>
    %cst_12 = arith.constant 1.000000e+00 : f32
    %27 = vector.broadcast %cst_12 : f32 to vector<128x64xf32>
    %28 = arith.addf %27, %26 : vector<128x64xf32>
    %cst_13 = arith.constant 1.000000e+00 : f32
    %29 = vector.broadcast %cst_13 : f32 to vector<128x64xf32>
    %30 = arith.divf %29, %28 : vector<128x64xf32>
    %31 = arith.mulf %1, %30 : vector<128x64xf32>
    %32 = arith.mulf %23, %31 : vector<128x64xf32>
    %c0_14 = arith.constant 0 : index
    %c0_15 = arith.constant 0 : index
    %33 = vector.load %arg5[%c0_14, %c0_15] : memref<64x32xf32, #tpu.memory_space<vmem>>, vector<64x32xf32>
    %cst_16 = arith.constant dense<0.000000e+00> : vector<128x32xf32>
    %34 = tpu.matmul %32, %33, %cst_16 {dimension_numbers = #tpu.dot_dimension_numbers<[1], [0], [0], [1], [0, 0, 1, 1], [], []>} : vector<128x64xf32>, vector<64x32xf32>, vector<128x32xf32> -> vector<128x32xf32>
    %c0_17 = arith.constant 0 : index
    %c0_18 = arith.constant 0 : index
    %35 = vector.load %arg6[%c0_17, %c0_18] : memref<128x32xf32, #tpu.memory_space<vmem>>, vector<128x32xf32>
    tpu.vector_store %arg6[%c0_17, %c0_18], %34 {strides = array<i32>} : memref<128x32xf32, #tpu.memory_space<vmem>>, vector<128x32xf32>,
    return
  }
  func.func @transform_0(%arg0: i32) -> (i32, i32) {
    %c0_i32 = arith.constant 0 : i32
    %c0_i32_0 = arith.constant 0 : i32
    return %arg0, %c0_i32 : i32, i32
  }
  func.func @transform_1(%arg0: i32) -> (i32, i32) {
    %c0_i32 = arith.constant 0 : i32
    %c0_i32_0 = arith.constant 0 : i32
    return %arg0, %c0_i32 : i32, i32
  }
  func.func @transform_2(%arg0: i32) -> (i32, i32) {
    %c0_i32 = arith.constant 0 : i32
    %c0_i32_0 = arith.constant 0 : i32
    %c0_i32_1 = arith.constant 0 : i32
    return %c0_i32, %c0_i32_0 : i32, i32
  }
  func.func @transform_3(%arg0: i32) -> (i32, i32) {
    %c0_i32 = arith.constant 0 : i32
    %c0_i32_0 = arith.constant 0 : i32
    %c0_i32_1 = arith.constant 0 : i32
    return %c0_i32, %c0_i32_0 : i32, i32
  }
  func.func @transform_4(%arg0: i32) -> (i32, i32) {
    %c0_i32 = arith.constant 0 : i32
    %c0_i32_0 = arith.constant 0 : i32
    %c0_i32_1 = arith.constant 0 : i32
    return %c0_i32, %c0_i32_0 : i32, i32
  }
  func.func @transform_5(%arg0: i32) -> (i32, i32) {
    %c0_i32 = arith.constant 0 : i32
    %c0_i32_0 = arith.constant 0 : i32
    return %arg0, %c0_i32 : i32, i32
  }
}

module attributes {stable_mosaic.version = 11 : i64} {
  func.func @_linear_bias_res_kernel(%arg0: i32, %arg1: memref<128x96xf32, #tpu.memory_space<vmem>>, %arg2: memref<96x32xf32, #tpu.memory_space<vmem>>, %arg3: memref<1x32xf32, #tpu.memory_space<vmem>>, %arg4: memref<128x32xf32, #tpu.memory_space<vmem>>, %arg5: memref<128x32xf32, #tpu.memory_space<vmem>>) attributes {dimension_semantics = [#tpu.dimension_semantics<parallel>], iteration_bounds = array<i64: 1>, scalar_prefetch = 0 : i64, scratch_operands = 0 : i64, tpu.core_type = #tpu.core_type<tc>, window_params = [{transform_indices = @transform_0, window_bounds = array<i64: 128, 96>}, {pipeline_mode = #tpu.pipeline_mode<synchronous>, transform_indices = @transform_1, window_bounds = array<i64: 96, 32>}, {pipeline_mode = #tpu.pipeline_mode<synchronous>, transform_indices = @transform_2, window_bounds = array<i64: 1, 32>}, {transform_indices = @transform_3, window_bounds = array<i64: 128, 32>}, {transform_indices = @transform_4, window_bounds = array<i64: 128, 32>}]} {
    %c0 = arith.constant 0 : index
    %c0_0 = arith.constant 0 : index
    %0 = vector.load %arg1[%c0, %c0_0] : memref<128x96xf32, #tpu.memory_space<vmem>>, vector<128x96xf32>
    %c0_1 = arith.constant 0 : index
    %c0_2 = arith.constant 0 : index
    %1 = vector.load %arg2[%c0_1, %c0_2] : memref<96x32xf32, #tpu.memory_space<vmem>>, vector<96x32xf32>
    %cst = arith.constant dense<0.000000e+00> : vector<128x32xf32>
    %2 = tpu.matmul %0, %1, %cst {dimension_numbers = #tpu.dot_dimension_numbers<[1], [0], [0], [1], [0, 0, 1, 1], [], []>} : vector<128x96xf32>, vector<96x32xf32>, vector<128x32xf32> -> vector<128x32xf32>
    %c0_3 = arith.constant 0 : index
    %c0_4 = arith.constant 0 : index
    %3 = vector.load %arg3[%c0_3, %c0_4] : memref<1x32xf32, #tpu.memory_space<vmem>>, vector<1x32xf32>
    %4 = vector.broadcast %3 : vector<1x32xf32> to vector<128x32xf32>
    %5 = arith.addf %2, %4 : vector<128x32xf32>
    %c0_5 = arith.constant 0 : index
    %c0_6 = arith.constant 0 : index
    %6 = vector.load %arg4[%c0_5, %c0_6] : memref<128x32xf32, #tpu.memory_space<vmem>>, vector<128x32xf32>
    %7 = arith.addf %5, %6 : vector<128x32xf32>
    %c0_7 = arith.constant 0 : index
    %c0_8 = arith.constant 0 : index
    %8 = vector.load %arg5[%c0_7, %c0_8] : memref<128x32xf32, #tpu.memory_space<vmem>>, vector<128x32xf32>
    tpu.vector_store %arg5[%c0_7, %c0_8], %7 {strides = array<i32>} : memref<128x32xf32, #tpu.memory_space<vmem>>, vector<128x32xf32>,
    return
  }
  func.func @transform_0(%arg0: i32) -> (i32, i32) {
    %c0_i32 = arith.constant 0 : i32
    %c0_i32_0 = arith.constant 0 : i32
    return %arg0, %c0_i32 : i32, i32
  }
  func.func @transform_1(%arg0: i32) -> (i32, i32) {
    %c0_i32 = arith.constant 0 : i32
    %c0_i32_0 = arith.constant 0 : i32
    %c0_i32_1 = arith.constant 0 : i32
    return %c0_i32, %c0_i32_0 : i32, i32
  }
  func.func @transform_2(%arg0: i32) -> (i32, i32) {
    %c0_i32 = arith.constant 0 : i32
    %c0_i32_0 = arith.constant 0 : i32
    %c0_i32_1 = arith.constant 0 : i32
    return %c0_i32, %c0_i32_0 : i32, i32
  }
  func.func @transform_3(%arg0: i32) -> (i32, i32) {
    %c0_i32 = arith.constant 0 : i32
    %c0_i32_0 = arith.constant 0 : i32
    return %arg0, %c0_i32 : i32, i32
  }
  func.func @transform_4(%arg0: i32) -> (i32, i32) {
    %c0_i32 = arith.constant 0 : i32
    %c0_i32_0 = arith.constant 0 : i32
    return %arg0, %c0_i32 : i32, i32
  }
}

</mosaic_0001>

<bundles_post_ra>
// kernel: convbnssm_forward.20
= control target key start
LH: loop header
LB: loop body
LE: loop exit
PB: predicated region body
PF: predicated region fallthrough
CT: control target
= control target key end

     0   :  { %s389_s6 = smov 0   ;;  %s457_s0 = inlined_call_operand.vmem [shape: f32[2,64,32], index: 0, kind: input, shape index: {}]   ;;  %s458_s1 = inlined_call_operand.vmem [shape: f32[2,64,32], index: 1, kind: output, shape index: {}]  }
   0x1 LB: > { %s316_s7 = sadd.s32 4294967295, %s377_s6   ;;  %p320_p0 = scmp.ge.s32.totalorder %s377_s6, 1  ;;  %s377_s6 = sphi %s389_s6, %s11_s6  }
   0x2   : > { %p87_p1 = scmp.lt.s32.totalorder %s377_s6, 3 }
   0x4   : > { %p88_p2 = pnand %p320_p0, %p87_p1 }
   0x5   : > { %p107_p3 = scmp.lt.s32.totalorder (!%p88_p2), %s316_s7, 1 }
   0x6   : > { %91 = sbr.rel (%p88_p2) target bundleno = 139 (0x8b), region = 24 }
   0xb   : > { %s460_s7 = smov (!%p107_p3, %s316_s7), 1  ;;  %vm125_vm0 = vcmask 261120  }
   0xc   : > { %s327_s8 = sshll.u32 %s460_s7, 6 }
   0xd   : > { %s111_s11 = scalar_lea.vmem %s457_s0, %s327_s8  ;;  %s116_s14 = scalar_lea.vmem %s458_s1, %s327_s8 }
   0xe   : > { %v117_v0 = vld [vmem:[%s111_s11] sm:$0xff]  ;;  %v118_v1 = vld [vmem:[%s111_s11 + $0x8] sm:$0xff]  ;;  %v119_v2 = vld [vmem:[%s111_s11 + $0x10] sm:$0xff] }
   0xf   : > { %v120_v3 = vld [vmem:[%s111_s11 + $0x18] sm:$0xff]  ;;  %v126_v4 = vsel %vm125_vm0, %v117_v0, 0.0  ;;  %v127_v5 = vsel %vm125_vm0, %v118_v1, 0.0  ;;  %v129_v6 = vsel %vm125_vm0, %v119_v2, 0.0  ;;  %v121_v7 = vld [vmem:[%s111_s11 + $0x20] sm:$0xff]  ;;  %v122_v10 = vld [vmem:[%s111_s11 + $0x28] sm:$0xff] }
  0x10   : > { %v128_v8 = vadd.f32 %v127_v5, %v126_v4  ;;  %v131_v9 = vsel %vm125_vm0, %v120_v3, 0.0  ;;  %v133_v12 = vsel %vm125_vm0, %v121_v7, 0.0  ;;  %v123_v13 = vld [vmem:[%s111_s11 + $0x30] sm:$0xff]  ;;  %v135_v15 = vsel %vm125_vm0, %v122_v10, 0.0  ;;  %v124_v16 = vld [vmem:[%s111_s11 + $0x38] sm:$0xff] }
  0x11   : > { %v137_v18 = vsel %vm125_vm0, %v123_v13, 0.0  ;;  %v139_v20 = vsel %vm125_vm0, %v124_v16, 0.0 }
  0x12   : > { %v130_v11 = vadd.f32 %v129_v6, %v128_v8 }
  0x14   : > { %v132_v14 = vadd.f32 %v131_v9, %v130_v11 }
  0x16   : > { %v134_v17 = vadd.f32 %v133_v12, %v132_v14 }
  0x18   : > { %v136_v19 = vadd.f32 %v135_v15, %v134_v17 }
  0x1a   : > { %v138_v21 = vadd.f32 %v137_v18, %v136_v19 }
  0x1c   : > { %v140_v22 = vadd.f32 %v139_v20, %v138_v21 }
  0x1e   : > { %v141_v23 = vrot.slane %v140_v22, 4 }
  0x20   : > { %v142_v24 = vadd.f32 %v141_v23, %v140_v22 }
  0x22   : > { %v143_v25 = vrot.slane %v142_v24, 2 }
  0x24   : > { %v144_v26 = vadd.f32 %v143_v25, %v142_v24 }
  0x26   : > { %v145_v27 = vrot.slane %v144_v26, 1 }
  0x28   : > { %v146_v28 = vadd.f32 %v145_v27, %v144_v26 }
  0x2a   : > { %v148_v29 = vmul.f32 0.015625, %v146_v28 }
  0x2c   : > { %v149_v30 = vsub.f32 %v117_v0, %v148_v29  ;;  %v150_v31 = vsub.f32 %v118_v1, %v148_v29  ;;  %v151_v32 = vsub.f32 %v119_v2, %v148_v29  ;;  %v152_v33 = vsub.f32 %v120_v3, %v148_v29 }
  0x2d   : > { %v153_v34 = vsub.f32 %v121_v7, %v148_v29  ;;  %v154_v35 = vsub.f32 %v122_v10, %v148_v29  ;;  %v155_v40 = vsub.f32 %v123_v13, %v148_v29  ;;  %v156_v46 = vsub.f32 %v124_v16, %v148_v29 }
  0x2e   : > { %v157_v36 = vmul.f32 %v149_v30, %v149_v30  ;;  %v158_v37 = vmul.f32 %v150_v31, %v150_v31  ;;  %v159_v38 = vmul.f32 %v151_v32, %v151_v32  ;;  %v160_v39 = vmul.f32 %v152_v33, %v152_v33 }
  0x2f   : > { %v161_v41 = vmul.f32 %v153_v34, %v153_v34  ;;  %v162_v47 = vmul.f32 %v154_v35, %v154_v35  ;;  %v163_v50 = vmul.f32 %v155_v40, %v155_v40  ;;  %v164_v53 = vmul.f32 %v156_v46, %v156_v46 }
  0x30   : > { %v165_v42 = vsel %vm125_vm0, %v157_v36, 0.0  ;;  %v166_v43 = vsel %vm125_vm0, %v158_v37, 0.0  ;;  %v168_v44 = vsel %vm125_vm0, %v159_v38, 0.0  ;;  %v170_v48 = vsel %vm125_vm0, %v160_v39, 0.0 }
  0x31   : > { %v167_v45 = vadd.f32 %v166_v43, %v165_v42  ;;  %v172_v51 = vsel %vm125_vm0, %v161_v41, 0.0  ;;  %v174_v54 = vsel %vm125_vm0, %v162_v47, 0.0  ;;  %v176_v56 = vsel %vm125_vm0, %v163_v50, 0.0 }
  0x32   : > { %v178_v58 = vsel %vm125_vm0, %v164_v53, 0.0 }
  0x33   : > { %v169_v49 = vadd.f32 %v168_v44, %v167_v45 }
  0x35   : > { %v171_v52 = vadd.f32 %v170_v48, %v169_v49 }
  0x37   : > { %v173_v55 = vadd.f32 %v172_v51, %v171_v52 }
  0x39   : > { %v175_v57 = vadd.f32 %v174_v54, %v173_v55 }
  0x3b   : > { %v177_v59 = vadd.f32 %v176_v56, %v175_v57 }
  0x3d   : > { %v179_v60 = vadd.f32 %v178_v58, %v177_v59 }
  0x3f   : > { %v180_v61 = vrot.slane %v179_v60, 4 }
  0x41   : > { %v181_v62 = vadd.f32 %v180_v61, %v179_v60 }
  0x43   : > { %v182_v63 = vrot.slane %v181_v62, 2 }
  0x45   : > { %v183_v0 = vadd.f32 %v182_v63, %v181_v62 }
  0x47   : > { %v184_v1 = vrot.slane %v183_v0, 1 }
  0x49   : > { %v185_v2 = vadd.f32 %v184_v1, %v183_v0 }
  0x4b   : > { %v186_v3 = vmul.f32 0.015625, %v185_v2 }
  0x4d   : > { %v187_v4 = vadd.f32 1e-05, %v186_v3 }
  0x4f   : > { %337 = vrsqrt.f32 %v187_v4 }
  0x5c   : > { %v338_v5 = vpop.eup %337 }
  0x5d   : > { %v189_v6 = vmul.f32 %v338_v5, %v149_v30  ;;  %v190_v7 = vmul.f32 %v338_v5, %v150_v31  ;;  %v191_v8 = vmul.f32 %v338_v5, %v151_v32  ;;  %v421_v9 = vmul.f32 %v338_v5, %v152_v33 }
  0x5e   : > { %v423_v10 = vmul.f32 %v338_v5, %v153_v34  ;;  %v425_v11 = vmul.f32 %v338_v5, %v154_v35  ;;  %v427_v12 = vmul.f32 %v338_v5, %v155_v40  ;;  %v429_v13 = vmul.f32 %v338_v5, %v156_v46 }
  0x5f   : > { %v197_v14 = vsub.f32 0.0, %v189_v6  ;;  %v198_v15 = vsub.f32 0.0, %v190_v7  ;;  %v199_v16 = vsub.f32 0.0, %v191_v8  ;;  %v200_v17 = vsub.f32 0.0, %v421_v9 }
  0x60   : > { %v201_v18 = vsub.f32 0.0, %v423_v10  ;;  %v202_v19 = vsub.f32 0.0, %v425_v11  ;;  %v203_v20 = vsub.f32 0.0, %v427_v12  ;;  %v204_v25 = vsub.f32 0.0, %v429_v13 }
  0x61   : > { %v205_v21 = vmul.f32 1.442695, %v197_v14  ;;  %v207_v22 = vmul.f32 1.442695, %v198_v15  ;;  %v209_v23 = vmul.f32 1.442695, %v199_v16 }
  0x62   : > { %v211_v24 = vmul.f32 1.442695, %v200_v17  ;;  %v213_v26 = vmul.f32 1.442695, %v201_v18  ;;  %v215_v27 = vmul.f32 1.442695, %v202_v19 }
  0x63   : > { %339 = vpow2.f32 %v205_v21  ;;  %v217_v28 = vmul.f32 1.442695, %v203_v20  ;;  %v219_v29 = vmul.f32 1.442695, %v204_v25 }
  0x64   : > { %341 = vpow2.f32 %v207_v22 }
  0x65   : > { %343 = vpow2.f32 %v209_v23 }
  0x66   : > { %345 = vpow2.f32 %v211_v24 }
  0x67   : > { %347 = vpow2.f32 %v213_v26 }
  0x68   : > { %349 = vpow2.f32 %v215_v27 }
  0x69   : > { %351 = vpow2.f32 %v217_v28 }
  0x6a   : > { %353 = vpow2.f32 %v219_v29 }
  0x70   : > { %v340_v30 = vpop.eup %339 }
  0x71   : > { %v342_v31 = vpop.eup %341  ;;  %v221_v32 = vadd.f32 1.0, %v340_v30 }
  0x72   : > { %v344_v33 = vpop.eup %343  ;;  %v222_v34 = vadd.f32 1.0, %v342_v31 }
  0x73   : > { %v346_v35 = vpop.eup %345  ;;  %355 = vrcp.f32 %v221_v32  ;;  %v223_v36 = vadd.f32 1.0, %v344_v33 }
  0x74   : > { %v348_v37 = vpop.eup %347  ;;  %357 = vrcp.f32 %v222_v34  ;;  %v224_v38 = vadd.f32 1.0, %v346_v35 }
  0x75   : > { %v350_v39 = vpop.eup %349  ;;  %359 = vrcp.f32 %v223_v36  ;;  %v225_v40 = vadd.f32 1.0, %v348_v37 }
  0x76   : > { %v352_v41 = vpop.eup %351  ;;  %361 = vrcp.f32 %v224_v38  ;;  %v226_v42 = vadd.f32 1.0, %v350_v39 }
  0x77   : > { %v354_v43 = vpop.eup %353  ;;  %363 = vrcp.f32 %v225_v40  ;;  %v227_v44 = vadd.f32 1.0, %v352_v41 }
  0x78   : > { %365 = vrcp.f32 %v226_v42  ;;  %v228_v45 = vadd.f32 1.0, %v354_v43 }
  0x79   : > { %367 = vrcp.f32 %v227_v44 }
  0x7a   : > { %369 = vrcp.f32 %v228_v45 }
  0x80   : > { %v356_v46 = vpop.eup %355 }
  0x81   : > { %v358_v47 = vpop.eup %357  ;;  %v245_v48 = vmul.f32 %v356_v46, %v189_v6 }
  0x82   : > { %v360_v49 = vpop.eup %359  ;;  %v246_v50 = vmul.f32 %v358_v47, %v190_v7 }
  0x83   : > { %v362_v51 = vpop.eup %361  ;;  %253 = vst.msk [vmem:[%s116_s14] sm:$0xff] %vm125_vm0, %v245_v48  ;;  %v247_v52 = vmul.f32 %v360_v49, %v191_v8 }
  0x84   : > { %v364_v53 = vpop.eup %363  ;;  %254 = vst.msk [vmem:[%s116_s14 + $0x8] sm:$0xff] %vm125_vm0, %v246_v50  ;;  %v248_v54 = vmul.f32 %v362_v51, %v421_v9 }
  0x85   : > { %v366_v55 = vpop.eup %365  ;;  %255 = vst.msk [vmem:[%s116_s14 + $0x10] sm:$0xff] %vm125_vm0, %v247_v52  ;;  %v249_v56 = vmul.f32 %v364_v53, %v423_v10 }
  0x86   : > { %v368_v57 = vpop.eup %367  ;;  %256 = vst.msk [vmem:[%s116_s14 + $0x18] sm:$0xff] %vm125_vm0, %v248_v54  ;;  %v250_v58 = vmul.f32 %v366_v55, %v425_v11 }
  0x87   : > { %v370_v59 = vpop.eup %369  ;;  %257 = vst.msk [vmem:[%s116_s14 + $0x20] sm:$0xff] %vm125_vm0, %v249_v56  ;;  %v251_v60 = vmul.f32 %v368_v57, %v427_v12 }
  0x88   : > { %258 = vst.msk [vmem:[%s116_s14 + $0x28] sm:$0xff] %vm125_vm0, %v250_v58  ;;  %v252_v61 = vmul.f32 %v370_v59, %v429_v13 }
  0x89   : > { %259 = vst.msk [vmem:[%s116_s14 + $0x30] sm:$0xff] %vm125_vm0, %v251_v60 }
  0x8a   : > { %260 = vst.msk [vmem:[%s116_s14 + $0x38] sm:$0xff] %vm125_vm0, %v252_v61 }
  0x8b PF: > { %s11_s6 = sadd.s32 1, %s377_s6  }
  0x8c   : > { %p8_p4 = scmp.ge.s32.totalorder %s11_s6, 4  }
  0x8e   :  { %10 = sbr.rel (!%p8_p4) target bundleno = 1 (0x1), region = 54 }

// kernel: convbnssm_forward.19
= control target key start
LH: loop header
LB: loop body
LE: loop exit
PB: predicated region body
PF: predicated region fallthrough
CT: control target
= control target key end

     0   :  { %8 = vsyncpa [#allocation3], 0  ;;  %s953_s0 = inlined_call_operand.hbm [shape: f32[2,64,32], index: 0, kind: input, shape index: {}]   ;;  %s954_s1 = inlined_call_operand.vmem [shape: f32[32,32], index: 1, kind: input, shape index: {}]   ;;  %s955_s2 = inlined_call_operand.vmem [shape: f32[1,32], index: 2, kind: input, shape index: {}]   ;;  %s956_s3 = inlined_call_operand.vmem [shape: f32[2,64,32], index: 3, kind: output, shape index: {}]  }
   0x1   :  { %10 = vsyncpa [#allocation3 + $0x1], 0  ;;  %s767_s12 = smov 0   ;;  %s769_s13 = smov 0  }
   0x2   :  { %s771_s14 = smov 0   ;;  %s773_s15 = smov 0  }
   0x3 LB: > { %s786_s16 = sadd.s32 4294967295, %s742_s15   ;;  %s789_s17 = sadd.s32 1, %s742_s15   ;;  %s742_s15 = sphi %s773_s15, %s965_s15   ;;  %s738_s14 = sphi %s771_s14, %s964_s14   ;;  %s734_s13 = sphi %s769_s13, %s963_s13   ;;  %s730_s12 = sphi %s767_s12, %s962_s12  }
   0x4   : > { %s20_s18 = ssub.s32 %s742_s15, %s789_s17  ;;  %s23_s19 = sadd.s32 1, %s738_s14 }
   0x5   : > { %p21_p0 = scmp.eq.s32.totalorder %s20_s18, 0  ;;  %p30_p1 = scmp.ne.s32.totalorder %s738_s14, %s734_s13 }
   0x6   : > { %p31_p2 = scmp.eq.s32.totalorder %s742_s15, 0  ;;  %p36_p3 = scmp.ne.s32.totalorder %s734_s13, %s730_s12 }
   0x7   : > { %s799_s20 = scalar_select %p21_p0, %s738_s14, %s23_s19  }
   0x8   : > { %p32_p4 = por %p31_p2, %p30_p1  ;;  %p37_p5 = scmp.eq.s32.totalorder %s786_s16, 0 }
   0x9   : > { %p611_p6 = scmp.lt.s32.totalorder %s742_s15, 2  ;;  %s134_s22 = sand.u32 1, %s738_s14  }
   0xa   : > { %p803_p7 = por %p37_p5, %p36_p3  ;;  %s545_s23 = sshll.u32 %s134_s22, 6 }
   0xb   : > { %s563_s24 = sshll.u32 %s742_s15, 10  ;;  %s138_s28 = scalar_lea.vmem [#allocation2], %s545_s23 }
   0xc   : > { %s958_s21 = scalar_select %p803_p7, 1, 0 }
   0xd   : > { %s812_s27 = scalar_lea.hbm %s953_s0, %s563_s24  ;;  %s145_s29 = sshll.u32 %s138_s28, 4  ;;  %s814_s29 = int_to_ptr.vmem [resolvable:$true] %s145_s29 }
   0xe   : > { %p816_p8 = pnand %p611_p6, %p32_p4  ;;  %s821_s4 = scalar_lea.sflag [#allocation3], %s134_s22 }
   0xf   : > { %s680_s5 = scalar_lea.hbm %s812_s27, 1024  ;;  %s685_s8 = scalar_lea.hbm %s953_s0, 2048 }
  0x10   : > { %p681_p10 = scmp.ne.s32.totalorder %s812_s27, %s680_s5  ;;  %p682_p11 = pneg %p816_p8 }
  0x11   : > { %p686_p0 = scmp.lt.s32.totalorder %s812_s27, %s953_s0  ;;  %p687_p1 = scmp.lt.s32.totalorder %s685_s8, %s680_s5 }
  0x12   : > { %p683_p12 = pnand %p682_p11, %p681_p10 }
  0x13   : > { %p688_p2 = por %p687_p1, %p686_p0 }
  0x14   : > { %p684_p13 = pneg %p683_p12 }
  0x16   : > { %p689_p3 = pnand %p688_p2, %p684_p13 }
  0x18   : > { %692 = shalt.err (!%p689_p3)
}
  0x19   : > { %s693_s11 = scalar_lea.vmem %s814_s29, 1024  ;;  %s744_s12 = smov [#allocation2]  }
  0x1a   : > { %p694_p4 = scmp.ne.s32.totalorder %s814_s29, %s693_s11  ;;  %s698_s18 = sshll.u32 %s744_s12, 4  ;;  %s699_s18 = int_to_ptr.vmem [resolvable:$false] %s698_s18 }
  0x1b   : > { %s700_s19 = scalar_lea.vmem %s699_s18, 2048  ;;  %p701_p10 = scmp.lt.s32.totalorder %s814_s29, %s699_s18 }
  0x1c   : > { %p696_p5 = pnand %p694_p4, %p682_p11  ;;  %p702_p12 = scmp.lt.s32.totalorder %s700_s19, %s693_s11 }
  0x1e   : > { %p697_p6 = pneg %p696_p5  ;;  %p703_p9 = por %p702_p12, %p701_p10 }
  0x20   : > { %p704_p7 = pnand %p703_p9, %p697_p6 }
  0x22   : > { %707 = shalt.err (!%p704_p7)
}
  0x23   : > { %s745_s22 = smov 128   ;;  %s746_s23 = smov 8  }
  0x24   : > { %610 = dma.hbm_to_vmem [thread:$0]  (!%p816_p8), %s812_s27, 1024, %s814_s29, %s821_s4, %s745_s22, %s745_s22, %s746_s23  }
  0x25   : > { %p153_p11 = scmp.lt.s32.totalorder %s742_s15, 3  ;;  %p960_p13 = scmp.ge.s32.totalorder %s742_s15, 1 }
  0x27   : > { %p154_p0 = pnand %p960_p13, %p153_p11 }
  0x28   : > { %s159_s24 = sand.u32 (!%p154_p0), 1, %s734_s13   ;;  %p961_p7 = scmp.ne.s32.totalorder (!%p154_p0), %s958_s21, 0 }
  0x29   : > { %157 = sbr.rel (%p154_p0) target bundleno = 379 (0x17b), region = 32  ;;  %s549_s25 = sshll.u32 (!%p154_p0), %s159_s24, 6 }
  0x2a   : > { %s160_s26 = scalar_lea.sflag (!%p154_p0), [#allocation3], %s159_s24  ;;  %s846_s28 = scalar_lea.vmem (!%p154_p0), [#allocation2], %s549_s25 }
  0x2e   : > { %725 = dma.done.wait (%p961_p7), %s160_s26, 1024  }
  0x2f   : > { %727 = vsyncadd (%p961_p7), %s160_s26, 4294966272  ;;  %v202_v0 = vld [vmem:[%s954_s1 + $0x18] sm:$0xff]  ;;  %v201_v1 = vld [vmem:[%s954_s1 + $0x10] sm:$0xff]  ;;  %vm210_vm0 = vcmask 261120   ;;  %p186_p8 = scmp.lt.s32.totalorder %s786_s16, 1 }
  0x30   : > { %577 = vmatprep.subr.mxu0 %v202_v0  ;;  %597 = vmatprep.subr.mxu1 %v202_v0  ;;  %v191_v2 = vld [vmem:[%s846_s28] sm:$0xff]  ;;  %v200_v3 = vld [vmem:[%s954_s1 + $0x8] sm:$0xff]  ;;  %v193_v6 = vld [vmem:[%s846_s28 + $0x10] sm:$0xff] }
  0x31   : > { %578 = vmatpush3.msra.mxu0 %v202_v0  ;;  %601 = vmatpush3.msra.mxu1 %v202_v0  ;;  %v199_v4 = vld [vmem:[%s954_s1] sm:$0xff]  ;;  %v192_v5 = vld [vmem:[%s846_s28 + $0x8] sm:$0xff]  ;;  %v197_v9 = vld [vmem:[%s846_s28 + $0x30] sm:$0xff]  ;;  %s967_s16 = smov (!%p186_p8, %s786_s16), 1 }
  0x32   : > { %579 = vmatprep.subr.mxu0 %v201_v1  ;;  %585 = vmatprep.mubr.msk.f32.mxu0 %vm210_vm0, %v191_v2  ;;  %v195_v7 = vld [vmem:[%s846_s28 + $0x20] sm:$0xff]  ;;  %v196_v8 = vld [vmem:[%s846_s28 + $0x28] sm:$0xff]  ;;  %v194_v10 = vld [vmem:[%s846_s28 + $0x18] sm:$0xff]  ;;  %s564_s9 = sshll.u32 %s967_s16, 6 }
  0x33   : > { %580 = vmatpush3.msra.mxu0 %v201_v1  ;;  %598 = vmatprep.subr.mxu1 %v201_v1  ;;  %v198_v11 = vld [vmem:[%s846_s28 + $0x38] sm:$0xff]  ;;  %v552_v13 = vld [vmem:[%s955_s2] ss:$0 sm:$0xff]  ;;  %s190_s12 = scalar_lea.vmem %s956_s3, %s564_s9 }
  0x34   : > { %581 = vmatprep.subr.mxu0 %v200_v3  ;;  %602 = vmatpush3.msra.mxu1 %v201_v1 }
  0x35   : > { %582 = vmatpush3.msra.mxu0 %v200_v3  ;;  %599 = vmatprep.subr.mxu1 %v200_v3 }
  0x36   : > { %583 = vmatprep.subr.mxu0 %v199_v4  ;;  %603 = vmatpush3.msra.mxu1 %v200_v3 }
  0x37   : > { %584 = vmatpush3.msra.mxu0 %v199_v4  ;;  %600 = vmatprep.subr.mxu1 %v199_v4 }
  0x38   : > { %586 = vmatmul.mubr.msk.f32.vlgmr.msra.gmra.mxu0 %vm210_vm0, %v192_v5  ;;  %604 = vmatpush3.msra.mxu1 %v199_v4 }
  0x39   : > { %588 = vmatprep.mubr.msk.f32.mxu0 %vm210_vm0, %v193_v6  ;;  %591 = vmatprep.mubr.msk.f32.mxu1 %vm210_vm0, %v195_v7 }
  0x3a   : > { %592 = vmatmul.mubr.msk.f32.vlgmr.msra.gmra.mxu1 %vm210_vm0, %v196_v8 }
  0x3b   : > { %594 = vmatprep.mubr.msk.f32.mxu1 %vm210_vm0, %v197_v9 }
  0x3c   : > { %589 = vmatmul.mubr.msk.f32.gmra.mxu0 %vm210_vm0, %v194_v10 }
  0x3e   : > { %595 = vmatmul.mubr.msk.f32.gmra.mxu1 %vm210_vm0, %v198_v11 }
  0xf8   : > { %v587_v12 = vpop.f32.mrf.mxu0 }
  0xf9   : > { %v307_v16 = vadd.f32 %v587_v12, %v552_v13 }
  0xfa   : > { %v301_v14 = vpop.f32.mrf.mxu0  ;;  %v593_v15 = vpop.f32.mrf.mxu1 }
  0xfb   : > { %v302_v17 = vadd.f32 %v552_v13, %v301_v14  ;;  %v341_v23 = vsel %vm210_vm0, %v307_v16, 0.0  ;;  %v327_v32 = vadd.f32 %v593_v15, %v552_v13 }
  0xfc   : > { %v590_v18 = vpop.f32.mrf.mxu0  ;;  %v321_v19 = vpop.f32.mrf.mxu1 }
  0xfd   : > { %v340_v20 = vsel %vm210_vm0, %v302_v17, 0.0  ;;  %v317_v24 = vadd.f32 %v590_v18, %v552_v13  ;;  %v322_v28 = vadd.f32 %v552_v13, %v321_v19  ;;  %v349_v37 = vsel %vm210_vm0, %v327_v32, 0.0 }
  0xfe   : > { %v311_v21 = vpop.f32.mrf.mxu0  ;;  %v596_v22 = vpop.f32.mrf.mxu1  ;;  %v342_v26 = vadd.f32 %v341_v23, %v340_v20 }
  0xff   : > { %v312_v25 = vadd.f32 %v552_v13, %v311_v21  ;;  %v345_v31 = vsel %vm210_vm0, %v317_v24, 0.0  ;;  %v347_v34 = vsel %vm210_vm0, %v322_v28, 0.0  ;;  %v337_v38 = vadd.f32 %v596_v22, %v552_v13 }
 0x100   : > { %v331_v30 = vpop.f32.mrf.mxu1 }
 0x101   : > { %v343_v27 = vsel %vm210_vm0, %v312_v25, 0.0  ;;  %v332_v35 = vadd.f32 %v552_v13, %v331_v30  ;;  %v353_v42 = vsel %vm210_vm0, %v337_v38, 0.0 }
 0x102   : > { %v344_v29 = vadd.f32 %v343_v27, %v342_v26 }
 0x103   : > { %v351_v40 = vsel %vm210_vm0, %v332_v35, 0.0 }
 0x104   : > { %v346_v33 = vadd.f32 %v345_v31, %v344_v29 }
 0x106   : > { %v348_v36 = vadd.f32 %v347_v34, %v346_v33 }
 0x108   : > { %v350_v39 = vadd.f32 %v349_v37, %v348_v36 }
 0x10a   : > { %v352_v41 = vadd.f32 %v351_v40, %v350_v39 }
 0x10c   : > { %v354_v43 = vadd.f32 %v353_v42, %v352_v41 }
 0x10e   : > { %v355_v44 = vrot.slane %v354_v43, 4 }
 0x110   : > { %v356_v45 = vadd.f32 %v355_v44, %v354_v43 }
 0x112   : > { %v357_v46 = vrot.slane %v356_v45, 2 }
 0x114   : > { %v358_v47 = vadd.f32 %v357_v46, %v356_v45 }
 0x116   : > { %v359_v48 = vrot.slane %v358_v47, 1 }
 0x118   : > { %v360_v49 = vadd.f32 %v359_v48, %v358_v47 }
 0x11a   : > { %v362_v50 = vmul.f32 0.015625, %v360_v49 }
 0x11c   : > { %v363_v51 = vsub.f32 %v302_v17, %v362_v50  ;;  %v364_v52 = vsub.f32 %v307_v16, %v362_v50  ;;  %v365_v53 = vsub.f32 %v312_v25, %v362_v50  ;;  %v366_v54 = vsub.f32 %v317_v24, %v362_v50 }
 0x11d   : > { %v367_v55 = vsub.f32 %v322_v28, %v362_v50  ;;  %v368_v59 = vsub.f32 %v327_v32, %v362_v50  ;;  %v369_v0 = vsub.f32 %v332_v35, %v362_v50  ;;  %v370_v4 = vsub.f32 %v337_v38, %v362_v50 }
 0x11e   : > { %v371_v56 = vmul.f32 %v363_v51, %v363_v51  ;;  %v372_v57 = vmul.f32 %v364_v52, %v364_v52  ;;  %v373_v58 = vmul.f32 %v365_v53, %v365_v53  ;;  %v374_v60 = vmul.f32 %v366_v54, %v366_v54 }
 0x11f   : > { %v375_v1 = vmul.f32 %v367_v55, %v367_v55  ;;  %v376_v5 = vmul.f32 %v368_v59, %v368_v59  ;;  %v377_v8 = vmul.f32 %v369_v0, %v369_v0  ;;  %v378_v11 = vmul.f32 %v370_v4, %v370_v4 }
 0x120   : > { %v379_v61 = vsel %vm210_vm0, %v371_v56, 0.0  ;;  %v380_v62 = vsel %vm210_vm0, %v372_v57, 0.0  ;;  %v382_v2 = vsel %vm210_vm0, %v373_v58, 0.0  ;;  %v384_v6 = vsel %vm210_vm0, %v374_v60, 0.0 }
 0x121   : > { %v381_v63 = vadd.f32 %v380_v62, %v379_v61  ;;  %v386_v9 = vsel %vm210_vm0, %v375_v1, 0.0  ;;  %v388_v12 = vsel %vm210_vm0, %v376_v5, 0.0  ;;  %v390_v14 = vsel %vm210_vm0, %v377_v8, 0.0 }
 0x122   : > { %v392_v16 = vsel %vm210_vm0, %v378_v11, 0.0 }
 0x123   : > { %v383_v3 = vadd.f32 %v382_v2, %v381_v63 }
 0x125   : > { %v385_v7 = vadd.f32 %v384_v6, %v383_v3 }
 0x127   : > { %v387_v10 = vadd.f32 %v386_v9, %v385_v7 }
 0x129   : > { %v389_v13 = vadd.f32 %v388_v12, %v387_v10 }
 0x12b   : > { %v391_v15 = vadd.f32 %v390_v14, %v389_v13 }
 0x12d   : > { %v393_v17 = vadd.f32 %v392_v16, %v391_v15 }
 0x12f   : > { %v394_v18 = vrot.slane %v393_v17, 4 }
 0x131   : > { %v395_v19 = vadd.f32 %v394_v18, %v393_v17 }
 0x133   : > { %v396_v20 = vrot.slane %v395_v19, 2 }
 0x135   : > { %v397_v21 = vadd.f32 %v396_v20, %v395_v19 }
 0x137   : > { %v398_v22 = vrot.slane %v397_v21, 1 }
 0x139   : > { %v399_v23 = vadd.f32 %v398_v22, %v397_v21 }
 0x13b   : > { %v400_v24 = vmul.f32 0.015625, %v399_v23 }
 0x13d   : > { %v401_v25 = vadd.f32 1e-05, %v400_v24 }
 0x13f   : > { %646 = vrsqrt.f32 %v401_v25 }
 0x14c   : > { %v647_v26 = vpop.eup %646 }
 0x14d   : > { %v403_v27 = vmul.f32 %v647_v26, %v363_v51  ;;  %v899_v28 = vmul.f32 %v647_v26, %v364_v52  ;;  %v901_v29 = vmul.f32 %v647_v26, %v365_v53  ;;  %v903_v30 = vmul.f32 %v647_v26, %v366_v54 }
 0x14e   : > { %v905_v31 = vmul.f32 %v647_v26, %v367_v55  ;;  %v907_v32 = vmul.f32 %v647_v26, %v368_v59  ;;  %v909_v33 = vmul.f32 %v647_v26, %v369_v0  ;;  %v911_v34 = vmul.f32 %v647_v26, %v370_v4 }
 0x14f   : > { %v411_v35 = vsub.f32 0.0, %v403_v27  ;;  %v412_v36 = vsub.f32 0.0, %v899_v28  ;;  %v413_v37 = vsub.f32 0.0, %v901_v29  ;;  %v414_v38 = vsub.f32 0.0, %v903_v30 }
 0x150   : > { %v415_v39 = vsub.f32 0.0, %v905_v31  ;;  %v416_v40 = vsub.f32 0.0, %v907_v32  ;;  %v417_v41 = vsub.f32 0.0, %v909_v33  ;;  %v418_v45 = vsub.f32 0.0, %v911_v34 }
 0x151   : > { %v419_v42 = vmul.f32 1.442695, %v411_v35  ;;  %v421_v43 = vmul.f32 1.442695, %v412_v36  ;;  %v423_v44 = vmul.f32 1.442695, %v413_v37 }
 0x152   : > { %v425_v46 = vmul.f32 1.442695, %v414_v38  ;;  %v427_v47 = vmul.f32 1.442695, %v415_v39  ;;  %v429_v48 = vmul.f32 1.442695, %v416_v40 }
 0x153   : > { %648 = vpow2.f32 %v419_v42  ;;  %v431_v49 = vmul.f32 1.442695, %v417_v41  ;;  %v433_v50 = vmul.f32 1.442695, %v418_v45 }
 0x154   : > { %650 = vpow2.f32 %v421_v43 }
 0x155   : > { %652 = vpow2.f32 %v423_v44 }
 0x156   : > { %654 = vpow2.f32 %v425_v46 }
 0x157   : > { %656 = vpow2.f32 %v427_v47 }
 0x158   : > { %658 = vpow2.f32 %v429_v48 }
 0x159   : > { %660 = vpow2.f32 %v431_v49 }
 0x15a   : > { %662 = vpow2.f32 %v433_v50 }
 0x160   : > { %v649_v51 = vpop.eup %648 }
 0x161   : > { %v651_v52 = vpop.eup %650  ;;  %v435_v53 = vadd.f32 1.0, %v649_v51 }
 0x162   : > { %v653_v54 = vpop.eup %652  ;;  %v436_v55 = vadd.f32 1.0, %v651_v52 }
 0x163   : > { %v655_v56 = vpop.eup %654  ;;  %v437_v57 = vadd.f32 1.0, %v653_v54  ;;  %664 = vrcp.f32 %v435_v53 }
 0x164   : > { %v657_v58 = vpop.eup %656  ;;  %v438_v59 = vadd.f32 1.0, %v655_v56  ;;  %666 = vrcp.f32 %v436_v55 }
 0x165   : > { %v659_v60 = vpop.eup %658  ;;  %v439_v61 = vadd.f32 1.0, %v657_v58  ;;  %668 = vrcp.f32 %v437_v57 }
 0x166   : > { %v661_v62 = vpop.eup %660  ;;  %v440_v63 = vadd.f32 1.0, %v659_v60  ;;  %670 = vrcp.f32 %v438_v59 }
 0x167   : > { %v663_v0 = vpop.eup %662  ;;  %v441_v1 = vadd.f32 1.0, %v661_v62  ;;  %672 = vrcp.f32 %v439_v61 }
 0x168   : > { %v442_v2 = vadd.f32 1.0, %v663_v0  ;;  %674 = vrcp.f32 %v440_v63 }
 0x169   : > { %676 = vrcp.f32 %v441_v1 }
 0x16a   : > { %678 = vrcp.f32 %v442_v2 }
 0x170   : > { %v665_v3 = vpop.eup %664 }
 0x171   : > { %v667_v4 = vpop.eup %666  ;;  %v459_v5 = vmul.f32 %v665_v3, %v403_v27 }
 0x172   : > { %v669_v6 = vpop.eup %668  ;;  %v460_v7 = vmul.f32 %v667_v4, %v899_v28 }
 0x173   : > { %v671_v8 = vpop.eup %670  ;;  %v461_v9 = vmul.f32 %v669_v6, %v901_v29  ;;  %467 = vst.msk [vmem:[%s190_s12] sm:$0xff] %vm210_vm0, %v459_v5 }
 0x174   : > { %v673_v10 = vpop.eup %672  ;;  %v462_v11 = vmul.f32 %v671_v8, %v903_v30  ;;  %468 = vst.msk [vmem:[%s190_s12 + $0x8] sm:$0xff] %vm210_vm0, %v460_v7 }
 0x175   : > { %v675_v12 = vpop.eup %674  ;;  %v463_v13 = vmul.f32 %v673_v10, %v905_v31  ;;  %469 = vst.msk [vmem:[%s190_s12 + $0x10] sm:$0xff] %vm210_vm0, %v461_v9 }
 0x176   : > { %v677_v14 = vpop.eup %676  ;;  %v464_v15 = vmul.f32 %v675_v12, %v907_v32  ;;  %470 = vst.msk [vmem:[%s190_s12 + $0x18] sm:$0xff] %vm210_vm0, %v462_v11 }
 0x177   : > { %v679_v16 = vpop.eup %678  ;;  %v465_v17 = vmul.f32 %v677_v14, %v909_v33  ;;  %471 = vst.msk [vmem:[%s190_s12 + $0x20] sm:$0xff] %vm210_vm0, %v463_v13 }
 0x178   : > { %v466_v18 = vmul.f32 %v679_v16, %v911_v34  ;;  %472 = vst.msk [vmem:[%s190_s12 + $0x28] sm:$0xff] %vm210_vm0, %v464_v15 }
 0x179   : > { %473 = vst.msk [vmem:[%s190_s12 + $0x30] sm:$0xff] %vm210_vm0, %v465_v17 }
 0x17a   : > { %474 = vst.msk [vmem:[%s190_s12 + $0x38] sm:$0xff] %vm210_vm0, %v466_v18 }
 0x17b PF: > { %p13_p9 = scmp.ge.s32.totalorder %s789_s17, 4   ;;  %s962_s12 = smov %s734_s13 }
 0x17c   : > { %s963_s13 = smov %s738_s14  ;;  %s964_s14 = smov %s799_s20 }
 0x17d   : > { %s965_s15 = smov %s789_s17  ;;  %15 = sbr.rel (!%p13_p9) target bundleno = 3 (0x3), region = 72 }
 0x182   :  { %496 = vsyncpa [#allocation3], 1 }
 0x183   :  { %498 = vsyncpa [#allocation3 + $0x1], 1 }

// kernel: convbnssm_forward.21
= control target key start
LH: loop header
LB: loop body
LE: loop exit
PB: predicated region body
PF: predicated region fallthrough
CT: control target
= control target key end

     0   :  { %s642_s12 = smov 0   ;;  %s733_s0 = inlined_call_operand.vmem [shape: f32[2,64,32], index: 0, kind: input, shape index: {}]   ;;  %s734_s1 = inlined_call_operand.vmem [shape: f32[32,32], index: 1, kind: input, shape index: {}]   ;;  %s735_s2 = inlined_call_operand.vmem [shape: f32[1,32], index: 2, kind: input, shape index: {}]   ;;  %s736_s3 = inlined_call_operand.vmem [shape: f32[2,64,32], index: 3, kind: output, shape index: {}]  }
   0x1 LB: > { %s510_s13 = sadd.s32 4294967295, %s620_s12   ;;  %p514_p0 = scmp.ge.s32.totalorder %s620_s12, 1  ;;  %s620_s12 = sphi %s642_s12, %s13_s12  }
   0x2   : > { %p137_p1 = scmp.lt.s32.totalorder %s620_s12, 3 }
   0x4   : > { %p138_p2 = pnand %p514_p0, %p137_p1 }
   0x5   : > { %p161_p3 = scmp.lt.s32.totalorder (!%p138_p2), %s510_s13, 1 }
   0x6   : > { %141 = sbr.rel (%p138_p2) target bundleno = 343 (0x157), region = 32 }
   0xb   : > { %v182_v0 = vld [vmem:[%s734_s1 + $0x18] sm:$0xff]  ;;  %v181_v1 = vld [vmem:[%s734_s1 + $0x10] sm:$0xff]  ;;  %v180_v2 = vld [vmem:[%s734_s1 + $0x8] sm:$0xff]  ;;  %s738_s13 = smov (!%p161_p3, %s510_s13), 1  ;;  %vm190_vm0 = vcmask 261120  }
   0xc   : > { %544 = vmatprep.subr.mxu0 %v182_v0  ;;  %564 = vmatprep.subr.mxu1 %v182_v0  ;;  %v179_v3 = vld [vmem:[%s734_s1] sm:$0xff]  ;;  %s530_s22 = sshll.u32 %s738_s13, 6 }
   0xd   : > { %545 = vmatpush3.msra.mxu0 %v182_v0  ;;  %568 = vmatpush3.msra.mxu1 %v182_v0  ;;  %s165_s25 = scalar_lea.vmem %s733_s0, %s530_s22  ;;  %v519_v13 = vld [vmem:[%s735_s2] ss:$0 sm:$0xff]  ;;  %s170_s30 = scalar_lea.vmem %s736_s3, %s530_s22 }
   0xe   : > { %546 = vmatprep.subr.mxu0 %v181_v1  ;;  %565 = vmatprep.subr.mxu1 %v181_v1  ;;  %v171_v4 = vld [vmem:[%s165_s25] sm:$0xff]  ;;  %v172_v5 = vld [vmem:[%s165_s25 + $0x8] sm:$0xff]  ;;  %v173_v6 = vld [vmem:[%s165_s25 + $0x10] sm:$0xff] }
   0xf   : > { %547 = vmatpush3.msra.mxu0 %v181_v1  ;;  %569 = vmatpush3.msra.mxu1 %v181_v1  ;;  %v175_v7 = vld [vmem:[%s165_s25 + $0x20] sm:$0xff]  ;;  %v176_v8 = vld [vmem:[%s165_s25 + $0x28] sm:$0xff]  ;;  %v177_v9 = vld [vmem:[%s165_s25 + $0x30] sm:$0xff] }
  0x10   : > { %548 = vmatprep.subr.mxu0 %v180_v2  ;;  %566 = vmatprep.subr.mxu1 %v180_v2  ;;  %v174_v10 = vld [vmem:[%s165_s25 + $0x18] sm:$0xff] }
  0x11   : > { %549 = vmatpush3.msra.mxu0 %v180_v2  ;;  %570 = vmatpush3.msra.mxu1 %v180_v2  ;;  %v178_v11 = vld [vmem:[%s165_s25 + $0x38] sm:$0xff] }
  0x12   : > { %550 = vmatprep.subr.mxu0 %v179_v3  ;;  %552 = vmatprep.mubr.msk.f32.mxu0 %vm190_vm0, %v171_v4 }
  0x13   : > { %551 = vmatpush3.msra.mxu0 %v179_v3  ;;  %567 = vmatprep.subr.mxu1 %v179_v3 }
  0x14   : > { %553 = vmatmul.mubr.msk.f32.vlgmr.msra.gmra.mxu0 %vm190_vm0, %v172_v5  ;;  %571 = vmatpush3.msra.mxu1 %v179_v3 }
  0x15   : > { %555 = vmatprep.mubr.msk.f32.mxu0 %vm190_vm0, %v173_v6  ;;  %558 = vmatprep.mubr.msk.f32.mxu1 %vm190_vm0, %v175_v7 }
  0x16   : > { %559 = vmatmul.mubr.msk.f32.vlgmr.msra.gmra.mxu1 %vm190_vm0, %v176_v8 }
  0x17   : > { %561 = vmatprep.mubr.msk.f32.mxu1 %vm190_vm0, %v177_v9 }
  0x18   : > { %556 = vmatmul.mubr.msk.f32.gmra.mxu0 %vm190_vm0, %v174_v10 }
  0x1a   : > { %562 = vmatmul.mubr.msk.f32.gmra.mxu1 %vm190_vm0, %v178_v11 }
  0xd4   : > { %v554_v12 = vpop.f32.mrf.mxu0 }
  0xd5   : > { %v287_v16 = vadd.f32 %v554_v12, %v519_v13 }
  0xd6   : > { %v281_v14 = vpop.f32.mrf.mxu0  ;;  %v560_v15 = vpop.f32.mrf.mxu1 }
  0xd7   : > { %v282_v17 = vadd.f32 %v519_v13, %v281_v14  ;;  %v321_v23 = vsel %vm190_vm0, %v287_v16, 0.0  ;;  %v307_v32 = vadd.f32 %v560_v15, %v519_v13 }
  0xd8   : > { %v557_v18 = vpop.f32.mrf.mxu0  ;;  %v301_v19 = vpop.f32.mrf.mxu1 }
  0xd9   : > { %v320_v20 = vsel %vm190_vm0, %v282_v17, 0.0  ;;  %v297_v24 = vadd.f32 %v557_v18, %v519_v13  ;;  %v302_v28 = vadd.f32 %v519_v13, %v301_v19  ;;  %v329_v37 = vsel %vm190_vm0, %v307_v32, 0.0 }
  0xda   : > { %v291_v21 = vpop.f32.mrf.mxu0  ;;  %v563_v22 = vpop.f32.mrf.mxu1  ;;  %v322_v26 = vadd.f32 %v321_v23, %v320_v20 }
  0xdb   : > { %v292_v25 = vadd.f32 %v519_v13, %v291_v21  ;;  %v325_v31 = vsel %vm190_vm0, %v297_v24, 0.0  ;;  %v327_v34 = vsel %vm190_vm0, %v302_v28, 0.0  ;;  %v317_v38 = vadd.f32 %v563_v22, %v519_v13 }
  0xdc   : > { %v311_v30 = vpop.f32.mrf.mxu1 }
  0xdd   : > { %v323_v27 = vsel %vm190_vm0, %v292_v25, 0.0  ;;  %v312_v35 = vadd.f32 %v519_v13, %v311_v30  ;;  %v333_v42 = vsel %vm190_vm0, %v317_v38, 0.0 }
  0xde   : > { %v324_v29 = vadd.f32 %v323_v27, %v322_v26 }
  0xdf   : > { %v331_v40 = vsel %vm190_vm0, %v312_v35, 0.0 }
  0xe0   : > { %v326_v33 = vadd.f32 %v325_v31, %v324_v29 }
  0xe2   : > { %v328_v36 = vadd.f32 %v327_v34, %v326_v33 }
  0xe4   : > { %v330_v39 = vadd.f32 %v329_v37, %v328_v36 }
  0xe6   : > { %v332_v41 = vadd.f32 %v331_v40, %v330_v39 }
  0xe8   : > { %v334_v43 = vadd.f32 %v333_v42, %v332_v41 }
  0xea   : > { %v335_v44 = vrot.slane %v334_v43, 4 }
  0xec   : > { %v336_v45 = vadd.f32 %v335_v44, %v334_v43 }
  0xee   : > { %v337_v46 = vrot.slane %v336_v45, 2 }
  0xf0   : > { %v338_v47 = vadd.f32 %v337_v46, %v336_v45 }
  0xf2   : > { %v339_v48 = vrot.slane %v338_v47, 1 }
  0xf4   : > { %v340_v49 = vadd.f32 %v339_v48, %v338_v47 }
  0xf6   : > { %v342_v50 = vmul.f32 0.015625, %v340_v49 }
  0xf8   : > { %v343_v51 = vsub.f32 %v282_v17, %v342_v50  ;;  %v344_v52 = vsub.f32 %v287_v16, %v342_v50  ;;  %v345_v53 = vsub.f32 %v292_v25, %v342_v50  ;;  %v346_v54 = vsub.f32 %v297_v24, %v342_v50 }
  0xf9   : > { %v347_v55 = vsub.f32 %v302_v28, %v342_v50  ;;  %v348_v59 = vsub.f32 %v307_v32, %v342_v50  ;;  %v349_v0 = vsub.f32 %v312_v35, %v342_v50  ;;  %v350_v4 = vsub.f32 %v317_v38, %v342_v50 }
  0xfa   : > { %v351_v56 = vmul.f32 %v343_v51, %v343_v51  ;;  %v352_v57 = vmul.f32 %v344_v52, %v344_v52  ;;  %v353_v58 = vmul.f32 %v345_v53, %v345_v53  ;;  %v354_v60 = vmul.f32 %v346_v54, %v346_v54 }
  0xfb   : > { %v355_v1 = vmul.f32 %v347_v55, %v347_v55  ;;  %v356_v5 = vmul.f32 %v348_v59, %v348_v59  ;;  %v357_v8 = vmul.f32 %v349_v0, %v349_v0  ;;  %v358_v11 = vmul.f32 %v350_v4, %v350_v4 }
  0xfc   : > { %v359_v61 = vsel %vm190_vm0, %v351_v56, 0.0  ;;  %v360_v62 = vsel %vm190_vm0, %v352_v57, 0.0  ;;  %v362_v2 = vsel %vm190_vm0, %v353_v58, 0.0  ;;  %v364_v6 = vsel %vm190_vm0, %v354_v60, 0.0 }
  0xfd   : > { %v361_v63 = vadd.f32 %v360_v62, %v359_v61  ;;  %v366_v9 = vsel %vm190_vm0, %v355_v1, 0.0  ;;  %v368_v12 = vsel %vm190_vm0, %v356_v5, 0.0  ;;  %v370_v14 = vsel %vm190_vm0, %v357_v8, 0.0 }
  0xfe   : > { %v372_v16 = vsel %vm190_vm0, %v358_v11, 0.0 }
  0xff   : > { %v363_v3 = vadd.f32 %v362_v2, %v361_v63 }
 0x101   : > { %v365_v7 = vadd.f32 %v364_v6, %v363_v3 }
 0x103   : > { %v367_v10 = vadd.f32 %v366_v9, %v365_v7 }
 0x105   : > { %v369_v13 = vadd.f32 %v368_v12, %v367_v10 }
 0x107   : > { %v371_v15 = vadd.f32 %v370_v14, %v369_v13 }
 0x109   : > { %v373_v17 = vadd.f32 %v372_v16, %v371_v15 }
 0x10b   : > { %v374_v18 = vrot.slane %v373_v17, 4 }
 0x10d   : > { %v375_v19 = vadd.f32 %v374_v18, %v373_v17 }
 0x10f   : > { %v376_v20 = vrot.slane %v375_v19, 2 }
 0x111   : > { %v377_v21 = vadd.f32 %v376_v20, %v375_v19 }
 0x113   : > { %v378_v22 = vrot.slane %v377_v21, 1 }
 0x115   : > { %v379_v23 = vadd.f32 %v378_v22, %v377_v21 }
 0x117   : > { %v380_v24 = vmul.f32 0.015625, %v379_v23 }
 0x119   : > { %v381_v25 = vadd.f32 1e-05, %v380_v24 }
 0x11b   : > { %580 = vrsqrt.f32 %v381_v25 }
 0x128   : > { %v581_v26 = vpop.eup %580 }
 0x129   : > { %v383_v27 = vmul.f32 %v581_v26, %v343_v51  ;;  %v384_v28 = vmul.f32 %v581_v26, %v344_v52  ;;  %v385_v29 = vmul.f32 %v581_v26, %v345_v53  ;;  %v697_v30 = vmul.f32 %v581_v26, %v346_v54 }
 0x12a   : > { %v699_v31 = vmul.f32 %v581_v26, %v347_v55  ;;  %v701_v32 = vmul.f32 %v581_v26, %v348_v59  ;;  %v703_v33 = vmul.f32 %v581_v26, %v349_v0  ;;  %v705_v34 = vmul.f32 %v581_v26, %v350_v4 }
 0x12b   : > { %v391_v35 = vsub.f32 0.0, %v383_v27  ;;  %v392_v36 = vsub.f32 0.0, %v384_v28  ;;  %v393_v37 = vsub.f32 0.0, %v385_v29  ;;  %v394_v38 = vsub.f32 0.0, %v697_v30 }
 0x12c   : > { %v395_v39 = vsub.f32 0.0, %v699_v31  ;;  %v396_v40 = vsub.f32 0.0, %v701_v32  ;;  %v397_v41 = vsub.f32 0.0, %v703_v33  ;;  %v398_v45 = vsub.f32 0.0, %v705_v34 }
 0x12d   : > { %v399_v42 = vmul.f32 1.442695, %v391_v35  ;;  %v401_v43 = vmul.f32 1.442695, %v392_v36  ;;  %v403_v44 = vmul.f32 1.442695, %v393_v37 }
 0x12e   : > { %v405_v46 = vmul.f32 1.442695, %v394_v38  ;;  %v407_v47 = vmul.f32 1.442695, %v395_v39  ;;  %v409_v48 = vmul.f32 1.442695, %v396_v40 }
 0x12f   : > { %582 = vpow2.f32 %v399_v42  ;;  %v411_v49 = vmul.f32 1.442695, %v397_v41  ;;  %v413_v50 = vmul.f32 1.442695, %v398_v45 }
 0x130   : > { %584 = vpow2.f32 %v401_v43 }
 0x131   : > { %586 = vpow2.f32 %v403_v44 }
 0x132   : > { %588 = vpow2.f32 %v405_v46 }
 0x133   : > { %590 = vpow2.f32 %v407_v47 }
 0x134   : > { %592 = vpow2.f32 %v409_v48 }
 0x135   : > { %594 = vpow2.f32 %v411_v49 }
 0x136   : > { %596 = vpow2.f32 %v413_v50 }
 0x13c   : > { %v583_v51 = vpop.eup %582 }
 0x13d   : > { %v585_v52 = vpop.eup %584  ;;  %v415_v53 = vadd.f32 1.0, %v583_v51 }
 0x13e   : > { %v587_v54 = vpop.eup %586  ;;  %v416_v55 = vadd.f32 1.0, %v585_v52 }
 0x13f   : > { %v589_v56 = vpop.eup %588  ;;  %v417_v57 = vadd.f32 1.0, %v587_v54  ;;  %598 = vrcp.f32 %v415_v53 }
 0x140   : > { %v591_v58 = vpop.eup %590  ;;  %v418_v59 = vadd.f32 1.0, %v589_v56  ;;  %600 = vrcp.f32 %v416_v55 }
 0x141   : > { %v593_v60 = vpop.eup %592  ;;  %v419_v61 = vadd.f32 1.0, %v591_v58  ;;  %602 = vrcp.f32 %v417_v57 }
 0x142   : > { %v595_v62 = vpop.eup %594  ;;  %v420_v63 = vadd.f32 1.0, %v593_v60  ;;  %604 = vrcp.f32 %v418_v59 }
 0x143   : > { %v597_v0 = vpop.eup %596  ;;  %v421_v1 = vadd.f32 1.0, %v595_v62  ;;  %606 = vrcp.f32 %v419_v61 }
 0x144   : > { %v422_v2 = vadd.f32 1.0, %v597_v0  ;;  %608 = vrcp.f32 %v420_v63 }
 0x145   : > { %610 = vrcp.f32 %v421_v1 }
 0x146   : > { %612 = vrcp.f32 %v422_v2 }
 0x14c   : > { %v599_v3 = vpop.eup %598 }
 0x14d   : > { %v601_v4 = vpop.eup %600  ;;  %v439_v5 = vmul.f32 %v599_v3, %v383_v27 }
 0x14e   : > { %v603_v6 = vpop.eup %602  ;;  %v440_v7 = vmul.f32 %v601_v4, %v384_v28 }
 0x14f   : > { %v605_v8 = vpop.eup %604  ;;  %v441_v9 = vmul.f32 %v603_v6, %v385_v29  ;;  %447 = vst.msk [vmem:[%s170_s30] sm:$0xff] %vm190_vm0, %v439_v5 }
 0x150   : > { %v607_v10 = vpop.eup %606  ;;  %v442_v11 = vmul.f32 %v605_v8, %v697_v30  ;;  %448 = vst.msk [vmem:[%s170_s30 + $0x8] sm:$0xff] %vm190_vm0, %v440_v7 }
 0x151   : > { %v609_v12 = vpop.eup %608  ;;  %v443_v13 = vmul.f32 %v607_v10, %v699_v31  ;;  %449 = vst.msk [vmem:[%s170_s30 + $0x10] sm:$0xff] %vm190_vm0, %v441_v9 }
 0x152   : > { %v611_v14 = vpop.eup %610  ;;  %v444_v15 = vmul.f32 %v609_v12, %v701_v32  ;;  %450 = vst.msk [vmem:[%s170_s30 + $0x18] sm:$0xff] %vm190_vm0, %v442_v11 }
 0x153   : > { %v613_v16 = vpop.eup %612  ;;  %v445_v17 = vmul.f32 %v611_v14, %v703_v33  ;;  %451 = vst.msk [vmem:[%s170_s30 + $0x20] sm:$0xff] %vm190_vm0, %v443_v13 }
 0x154   : > { %v446_v18 = vmul.f32 %v613_v16, %v705_v34  ;;  %452 = vst.msk [vmem:[%s170_s30 + $0x28] sm:$0xff] %vm190_vm0, %v444_v15 }
 0x155   : > { %453 = vst.msk [vmem:[%s170_s30 + $0x30] sm:$0xff] %vm190_vm0, %v445_v17 }
 0x156   : > { %454 = vst.msk [vmem:[%s170_s30 + $0x38] sm:$0xff] %vm190_vm0, %v446_v18 }
 0x157 PF: > { %s13_s12 = sadd.s32 1, %s620_s12  }
 0x158   : > { %p10_p4 = scmp.ge.s32.totalorder %s13_s12, 4  }
 0x15a   :  { %12 = sbr.rel (!%p10_p4) target bundleno = 1 (0x1), region = 62 }

// kernel: convbnssm_forward.13
= control target key start
LH: loop header
LB: loop body
LE: loop exit
PB: predicated region body
PF: predicated region fallthrough
CT: control target
= control target key end

     0   :  { %vm33_vm0 = vcmask 261120   ;;  %s959_s0 = inlined_call_operand.vmem [shape: f32[128,32], index: 0, kind: input, shape index: {}]   ;;  %s960_s3 = inlined_call_operand.vmem [shape: f32[32,128], index: 3, kind: input, shape index: {}]   ;;  %s961_s1 = inlined_call_operand.vmem [shape: f32[1,32], index: 1, kind: input, shape index: {}]   ;;  %s962_s2 = inlined_call_operand.vmem [shape: f32[1,32], index: 2, kind: input, shape index: {}]   ;;  %s963_s4 = inlined_call_operand.vmem [shape: f32[128,128], index: 4, kind: output, shape index: {}]  }
   0x1   :  { %v17_v0 = vld [vmem:[%s959_s0] sm:$0xff]  ;;  %v18_v1 = vld [vmem:[%s959_s0 + $0x8] sm:$0xff]  ;;  %v19_v8 = vld [vmem:[%s959_s0 + $0x10] sm:$0xff] }
   0x2   :  { %v25_v2 = vld [vmem:[%s959_s0 + $0x40] sm:$0xff]  ;;  %v34_v3 = vsel %vm33_vm0, %v17_v0, 0.0  ;;  %v37_v4 = vsel %vm33_vm0, %v18_v1, 0.0  ;;  %v26_v5 = vld [vmem:[%s959_s0 + $0x48] sm:$0xff]  ;;  %v27_v9 = vld [vmem:[%s959_s0 + $0x50] sm:$0xff]  ;;  %v40_v10 = vsel %vm33_vm0, %v19_v8, 0.0 }
   0x3   :  { %35 = vadd.xlane.f32.xlu0 %v34_v3  ;;  %38 = vadd.xlane.f32.xlu1 %v37_v4  ;;  %v58_v6 = vsel %vm33_vm0, %v25_v2, 0.0  ;;  %v61_v7 = vsel %vm33_vm0, %v26_v5, 0.0  ;;  %v64_v11 = vsel %vm33_vm0, %v27_v9, 0.0  ;;  %v668_v12 = vld [vmem:[%s959_s0 + $0x18] sm:$0xff]  ;;  %v682_v16 = vld [vmem:[%s959_s0 + $0x20] sm:$0xff]  ;;  %v696_v20 = vld [vmem:[%s959_s0 + $0x28] sm:$0xff] }
   0x4   :  { %v673_v13 = vld [vmem:[%s959_s0 + $0x58] sm:$0xff]  ;;  %v43_v14 = vsel %vm33_vm0, %v668_v12, 0.0  ;;  %v687_v17 = vld [vmem:[%s959_s0 + $0x60] sm:$0xff]  ;;  %v46_v18 = vsel %vm33_vm0, %v682_v16, 0.0  ;;  %v701_v21 = vld [vmem:[%s959_s0 + $0x68] sm:$0xff]  ;;  %v49_v22 = vsel %vm33_vm0, %v696_v20, 0.0 }
   0x5   :  { %v67_v15 = vsel %vm33_vm0, %v673_v13, 0.0  ;;  %v70_v19 = vsel %vm33_vm0, %v687_v17, 0.0  ;;  %v73_v23 = vsel %vm33_vm0, %v701_v21, 0.0  ;;  %v710_v24 = vld [vmem:[%s959_s0 + $0x30] sm:$0xff]  ;;  %v724_v28 = vld [vmem:[%s959_s0 + $0x38] sm:$0xff] }
   0x6   :  { %v715_v25 = vld [vmem:[%s959_s0 + $0x70] sm:$0xff]  ;;  %v52_v26 = vsel %vm33_vm0, %v710_v24, 0.0  ;;  %v729_v29 = vld [vmem:[%s959_s0 + $0x78] sm:$0xff]  ;;  %v55_v30 = vsel %vm33_vm0, %v724_v28, 0.0 }
   0x7   :  { %59 = vadd.xlane.f32.xlu0 %v58_v6  ;;  %62 = vadd.xlane.f32.xlu1 %v61_v7  ;;  %v76_v27 = vsel %vm33_vm0, %v715_v25, 0.0  ;;  %v79_v31 = vsel %vm33_vm0, %v729_v29, 0.0 }
   0xb   :  { %41 = vadd.xlane.f32.xlu0 %v40_v10  ;;  %65 = vadd.xlane.f32.xlu1 %v64_v11 }
   0xf   :  { %44 = vadd.xlane.f32.xlu0 %v43_v14  ;;  %68 = vadd.xlane.f32.xlu1 %v67_v15 }
  0x13   :  { %47 = vadd.xlane.f32.xlu0 %v46_v18  ;;  %71 = vadd.xlane.f32.xlu1 %v70_v19 }
  0x17   :  { %50 = vadd.xlane.f32.xlu0 %v49_v22  ;;  %74 = vadd.xlane.f32.xlu1 %v73_v23 }
  0x1b   :  { %53 = vadd.xlane.f32.xlu0 %v52_v26  ;;  %77 = vadd.xlane.f32.xlu1 %v76_v27 }
  0x1f   :  { %56 = vadd.xlane.f32.xlu0 %v55_v30  ;;  %80 = vadd.xlane.f32.xlu1 %v79_v31 }
  0x8c   :  { %v36_v32 = vpop.xlane.xlu0 %35  ;;  %v39_v33 = vpop.xlane.xlu1 %38 }
  0x8d   :  { %v83_v34 = vmul.f32 0.03125, %v36_v32  ;;  %v84_v35 = vmul.f32 0.03125, %v39_v33 }
  0x8f   :  { %v735_v36 = vsub.f32 %v17_v0, %v83_v34  ;;  %v737_v37 = vsub.f32 %v18_v1, %v84_v35 }
  0x90   :  { %v60_v38 = vpop.xlane.xlu0 %59  ;;  %v63_v39 = vpop.xlane.xlu1 %62 }
  0x91   :  { %v91_v40 = vmul.f32 0.03125, %v60_v38  ;;  %v92_v41 = vmul.f32 0.03125, %v63_v39  ;;  %v115_v42 = vmul.f32 %v735_v36, %v735_v36  ;;  %v116_v43 = vmul.f32 %v737_v37, %v737_v37 }
  0x93   :  { %v743_v44 = vsub.f32 %v25_v2, %v91_v40  ;;  %v745_v45 = vsub.f32 %v26_v5, %v92_v41  ;;  %v131_v46 = vsel %vm33_vm0, %v115_v42, 0.0  ;;  %v134_v49 = vsel %vm33_vm0, %v116_v43, 0.0 }
  0x94   :  { %132 = vadd.xlane.f32.xlu0 %v131_v46  ;;  %v42_v47 = vpop.xlane.xlu0 %41  ;;  %v66_v48 = vpop.xlane.xlu1 %65 }
  0x95   :  { %v85_v50 = vmul.f32 0.03125, %v42_v47  ;;  %v93_v51 = vmul.f32 0.03125, %v66_v48  ;;  %v123_v52 = vmul.f32 %v743_v44, %v743_v44  ;;  %v124_v53 = vmul.f32 %v745_v45, %v745_v45 }
  0x97   :  { %v753_v54 = vsub.f32 %v19_v8, %v85_v50  ;;  %v755_v55 = vsub.f32 %v27_v9, %v93_v51  ;;  %v155_v56 = vsel %vm33_vm0, %v123_v52, 0.0  ;;  %v158_v59 = vsel %vm33_vm0, %v124_v53, 0.0  ;;  %v291_v53 = vld [vmem:[%s960_s3 + $0x10] sm:$0xff] }
  0x98   :  { %135 = vadd.xlane.f32.xlu0 %v134_v49  ;;  %156 = vadd.xlane.f32.xlu1 %v155_v56  ;;  %v45_v57 = vpop.xlane.xlu0 %44  ;;  %v69_v58 = vpop.xlane.xlu1 %68  ;;  %v290_v56 = vld [vmem:[%s960_s3 + $0x8] sm:$0xff] }
  0x99   :  { %v86_v60 = vmul.f32 0.03125, %v45_v57  ;;  %v94_v61 = vmul.f32 0.03125, %v69_v58  ;;  %v117_v62 = vmul.f32 %v753_v54, %v753_v54  ;;  %v125_v63 = vmul.f32 %v755_v55, %v755_v55  ;;  %v289_v57 = vld [vmem:[%s960_s3] sm:$0xff] }
  0x9b   :  { %v764_v0 = vsub.f32 %v668_v12, %v86_v60  ;;  %v767_v1 = vsub.f32 %v673_v13, %v94_v61  ;;  %v137_v2 = vsel %vm33_vm0, %v117_v62, 0.0  ;;  %v161_v5 = vsel %vm33_vm0, %v125_v63, 0.0 }
  0x9c   :  { %159 = vadd.xlane.f32.xlu1 %v158_v59  ;;  %138 = vadd.xlane.f32.xlu0 %v137_v2  ;;  %v48_v3 = vpop.xlane.xlu0 %47  ;;  %v72_v4 = vpop.xlane.xlu1 %71 }
  0x9d   :  { %v87_v6 = vmul.f32 0.03125, %v48_v3  ;;  %v95_v7 = vmul.f32 0.03125, %v72_v4  ;;  %v118_v8 = vmul.f32 %v764_v0, %v764_v0  ;;  %v126_v9 = vmul.f32 %v767_v1, %v767_v1 }
  0x9f   :  { %v776_v10 = vsub.f32 %v682_v16, %v87_v6  ;;  %v779_v11 = vsub.f32 %v687_v17, %v95_v7  ;;  %v140_v12 = vsel %vm33_vm0, %v118_v8, 0.0  ;;  %v164_v15 = vsel %vm33_vm0, %v126_v9, 0.0 }
  0xa0   :  { %162 = vadd.xlane.f32.xlu1 %v161_v5  ;;  %141 = vadd.xlane.f32.xlu0 %v140_v12  ;;  %v51_v13 = vpop.xlane.xlu0 %50  ;;  %v75_v14 = vpop.xlane.xlu1 %74 }
  0xa1   :  { %v88_v18 = vmul.f32 0.03125, %v51_v13  ;;  %v96_v19 = vmul.f32 0.03125, %v75_v14  ;;  %v119_v22 = vmul.f32 %v776_v10, %v776_v10  ;;  %v127_v16 = vmul.f32 %v779_v11, %v779_v11 }
  0xa3   :  { %v788_v23 = vsub.f32 %v696_v20, %v88_v18  ;;  %v791_v17 = vsub.f32 %v701_v21, %v96_v19  ;;  %v143_v26 = vsel %vm33_vm0, %v119_v22, 0.0  ;;  %v167_v31 = vsel %vm33_vm0, %v127_v16, 0.0 }
  0xa4   :  { %165 = vadd.xlane.f32.xlu1 %v164_v15  ;;  %144 = vadd.xlane.f32.xlu0 %v143_v26  ;;  %v54_v27 = vpop.xlane.xlu0 %53  ;;  %v78_v30 = vpop.xlane.xlu1 %77 }
  0xa5   :  { %v89_v32 = vmul.f32 0.03125, %v54_v27  ;;  %v97_v33 = vmul.f32 0.03125, %v78_v30  ;;  %v120_v34 = vmul.f32 %v788_v23, %v788_v23  ;;  %v128_v20 = vmul.f32 %v791_v17, %v791_v17 }
  0xa7   :  { %v800_v35 = vsub.f32 %v710_v24, %v89_v32  ;;  %v803_v21 = vsub.f32 %v715_v25, %v97_v33  ;;  %v146_v38 = vsel %vm33_vm0, %v120_v34, 0.0  ;;  %v170_v41 = vsel %vm33_vm0, %v128_v20, 0.0  ;;  %v840_v32 = vld [vmem:[%s961_s1] ss:$0 sm:$0xff] }
  0xa8   :  { %168 = vadd.xlane.f32.xlu1 %v167_v31  ;;  %147 = vadd.xlane.f32.xlu0 %v146_v38  ;;  %v57_v39 = vpop.xlane.xlu0 %56  ;;  %v81_v40 = vpop.xlane.xlu1 %80 }
  0xa9   :  { %v90_v42 = vmul.f32 0.03125, %v57_v39  ;;  %v98_v43 = vmul.f32 0.03125, %v81_v40  ;;  %v121_v46 = vmul.f32 %v800_v35, %v800_v35  ;;  %v129_v24 = vmul.f32 %v803_v21, %v803_v21  ;;  %v846_v40 = vld [vmem:[%s962_s2] ss:$0 sm:$0xff] }
  0xab   :  { %v812_v47 = vsub.f32 %v724_v28, %v90_v42  ;;  %v815_v25 = vsub.f32 %v729_v29, %v98_v43  ;;  %v149_v48 = vsel %vm33_vm0, %v121_v46, 0.0  ;;  %v173_v49 = vsel %vm33_vm0, %v129_v24, 0.0  ;;  %v292_v29 = vld [vmem:[%s960_s3 + $0x18] sm:$0xff] }
  0xac   :  { %171 = vadd.xlane.f32.xlu1 %v170_v41  ;;  %150 = vadd.xlane.f32.xlu0 %v149_v48 }
  0xad   :  { %v122_v50 = vmul.f32 %v812_v47, %v812_v47  ;;  %v130_v51 = vmul.f32 %v815_v25, %v815_v25  ;;  %544 = vmatprep.subr.mxu0 %v292_v29  ;;  %576 = vmatprep.subr.mxu1 %v292_v29 }
  0xae   :  { %545 = vmatpush3.msra.mxu0 %v292_v29  ;;  %580 = vmatpush3.msra.mxu1 %v292_v29 }
  0xaf   :  { %v152_v52 = vsel %vm33_vm0, %v122_v50, 0.0  ;;  %v176_v28 = vsel %vm33_vm0, %v130_v51, 0.0  ;;  %546 = vmatprep.subr.mxu0 %v291_v53  ;;  %577 = vmatprep.subr.mxu1 %v291_v53 }
  0xb0   :  { %174 = vadd.xlane.f32.xlu1 %v173_v49  ;;  %153 = vadd.xlane.f32.xlu0 %v152_v52 }
  0xb1   :  { %547 = vmatpush3.msra.mxu0 %v291_v53  ;;  %581 = vmatpush3.msra.mxu1 %v291_v53 }
  0xb2   :  { %548 = vmatprep.subr.mxu0 %v290_v56  ;;  %578 = vmatprep.subr.mxu1 %v290_v56 }
  0xb3   :  { %549 = vmatpush3.msra.mxu0 %v290_v56  ;;  %582 = vmatpush3.msra.mxu1 %v290_v56 }
  0xb4   :  { %177 = vadd.xlane.f32.xlu1 %v176_v28  ;;  %550 = vmatprep.subr.mxu0 %v289_v57 }
  0xb5   :  { %551 = vmatpush3.msra.mxu0 %v289_v57  ;;  %579 = vmatprep.subr.mxu1 %v289_v57 }
  0xb6   :  { %583 = vmatpush3.msra.mxu1 %v289_v57 }
 0x11d   :  { %v133_v58 = vpop.xlane.xlu0 %132 }
 0x11e   :  { %v179_v59 = vmul.f32 0.03125, %v133_v58 }
 0x120   :  { %v195_v60 = vadd.f32 1e-06, %v179_v59 }
 0x121   :  { %v157_v61 = vpop.xlane.xlu1 %156  ;;  %v136_v62 = vpop.xlane.xlu0 %135 }
 0x122   :  { %584 = vrsqrt.f32 %v195_v60  ;;  %v187_v63 = vmul.f32 0.03125, %v157_v61  ;;  %v180_v2 = vmul.f32 0.03125, %v136_v62 }
 0x124   :  { %v203_v3 = vadd.f32 1e-06, %v187_v63  ;;  %v196_v4 = vadd.f32 1e-06, %v180_v2 }
 0x125   :  { %v160_v5 = vpop.xlane.xlu1 %159  ;;  %v139_v6 = vpop.xlane.xlu0 %138 }
 0x126   :  { %586 = vrsqrt.f32 %v203_v3  ;;  %v188_v7 = vmul.f32 0.03125, %v160_v5  ;;  %v181_v8 = vmul.f32 0.03125, %v139_v6 }
 0x127   :  { %588 = vrsqrt.f32 %v196_v4 }
 0x128   :  { %v204_v9 = vadd.f32 1e-06, %v188_v7  ;;  %v197_v12 = vadd.f32 1e-06, %v181_v8 }
 0x129   :  { %v163_v13 = vpop.xlane.xlu1 %162  ;;  %v142_v14 = vpop.xlane.xlu0 %141 }
 0x12a   :  { %590 = vrsqrt.f32 %v204_v9  ;;  %v189_v15 = vmul.f32 0.03125, %v163_v13  ;;  %v182_v18 = vmul.f32 0.03125, %v142_v14 }
 0x12b   :  { %592 = vrsqrt.f32 %v197_v12 }
 0x12c   :  { %v205_v19 = vadd.f32 1e-06, %v189_v15  ;;  %v198_v22 = vadd.f32 1e-06, %v182_v18 }
 0x12d   :  { %v166_v16 = vpop.xlane.xlu1 %165  ;;  %v145_v26 = vpop.xlane.xlu0 %144 }
 0x12e   :  { %594 = vrsqrt.f32 %v205_v19  ;;  %v190_v27 = vmul.f32 0.03125, %v166_v16  ;;  %v183_v30 = vmul.f32 0.03125, %v145_v26 }
 0x12f   :  { %v585_v31 = vpop.eup %584  ;;  %596 = vrsqrt.f32 %v198_v22 }
 0x130   :  { %v206_v33 = vadd.f32 1e-06, %v190_v27  ;;  %v199_v34 = vadd.f32 1e-06, %v183_v30  ;;  %v227_v20 = vmul.f32 %v585_v31, %v735_v36 }
 0x131   :  { %v169_v38 = vpop.xlane.xlu1 %168  ;;  %v148_v39 = vpop.xlane.xlu0 %147 }
 0x132   :  { %598 = vrsqrt.f32 %v206_v33  ;;  %v191_v41 = vmul.f32 0.03125, %v169_v38  ;;  %v184_v42 = vmul.f32 0.03125, %v148_v39  ;;  %v250_v43 = vmul.f32 %v840_v32, %v227_v20 }
 0x133   :  { %v587_v46 = vpop.eup %586  ;;  %600 = vrsqrt.f32 %v199_v34 }
 0x134   :  { %v589_v24 = vpop.eup %588  ;;  %v207_v48 = vadd.f32 1e-06, %v191_v41  ;;  %v200_v49 = vadd.f32 1e-06, %v184_v42  ;;  %v273_v50 = vadd.f32 %v846_v40, %v250_v43  ;;  %v235_v36 = vmul.f32 %v587_v46, %v743_v44 }
 0x135   :  { %v172_v51 = vpop.xlane.xlu1 %171  ;;  %v151_v52 = vpop.xlane.xlu0 %150  ;;  %v228_v28 = vmul.f32 %v589_v24, %v737_v37 }
 0x136   :  { %602 = vrsqrt.f32 %v207_v48  ;;  %v192_v29 = vmul.f32 0.03125, %v172_v51  ;;  %v185_v53 = vmul.f32 0.03125, %v151_v52  ;;  %552 = vmatprep.mubr.msk.f32.mxu0 %vm33_vm0, %v273_v50  ;;  %v258_v56 = vmul.f32 %v840_v32, %v235_v36 }
 0x137   :  { %v591_v57 = vpop.eup %590  ;;  %604 = vrsqrt.f32 %v200_v49  ;;  %v251_v58 = vmul.f32 %v840_v32, %v228_v28 }
 0x138   :  { %v593_v59 = vpop.eup %592  ;;  %v208_v60 = vadd.f32 1e-06, %v192_v29  ;;  %v201_v61 = vadd.f32 1e-06, %v185_v53  ;;  %v281_v44 = vadd.f32 %v846_v40, %v258_v56  ;;  %v236_v62 = vmul.f32 %v591_v57, %v745_v45 }
 0x139   :  { %v175_v63 = vpop.xlane.xlu1 %174  ;;  %v154_v37 = vpop.xlane.xlu0 %153  ;;  %v274_v2 = vadd.f32 %v846_v40, %v251_v58  ;;  %v229_v3 = vmul.f32 %v593_v59, %v753_v54 }
 0x13a   :  { %606 = vrsqrt.f32 %v208_v60  ;;  %v193_v4 = vmul.f32 0.03125, %v175_v63  ;;  %v186_v5 = vmul.f32 0.03125, %v154_v37  ;;  %564 = vmatprep.mubr.msk.f32.mxu1 %vm33_vm0, %v281_v44  ;;  %v259_v6 = vmul.f32 %v840_v32, %v236_v62 }
 0x13b   :  { %v595_v7 = vpop.eup %594  ;;  %608 = vrsqrt.f32 %v201_v61  ;;  %553 = vmatmul.mubr.msk.f32.vlgmr.msra.gmra.mxu0 %vm33_vm0, %v274_v2  ;;  %v252_v8 = vmul.f32 %v840_v32, %v229_v3 }
 0x13c   :  { %v597_v45 = vpop.eup %596  ;;  %v209_v9 = vadd.f32 1e-06, %v193_v4  ;;  %v202_v12 = vadd.f32 1e-06, %v186_v5  ;;  %v282_v13 = vadd.f32 %v846_v40, %v259_v6  ;;  %v237_v54 = vmul.f32 %v595_v7, %v755_v55 }
 0x13d   :  { %v178_v14 = vpop.xlane.xlu1 %177  ;;  %v275_v15 = vadd.f32 %v846_v40, %v252_v8  ;;  %v230_v18 = vmul.f32 %v597_v45, %v764_v0 }
 0x13e   :  { %610 = vrsqrt.f32 %v209_v9  ;;  %v194_v19 = vmul.f32 0.03125, %v178_v14  ;;  %565 = vmatmul.mubr.msk.f32.vlgmr.msra.gmra.mxu1 %vm33_vm0, %v282_v13  ;;  %v260_v22 = vmul.f32 %v840_v32, %v237_v54 }
 0x13f   :  { %v599_v16 = vpop.eup %598  ;;  %612 = vrsqrt.f32 %v202_v12  ;;  %555 = vmatprep.mubr.msk.f32.mxu0 %vm33_vm0, %v275_v15  ;;  %v253_v26 = vmul.f32 %v840_v32, %v230_v18 }
 0x140   :  { %v601_v27 = vpop.eup %600  ;;  %v210_v30 = vadd.f32 1e-06, %v194_v19  ;;  %v283_v55 = vadd.f32 %v846_v40, %v260_v22  ;;  %v238_v31 = vmul.f32 %v599_v16, %v767_v1 }
 0x141   :  { %v276_v0 = vadd.f32 %v846_v40, %v253_v26  ;;  %v231_v33 = vmul.f32 %v601_v27, %v776_v10 }
 0x142   :  { %614 = vrsqrt.f32 %v210_v30  ;;  %567 = vmatprep.mubr.msk.f32.mxu1 %vm33_vm0, %v283_v55  ;;  %v261_v34 = vmul.f32 %v840_v32, %v238_v31 }
 0x143   :  { %v603_v20 = vpop.eup %602  ;;  %556 = vmatmul.mubr.msk.f32.gmra.mxu0 %vm33_vm0, %v276_v0  ;;  %v254_v38 = vmul.f32 %v840_v32, %v231_v33 }
 0x144   :  { %v605_v39 = vpop.eup %604  ;;  %v284_v41 = vadd.f32 %v846_v40, %v261_v34  ;;  %v239_v42 = vmul.f32 %v603_v20, %v779_v11 }
 0x145   :  { %v277_v1 = vadd.f32 %v846_v40, %v254_v38  ;;  %v232_v43 = vmul.f32 %v605_v39, %v788_v23 }
 0x146   :  { %568 = vmatmul.mubr.msk.f32.gmra.mxu1 %vm33_vm0, %v284_v41  ;;  %v262_v10 = vmul.f32 %v840_v32, %v239_v42 }
 0x147   :  { %v607_v46 = vpop.eup %606  ;;  %558 = vmatprep.mubr.msk.f32.mxu0 %vm33_vm0, %v277_v1  ;;  %v255_v24 = vmul.f32 %v840_v32, %v232_v43 }
 0x148   :  { %v609_v48 = vpop.eup %608  ;;  %v285_v49 = vadd.f32 %v846_v40, %v262_v10  ;;  %v240_v50 = vmul.f32 %v607_v46, %v791_v17 }
 0x149   :  { %v278_v11 = vadd.f32 %v846_v40, %v255_v24  ;;  %v233_v36 = vmul.f32 %v609_v48, %v800_v35 }
 0x14a   :  { %570 = vmatprep.mubr.msk.f32.mxu1 %vm33_vm0, %v285_v49  ;;  %v263_v23 = vmul.f32 %v840_v32, %v240_v50 }
 0x14b   :  { %v611_v51 = vpop.eup %610  ;;  %559 = vmatmul.mubr.msk.f32.gmra.mxu0 %vm33_vm0, %v278_v11  ;;  %v256_v52 = vmul.f32 %v840_v32, %v233_v36 }
 0x14c   :  { %v613_v28 = vpop.eup %612  ;;  %v286_v29 = vadd.f32 %v846_v40, %v263_v23  ;;  %v241_v53 = vmul.f32 %v611_v51, %v803_v21 }
 0x14d   :  { %v279_v17 = vadd.f32 %v846_v40, %v256_v52  ;;  %v234_v56 = vmul.f32 %v613_v28, %v812_v47 }
 0x14e   :  { %571 = vmatmul.mubr.msk.f32.gmra.mxu1 %vm33_vm0, %v286_v29  ;;  %v264_v35 = vmul.f32 %v840_v32, %v241_v53 }
 0x14f   :  { %v615_v57 = vpop.eup %614  ;;  %561 = vmatprep.mubr.msk.f32.mxu0 %vm33_vm0, %v279_v17  ;;  %v257_v58 = vmul.f32 %v840_v32, %v234_v56 }
 0x150   :  { %v287_v59 = vadd.f32 %v846_v40, %v264_v35  ;;  %v242_v60 = vmul.f32 %v615_v57, %v815_v25 }
 0x151   :  { %v280_v61 = vadd.f32 %v846_v40, %v257_v58 }
 0x152   :  { %573 = vmatprep.mubr.msk.f32.mxu1 %vm33_vm0, %v287_v59  ;;  %v265_v21 = vmul.f32 %v840_v32, %v242_v60 }
 0x153   :  { %562 = vmatmul.mubr.msk.f32.gmra.mxu0 %vm33_vm0, %v280_v61 }
 0x154   :  { %v288_v47 = vadd.f32 %v846_v40, %v265_v21 }
 0x156   :  { %574 = vmatmul.mubr.msk.f32.gmra.mxu1 %vm33_vm0, %v288_v47 }
 0x1fb   :  { %v554_v44 = vpop.f32.mrf.mxu0 }
 0x1fc   :  { %487 = vst [vmem:[%s963_s4 + $0x8] sm:$0xff] %v554_v44 }
 0x1fd   :  { %v407_v62 = vpop.f32.mrf.mxu0 }
 0x1fe   :  { %486 = vst [vmem:[%s963_s4] sm:$0xff] %v407_v62  ;;  %v566_v25 = vpop.f32.mrf.mxu1 }
 0x1ff   :  { %495 = vst [vmem:[%s963_s4 + $0x48] sm:$0xff] %v566_v25 }
 0x200   :  { %v447_v32 = vpop.f32.mrf.mxu1 }
 0x201   :  { %494 = vst [vmem:[%s963_s4 + $0x40] sm:$0xff] %v447_v32 }
 0x203   :  { %v557_v40 = vpop.f32.mrf.mxu0 }
 0x204   :  { %489 = vst [vmem:[%s963_s4 + $0x18] sm:$0xff] %v557_v40 }
 0x205   :  { %v417_v63 = vpop.f32.mrf.mxu0 }
 0x206   :  { %488 = vst [vmem:[%s963_s4 + $0x10] sm:$0xff] %v417_v63  ;;  %v569_v37 = vpop.f32.mrf.mxu1 }
 0x207   :  { %497 = vst [vmem:[%s963_s4 + $0x58] sm:$0xff] %v569_v37 }
 0x208   :  { %v457_v2 = vpop.f32.mrf.mxu1 }
 0x209   :  { %496 = vst [vmem:[%s963_s4 + $0x50] sm:$0xff] %v457_v2 }
 0x20b   :  { %v560_v3 = vpop.f32.mrf.mxu0 }
 0x20c   :  { %491 = vst [vmem:[%s963_s4 + $0x28] sm:$0xff] %v560_v3 }
 0x20d   :  { %v427_v4 = vpop.f32.mrf.mxu0 }
 0x20e   :  { %490 = vst [vmem:[%s963_s4 + $0x20] sm:$0xff] %v427_v4  ;;  %v572_v5 = vpop.f32.mrf.mxu1 }
 0x20f   :  { %499 = vst [vmem:[%s963_s4 + $0x68] sm:$0xff] %v572_v5 }
 0x210   :  { %v467_v6 = vpop.f32.mrf.mxu1 }
 0x211   :  { %498 = vst [vmem:[%s963_s4 + $0x60] sm:$0xff] %v467_v6 }
 0x213   :  { %v563_v7 = vpop.f32.mrf.mxu0 }
 0x214   :  { %493 = vst [vmem:[%s963_s4 + $0x38] sm:$0xff] %v563_v7 }
 0x215   :  { %v437_v8 = vpop.f32.mrf.mxu0 }
 0x216   :  { %492 = vst [vmem:[%s963_s4 + $0x30] sm:$0xff] %v437_v8  ;;  %v575_v45 = vpop.f32.mrf.mxu1 }
 0x217   :  { %501 = vst [vmem:[%s963_s4 + $0x78] sm:$0xff] %v575_v45 }
 0x218   :  { %v477_v9 = vpop.f32.mrf.mxu1 }
 0x219   :  { %500 = vst [vmem:[%s963_s4 + $0x70] sm:$0xff] %v477_v9 }

// kernel: reverse.3
= control target key start
LH: loop header
LB: loop body
LE: loop exit
PB: predicated region body
PF: predicated region fallthrough
CT: control target
= control target key end

     0   :  { %s409_s0 = inlined_call_operand.vmem [shape: f32[2,1,64,64], index: 0, kind: input, shape index: {}]   ;;  %s410_s1 = inlined_call_operand.vmem [shape: f32[2,1,64,64], index: 1, kind: output, shape index: {}]  }
   0x1   :  { %v60_v0 = vld [vmem:[%s409_s0] sm:$0xff]  ;;  %v62_v1 = vld [vmem:[%s409_s0 + $0x8] sm:$0xff]  ;;  %v64_v2 = vld [vmem:[%s409_s0 + $0x10] sm:$0xff] }
   0x2   :  { %61 = vst [vmem:[#allocation0] sm:$0xff] %v60_v0  ;;  %63 = vst [vmem:[#allocation0 + $0x8] sm:$0xff] %v62_v1  ;;  %v66_v3 = vld [vmem:[%s409_s0 + $0x18] sm:$0xff]  ;;  %v68_v4 = vld [vmem:[%s409_s0 + $0x20] sm:$0xff] }
   0x3   :  { %65 = vst [vmem:[#allocation0 + $0x10] sm:$0xff] %v64_v2  ;;  %v70_v5 = vld [vmem:[%s409_s0 + $0x28] sm:$0xff]  ;;  %67 = vst [vmem:[#allocation0 + $0x18] sm:$0xff] %v66_v3  ;;  %v72_v6 = vld [vmem:[%s409_s0 + $0x30] sm:$0xff] }
   0x4   :  { %69 = vst [vmem:[#allocation0 + $0x20] sm:$0xff] %v68_v4  ;;  %71 = vst [vmem:[#allocation0 + $0x28] sm:$0xff] %v70_v5  ;;  %v74_v7 = vld [vmem:[%s409_s0 + $0x38] sm:$0xff]  ;;  %v76_v8 = vld [vmem:[%s409_s0 + $0x40] sm:$0xff] }
   0x5   :  { %73 = vst [vmem:[#allocation0 + $0x30] sm:$0xff] %v72_v6  ;;  %75 = vst [vmem:[#allocation0 + $0x38] sm:$0xff] %v74_v7  ;;  %v78_v9 = vld [vmem:[%s409_s0 + $0x48] sm:$0xff]  ;;  %v80_v10 = vld [vmem:[%s409_s0 + $0x50] sm:$0xff] }
   0x6   :  { %77 = vst [vmem:[#allocation0 + $0x40] sm:$0xff] %v76_v8  ;;  %v82_v11 = vld [vmem:[%s409_s0 + $0x58] sm:$0xff]  ;;  %79 = vst [vmem:[#allocation0 + $0x48] sm:$0xff] %v78_v9  ;;  %v84_v12 = vld [vmem:[%s409_s0 + $0x60] sm:$0xff] }
   0x7   :  { %81 = vst [vmem:[#allocation0 + $0x50] sm:$0xff] %v80_v10  ;;  %83 = vst [vmem:[#allocation0 + $0x58] sm:$0xff] %v82_v11  ;;  %v86_v13 = vld [vmem:[%s409_s0 + $0x68] sm:$0xff]  ;;  %v88_v14 = vld [vmem:[%s409_s0 + $0x70] sm:$0xff] }
   0x8   :  { %85 = vst [vmem:[#allocation0 + $0x60] sm:$0xff] %v84_v12  ;;  %87 = vst [vmem:[#allocation0 + $0x68] sm:$0xff] %v86_v13  ;;  %v90_v15 = vld [vmem:[%s409_s0 + $0x78] sm:$0xff] }
   0x9   :  { %89 = vst [vmem:[#allocation0 + $0x70] sm:$0xff] %v88_v14  ;;  %91 = vst [vmem:[#allocation0 + $0x78] sm:$0xff] %v90_v15  ;;  %v127_v17 = vld [vmem:[#allocation0 + $0xf] ss:$-1 sm:$0xff]  ;;  %v131_v18 = vld [vmem:[#allocation0 + $0x7] ss:$-1 sm:$0xff] }
   0xa   :  { %v122_v16 = vld [vmem:[#allocation0 + $0x17] ss:$-1 sm:$0xff]  ;;  %v117_v21 = vld [vmem:[#allocation0 + $0x1f] ss:$-1 sm:$0xff]  ;;  %244 = vst [vmem:[%s410_s1 + $0x30] sm:$0xff] %v127_v17  ;;  %246 = vst [vmem:[%s410_s1 + $0x38] sm:$0xff] %v131_v18 }
   0xb   :  { %v107_v19 = vld [vmem:[#allocation0 + $0x2f] ss:$-1 sm:$0xff]  ;;  %v112_v20 = vld [vmem:[#allocation0 + $0x27] ss:$-1 sm:$0xff]  ;;  %242 = vst [vmem:[%s410_s1 + $0x28] sm:$0xff] %v122_v16  ;;  %240 = vst [vmem:[%s410_s1 + $0x20] sm:$0xff] %v117_v21 }
   0xc   :  { %v97_v22 = vld [vmem:[#allocation0 + $0x3f] ss:$-1 sm:$0xff]  ;;  %v102_v23 = vld [vmem:[#allocation0 + $0x37] ss:$-1 sm:$0xff]  ;;  %236 = vst [vmem:[%s410_s1 + $0x10] sm:$0xff] %v107_v19  ;;  %238 = vst [vmem:[%s410_s1 + $0x18] sm:$0xff] %v112_v20 }
   0xd   :  { %v171_v24 = vld [vmem:[#allocation0 + $0x47] ss:$-1 sm:$0xff]  ;;  %v167_v27 = vld [vmem:[#allocation0 + $0x4f] ss:$-1 sm:$0xff]  ;;  %232 = vst [vmem:[%s410_s1] sm:$0xff] %v97_v22  ;;  %234 = vst [vmem:[%s410_s1 + $0x8] sm:$0xff] %v102_v23 }
   0xe   :  { %v157_v25 = vld [vmem:[#allocation0 + $0x5f] ss:$-1 sm:$0xff]  ;;  %v162_v26 = vld [vmem:[#allocation0 + $0x57] ss:$-1 sm:$0xff]  ;;  %262 = vst [vmem:[%s410_s1 + $0x78] sm:$0xff] %v171_v24  ;;  %260 = vst [vmem:[%s410_s1 + $0x70] sm:$0xff] %v167_v27 }
   0xf   :  { %v147_v29 = vld [vmem:[#allocation0 + $0x6f] ss:$-1 sm:$0xff]  ;;  %v152_v30 = vld [vmem:[#allocation0 + $0x67] ss:$-1 sm:$0xff]  ;;  %256 = vst [vmem:[%s410_s1 + $0x60] sm:$0xff] %v157_v25  ;;  %258 = vst [vmem:[%s410_s1 + $0x68] sm:$0xff] %v162_v26 }
  0x10   :  { %v142_v28 = vld [vmem:[#allocation0 + $0x77] ss:$-1 sm:$0xff]  ;;  %v137_v31 = vld [vmem:[#allocation0 + $0x7f] ss:$-1 sm:$0xff]  ;;  %252 = vst [vmem:[%s410_s1 + $0x50] sm:$0xff] %v147_v29  ;;  %254 = vst [vmem:[%s410_s1 + $0x58] sm:$0xff] %v152_v30 }
  0x11   :  { %250 = vst [vmem:[%s410_s1 + $0x48] sm:$0xff] %v142_v28  ;;  %248 = vst [vmem:[%s410_s1 + $0x40] sm:$0xff] %v137_v31 }

// kernel: convbnssm_forward.15
= control target key start
LH: loop header
LB: loop body
LE: loop exit
PB: predicated region body
PF: predicated region fallthrough
CT: control target
= control target key end

     0   :  { %vm52_vm0 = vcmask 523264   ;;  %vm637_vm1 = vcmask 261120   ;;  %s1352_s0 = inlined_call_operand.vmem [shape: f32[128,64], index: 0, kind: input, shape index: {}]   ;;  %s1353_s4 = inlined_call_operand.vmem [shape: f32[64,32], index: 4, kind: input, shape index: {}]   ;;  %s1354_s1 = inlined_call_operand.vmem [shape: f32[128,64], index: 1, kind: input, shape index: {}]   ;;  %s1355_s2 = inlined_call_operand.vmem [shape: f32[1,64], index: 2, kind: input, shape index: {}]   ;;  %s1356_s3 = inlined_call_operand.vmem [shape: f32[1,64], index: 3, kind: input, shape index: {}]   ;;  %s1357_s5 = inlined_call_operand.vmem [shape: f32[128,32], index: 5, kind: output, shape index: {}]  }
   0x1   :  { %v20_v0 = vld [vmem:[%s1352_s0] sm:$0xff]  ;;  %v21_v1 = vld [vmem:[%s1352_s0 + $0x8] sm:$0xff]  ;;  %v22_v8 = vld [vmem:[%s1352_s0 + $0x10] sm:$0xff] }
   0x2   :  { %v28_v2 = vld [vmem:[%s1352_s0 + $0x40] sm:$0xff]  ;;  %v53_v3 = vsel %vm52_vm0, %v20_v0, 0.0  ;;  %v56_v4 = vsel %vm52_vm0, %v21_v1, 0.0  ;;  %v29_v5 = vld [vmem:[%s1352_s0 + $0x48] sm:$0xff]  ;;  %v30_v9 = vld [vmem:[%s1352_s0 + $0x50] sm:$0xff]  ;;  %v59_v10 = vsel %vm52_vm0, %v22_v8, 0.0 }
   0x3   :  { %54 = vadd.xlane.f32.xlu0 %v53_v3  ;;  %57 = vadd.xlane.f32.xlu1 %v56_v4  ;;  %v77_v6 = vsel %vm52_vm0, %v28_v2, 0.0  ;;  %v80_v7 = vsel %vm52_vm0, %v29_v5, 0.0  ;;  %v83_v11 = vsel %vm52_vm0, %v30_v9, 0.0  ;;  %v909_v12 = vld [vmem:[%s1352_s0 + $0x18] sm:$0xff]  ;;  %v923_v16 = vld [vmem:[%s1352_s0 + $0x20] sm:$0xff]  ;;  %v937_v20 = vld [vmem:[%s1352_s0 + $0x28] sm:$0xff] }
   0x4   :  { %v914_v13 = vld [vmem:[%s1352_s0 + $0x58] sm:$0xff]  ;;  %v62_v14 = vsel %vm52_vm0, %v909_v12, 0.0  ;;  %v928_v17 = vld [vmem:[%s1352_s0 + $0x60] sm:$0xff]  ;;  %v65_v18 = vsel %vm52_vm0, %v923_v16, 0.0  ;;  %v942_v21 = vld [vmem:[%s1352_s0 + $0x68] sm:$0xff]  ;;  %v68_v22 = vsel %vm52_vm0, %v937_v20, 0.0 }
   0x5   :  { %v86_v15 = vsel %vm52_vm0, %v914_v13, 0.0  ;;  %v89_v19 = vsel %vm52_vm0, %v928_v17, 0.0  ;;  %v92_v23 = vsel %vm52_vm0, %v942_v21, 0.0  ;;  %v951_v24 = vld [vmem:[%s1352_s0 + $0x30] sm:$0xff]  ;;  %v965_v28 = vld [vmem:[%s1352_s0 + $0x38] sm:$0xff] }
   0x6   :  { %v956_v25 = vld [vmem:[%s1352_s0 + $0x70] sm:$0xff]  ;;  %v71_v26 = vsel %vm52_vm0, %v951_v24, 0.0  ;;  %v970_v29 = vld [vmem:[%s1352_s0 + $0x78] sm:$0xff]  ;;  %v74_v30 = vsel %vm52_vm0, %v965_v28, 0.0 }
   0x7   :  { %78 = vadd.xlane.f32.xlu0 %v77_v6  ;;  %81 = vadd.xlane.f32.xlu1 %v80_v7  ;;  %v95_v27 = vsel %vm52_vm0, %v956_v25, 0.0  ;;  %v98_v31 = vsel %vm52_vm0, %v970_v29, 0.0 }
   0xb   :  { %60 = vadd.xlane.f32.xlu0 %v59_v10  ;;  %84 = vadd.xlane.f32.xlu1 %v83_v11 }
   0xf   :  { %63 = vadd.xlane.f32.xlu0 %v62_v14  ;;  %87 = vadd.xlane.f32.xlu1 %v86_v15 }
  0x13   :  { %66 = vadd.xlane.f32.xlu0 %v65_v18  ;;  %90 = vadd.xlane.f32.xlu1 %v89_v19 }
  0x17   :  { %69 = vadd.xlane.f32.xlu0 %v68_v22  ;;  %93 = vadd.xlane.f32.xlu1 %v92_v23 }
  0x1b   :  { %72 = vadd.xlane.f32.xlu0 %v71_v26  ;;  %96 = vadd.xlane.f32.xlu1 %v95_v27 }
  0x1f   :  { %75 = vadd.xlane.f32.xlu0 %v74_v30  ;;  %99 = vadd.xlane.f32.xlu1 %v98_v31 }
  0x8c   :  { %v55_v32 = vpop.xlane.xlu0 %54  ;;  %v58_v33 = vpop.xlane.xlu1 %57 }
  0x8d   :  { %v102_v34 = vmul.f32 0.015625, %v55_v32  ;;  %v103_v35 = vmul.f32 0.015625, %v58_v33 }
  0x8f   :  { %v976_v36 = vsub.f32 %v20_v0, %v102_v34  ;;  %v978_v37 = vsub.f32 %v21_v1, %v103_v35 }
  0x90   :  { %v79_v38 = vpop.xlane.xlu0 %78  ;;  %v82_v39 = vpop.xlane.xlu1 %81 }
  0x91   :  { %v110_v40 = vmul.f32 0.015625, %v79_v38  ;;  %v111_v41 = vmul.f32 0.015625, %v82_v39  ;;  %v134_v42 = vmul.f32 %v976_v36, %v976_v36  ;;  %v135_v43 = vmul.f32 %v978_v37, %v978_v37 }
  0x93   :  { %v984_v44 = vsub.f32 %v28_v2, %v110_v40  ;;  %v986_v45 = vsub.f32 %v29_v5, %v111_v41  ;;  %v150_v46 = vsel %vm52_vm0, %v134_v42, 0.0  ;;  %v153_v49 = vsel %vm52_vm0, %v135_v43, 0.0 }
  0x94   :  { %151 = vadd.xlane.f32.xlu0 %v150_v46  ;;  %v61_v47 = vpop.xlane.xlu0 %60  ;;  %v85_v48 = vpop.xlane.xlu1 %84 }
  0x95   :  { %v104_v50 = vmul.f32 0.015625, %v61_v47  ;;  %v112_v51 = vmul.f32 0.015625, %v85_v48  ;;  %v142_v52 = vmul.f32 %v984_v44, %v984_v44  ;;  %v143_v53 = vmul.f32 %v986_v45, %v986_v45 }
  0x97   :  { %v994_v54 = vsub.f32 %v22_v8, %v104_v50  ;;  %v996_v55 = vsub.f32 %v30_v9, %v112_v51  ;;  %v174_v56 = vsel %vm52_vm0, %v142_v52, 0.0  ;;  %v177_v59 = vsel %vm52_vm0, %v143_v53, 0.0  ;;  %v441_v53 = vld [vmem:[%s1353_s4 + $0x28] sm:$0xff] }
  0x98   :  { %154 = vadd.xlane.f32.xlu0 %v153_v49  ;;  %175 = vadd.xlane.f32.xlu1 %v174_v56  ;;  %v64_v57 = vpop.xlane.xlu0 %63  ;;  %v88_v58 = vpop.xlane.xlu1 %87  ;;  %v443_v49 = vld [vmem:[%s1353_s4 + $0x38] sm:$0xff] }
  0x99   :  { %v105_v60 = vmul.f32 0.015625, %v64_v57  ;;  %v113_v61 = vmul.f32 0.015625, %v88_v58  ;;  %v136_v62 = vmul.f32 %v994_v54, %v994_v54  ;;  %v144_v63 = vmul.f32 %v996_v55, %v996_v55  ;;  %700 = vmatprep.subr.mxu0 %v443_v49  ;;  %740 = vmatprep.subr.mxu1 %v443_v49  ;;  %v440_v57 = vld [vmem:[%s1353_s4 + $0x20] sm:$0xff]  ;;  %v439_v58 = vld [vmem:[%s1353_s4 + $0x18] sm:$0xff] }
  0x9a   :  { %701 = vmatpush3.msra.mxu0 %v443_v49  ;;  %748 = vmatpush3.msra.mxu1 %v443_v49 }
  0x9b   :  { %v1005_v0 = vsub.f32 %v909_v12, %v105_v60  ;;  %v1008_v1 = vsub.f32 %v914_v13, %v113_v61  ;;  %v156_v2 = vsel %vm52_vm0, %v136_v62, 0.0  ;;  %v180_v5 = vsel %vm52_vm0, %v144_v63, 0.0  ;;  %v437_v60 = vld [vmem:[%s1353_s4 + $0x8] sm:$0xff]  ;;  %v436_v61 = vld [vmem:[%s1353_s4] sm:$0xff] }
  0x9c   :  { %178 = vadd.xlane.f32.xlu1 %v177_v59  ;;  %157 = vadd.xlane.f32.xlu0 %v156_v2  ;;  %v67_v3 = vpop.xlane.xlu0 %66  ;;  %v91_v4 = vpop.xlane.xlu1 %90  ;;  %v438_v59 = vld [vmem:[%s1353_s4 + $0x10] sm:$0xff]  ;;  %v1093_v62 = vld [vmem:[%s1354_s1] sm:$0xff]  ;;  %v1099_v2 = vld [vmem:[%s1354_s1 + $0x8] sm:$0xff] }
  0x9d   :  { %v106_v6 = vmul.f32 0.015625, %v67_v3  ;;  %v114_v7 = vmul.f32 0.015625, %v91_v4  ;;  %v137_v8 = vmul.f32 %v1005_v0, %v1005_v0  ;;  %v145_v9 = vmul.f32 %v1008_v1, %v1008_v1  ;;  %v1104_v3 = vld [vmem:[%s1354_s1 + $0x40] sm:$0xff] }
  0x9e   :  { %v308_v63 = vsub.f32 0.0, %v1093_v62  ;;  %v309_v4 = vsub.f32 0.0, %v1099_v2 }
  0x9f   :  { %v1017_v10 = vsub.f32 %v923_v16, %v106_v6  ;;  %v1020_v11 = vsub.f32 %v928_v17, %v114_v7  ;;  %v159_v12 = vsel %vm52_vm0, %v137_v8, 0.0  ;;  %v183_v15 = vsel %vm52_vm0, %v145_v9, 0.0  ;;  %v1111_v7 = vld [vmem:[%s1354_s1 + $0x10] sm:$0xff]  ;;  %v1116_v8 = vld [vmem:[%s1354_s1 + $0x48] sm:$0xff]  ;;  %v1121_v9 = vld [vmem:[%s1354_s1 + $0x18] sm:$0xff] }
  0xa0   :  { %181 = vadd.xlane.f32.xlu1 %v180_v5  ;;  %160 = vadd.xlane.f32.xlu0 %v159_v12  ;;  %v70_v13 = vpop.xlane.xlu0 %69  ;;  %v94_v14 = vpop.xlane.xlu1 %93  ;;  %v324_v5 = vmul.f32 1.442695, %v308_v63  ;;  %v316_v6 = vsub.f32 0.0, %v1104_v3  ;;  %v326_v12 = vmul.f32 1.442695, %v309_v4  ;;  %v1176_v4 = vld [vmem:[%s1354_s1 + $0x70] sm:$0xff] }
  0xa1   :  { %v107_v18 = vmul.f32 0.015625, %v70_v13  ;;  %v115_v19 = vmul.f32 0.015625, %v94_v14  ;;  %v138_v22 = vmul.f32 %v1017_v10, %v1017_v10  ;;  %v146_v16 = vmul.f32 %v1020_v11, %v1020_v11 }
  0xa2   :  { %v310_v13 = vsub.f32 0.0, %v1111_v7  ;;  %756 = vpow2.f32 %v324_v5  ;;  %v340_v14 = vmul.f32 1.442695, %v316_v6 }
  0xa3   :  { %v1029_v23 = vsub.f32 %v937_v20, %v107_v18  ;;  %v1032_v17 = vsub.f32 %v942_v21, %v115_v19  ;;  %v162_v26 = vsel %vm52_vm0, %v138_v22, 0.0  ;;  %v186_v31 = vsel %vm52_vm0, %v146_v16, 0.0  ;;  %v1129_v19 = vld [vmem:[%s1354_s1 + $0x50] sm:$0xff] }
  0xa4   :  { %184 = vadd.xlane.f32.xlu1 %v183_v15  ;;  %163 = vadd.xlane.f32.xlu0 %v162_v26  ;;  %v73_v27 = vpop.xlane.xlu0 %72  ;;  %v97_v30 = vpop.xlane.xlu1 %96  ;;  %v317_v15 = vsub.f32 0.0, %v1116_v8  ;;  %v311_v18 = vsub.f32 0.0, %v1121_v9  ;;  %758 = vpow2.f32 %v326_v12  ;;  %v328_v22 = vmul.f32 1.442695, %v310_v13 }
  0xa5   :  { %v108_v32 = vmul.f32 0.015625, %v73_v27  ;;  %v116_v33 = vmul.f32 0.015625, %v97_v30  ;;  %v139_v34 = vmul.f32 %v1029_v23, %v1029_v23  ;;  %v147_v20 = vmul.f32 %v1032_v17, %v1032_v17  ;;  %v1135_v30 = vld [vmem:[%s1354_s1 + $0x20] sm:$0xff] }
  0xa6   :  { %760 = vpow2.f32 %v340_v14  ;;  %v342_v16 = vmul.f32 1.442695, %v317_v15  ;;  %v318_v26 = vsub.f32 0.0, %v1129_v19  ;;  %v330_v27 = vmul.f32 1.442695, %v311_v18 }
  0xa7   :  { %v1041_v35 = vsub.f32 %v951_v24, %v108_v32  ;;  %v1044_v21 = vsub.f32 %v956_v25, %v116_v33  ;;  %v165_v38 = vsel %vm52_vm0, %v139_v34, 0.0  ;;  %v189_v41 = vsel %vm52_vm0, %v147_v20, 0.0  ;;  %v1141_v33 = vld [vmem:[%s1354_s1 + $0x58] sm:$0xff]  ;;  %v1146_v34 = vld [vmem:[%s1354_s1 + $0x28] sm:$0xff] }
  0xa8   :  { %187 = vadd.xlane.f32.xlu1 %v186_v31  ;;  %166 = vadd.xlane.f32.xlu0 %v165_v38  ;;  %v76_v39 = vpop.xlane.xlu0 %75  ;;  %v100_v40 = vpop.xlane.xlu1 %99  ;;  %762 = vpow2.f32 %v328_v22  ;;  %v344_v31 = vmul.f32 1.442695, %v318_v26  ;;  %v312_v32 = vsub.f32 0.0, %v1135_v30  ;;  %v319_v38 = vsub.f32 0.0, %v1141_v33  ;;  %v1183_v22 = vld [vmem:[%s1354_s1 + $0x78] sm:$0xff] }
  0xa9   :  { %v109_v42 = vmul.f32 0.015625, %v76_v39  ;;  %v117_v43 = vmul.f32 0.015625, %v100_v40  ;;  %v140_v46 = vmul.f32 %v1041_v35, %v1041_v35  ;;  %v148_v24 = vmul.f32 %v1044_v21, %v1044_v21 }
  0xaa   :  { %764 = vpow2.f32 %v342_v16  ;;  %v332_v39 = vmul.f32 1.442695, %v312_v32  ;;  %v313_v40 = vsub.f32 0.0, %v1146_v34  ;;  %v322_v18 = vsub.f32 0.0, %v1176_v4 }
  0xab   :  { %v1053_v47 = vsub.f32 %v965_v28, %v109_v42  ;;  %v1056_v25 = vsub.f32 %v970_v29, %v117_v43  ;;  %v168_v48 = vsel %vm52_vm0, %v140_v46, 0.0  ;;  %v192_v50 = vsel %vm52_vm0, %v148_v24, 0.0  ;;  %v442_v29 = vld [vmem:[%s1353_s4 + $0x30] sm:$0xff] }
  0xac   :  { %190 = vadd.xlane.f32.xlu1 %v189_v41  ;;  %169 = vadd.xlane.f32.xlu0 %v168_v48  ;;  %766 = vpow2.f32 %v330_v27  ;;  %v1153_v41 = vld [vmem:[%s1354_s1 + $0x60] sm:$0xff]  ;;  %v1158_v42 = vld [vmem:[%s1354_s1 + $0x30] sm:$0xff]  ;;  %v346_v48 = vmul.f32 1.442695, %v319_v38  ;;  %v323_v32 = vsub.f32 0.0, %v1183_v22 }
  0xad   :  { %v141_v51 = vmul.f32 %v1053_v47, %v1053_v47  ;;  %v149_v28 = vmul.f32 %v1056_v25, %v1056_v25  ;;  %702 = vmatprep.subr.mxu0 %v442_v29  ;;  %741 = vmatprep.subr.mxu1 %v442_v29  ;;  %768 = vpow2.f32 %v344_v31  ;;  %v320_v49 = vsub.f32 0.0, %v1153_v41 }
  0xae   :  { %703 = vmatpush3.msra.mxu0 %v442_v29  ;;  %749 = vmatpush3.msra.mxu1 %v442_v29  ;;  %770 = vpow2.f32 %v332_v39  ;;  %v1165_v29 = vld [vmem:[%s1354_s1 + $0x68] sm:$0xff]  ;;  %v352_v39 = vmul.f32 1.442695, %v322_v18 }
  0xaf   :  { %v171_v52 = vsel %vm52_vm0, %v141_v51, 0.0  ;;  %v195_v56 = vsel %vm52_vm0, %v149_v28, 0.0  ;;  %704 = vmatprep.subr.mxu0 %v441_v53  ;;  %742 = vmatprep.subr.mxu1 %v441_v53  ;;  %v757_v20 = vpop.eup %756  ;;  %v314_v51 = vsub.f32 0.0, %v1158_v42 }
  0xb0   :  { %193 = vadd.xlane.f32.xlu1 %v192_v50  ;;  %172 = vadd.xlane.f32.xlu0 %v171_v52  ;;  %v356_v46 = vadd.f32 1.0, %v757_v20  ;;  %v334_v50 = vmul.f32 1.442695, %v313_v40 }
  0xb1   :  { %705 = vmatpush3.msra.mxu0 %v441_v53  ;;  %750 = vmatpush3.msra.mxu1 %v441_v53  ;;  %v759_v43 = vpop.eup %758 }
  0xb2   :  { %706 = vmatprep.subr.mxu0 %v440_v57  ;;  %743 = vmatprep.subr.mxu1 %v440_v57  ;;  %v357_v28 = vadd.f32 1.0, %v759_v43  ;;  %772 = vrcp.f32 %v356_v46 }
  0xb3   :  { %707 = vmatpush3.msra.mxu0 %v440_v57  ;;  %751 = vmatpush3.msra.mxu1 %v440_v57  ;;  %v761_v24 = vpop.eup %760  ;;  %774 = vpow2.f32 %v346_v48  ;;  %v348_v57 = vmul.f32 1.442695, %v320_v49 }
  0xb4   :  { %196 = vadd.xlane.f32.xlu1 %v195_v56  ;;  %708 = vmatprep.subr.mxu0 %v439_v58  ;;  %v364_v53 = vadd.f32 1.0, %v761_v24  ;;  %776 = vpow2.f32 %v334_v50  ;;  %v354_v50 = vmul.f32 1.442695, %v323_v32 }
  0xb5   :  { %709 = vmatpush3.msra.mxu0 %v439_v58  ;;  %744 = vmatprep.subr.mxu1 %v439_v58  ;;  %v763_v52 = vpop.eup %762  ;;  %778 = vrcp.f32 %v357_v28 }
  0xb6   :  { %710 = vmatprep.subr.mxu0 %v438_v59  ;;  %752 = vmatpush3.msra.mxu1 %v439_v58  ;;  %v358_v63 = vadd.f32 1.0, %v763_v52  ;;  %780 = vrcp.f32 %v364_v53 }
  0xb7   :  { %711 = vmatpush3.msra.mxu0 %v438_v59  ;;  %745 = vmatprep.subr.mxu1 %v438_v59  ;;  %v765_v56 = vpop.eup %764  ;;  %782 = vpow2.f32 %v348_v57 }
  0xb8   :  { %712 = vmatprep.subr.mxu0 %v437_v60  ;;  %753 = vmatpush3.msra.mxu1 %v438_v59  ;;  %v336_v59 = vmul.f32 1.442695, %v314_v51  ;;  %v365_v5 = vadd.f32 1.0, %v765_v56 }
  0xb9   :  { %713 = vmatpush3.msra.mxu0 %v437_v60  ;;  %746 = vmatprep.subr.mxu1 %v437_v60  ;;  %v767_v58 = vpop.eup %766 }
  0xba   :  { %714 = vmatprep.subr.mxu0 %v436_v61  ;;  %754 = vmatpush3.msra.mxu1 %v437_v60  ;;  %v321_v60 = vsub.f32 0.0, %v1165_v29  ;;  %v769_v6 = vpop.eup %768  ;;  %v359_v12 = vadd.f32 1.0, %v767_v58  ;;  %784 = vpow2.f32 %v336_v59 }
  0xbb   :  { %715 = vmatpush3.msra.mxu0 %v436_v61  ;;  %747 = vmatprep.subr.mxu1 %v436_v61  ;;  %786 = vrcp.f32 %v358_v63  ;;  %v366_v26 = vadd.f32 1.0, %v769_v6  ;;  %v771_v40 = vpop.eup %770 }
  0xbc   :  { %755 = vmatpush3.msra.mxu1 %v436_v61  ;;  %v1171_v61 = vld [vmem:[%s1354_s1 + $0x38] sm:$0xff]  ;;  %v350_v15 = vmul.f32 1.442695, %v321_v60  ;;  %788 = vrcp.f32 %v365_v5  ;;  %v360_v53 = vadd.f32 1.0, %v771_v40 }
  0xbd   :  { %v315_v13 = vsub.f32 0.0, %v1171_v61  ;;  %790 = vrcp.f32 %v359_v12 }
  0xbe   :  { %792 = vpow2.f32 %v350_v15 }
  0xbf   :  { %v338_v31 = vmul.f32 1.442695, %v315_v13  ;;  %v773_v24 = vpop.eup %772 }
  0xc0   :  { %v775_v51 = vpop.eup %774 }
  0xc1   :  { %v777_v56 = vpop.eup %776  ;;  %v367_v6 = vadd.f32 1.0, %v775_v51 }
  0xc2   :  { %v779_v59 = vpop.eup %778  ;;  %v361_v15 = vadd.f32 1.0, %v777_v56 }
  0xc3   :  { %v781_v60 = vpop.eup %780 }
  0xc4   :  { %v783_v12 = vpop.eup %782 }
  0xc7   :  { %v785_v18 = vpop.eup %784 }
 0x11d   :  { %v152_v14 = vpop.xlane.xlu0 %151 }
 0x11e   :  { %v198_v16 = vmul.f32 0.015625, %v152_v14 }
 0x120   :  { %v214_v27 = vadd.f32 1e-05, %v198_v16 }
 0x121   :  { %v176_v20 = vpop.xlane.xlu1 %175  ;;  %v155_v38 = vpop.xlane.xlu0 %154 }
 0x122   :  { %794 = vrsqrt.f32 %v214_v27  ;;  %v206_v43 = vmul.f32 0.015625, %v176_v20  ;;  %v199_v46 = vmul.f32 0.015625, %v155_v38  ;;  %v787_v27 = vpop.eup %786  ;;  %v368_v38 = vadd.f32 1.0, %v783_v12 }
 0x123   :  { %796 = vrcp.f32 %v366_v26  ;;  %v404_v12 = vmul.f32 %v773_v24, %v1093_v62 }
 0x124   :  { %v222_v48 = vadd.f32 1e-05, %v206_v43  ;;  %v215_v49 = vadd.f32 1e-05, %v199_v46  ;;  %798 = vpow2.f32 %v338_v31  ;;  %v789_v31 = vpop.eup %788  ;;  %v362_v46 = vadd.f32 1.0, %v785_v18 }
 0x125   :  { %v179_v28 = vpop.xlane.xlu1 %178  ;;  %v158_v52 = vpop.xlane.xlu0 %157  ;;  %800 = vpow2.f32 %v352_v39 }
 0x126   :  { %802 = vrsqrt.f32 %v222_v48  ;;  %v207_v57 = vmul.f32 0.015625, %v179_v28  ;;  %v200_v58 = vmul.f32 0.015625, %v158_v52  ;;  %v1186_v39 = vpop.eup %790  ;;  %v1191_v28 = vld [vmem:[%s1355_s2] ss:$0 sm:$0xff] }
 0x127   :  { %804 = vrsqrt.f32 %v215_v49  ;;  %v793_v48 = vpop.eup %792 }
 0x128   :  { %v223_v63 = vadd.f32 1e-05, %v207_v57  ;;  %v216_v5 = vadd.f32 1e-05, %v200_v58  ;;  %806 = vpow2.f32 %v354_v50 }
 0x129   :  { %v182_v13 = vpop.xlane.xlu1 %181  ;;  %v161_v14 = vpop.xlane.xlu0 %160  ;;  %808 = vrcp.f32 %v360_v53 }
 0x12a   :  { %810 = vrsqrt.f32 %v223_v63  ;;  %v208_v16 = vmul.f32 0.015625, %v182_v13  ;;  %v201_v26 = vmul.f32 0.015625, %v161_v14  ;;  %v369_v13 = vadd.f32 1.0, %v793_v48 }
 0x12b   :  { %812 = vrsqrt.f32 %v216_v5 }
 0x12c   :  { %v224_v32 = vadd.f32 1e-05, %v208_v16  ;;  %v217_v20 = vadd.f32 1e-05, %v201_v26  ;;  %814 = vrcp.f32 %v367_v6  ;;  %v1197_v6 = vld [vmem:[%s1356_s3] ss:$0 sm:$0xff]  ;;  %v405_v26 = vmul.f32 %v779_v59, %v1099_v2 }
 0x12d   :  { %v185_v40 = vpop.xlane.xlu1 %184  ;;  %v164_v43 = vpop.xlane.xlu0 %163  ;;  %816 = vrcp.f32 %v361_v15 }
 0x12e   :  { %818 = vrsqrt.f32 %v224_v32  ;;  %v209_v49 = vmul.f32 0.015625, %v185_v40  ;;  %v202_v50 = vmul.f32 0.015625, %v164_v43  ;;  %v412_v32 = vmul.f32 %v781_v60, %v1104_v3 }
 0x12f   :  { %v795_v51 = vpop.eup %794  ;;  %820 = vrsqrt.f32 %v217_v20  ;;  %v1204_v20 = vmul.f32 %v787_v27, %v1111_v7 }
 0x130   :  { %v797_v52 = vpop.eup %796  ;;  %v225_v53 = vadd.f32 1e-05, %v209_v49  ;;  %v218_v56 = vadd.f32 1e-05, %v202_v50  ;;  %v246_v57 = vmul.f32 %v795_v51, %v976_v36  ;;  %822 = vrcp.f32 %v368_v38 }
 0x131   :  { %v799_v58 = vpop.eup %798  ;;  %v188_v63 = vpop.xlane.xlu1 %187  ;;  %824 = vrcp.f32 %v362_v46  ;;  %v413_v51 = vmul.f32 %v789_v31, %v1116_v8 }
 0x132   :  { %v167_v5 = vpop.xlane.xlu0 %166  ;;  %v801_v14 = vpop.eup %800  ;;  %826 = vrsqrt.f32 %v225_v53  ;;  %v210_v15 = vmul.f32 0.015625, %v188_v63  ;;  %v269_v16 = vmul.f32 %v1191_v28, %v246_v57  ;;  %v363_v2 = vadd.f32 1.0, %v799_v58 }
 0x133   :  { %v203_v18 = vmul.f32 0.015625, %v167_v5  ;;  %v803_v36 = vpop.eup %802  ;;  %828 = vrsqrt.f32 %v218_v56  ;;  %v414_v56 = vmul.f32 %v797_v52, %v1129_v19  ;;  %v370_v31 = vadd.f32 1.0, %v801_v14 }
 0x134   :  { %v805_v38 = vpop.eup %804  ;;  %v226_v40 = vadd.f32 1e-05, %v210_v15  ;;  %v292_v24 = vadd.f32 %v1197_v6, %v269_v16  ;;  %v254_v43 = vmul.f32 %v803_v36, %v984_v44  ;;  %830 = vrcp.f32 %v369_v13 }
 0x135   :  { %v219_v62 = vadd.f32 1e-05, %v203_v18  ;;  %v807_v46 = vpop.eup %806  ;;  %v191_v48 = vpop.xlane.xlu1 %190  ;;  %v247_v50 = vmul.f32 %v805_v38, %v978_v37 }
 0x136   :  { %v170_v49 = vpop.xlane.xlu0 %169  ;;  %v1210_v3 = vpop.eup %808  ;;  %832 = vrsqrt.f32 %v226_v40  ;;  %v211_v7 = vmul.f32 0.015625, %v191_v48  ;;  %v420_v60 = vmul.f32 %v404_v12, %v292_v24  ;;  %v277_v44 = vmul.f32 %v1191_v28, %v254_v43 }
 0x137   :  { %v204_v59 = vmul.f32 0.015625, %v170_v49  ;;  %v811_v27 = vpop.eup %810  ;;  %834 = vrsqrt.f32 %v219_v62  ;;  %v270_v53 = vmul.f32 %v1191_v28, %v247_v50 }
 0x138   :  { %v813_v57 = vpop.eup %812  ;;  %v227_v37 = vadd.f32 1e-05, %v211_v7  ;;  %716 = vmatprep.mubr.msk.f32.mxu0 %vm52_vm0, %v420_v60  ;;  %v255_v8 = vmul.f32 %v811_v27, %v986_v45  ;;  %v300_v15 = vadd.f32 %v1197_v6, %v277_v44  ;;  %836 = vrcp.f32 %v363_v2 }
 0x139   :  { %v220_v63 = vadd.f32 1e-05, %v204_v59  ;;  %v815_v58 = vpop.eup %814  ;;  %v194_v5 = vpop.xlane.xlu1 %193  ;;  %v293_v12 = vadd.f32 %v1197_v6, %v270_v53  ;;  %v248_v18 = vmul.f32 %v813_v57, %v994_v54  ;;  %v407_v57 = vmul.f32 %v1186_v39, %v1121_v9 }
 0x13a   :  { %v173_v13 = vpop.xlane.xlu0 %172  ;;  %v1220_v16 = vpop.eup %816  ;;  %838 = vrsqrt.f32 %v227_v37  ;;  %v212_v19 = vmul.f32 0.015625, %v194_v5  ;;  %v278_v36 = vmul.f32 %v1191_v28, %v255_v8  ;;  %v428_v14 = vmul.f32 %v412_v32, %v300_v15 }
 0x13b   :  { %v205_v52 = vmul.f32 0.015625, %v173_v13  ;;  %v819_v38 = vpop.eup %818  ;;  %840 = vrsqrt.f32 %v220_v63  ;;  %v421_v45 = vmul.f32 %v405_v26, %v293_v12  ;;  %v271_v40 = vmul.f32 %v1191_v28, %v248_v18 }
 0x13c   :  { %v821_v62 = vpop.eup %820  ;;  %v228_v24 = vadd.f32 1e-05, %v212_v19  ;;  %v301_v48 = vadd.f32 %v1197_v6, %v278_v36  ;;  %v256_v54 = vmul.f32 %v819_v38, %v996_v55  ;;  %728 = vmatprep.mubr.msk.f32.mxu1 %vm52_vm0, %v428_v14  ;;  %842 = vrcp.f32 %v370_v31 }
 0x13d   :  { %v221_v43 = vadd.f32 1e-05, %v205_v52  ;;  %v823_v49 = vpop.eup %822  ;;  %717 = vmatmul.mubr.msk.f32.vlgmr.msra.gmra.mxu0 %vm52_vm0, %v421_v45  ;;  %v197_v50 = vpop.xlane.xlu1 %196  ;;  %v294_v2 = vadd.f32 %v1197_v6, %v271_v40  ;;  %v249_v26 = vmul.f32 %v821_v62, %v1005_v0  ;;  %v371_v32 = vadd.f32 1.0, %v807_v46 }
 0x13e   :  { %v825_v7 = vpop.eup %824  ;;  %844 = vrsqrt.f32 %v228_v24  ;;  %v213_v59 = vmul.f32 0.015625, %v197_v50  ;;  %v429_v60 = vmul.f32 %v413_v51, %v301_v48  ;;  %v279_v27 = vmul.f32 %v1191_v28, %v256_v54 }
 0x13f   :  { %v827_v53 = vpop.eup %826  ;;  %846 = vrsqrt.f32 %v221_v43  ;;  %v422_v55 = vmul.f32 %v1204_v20, %v294_v2  ;;  %v272_v44 = vmul.f32 %v1191_v28, %v249_v26  ;;  %v415_v39 = vmul.f32 %v815_v58, %v1141_v33 }
 0x140   :  { %v829_v37 = vpop.eup %828  ;;  %v229_v63 = vadd.f32 1e-05, %v213_v59  ;;  %729 = vmatmul.mubr.msk.f32.vlgmr.msra.gmra.mxu1 %vm52_vm0, %v429_v60  ;;  %v302_v0 = vadd.f32 %v1197_v6, %v279_v27  ;;  %v257_v46 = vmul.f32 %v827_v53, %v1008_v1  ;;  %848 = vrcp.f32 %v371_v32 }
 0x141   :  { %719 = vmatprep.mubr.msk.f32.mxu0 %vm52_vm0, %v422_v55  ;;  %v295_v51 = vadd.f32 %v1197_v6, %v272_v44  ;;  %v250_v8 = vmul.f32 %v829_v37, %v1017_v10  ;;  %v831_v20 = vpop.eup %830  ;;  %v408_v1 = vmul.f32 %v1210_v3, %v1135_v30  ;;  %v416_v36 = vmul.f32 %v823_v49, %v1153_v41 }
 0x142   :  { %850 = vrsqrt.f32 %v229_v63  ;;  %v430_v31 = vmul.f32 %v414_v56, %v302_v0  ;;  %v280_v9 = vmul.f32 %v1191_v28, %v257_v46  ;;  %v409_v45 = vmul.f32 %v1220_v16, %v1146_v34 }
 0x143   :  { %v833_v5 = vpop.eup %832  ;;  %v423_v13 = vmul.f32 %v407_v57, %v295_v51  ;;  %v273_v12 = vmul.f32 %v1191_v28, %v250_v8  ;;  %v417_v48 = vmul.f32 %v831_v20, %v1165_v29  ;;  %v410_v49 = vmul.f32 %v825_v7, %v1158_v42 }
 0x144   :  { %v835_v15 = vpop.eup %834  ;;  %731 = vmatprep.mubr.msk.f32.mxu1 %vm52_vm0, %v430_v31  ;;  %v303_v10 = vadd.f32 %v1197_v6, %v280_v9  ;;  %v258_v18 = vmul.f32 %v833_v5, %v1020_v11 }
 0x145   :  { %720 = vmatmul.mubr.msk.f32.gmra.mxu0 %vm52_vm0, %v423_v13  ;;  %v296_v56 = vadd.f32 %v1197_v6, %v273_v12  ;;  %v251_v33 = vmul.f32 %v835_v15, %v1029_v23  ;;  %v837_v58 = vpop.eup %836 }
 0x146   :  { %v431_v19 = vmul.f32 %v415_v39, %v303_v10  ;;  %v281_v52 = vmul.f32 %v1191_v28, %v258_v18  ;;  %v411_v53 = vmul.f32 %v837_v58, %v1171_v61 }
 0x147   :  { %v839_v30 = vpop.eup %838  ;;  %v424_v3 = vmul.f32 %v408_v1, %v296_v56  ;;  %v274_v38 = vmul.f32 %v1191_v28, %v251_v33 }
 0x148   :  { %v841_v11 = vpop.eup %840  ;;  %732 = vmatmul.mubr.msk.f32.gmra.mxu1 %vm52_vm0, %v431_v19  ;;  %v304_v14 = vadd.f32 %v1197_v6, %v281_v52  ;;  %v259_v23 = vmul.f32 %v839_v30, %v1032_v17 }
 0x149   :  { %722 = vmatprep.mubr.msk.f32.mxu0 %vm52_vm0, %v424_v3  ;;  %v297_v40 = vadd.f32 %v1197_v6, %v274_v38  ;;  %v252_v41 = vmul.f32 %v841_v11, %v1041_v35  ;;  %v843_v62 = vpop.eup %842 }
 0x14a   :  { %v432_v24 = vmul.f32 %v416_v36, %v304_v14  ;;  %v282_v43 = vmul.f32 %v1191_v28, %v259_v23  ;;  %v418_v60 = vmul.f32 %v843_v62, %v1176_v4 }
 0x14b   :  { %v845_v34 = vpop.eup %844  ;;  %v425_v16 = vmul.f32 %v409_v45, %v297_v40  ;;  %v275_v54 = vmul.f32 %v1191_v28, %v252_v41 }
 0x14c   :  { %v847_v50 = vpop.eup %846  ;;  %734 = vmatprep.mubr.msk.f32.mxu1 %vm52_vm0, %v432_v24  ;;  %v305_v17 = vadd.f32 %v1197_v6, %v282_v43  ;;  %v260_v2 = vmul.f32 %v845_v34, %v1044_v21 }
 0x14d   :  { %723 = vmatmul.mubr.msk.f32.gmra.mxu0 %vm52_vm0, %v425_v16  ;;  %v298_v35 = vadd.f32 %v1197_v6, %v275_v54  ;;  %v253_v26 = vmul.f32 %v847_v50, %v1053_v47  ;;  %v849_v29 = vpop.eup %848 }
 0x14e   :  { %v433_v32 = vmul.f32 %v417_v48, %v305_v17  ;;  %v283_v59 = vmul.f32 %v1191_v28, %v260_v2  ;;  %v419_v4 = vmul.f32 %v849_v29, %v1183_v22 }
 0x14f   :  { %v851_v42 = vpop.eup %850  ;;  %v426_v7 = vmul.f32 %v410_v49, %v298_v35  ;;  %v276_v27 = vmul.f32 %v1191_v28, %v253_v26 }
 0x150   :  { %735 = vmatmul.mubr.msk.f32.gmra.mxu1 %vm52_vm0, %v433_v32  ;;  %v306_v21 = vadd.f32 %v1197_v6, %v283_v59  ;;  %v261_v55 = vmul.f32 %v851_v42, %v1056_v25 }
 0x151   :  { %725 = vmatprep.mubr.msk.f32.mxu0 %vm52_vm0, %v426_v7  ;;  %v299_v47 = vadd.f32 %v1197_v6, %v276_v27 }
 0x152   :  { %v434_v44 = vmul.f32 %v418_v60, %v306_v21  ;;  %v284_v57 = vmul.f32 %v1191_v28, %v261_v55 }
 0x153   :  { %v427_v37 = vmul.f32 %v411_v53, %v299_v47 }
 0x154   :  { %737 = vmatprep.mubr.msk.f32.mxu1 %vm52_vm0, %v434_v44  ;;  %v307_v61 = vadd.f32 %v1197_v6, %v284_v57 }
 0x155   :  { %726 = vmatmul.mubr.msk.f32.gmra.mxu0 %vm52_vm0, %v427_v37 }
 0x156   :  { %v435_v63 = vmul.f32 %v419_v4, %v307_v61 }
 0x158   :  { %738 = vmatmul.mubr.msk.f32.gmra.mxu1 %vm52_vm0, %v435_v63 }
 0x1fd   :  { %v718_v25 = vpop.f32.mrf.mxu0 }
 0x1fe   :  { %639 = vst.msk [vmem:[%s1357_s5 + $0x8] sm:$0xff] %vm637_vm1, %v718_v25 }
 0x1ff   :  { %v558_v28 = vpop.f32.mrf.mxu0 }
 0x200   :  { %638 = vst.msk [vmem:[%s1357_s5] sm:$0xff] %vm637_vm1, %v558_v28  ;;  %v730_v22 = vpop.f32.mrf.mxu1 }
 0x201   :  { %647 = vst.msk [vmem:[%s1357_s5 + $0x48] sm:$0xff] %vm637_vm1, %v730_v22 }
 0x202   :  { %v598_v6 = vpop.f32.mrf.mxu1 }
 0x203   :  { %646 = vst.msk [vmem:[%s1357_s5 + $0x40] sm:$0xff] %vm637_vm1, %v598_v6 }
 0x205   :  { %v721_v0 = vpop.f32.mrf.mxu0 }
 0x206   :  { %641 = vst.msk [vmem:[%s1357_s5 + $0x18] sm:$0xff] %vm637_vm1, %v721_v0 }
 0x207   :  { %v568_v46 = vpop.f32.mrf.mxu0 }
 0x208   :  { %640 = vst.msk [vmem:[%s1357_s5 + $0x10] sm:$0xff] %vm637_vm1, %v568_v46  ;;  %v733_v51 = vpop.f32.mrf.mxu1 }
 0x209   :  { %649 = vst.msk [vmem:[%s1357_s5 + $0x58] sm:$0xff] %vm637_vm1, %v733_v51 }
 0x20a   :  { %v608_v8 = vpop.f32.mrf.mxu1 }
 0x20b   :  { %648 = vst.msk [vmem:[%s1357_s5 + $0x50] sm:$0xff] %vm637_vm1, %v608_v8 }
 0x20d   :  { %v724_v20 = vpop.f32.mrf.mxu0 }
 0x20e   :  { %643 = vst.msk [vmem:[%s1357_s5 + $0x28] sm:$0xff] %vm637_vm1, %v724_v20 }
 0x20f   :  { %v578_v31 = vpop.f32.mrf.mxu0 }
 0x210   :  { %642 = vst.msk [vmem:[%s1357_s5 + $0x20] sm:$0xff] %vm637_vm1, %v578_v31  ;;  %v736_v9 = vpop.f32.mrf.mxu1 }
 0x211   :  { %651 = vst.msk [vmem:[%s1357_s5 + $0x68] sm:$0xff] %vm637_vm1, %v736_v9 }
 0x212   :  { %v618_v39 = vpop.f32.mrf.mxu1 }
 0x213   :  { %650 = vst.msk [vmem:[%s1357_s5 + $0x60] sm:$0xff] %vm637_vm1, %v618_v39 }
 0x215   :  { %v727_v5 = vpop.f32.mrf.mxu0 }
 0x216   :  { %645 = vst.msk [vmem:[%s1357_s5 + $0x38] sm:$0xff] %vm637_vm1, %v727_v5 }
 0x217   :  { %v588_v13 = vpop.f32.mrf.mxu0 }
 0x218   :  { %644 = vst.msk [vmem:[%s1357_s5 + $0x30] sm:$0xff] %vm637_vm1, %v588_v13  ;;  %v739_v12 = vpop.f32.mrf.mxu1 }
 0x219   :  { %653 = vst.msk [vmem:[%s1357_s5 + $0x78] sm:$0xff] %vm637_vm1, %v739_v12 }
 0x21a   :  { %v628_v1 = vpop.f32.mrf.mxu1 }
 0x21b   :  { %652 = vst.msk [vmem:[%s1357_s5 + $0x70] sm:$0xff] %vm637_vm1, %v628_v1 }

// kernel: convbnssm_forward.25
= control target key start
LH: loop header
LB: loop body
LE: loop exit
PB: predicated region body
PF: predicated region fallthrough
CT: control target
= control target key end

     0   :  { %s670_s0 = inlined_call_operand.vmem [shape: f32[128,96], index: 0, kind: input, shape index: {}]   ;;  %s671_s1 = inlined_call_operand.vmem [shape: f32[96,32], index: 1, kind: input, shape index: {}]   ;;  %s672_s2 = inlined_call_operand.vmem [shape: f32[1,32], index: 2, kind: input, shape index: {}]   ;;  %s673_s3 = inlined_call_operand.vmem [shape: f32[128,32], index: 3, kind: input, shape index: {}]   ;;  %s674_s4 = inlined_call_operand.hbm [shape: f32[128,32], index: 4, kind: output, shape index: {}]  }
   0x1   :  { %v45_v0 = vld [vmem:[%s671_s1 + $0x58] sm:$0xff]  ;;  %v44_v1 = vld [vmem:[%s671_s1 + $0x50] sm:$0xff]  ;;  %v43_v2 = vld [vmem:[%s671_s1 + $0x48] sm:$0xff] }
   0x2   :  { %357 = vmatprep.subr.mxu0 %v45_v0  ;;  %405 = vmatprep.subr.mxu1 %v45_v0  ;;  %v42_v3 = vld [vmem:[%s671_s1 + $0x40] sm:$0xff]  ;;  %v41_v4 = vld [vmem:[%s671_s1 + $0x38] sm:$0xff]  ;;  %v40_v5 = vld [vmem:[%s671_s1 + $0x30] sm:$0xff] }
   0x3   :  { %358 = vmatpush3.msra.mxu0 %v45_v0  ;;  %417 = vmatpush3.msra.mxu1 %v45_v0 }
   0x4   :  { %359 = vmatprep.subr.mxu0 %v44_v1  ;;  %406 = vmatprep.subr.mxu1 %v44_v1 }
   0x5   :  { %360 = vmatpush3.msra.mxu0 %v44_v1  ;;  %418 = vmatpush3.msra.mxu1 %v44_v1 }
   0x6   :  { %361 = vmatprep.subr.mxu0 %v43_v2  ;;  %407 = vmatprep.subr.mxu1 %v43_v2 }
   0x7   :  { %362 = vmatpush3.msra.mxu0 %v43_v2  ;;  %419 = vmatpush3.msra.mxu1 %v43_v2 }
   0x8   :  { %363 = vmatprep.subr.mxu0 %v42_v3  ;;  %408 = vmatprep.subr.mxu1 %v42_v3 }
   0x9   :  { %364 = vmatpush3.msra.mxu0 %v42_v3  ;;  %420 = vmatpush3.msra.mxu1 %v42_v3 }
   0xa   :  { %365 = vmatprep.subr.mxu0 %v41_v4  ;;  %409 = vmatprep.subr.mxu1 %v41_v4 }
   0xb   :  { %9 = vsyncpa [#allocation3], 0  ;;  %366 = vmatpush3.msra.mxu0 %v41_v4  ;;  %421 = vmatpush3.msra.mxu1 %v41_v4  ;;  %v39_v6 = vld [vmem:[%s671_s1 + $0x28] sm:$0xff]  ;;  %v38_v7 = vld [vmem:[%s671_s1 + $0x20] sm:$0xff]  ;;  %vm53_vm0 = vcmask 785408   ;;  %vm279_vm1 = vcmask 261120  }
   0xc   :  { %367 = vmatprep.subr.mxu0 %v40_v5  ;;  %410 = vmatprep.subr.mxu1 %v40_v5  ;;  %v37_v8 = vld [vmem:[%s671_s1 + $0x18] sm:$0xff]  ;;  %v36_v9 = vld [vmem:[%s671_s1 + $0x10] sm:$0xff]  ;;  %v35_v10 = vld [vmem:[%s671_s1 + $0x8] sm:$0xff] }
   0xd   :  { %368 = vmatpush3.msra.mxu0 %v40_v5  ;;  %422 = vmatpush3.msra.mxu1 %v40_v5  ;;  %v34_v11 = vld [vmem:[%s671_s1] sm:$0xff]  ;;  %v19_v14 = vld [vmem:[%s670_s0 + $0x8] sm:$0xff]  ;;  %v20_v16 = vld [vmem:[%s670_s0 + $0x10] sm:$0xff]  ;;  %s454_s1 = smov [#allocation2]  }
   0xe   :  { %369 = vmatprep.subr.mxu0 %v39_v6  ;;  %411 = vmatprep.subr.mxu1 %v39_v6  ;;  %v18_v12 = vld [vmem:[%s670_s0] sm:$0xff]  ;;  %v27_v15 = vld [vmem:[%s670_s0 + $0x48] sm:$0xff]  ;;  %v28_v17 = vld [vmem:[%s670_s0 + $0x50] sm:$0xff]  ;;  %s301_s19 = sshll.u32 %s454_s1, 4  ;;  %s302_s19 = int_to_ptr.vmem [resolvable:$true] %s301_s19 }
   0xf   :  { %370 = vmatpush3.msra.mxu0 %v39_v6  ;;  %423 = vmatpush3.msra.mxu1 %v39_v6  ;;  %v26_v13 = vld [vmem:[%s670_s0 + $0x40] sm:$0xff]  ;;  %v21_v18 = vld [vmem:[%s670_s0 + $0x18] sm:$0xff]  ;;  %v23_v22 = vld [vmem:[%s670_s0 + $0x28] sm:$0xff]  ;;  %p437_p1 = scmp.lt.s32.totalorder %s302_s19, %s302_s19 }
  0x10   :  { %371 = vmatprep.subr.mxu0 %v38_v7  ;;  %412 = vmatprep.subr.mxu1 %v38_v7  ;;  %v29_v19 = vld [vmem:[%s670_s0 + $0x58] sm:$0xff]  ;;  %v22_v20 = vld [vmem:[%s670_s0 + $0x20] sm:$0xff]  ;;  %v31_v23 = vld [vmem:[%s670_s0 + $0x68] sm:$0xff] }
  0x11   :  { %372 = vmatpush3.msra.mxu0 %v38_v7  ;;  %424 = vmatpush3.msra.mxu1 %v38_v7  ;;  %v30_v21 = vld [vmem:[%s670_s0 + $0x60] sm:$0xff]  ;;  %v24_v24 = vld [vmem:[%s670_s0 + $0x30] sm:$0xff]  ;;  %v25_v26 = vld [vmem:[%s670_s0 + $0x38] sm:$0xff] }
  0x12   :  { %373 = vmatprep.subr.mxu0 %v37_v8  ;;  %413 = vmatprep.subr.mxu1 %v37_v8  ;;  %v32_v25 = vld [vmem:[%s670_s0 + $0x70] sm:$0xff]  ;;  %v33_v27 = vld [vmem:[%s670_s0 + $0x78] sm:$0xff]  ;;  %v585_v28 = vld [vmem:[%s672_s2] ss:$0 sm:$0xff] }
  0x13   :  { %374 = vmatpush3.msra.mxu0 %v37_v8  ;;  %425 = vmatpush3.msra.mxu1 %v37_v8  ;;  %v248_v30 = vld [vmem:[%s673_s3 + $0x8] sm:$0xff]  ;;  %v247_v36 = vld [vmem:[%s673_s3] sm:$0xff]  ;;  %v250_v44 = vld [vmem:[%s673_s3 + $0x18] sm:$0xff] }
  0x14   :  { %375 = vmatprep.subr.mxu0 %v36_v9  ;;  %414 = vmatprep.subr.mxu1 %v36_v9  ;;  %v256_v32 = vld [vmem:[%s673_s3 + $0x48] sm:$0xff]  ;;  %v255_v38 = vld [vmem:[%s673_s3 + $0x40] sm:$0xff]  ;;  %v258_v46 = vld [vmem:[%s673_s3 + $0x58] sm:$0xff] }
  0x15   :  { %376 = vmatpush3.msra.mxu0 %v36_v9  ;;  %426 = vmatpush3.msra.mxu1 %v36_v9  ;;  %v249_v52 = vld [vmem:[%s673_s3 + $0x10] sm:$0xff]  ;;  %v252_v60 = vld [vmem:[%s673_s3 + $0x28] sm:$0xff]  ;;  %v251_v4 = vld [vmem:[%s673_s3 + $0x20] sm:$0xff] }
  0x16   :  { %377 = vmatprep.subr.mxu0 %v35_v10  ;;  %415 = vmatprep.subr.mxu1 %v35_v10  ;;  %v257_v54 = vld [vmem:[%s673_s3 + $0x50] sm:$0xff]  ;;  %v260_v62 = vld [vmem:[%s673_s3 + $0x68] sm:$0xff]  ;;  %v259_v6 = vld [vmem:[%s673_s3 + $0x60] sm:$0xff] }
  0x17   :  { %378 = vmatpush3.msra.mxu0 %v35_v10  ;;  %427 = vmatpush3.msra.mxu1 %v35_v10 }
  0x18   :  { %379 = vmatprep.subr.mxu0 %v34_v11  ;;  %416 = vmatprep.subr.mxu1 %v34_v11 }
  0x19   :  { %380 = vmatpush3.msra.mxu0 %v34_v11  ;;  %428 = vmatpush3.msra.mxu1 %v34_v11 }
  0x1a   :  { %381 = vmatprep.mubr.msk.f32.mxu0 %vm53_vm0, %v18_v12  ;;  %393 = vmatprep.mubr.msk.f32.mxu1 %vm53_vm0, %v26_v13  ;;  %v254_v12 = vld [vmem:[%s673_s3 + $0x38] sm:$0xff] }
  0x1b   :  { %382 = vmatmul.mubr.msk.f32.vlgmr.msra.gmra.mxu0 %vm53_vm0, %v19_v14  ;;  %394 = vmatmul.mubr.msk.f32.vlgmr.msra.gmra.mxu1 %vm53_vm0, %v27_v15  ;;  %v262_v14 = vld [vmem:[%s673_s3 + $0x78] sm:$0xff] }
  0x1c   :  { %384 = vmatprep.mubr.msk.f32.mxu0 %vm53_vm0, %v20_v16  ;;  %396 = vmatprep.mubr.msk.f32.mxu1 %vm53_vm0, %v28_v17 }
  0x1f   :  { %385 = vmatmul.mubr.msk.f32.gmra.mxu0 %vm53_vm0, %v21_v18  ;;  %397 = vmatmul.mubr.msk.f32.gmra.mxu1 %vm53_vm0, %v29_v19 }
  0x20   :  { %387 = vmatprep.mubr.msk.f32.mxu0 %vm53_vm0, %v22_v20  ;;  %399 = vmatprep.mubr.msk.f32.mxu1 %vm53_vm0, %v30_v21  ;;  %v253_v20 = vld [vmem:[%s673_s3 + $0x30] sm:$0xff] }
  0x23   :  { %388 = vmatmul.mubr.msk.f32.gmra.mxu0 %vm53_vm0, %v23_v22  ;;  %400 = vmatmul.mubr.msk.f32.gmra.mxu1 %vm53_vm0, %v31_v23  ;;  %v261_v22 = vld [vmem:[%s673_s3 + $0x70] sm:$0xff]  ;;  %s432_s3 = scalar_lea.vmem %s302_s19, 2048 }
  0x24   :  { %390 = vmatprep.mubr.msk.f32.mxu0 %vm53_vm0, %v24_v24  ;;  %402 = vmatprep.mubr.msk.f32.mxu1 %vm53_vm0, %v32_v25  ;;  %p433_p0 = scmp.ne.s32.totalorder %s302_s19, %s432_s3  ;;  %p438_p2 = scmp.lt.s32.totalorder %s432_s3, %s432_s3 }
  0x26   :  { %p439_p3 = por %p438_p2, %p437_p1 }
  0x27   :  { %391 = vmatmul.mubr.msk.f32.gmra.mxu0 %vm53_vm0, %v25_v26  ;;  %403 = vmatmul.mubr.msk.f32.gmra.mxu1 %vm53_vm0, %v33_v27 }
  0x28   :  { %p440_p4 = pnand %p439_p3, %p433_p0 }
  0xdb   :  { %v383_v29 = vpop.f32.mrf.mxu0  ;;  %v395_v31 = vpop.f32.mrf.mxu1 }
  0xdc   :  { %v174_v33 = vadd.f32 %v383_v29, %v585_v28  ;;  %v214_v34 = vadd.f32 %v395_v31, %v585_v28 }
  0xdd   :  { %v168_v35 = vpop.f32.mrf.mxu0  ;;  %v208_v37 = vpop.f32.mrf.mxu1 }
  0xde   :  { %v264_v39 = vadd.f32 %v248_v30, %v174_v33  ;;  %v272_v40 = vadd.f32 %v256_v32, %v214_v34  ;;  %v169_v41 = vadd.f32 %v585_v28, %v168_v35  ;;  %v209_v42 = vadd.f32 %v585_v28, %v208_v37 }
  0xdf   :  { %v386_v43 = vpop.f32.mrf.mxu0  ;;  %v398_v45 = vpop.f32.mrf.mxu1 }
  0xe0   :  { %281 = vst.msk [vmem:[#allocation2 + $0x8] sm:$0xff] %vm279_vm1, %v264_v39  ;;  %289 = vst.msk [vmem:[#allocation2 + $0x48] sm:$0xff] %vm279_vm1, %v272_v40  ;;  %v263_v47 = vadd.f32 %v247_v36, %v169_v41  ;;  %v271_v48 = vadd.f32 %v255_v38, %v209_v42  ;;  %v184_v49 = vadd.f32 %v386_v43, %v585_v28 }
  0xe1   :  { %v224_v50 = vadd.f32 %v398_v45, %v585_v28  ;;  %v178_v51 = vpop.f32.mrf.mxu0  ;;  %v218_v53 = vpop.f32.mrf.mxu1 }
  0xe2   :  { %280 = vst.msk [vmem:[#allocation2] sm:$0xff] %vm279_vm1, %v263_v47  ;;  %288 = vst.msk [vmem:[#allocation2 + $0x40] sm:$0xff] %vm279_vm1, %v271_v48  ;;  %v266_v55 = vadd.f32 %v250_v44, %v184_v49  ;;  %v179_v57 = vadd.f32 %v585_v28, %v178_v51  ;;  %v219_v58 = vadd.f32 %v585_v28, %v218_v53 }
  0xe3   :  { %v274_v56 = vadd.f32 %v258_v46, %v224_v50  ;;  %v389_v59 = vpop.f32.mrf.mxu0  ;;  %v401_v61 = vpop.f32.mrf.mxu1 }
  0xe4   :  { %283 = vst.msk [vmem:[#allocation2 + $0x18] sm:$0xff] %vm279_vm1, %v266_v55  ;;  %v265_v63 = vadd.f32 %v249_v52, %v179_v57  ;;  %v273_v0 = vadd.f32 %v257_v54, %v219_v58  ;;  %v194_v1 = vadd.f32 %v389_v59, %v585_v28  ;;  %v234_v2 = vadd.f32 %v401_v61, %v585_v28 }
  0xe5   :  { %291 = vst.msk [vmem:[#allocation2 + $0x58] sm:$0xff] %vm279_vm1, %v274_v56  ;;  %v188_v3 = vpop.f32.mrf.mxu0  ;;  %v228_v5 = vpop.f32.mrf.mxu1 }
  0xe6   :  { %282 = vst.msk [vmem:[#allocation2 + $0x10] sm:$0xff] %vm279_vm1, %v265_v63  ;;  %290 = vst.msk [vmem:[#allocation2 + $0x50] sm:$0xff] %vm279_vm1, %v273_v0  ;;  %v268_v7 = vadd.f32 %v252_v60, %v194_v1  ;;  %v276_v8 = vadd.f32 %v260_v62, %v234_v2  ;;  %v189_v9 = vadd.f32 %v585_v28, %v188_v3 }
  0xe7   :  { %v229_v10 = vadd.f32 %v585_v28, %v228_v5  ;;  %v392_v11 = vpop.f32.mrf.mxu0  ;;  %v404_v13 = vpop.f32.mrf.mxu1 }
  0xe8   :  { %285 = vst.msk [vmem:[#allocation2 + $0x28] sm:$0xff] %vm279_vm1, %v268_v7  ;;  %293 = vst.msk [vmem:[#allocation2 + $0x68] sm:$0xff] %vm279_vm1, %v276_v8  ;;  %v267_v15 = vadd.f32 %v251_v4, %v189_v9  ;;  %v204_v17 = vadd.f32 %v392_v11, %v585_v28  ;;  %v244_v18 = vadd.f32 %v404_v13, %v585_v28 }
  0xe9   :  { %v275_v16 = vadd.f32 %v259_v6, %v229_v10  ;;  %v198_v19 = vpop.f32.mrf.mxu0  ;;  %v238_v21 = vpop.f32.mrf.mxu1 }
  0xea   :  { %284 = vst.msk [vmem:[#allocation2 + $0x20] sm:$0xff] %vm279_vm1, %v267_v15  ;;  %v270_v23 = vadd.f32 %v254_v12, %v204_v17  ;;  %v278_v24 = vadd.f32 %v262_v14, %v244_v18  ;;  %v199_v25 = vadd.f32 %v585_v28, %v198_v19  ;;  %v239_v26 = vadd.f32 %v585_v28, %v238_v21 }
  0xeb   :  { %292 = vst.msk [vmem:[#allocation2 + $0x60] sm:$0xff] %vm279_vm1, %v275_v16 }
  0xec   :  { %287 = vst.msk [vmem:[#allocation2 + $0x38] sm:$0xff] %vm279_vm1, %v270_v23  ;;  %295 = vst.msk [vmem:[#allocation2 + $0x78] sm:$0xff] %vm279_vm1, %v278_v24  ;;  %v269_v27 = vadd.f32 %v253_v20, %v199_v25  ;;  %v277_v29 = vadd.f32 %v261_v22, %v239_v26 }
  0xee   :  { %286 = vst.msk [vmem:[#allocation2 + $0x30] sm:$0xff] %vm279_vm1, %v269_v27  ;;  %294 = vst.msk [vmem:[#allocation2 + $0x70] sm:$0xff] %vm279_vm1, %v277_v29 }
  0xef   :  { %443 = shalt.err (!%p440_p4)
}
  0xf0   :  { %s455_s23 = smov 128   ;;  %s456_s2 = smov 8  }
  0xf1   :  { %307 = dma.vmem_to_hbm [thread:$0]  %s302_s19, 2048, %s674_s4, [#allocation3], %s455_s23, %s455_s23, %s456_s2  }
  0xf2   :  { %452 = dma.done.wait [#allocation3], 2048  }
  0xf3   :  { %453 = vsyncadd [#allocation3], 4294965248 }
  0xf4   :  { %311 = vsyncpa [#allocation3], 1 }

// kernel: convbnssm_forward.14
= control target key start
LH: loop header
LB: loop body
LE: loop exit
PB: predicated region body
PF: predicated region fallthrough
CT: control target
= control target key end

     0   :  { %s6235_s21 = smov 0   ;;  %s6237_s22 = smov 0   ;;  %s8549_s0 = inlined_call_operand.vmem [shape: f32[2,8,64,64], index: 0, kind: input, shape index: {}]   ;;  %s8550_s1 = inlined_call_operand.vmem [shape: f32[8,64,34], index: 1, kind: input, shape index: {}]   ;;  %s8551_s2 = inlined_call_operand.vmem [shape: f32[8,2,64], index: 2, kind: input, shape index: {}]   ;;  %s8552_s3 = inlined_call_operand.vmem [shape: f32[8,1,64], index: 3, kind: input, shape index: {}]   ;;  %s8553_s4 = inlined_call_operand.vmem [shape: f32[8,16,64], index: 4, kind: input, shape index: {}]   ;;  %s8554_s5 = inlined_call_operand.vmem [shape: f32[8,1,64], index: 5, kind: input, shape index: {}]   ;;  %s8555_s6 = inlined_call_operand.vmem [shape: f32[2,8,64,64], index: 6, kind: output, shape index: {}]  }
   0x1   :  { %s6239_s23 = smov 0   ;;  %s6241_s24 = smov 0  }
   0x2   :  { %s6243_s25 = smov 0  }
   0x3 LB: > { %s25_s26 = sadd.s32 1, %s6177_s23  ;;  %s28_s27 = sadd.s32 1, %s6181_s24  ;;  %s6185_s25 = sphi %s6243_s25, %s16_s25   ;;  %s6181_s24 = sphi %s6241_s24, %s8936_s24   ;;  %s6177_s23 = sphi %s6239_s23, %s8935_s23   ;;  %s6173_s22 = sphi %s6237_s22, %s8934_s22   ;;  %s6169_s21 = sphi %s6235_s21, %s8933_s21  }
   0x4   : > { %p26_p0 = scmp.ge.s32.totalorder %s25_s26, 8  ;;  %p5667_p1 = scmp.ge.s32.totalorder %s6185_s25, 1 }
   0x5   : > { %p277_p2 = scmp.lt.s32.totalorder %s6185_s25, 17 }
   0x6   : > { %s8938_s26 = smov (%p26_p0, %s25_s26), 0  ;;  %s8940_s27 = smov (!%p26_p0, %s28_s27), %s6181_s24 }
   0x7   : > { %p278_p3 = pnand %p5667_p1, %p277_p2  ;;  %p30_p4 = scmp.ge.s32.totalorder %s8940_s27, 2 }
   0x9   : > { %s8942_s27 = smov (%p30_p4, %s8940_s27), 0  ;;  %281 = sbr.rel (%p278_p3) target bundleno = 1122 (0x462), region = 44 }
   0xe   : > { %p337_p5 = scmp.lt.s32.totalorder %s6169_s21, 7  ;;  %p335_p6 = scmp.lt.s32.totalorder %s6173_s22, 1  ;;  %vm389_vm0 = vcmask 523264   ;;  %vm552_vm1 = vcmask 1041408   ;;  %v753_v17 = vlaneseq  ;;  %vm527_vm2 = vcmask 15360  }
  0x10   : > { %s8944_s21 = smov (!%p337_p5, %s6169_s21), 7  ;;  %s8946_s22 = smov (!%p335_p6, %s6173_s22), 1  ;;  %v6332_v18 = vshrl.u32 %v753_v17, 7 }
  0x11   : > { %s5701_s28 = sshll.u32 %s8944_s21, 6  ;;  %s6275_s10 = scalar_lea.vmem %s8554_s5, %s8944_s21 }
  0x12   : > { %s348_s7 = scalar_lea.vmem %s8550_s1, %s5701_s28  ;;  %s5668_s11 = sshll.u32 %s8944_s21, 3  ;;  %v6335_v19 = vsub.s32 0, %v6332_v18  ;;  %v6341_v22 = vsub.s32 1, %v6332_v18  ;;  %v6356_v26 = vsub.s32 2, %v6332_v18  ;;  %v6372_v30 = vsub.s32 3, %v6332_v18 }
  0x13   : > { %v388_v0 = vld [vmem:[%s348_s7 + $0x38] sm:$0xff]  ;;  %v387_v1 = vld [vmem:[%s348_s7 + $0x30] sm:$0xff]  ;;  %v386_v2 = vld [vmem:[%s348_s7 + $0x28] sm:$0xff]  ;;  %s5669_s12 = sshll.u32 %s8946_s22, 6  ;;  %s5673_s22 = sshll.u32 %s8944_s21, 1  ;;  %v6388_v34 = vsub.s32 4, %v6332_v18 }
  0x14   : > { %5728 = vmatprep.subr.mxu0 %v388_v0  ;;  %s341_s13 = sadd.s32 %s5669_s12, %s5668_s11  ;;  %v385_v3 = vld [vmem:[%s348_s7 + $0x20] sm:$0xff]  ;;  %v384_v4 = vld [vmem:[%s348_s7 + $0x18] sm:$0xff]  ;;  %v383_v6 = vld [vmem:[%s348_s7 + $0x10] sm:$0xff]  ;;  %s352_s30 = scalar_lea.vmem %s8551_s2, %s5673_s22  ;;  %v6400_v37 = vsub.s32 5, %v6332_v18  ;;  %v6410_v39 = vsub.s32 6, %v6332_v18  ;;  %v6418_v41 = vsub.s32 7, %v6332_v18 }
  0x15   : > { %5729 = vmatpush3.msra.mxu0 %v388_v0  ;;  %s5670_s14 = sshll.u32 %s341_s13, 3  ;;  %v382_v7 = vld [vmem:[%s348_s7 + $0x8] sm:$0xff]  ;;  %v381_v8 = vld [vmem:[%s348_s7] sm:$0xff]  ;;  %s6731_s9 = scalar_lea.vmem %s8552_s3, %s8944_s21 }
  0x16   : > { %5730 = vmatprep.subr.mxu0 %v387_v1  ;;  %s6281_s17 = scalar_lea.vmem %s8549_s0, %s5670_s14  ;;  %s6286_s20 = scalar_lea.vmem %s8555_s6, %s5670_s14  ;;  %v519_v16 = vld [vmem:[%s352_s30] sm:$0x3] }
  0x17   : > { %5731 = vmatpush3.msra.mxu0 %v387_v1  ;;  %v6289_v5 = vld [vmem:[%s6281_s17] sm:$0xff]  ;;  %v6294_v9 = vld [vmem:[%s6281_s17 + $0x8] sm:$0xff]  ;;  %v6297_v10 = vld [vmem:[%s6281_s17 + $0x10] sm:$0xff]  ;;  %5756 = vmatprep.subr.msk.mxu1 %vm552_vm1, %v519_v16  ;;  %s5702_s11 = sshll.u32 %s8944_s21, 4  ;;  %s6195_s14 = smov 0  }
  0x18   : > { %5732 = vmatprep.subr.mxu0 %v386_v2  ;;  %8696 = vst [vmem:[#allocation5_spill] sm:$0xff] %v6289_v5  ;;  %5744 = vmatprep.mubr.msk.f32.mxu0 %vm389_vm0, %v6289_v5  ;;  %8697 = vst [vmem:[#allocation6_spill] sm:$0xff] %v6294_v9  ;;  %v6304_v11 = vld [vmem:[%s6281_s17 + $0x18] sm:$0xff]  ;;  %v6307_v12 = vld [vmem:[%s6281_s17 + $0x20] sm:$0xff]  ;;  %s360_s13 = scalar_lea.vmem %s8553_s4, %s5702_s11 }
  0x19   : > { %5733 = vmatpush3.msra.mxu0 %v386_v2  ;;  %8698 = vst [vmem:[#allocation7_spill] sm:$0xff] %v6297_v10  ;;  %8699 = vst [vmem:[#allocation8_spill] sm:$0xff] %v6304_v11  ;;  %v6314_v13 = vld [vmem:[%s6281_s17 + $0x28] sm:$0xff]  ;;  %v6317_v14 = vld [vmem:[%s6281_s17 + $0x30] sm:$0xff]  ;;  %5757 = vmatpush3.msk.msra.mxu1 %vm552_vm1, %v519_v16 }
  0x1a   : > { %5734 = vmatprep.subr.mxu0 %v385_v3  ;;  %8700 = vst [vmem:[#allocation9_spill] sm:$0xff] %v6307_v12  ;;  %8701 = vst [vmem:[#allocation10_spill] sm:$0xff] %v6314_v13  ;;  %v6324_v15 = vld [vmem:[%s6281_s17 + $0x38] sm:$0xff] }
  0x1b   : > { %5735 = vmatpush3.msra.mxu0 %v385_v3  ;;  %8702 = vst [vmem:[#allocation11_spill] sm:$0xff] %v6317_v14  ;;  %8703 = vst [vmem:[#allocation12_spill] sm:$0xff] %v6324_v15 }
  0x1c   : > { %5736 = vmatprep.subr.mxu0 %v384_v4 }
  0x1d   : > { %5737 = vmatpush3.msra.mxu0 %v384_v4 }
  0x1e   : > { %5738 = vmatprep.subr.mxu0 %v383_v6 }
  0x1f   : > { %5739 = vmatpush3.msra.mxu0 %v383_v6 }
  0x20   : > { %5740 = vmatprep.subr.mxu0 %v382_v7 }
  0x21   : > { %5741 = vmatpush3.msra.mxu0 %v382_v7 }
  0x22   : > { %5742 = vmatprep.subr.mxu0 %v381_v8 }
  0x23   : > { %5743 = vmatpush3.msra.mxu0 %v381_v8 }
  0x24   : > { %5745 = vmatmul.mubr.msk.f32.vlgmr.msra.gmra.mxu0 %vm389_vm0, %v6294_v9 }
  0x25   : > { %5747 = vmatprep.mubr.msk.f32.mxu0 %vm389_vm0, %v6297_v10 }
  0x28   : > { %5748 = vmatmul.mubr.msk.f32.gmra.mxu0 %vm389_vm0, %v6304_v11 }
  0x29   : > { %5750 = vmatprep.mubr.msk.f32.mxu0 %vm389_vm0, %v6307_v12 }
  0x2c   : > { %5751 = vmatmul.mubr.msk.f32.gmra.mxu0 %vm389_vm0, %v6314_v13 }
  0x2d   : > { %5753 = vmatprep.mubr.msk.f32.mxu0 %vm389_vm0, %v6317_v14 }
  0x30   : > { %5754 = vmatmul.mubr.msk.f32.gmra.mxu0 %vm389_vm0, %v6324_v15 }
  0xe4   : > { %v5746_v20 = vpop.f32.mrf.mxu0 }
  0xe5   : > { %v6338_v21 = vrot.slane %v5746_v20, %v6335_v19  ;;  %v6353_v25 = vrot.slane %v5746_v20, %v6341_v22  ;;  %v6369_v29 = vrot.slane %v5746_v20, %v6356_v26  ;;  %v6385_v33 = vrot.slane %v5746_v20, %v6372_v30 }
  0xe6   : > { %v6343_v23 = vpop.f32.mrf.mxu0  ;;  %v6397_v36 = vrot.slane %v5746_v20, %v6388_v34  ;;  %v6407_v38 = vrot.slane %v5746_v20, %v6400_v37  ;;  %v6415_v40 = vrot.slane %v5746_v20, %v6410_v39  ;;  %v6423_v42 = vrot.slane %v5746_v20, %v6418_v41 }
  0xe7   : > { %8704 = vst [vmem:[#allocation13_spill] sm:$0xff] %v6338_v21  ;;  %2487 = vbcast.lane.b32.xlu1 %v6338_v21, 266  ;;  %2483 = vbcast.lane.b32.xlu0 %v6338_v21, 258  ;;  %8705 = vst [vmem:[#allocation14_spill] sm:$0xff] %v6353_v25  ;;  %v6429_v43 = vrot.slane %v6343_v23, %v6341_v22  ;;  %v6433_v44 = vrot.slane %v6343_v23, %v6335_v19 }
  0xe8   : > { %5758 = vmatprep.mubr.msk.f32.mxu1 %vm527_vm2, %v6343_v23  ;;  %v6349_v24 = vpop.f32.mrf.mxu0  ;;  %8706 = vst [vmem:[#allocation15_spill] sm:$0xff] %v6369_v29  ;;  %8707 = vst [vmem:[#allocation16_spill] sm:$0xff] %v6385_v33  ;;  %v6441_v45 = vrot.slane %v6343_v23, %v6356_v26  ;;  %v6447_v46 = vrot.slane %v6343_v23, %v6372_v30  ;;  %v6453_v47 = vrot.slane %v6343_v23, %v6388_v34 }
  0xe9   : > { %5759 = vmatmul.mubr.msk.f32.vlgmr.msra.gmra.mxu1 %vm527_vm2, %v5746_v20  ;;  %8708 = vst [vmem:[#allocation17_spill] sm:$0xff] %v6397_v36  ;;  %8709 = vst [vmem:[#allocation18_spill] sm:$0xff] %v6407_v38  ;;  %v6459_v48 = vrot.slane %v6343_v23, %v6400_v37  ;;  %v6465_v49 = vrot.slane %v6343_v23, %v6410_v39  ;;  %v6471_v50 = vrot.slane %v6343_v23, %v6418_v41 }
  0xea   : > { %v6358_v27 = vpop.f32.mrf.mxu0  ;;  %8710 = vst [vmem:[#allocation19_spill] sm:$0xff] %v6415_v40  ;;  %8711 = vst [vmem:[#allocation20_spill] sm:$0xff] %v6423_v42  ;;  %v6477_v51 = vrot.slane %v6349_v24, %v6335_v19  ;;  %v6483_v52 = vrot.slane %v6349_v24, %v6341_v22  ;;  %v6489_v53 = vrot.slane %v6349_v24, %v6356_v26 }
  0xeb   : > { %2499 = vbcast.lane.b32.xlu1 %v6353_v25, 266  ;;  %2495 = vbcast.lane.b32.xlu0 %v6353_v25, 258  ;;  %8712 = vst [vmem:[#allocation21_spill] sm:$0xff] %v6429_v43  ;;  %8713 = vst [vmem:[#allocation22_spill] sm:$0xff] %v6433_v44  ;;  %v6495_v54 = vrot.slane %v6349_v24, %v6372_v30  ;;  %v6501_v55 = vrot.slane %v6349_v24, %v6388_v34 }
  0xec   : > { %5761 = vmatprep.mubr.msk.f32.mxu1 %vm527_vm2, %v6358_v27  ;;  %v6364_v28 = vpop.f32.mrf.mxu0  ;;  %8714 = vst [vmem:[#allocation23_spill] sm:$0xff] %v6441_v45  ;;  %8715 = vst [vmem:[#allocation24_spill] sm:$0xff] %v6447_v46  ;;  %v6507_v56 = vrot.slane %v6349_v24, %v6400_v37  ;;  %v6513_v57 = vrot.slane %v6349_v24, %v6410_v39  ;;  %v6519_v58 = vrot.slane %v6349_v24, %v6418_v41 }
  0xed   : > { %5762 = vmatmul.mubr.msk.f32.gmra.mxu1 %vm527_vm2, %v6349_v24  ;;  %8716 = vst [vmem:[#allocation25_spill] sm:$0xff] %v6453_v47  ;;  %8717 = vst [vmem:[#allocation26_spill] sm:$0xff] %v6459_v48  ;;  %v6525_v59 = vrot.slane %v6358_v27, %v6335_v19  ;;  %v6531_v60 = vrot.slane %v6358_v27, %v6341_v22  ;;  %v6537_v61 = vrot.slane %v6358_v27, %v6356_v26 }
  0xee   : > { %v6374_v31 = vpop.f32.mrf.mxu0  ;;  %8718 = vst [vmem:[#allocation27_spill] sm:$0xff] %v6465_v49  ;;  %8719 = vst [vmem:[#allocation28_spill] sm:$0xff] %v6471_v50  ;;  %v6543_v62 = vrot.slane %v6358_v27, %v6372_v30  ;;  %v6549_v63 = vrot.slane %v6358_v27, %v6388_v34  ;;  %v6559_v2 = vrot.slane %v6358_v27, %v6400_v37 }
  0xef   : > { %2511 = vbcast.lane.b32.xlu1 %v6369_v29, 266  ;;  %2507 = vbcast.lane.b32.xlu0 %v6369_v29, 258  ;;  %8720 = vst [vmem:[#allocation29_spill] sm:$0xff] %v6477_v51  ;;  %8721 = vst [vmem:[#allocation30_spill] sm:$0xff] %v6483_v52  ;;  %v6569_v6 = vrot.slane %v6358_v27, %v6410_v39  ;;  %v6579_v16 = vrot.slane %v6358_v27, %v6418_v41 }
  0xf0   : > { %5764 = vmatprep.mubr.msk.f32.mxu1 %vm527_vm2, %v6374_v31  ;;  %v6380_v32 = vpop.f32.mrf.mxu0  ;;  %8722 = vst [vmem:[#allocation31_spill] sm:$0xff] %v6489_v53  ;;  %8723 = vst [vmem:[#allocation32_spill] sm:$0xff] %v6495_v54  ;;  %v6589_v23 = vrot.slane %v6364_v28, %v6335_v19  ;;  %v6599_v15 = vrot.slane %v6364_v28, %v6341_v22  ;;  %v6609_v12 = vrot.slane %v6364_v28, %v6356_v26 }
  0xf1   : > { %5765 = vmatmul.mubr.msk.f32.gmra.mxu1 %vm527_vm2, %v6364_v28  ;;  %8724 = vst [vmem:[#allocation33_spill] sm:$0xff] %v6501_v55  ;;  %8725 = vst [vmem:[#allocation34_spill] sm:$0xff] %v6507_v56  ;;  %v6761_v21 = vrot.slane %v6380_v32, %v6356_v26 }
  0xf2   : > { %v6390_v35 = vpop.f32.mrf.mxu0  ;;  %8726 = vst [vmem:[#allocation35_spill] sm:$0xff] %v6513_v57  ;;  %8727 = vst [vmem:[#allocation36_spill] sm:$0xff] %v6519_v58 }
  0xf3   : > { %2523 = vbcast.lane.b32.xlu1 %v6385_v33, 266  ;;  %2519 = vbcast.lane.b32.xlu0 %v6385_v33, 258  ;;  %8728 = vst [vmem:[#allocation37_spill] sm:$0xff] %v6525_v59  ;;  %8729 = vst [vmem:[#allocation38_spill] sm:$0xff] %v6531_v60 }
  0xf4   : > { %5767 = vmatprep.mubr.msk.f32.mxu1 %vm527_vm2, %v6390_v35  ;;  %8730 = vst [vmem:[#allocation39_spill] sm:$0xff] %v6537_v61  ;;  %8731 = vst [vmem:[#allocation40_spill] sm:$0xff] %v6543_v62 }
  0xf5   : > { %5768 = vmatmul.mubr.msk.f32.gmra.mxu1 %vm527_vm2, %v6380_v32  ;;  %8732 = vst [vmem:[#allocation41_spill] sm:$0xff] %v6549_v63  ;;  %8733 = vst [vmem:[#allocation42_spill] sm:$0xff] %v6559_v2 }
  0xf6   : > { %8734 = vst [vmem:[#allocation43_spill] sm:$0xff] %v6569_v6  ;;  %8735 = vst [vmem:[#allocation44_spill] sm:$0xff] %v6579_v16 }
  0xf7   : > { %2535 = vbcast.lane.b32.xlu1 %v6397_v36, 266  ;;  %2531 = vbcast.lane.b32.xlu0 %v6397_v36, 258  ;;  %8736 = vst [vmem:[#allocation45_spill] sm:$0xff] %v6589_v23  ;;  %8737 = vst [vmem:[#allocation46_spill] sm:$0xff] %v6599_v15 }
  0xf8   : > { %8738 = vst [vmem:[#allocation47_spill] sm:$0xff] %v6609_v12  ;;  %8768 = vst [vmem:[#allocation77_spill] sm:$0xff] %v6761_v21 }
  0xfb   : > { %2547 = vbcast.lane.b32.xlu1 %v6407_v38, 266  ;;  %2543 = vbcast.lane.b32.xlu0 %v6407_v38, 258 }
  0xff   : > { %2559 = vbcast.lane.b32.xlu1 %v6415_v40, 266  ;;  %2555 = vbcast.lane.b32.xlu0 %v6415_v40, 258 }
 0x103   : > { %2571 = vbcast.lane.b32.xlu1 %v6423_v42, 266  ;;  %2567 = vbcast.lane.b32.xlu0 %v6423_v42, 258  ;;  %v6746_v42 = vrot.slane %v6380_v32, %v6341_v22 }
 0x105   : > { %8765 = vst [vmem:[#allocation74_spill] sm:$0xff] %v6746_v42 }
 0x107   : > { %2399 = vbcast.lane.b32.xlu1 %v6429_v43, 258  ;;  %2387 = vbcast.lane.b32.xlu0 %v6433_v44, 258 }
 0x10b   : > { %2403 = vbcast.lane.b32.xlu1 %v6429_v43, 266  ;;  %2391 = vbcast.lane.b32.xlu0 %v6433_v44, 266 }
 0x10f   : > { %2415 = vbcast.lane.b32.xlu1 %v6441_v45, 266  ;;  %2411 = vbcast.lane.b32.xlu0 %v6441_v45, 258 }
 0x113   : > { %2427 = vbcast.lane.b32.xlu1 %v6447_v46, 266  ;;  %2423 = vbcast.lane.b32.xlu0 %v6447_v46, 258 }
 0x117   : > { %2439 = vbcast.lane.b32.xlu1 %v6453_v47, 266  ;;  %2435 = vbcast.lane.b32.xlu0 %v6453_v47, 258 }
 0x11b   : > { %2451 = vbcast.lane.b32.xlu1 %v6459_v48, 266  ;;  %2447 = vbcast.lane.b32.xlu0 %v6459_v48, 258 }
 0x11f   : > { %2463 = vbcast.lane.b32.xlu1 %v6465_v49, 266  ;;  %2459 = vbcast.lane.b32.xlu0 %v6465_v49, 258 }
 0x123   : > { %2475 = vbcast.lane.b32.xlu1 %v6471_v50, 266  ;;  %2471 = vbcast.lane.b32.xlu0 %v6471_v50, 258 }
 0x127   : > { %2679 = vbcast.lane.b32.xlu1 %v6477_v51, 266  ;;  %2675 = vbcast.lane.b32.xlu0 %v6477_v51, 258 }
 0x12b   : > { %2691 = vbcast.lane.b32.xlu1 %v6483_v52, 266  ;;  %2687 = vbcast.lane.b32.xlu0 %v6483_v52, 258  ;;  %v6671_v52 = vrot.slane %v6374_v31, %v6341_v22 }
 0x12d   : > { %8747 = vst [vmem:[#allocation56_spill] sm:$0xff] %v6671_v52 }
 0x12f   : > { %2703 = vbcast.lane.b32.xlu1 %v6489_v53, 266  ;;  %2699 = vbcast.lane.b32.xlu0 %v6489_v53, 258 }
 0x133   : > { %2715 = vbcast.lane.b32.xlu1 %v6495_v54, 266  ;;  %2711 = vbcast.lane.b32.xlu0 %v6495_v54, 258 }
 0x137   : > { %2727 = vbcast.lane.b32.xlu1 %v6501_v55, 266  ;;  %2723 = vbcast.lane.b32.xlu0 %v6501_v55, 258  ;;  %v6645_v55 = vrot.slane %v6364_v28, %v6410_v39 }
 0x139   : > { %8742 = vst [vmem:[#allocation51_spill] sm:$0xff] %v6645_v55 }
 0x13b   : > { %2739 = vbcast.lane.b32.xlu1 %v6507_v56, 266  ;;  %2735 = vbcast.lane.b32.xlu0 %v6507_v56, 258 }
 0x13f   : > { %2751 = vbcast.lane.b32.xlu1 %v6513_v57, 266  ;;  %2747 = vbcast.lane.b32.xlu0 %v6513_v57, 258 }
 0x143   : > { %2763 = vbcast.lane.b32.xlu1 %v6519_v58, 266  ;;  %2759 = vbcast.lane.b32.xlu0 %v6519_v58, 258 }
 0x147   : > { %2583 = vbcast.lane.b32.xlu1 %v6525_v59, 266  ;;  %2579 = vbcast.lane.b32.xlu0 %v6525_v59, 258 }
 0x14b   : > { %2595 = vbcast.lane.b32.xlu1 %v6531_v60, 266  ;;  %2591 = vbcast.lane.b32.xlu0 %v6531_v60, 258  ;;  %v6723_v60 = vrot.slane %v6374_v31, %v6418_v41 }
 0x14d   : > { %8761 = vst [vmem:[#allocation70_spill] sm:$0xff] %v6723_v60 }
 0x14f   : > { %2607 = vbcast.lane.b32.xlu1 %v6537_v61, 266  ;;  %2603 = vbcast.lane.b32.xlu0 %v6537_v61, 258 }
 0x153   : > { %2619 = vbcast.lane.b32.xlu1 %v6543_v62, 266  ;;  %2615 = vbcast.lane.b32.xlu0 %v6543_v62, 258  ;;  %v6713_v62 = vrot.slane %v6374_v31, %v6410_v39 }
 0x155   : > { %8758 = vst [vmem:[#allocation67_spill] sm:$0xff] %v6713_v62 }
 0x157   : > { %2631 = vbcast.lane.b32.xlu1 %v6549_v63, 266  ;;  %2627 = vbcast.lane.b32.xlu0 %v6549_v63, 258 }
 0x159   : > { %v6553_v0 = vpop.permute.xlu1 %2487  ;;  %v6555_v1 = vpop.permute.xlu0 %2483 }
 0x15b   : > { %2643 = vbcast.lane.b32.xlu1 %v6559_v2, 266  ;;  %2639 = vbcast.lane.b32.xlu0 %v6559_v2, 258  ;;  %v6697_v2 = vrot.slane %v6374_v31, %v6388_v34 }
 0x15d   : > { %v6563_v3 = vpop.permute.xlu1 %2499  ;;  %v6565_v4 = vpop.permute.xlu0 %2495  ;;  %8754 = vst [vmem:[#allocation63_spill] sm:$0xff] %v6697_v2 }
 0x15f   : > { %2655 = vbcast.lane.b32.xlu1 %v6569_v6, 266  ;;  %2651 = vbcast.lane.b32.xlu0 %v6569_v6, 258 }
 0x161   : > { %v6573_v7 = vpop.permute.xlu1 %2511  ;;  %v6575_v8 = vpop.permute.xlu0 %2507 }
 0x163   : > { %2667 = vbcast.lane.b32.xlu1 %v6579_v16, 266  ;;  %2663 = vbcast.lane.b32.xlu0 %v6579_v16, 258 }
 0x165   : > { %v6583_v17 = vpop.permute.xlu1 %2523  ;;  %v6585_v20 = vpop.permute.xlu0 %2519 }
 0x167   : > { %2871 = vbcast.lane.b32.xlu1 %v6589_v23, 266  ;;  %2867 = vbcast.lane.b32.xlu0 %v6589_v23, 258  ;;  %v6619_v23 = vrot.slane %v6364_v28, %v6372_v30 }
 0x169   : > { %v6593_v24 = vpop.permute.xlu1 %2535  ;;  %v6595_v27 = vpop.permute.xlu0 %2531  ;;  %8739 = vst [vmem:[#allocation48_spill] sm:$0xff] %v6619_v23 }
 0x16b   : > { %2883 = vbcast.lane.b32.xlu1 %v6599_v15, 266  ;;  %2879 = vbcast.lane.b32.xlu0 %v6599_v15, 258  ;;  %v6625_v15 = vrot.slane %v6364_v28, %v6388_v34 }
 0x16d   : > { %v6603_v14 = vpop.permute.xlu1 %2547  ;;  %v6605_v13 = vpop.permute.xlu0 %2543  ;;  %8740 = vst [vmem:[#allocation49_spill] sm:$0xff] %v6625_v15 }
 0x16f   : > { %2895 = vbcast.lane.b32.xlu1 %v6609_v12, 266  ;;  %2891 = vbcast.lane.b32.xlu0 %v6609_v12, 258  ;;  %v6635_v12 = vrot.slane %v6364_v28, %v6400_v37 }
 0x171   : > { %v6613_v11 = vpop.permute.xlu1 %2559  ;;  %v6615_v10 = vpop.permute.xlu0 %2555  ;;  %8741 = vst [vmem:[#allocation50_spill] sm:$0xff] %v6635_v12 }
 0x173   : > { %2907 = vbcast.lane.b32.xlu1 %v6619_v23, 266  ;;  %2903 = vbcast.lane.b32.xlu0 %v6619_v23, 258 }
 0x175   : > { %v6627_v58 = vpop.permute.xlu1 %2571  ;;  %v6629_v57 = vpop.permute.xlu0 %2567 }
 0x177   : > { %2919 = vbcast.lane.b32.xlu1 %v6625_v15, 266  ;;  %2915 = vbcast.lane.b32.xlu0 %v6625_v15, 258  ;;  %v6651_v15 = vrot.slane %v6364_v28, %v6418_v41 }
 0x179   : > { %v6639_v23 = vpop.permute.xlu1 %2399  ;;  %v6641_v56 = vpop.permute.xlu0 %2387  ;;  %8743 = vst [vmem:[#allocation52_spill] sm:$0xff] %v6651_v15 }
 0x17b   : > { %2931 = vbcast.lane.b32.xlu1 %v6635_v12, 266  ;;  %2927 = vbcast.lane.b32.xlu0 %v6635_v12, 258  ;;  %v6661_v12 = vrot.slane %v6374_v31, %v6335_v19 }
 0x17d   : > { %v6653_v54 = vpop.permute.xlu1 %2403  ;;  %v6655_v53 = vpop.permute.xlu0 %2391  ;;  %8744 = vst [vmem:[#allocation53_spill] sm:$0xff] %v6661_v12 }
 0x17f   : > { %2943 = vbcast.lane.b32.xlu1 %v6645_v55, 266  ;;  %2939 = vbcast.lane.b32.xlu0 %v6645_v55, 258 }
 0x181   : > { %v6665_v55 = vpop.permute.xlu1 %2415  ;;  %v6667_v28 = vpop.permute.xlu0 %2411 }
 0x182   : > { %8745 = vst [vmem:[#allocation54_spill] sm:$0xff] %v6665_v55  ;;  %8746 = vst [vmem:[#allocation55_spill] sm:$0xff] %v6667_v28 }
 0x183   : > { %2955 = vbcast.lane.b32.xlu1 %v6651_v15, 266  ;;  %2951 = vbcast.lane.b32.xlu0 %v6651_v15, 258  ;;  %v6677_v15 = vrot.slane %v6374_v31, %v6356_v26 }
 0x185   : > { %8748 = vst [vmem:[#allocation57_spill] sm:$0xff] %v6677_v15  ;;  %v6679_v51 = vpop.permute.xlu1 %2427  ;;  %v6681_v16 = vpop.permute.xlu0 %2423 }
 0x186   : > { %8749 = vst [vmem:[#allocation58_spill] sm:$0xff] %v6679_v51  ;;  %8750 = vst [vmem:[#allocation59_spill] sm:$0xff] %v6681_v16 }
 0x187   : > { %2775 = vbcast.lane.b32.xlu1 %v6661_v12, 266  ;;  %2771 = vbcast.lane.b32.xlu0 %v6661_v12, 258  ;;  %v6687_v12 = vrot.slane %v6374_v31, %v6372_v30 }
 0x189   : > { %8751 = vst [vmem:[#allocation60_spill] sm:$0xff] %v6687_v12  ;;  %v6693_v6 = vpop.permute.xlu0 %2435 }
 0x18a   : > { %8753 = vst [vmem:[#allocation62_spill] sm:$0xff] %v6693_v6 }
 0x18b   : > { %2787 = vbcast.lane.b32.xlu1 %v6671_v52, 266  ;;  %2783 = vbcast.lane.b32.xlu0 %v6671_v52, 258  ;;  %v6691_v52 = vpop.permute.xlu1 %2439 }
 0x18c   : > { %8752 = vst [vmem:[#allocation61_spill] sm:$0xff] %v6691_v52 }
 0x18f   : > { %2799 = vbcast.lane.b32.xlu1 %v6677_v15, 266  ;;  %2795 = vbcast.lane.b32.xlu0 %v6677_v15, 258  ;;  %v6703_v15 = vrot.slane %v6374_v31, %v6400_v37  ;;  %v6705_v63 = vpop.permute.xlu1 %2451  ;;  %v5687_v31 = vld [vmem:[%s6731_s9] ss:$0 sm:$0xff] }
 0x190   : > { %8756 = vst [vmem:[#allocation65_spill] sm:$0xff] %v6705_v63 }
 0x191   : > { %8755 = vst [vmem:[#allocation64_spill] sm:$0xff] %v6703_v15 }
 0x193   : > { %2811 = vbcast.lane.b32.xlu1 %v6687_v12, 266  ;;  %2807 = vbcast.lane.b32.xlu0 %v6687_v12, 258  ;;  %v6707_v12 = vpop.permute.xlu0 %2447 }
 0x194   : > { %8757 = vst [vmem:[#allocation66_spill] sm:$0xff] %v6707_v12 }
 0x197   : > { %2823 = vbcast.lane.b32.xlu1 %v6697_v2, 266  ;;  %2819 = vbcast.lane.b32.xlu0 %v6697_v2, 258  ;;  %v6717_v2 = vpop.permute.xlu1 %2463  ;;  %v6719_v61 = vpop.permute.xlu0 %2459 }
 0x198   : > { %8759 = vst [vmem:[#allocation68_spill] sm:$0xff] %v6717_v2  ;;  %8760 = vst [vmem:[#allocation69_spill] sm:$0xff] %v6719_v61 }
 0x19b   : > { %2835 = vbcast.lane.b32.xlu1 %v6703_v15, 266  ;;  %2831 = vbcast.lane.b32.xlu0 %v6703_v15, 258  ;;  %v6737_v15 = vpop.permute.xlu1 %2475  ;;  %v6739_v59 = vpop.permute.xlu0 %2471 }
 0x19c   : > { %8763 = vst [vmem:[#allocation72_spill] sm:$0xff] %v6737_v15  ;;  %8764 = vst [vmem:[#allocation73_spill] sm:$0xff] %v6739_v59 }
 0x19f   : > { %2847 = vbcast.lane.b32.xlu1 %v6713_v62, 266  ;;  %2843 = vbcast.lane.b32.xlu0 %v6713_v62, 258  ;;  %v6735_v62 = vrot.slane %v6380_v32, %v6335_v19  ;;  %v6752_v36 = vpop.permute.xlu1 %2679  ;;  %v6754_v33 = vpop.permute.xlu0 %2675 }
 0x1a0   : > { %8766 = vst [vmem:[#allocation75_spill] sm:$0xff] %v6752_v36  ;;  %8767 = vst [vmem:[#allocation76_spill] sm:$0xff] %v6754_v33  ;;  %v6803_v33 = vrot.slane %v6390_v35, %v6356_v26 }
 0x1a1   : > { %8762 = vst [vmem:[#allocation71_spill] sm:$0xff] %v6735_v62 }
 0x1a2   : > { %8778 = vst [vmem:[#allocation87_spill] sm:$0xff] %v6803_v33 }
 0x1a3   : > { %2859 = vbcast.lane.b32.xlu1 %v6723_v60, 266  ;;  %2855 = vbcast.lane.b32.xlu0 %v6723_v60, 258  ;;  %v6776_v44 = vpop.permute.xlu1 %2691 }
 0x1a4   : > { %8771 = vst [vmem:[#allocation80_spill] sm:$0xff] %v6776_v44 }
 0x1a7   : > { %3063 = vbcast.lane.b32.xlu1 %v6735_v62, 266  ;;  %3059 = vbcast.lane.b32.xlu0 %v6735_v62, 258 }
 0x1a9   : > { %v5760_v60 = vpop.f32.mrf.mxu1 }
 0x1aa   : > { %v6748_v40 = vadd.f32 %v5760_v60, %v5687_v31 }
 0x1ab   : > { %v622_v38 = vpop.f32.mrf.mxu1  ;;  %3075 = vbcast.lane.b32.xlu1 %v6746_v42, 266  ;;  %3071 = vbcast.lane.b32.xlu0 %v6746_v42, 258 }
 0x1ac   : > { %v670_v62 = vand.u32 2147483647, %v6748_v40  ;;  %v6757_v29 = vadd.f32 %v5687_v31, %v622_v38 }
 0x1ad   : > { %v5763_v25 = vpop.f32.mrf.mxu1 }
 0x1ae   : > { %v678_v60 = vsub.f32 0.0, %v670_v62  ;;  %v669_v50 = vand.u32 2147483647, %v6757_v29  ;;  %v6764_v49 = vadd.f32 %v5763_v25, %v5687_v31  ;;  %v6774_v62 = vrot.slane %v6390_v35, %v6335_v19  ;;  %v6778_v25 = vpop.permute.xlu0 %2687 }
 0x1af   : > { %v632_v42 = vpop.f32.mrf.mxu1  ;;  %3087 = vbcast.lane.b32.xlu1 %v6761_v21, 266  ;;  %3083 = vbcast.lane.b32.xlu0 %v6761_v21, 258  ;;  %8772 = vst [vmem:[#allocation81_spill] sm:$0xff] %v6778_v25 }
 0x1b0   : > { %v687_v48 = vmul.f32 1.442695, %v678_v60  ;;  %v677_v47 = vsub.f32 0.0, %v669_v50  ;;  %v672_v38 = vand.u32 2147483647, %v6764_v49  ;;  %v6770_v46 = vadd.f32 %v5687_v31, %v632_v42  ;;  %8770 = vst [vmem:[#allocation79_spill] sm:$0xff] %v6774_v62 }
 0x1b1   : > { %v5766_v45 = vpop.f32.mrf.mxu1 }
 0x1b2   : > { %8769 = vst [vmem:[#allocation78_spill] sm:$0xff] %v6770_v46  ;;  %5835 = vpow2.f32 %v687_v48  ;;  %v685_v43 = vmul.f32 1.442695, %v677_v47  ;;  %v680_v36 = vsub.f32 0.0, %v672_v38  ;;  %v6780_v21 = vadd.f32 %v5766_v45, %v5687_v31  ;;  %v733_v48 = vld [vmem:[%s360_s13] sm:$0xff] }
 0x1b3   : > { %v671_v50 = vand.u32 2147483647, %v6770_v46  ;;  %2967 = vbcast.lane.b32.xlu1 %v6774_v62, 266  ;;  %2963 = vbcast.lane.b32.xlu0 %v6774_v62, 258  ;;  %v642_v60 = vpop.f32.mrf.mxu1  ;;  %v6791_v47 = vrot.slane %v6390_v35, %v6341_v22  ;;  %v6797_v62 = vpop.permute.xlu1 %2703 }
 0x1b4   : > { %8773 = vst [vmem:[#allocation82_spill] sm:$0xff] %v6780_v21  ;;  %5837 = vpow2.f32 %v685_v43  ;;  %v691_v42 = vmul.f32 1.442695, %v680_v36  ;;  %v674_v44 = vand.u32 2147483647, %v6780_v21  ;;  %v6793_v45 = vadd.f32 %v5687_v31, %v642_v60  ;;  %8776 = vst [vmem:[#allocation85_spill] sm:$0xff] %v6797_v62  ;;  %v6799_v43 = vpop.permute.xlu0 %2699 }
 0x1b5   : > { %8774 = vst [vmem:[#allocation83_spill] sm:$0xff] %v6791_v47  ;;  %v679_v38 = vsub.f32 0.0, %v671_v50  ;;  %8777 = vst [vmem:[#allocation86_spill] sm:$0xff] %v6799_v43  ;;  %v734_v36 = vld [vmem:[%s360_s13 + $0x8] sm:$0xff]  ;;  %v735_v31 = vmul.f32 1.442695, %v733_v48 }
 0x1b6   : > { %8775 = vst [vmem:[#allocation84_spill] sm:$0xff] %v6793_v45  ;;  %5839 = vpow2.f32 %v691_v42  ;;  %v682_v25 = vsub.f32 0.0, %v674_v44  ;;  %v673_v22 = vand.u32 2147483647, %v6793_v45  ;;  %v737_v50 = vmul.f32 1.442695, %v734_v36 }
 0x1b7   : > { %2979 = vbcast.lane.b32.xlu1 %v6791_v47, 266  ;;  %2975 = vbcast.lane.b32.xlu0 %v6791_v47, 258  ;;  %v689_v42 = vmul.f32 1.442695, %v679_v38  ;;  %v6810_v47 = vrot.slane %v6390_v35, %v6372_v30  ;;  %5841 = vpow2.f32 %v735_v31  ;;  %v6812_v44 = vpop.permute.xlu1 %2715 }
 0x1b8   : > { %v695_v60 = vmul.f32 1.442695, %v682_v25  ;;  %v681_v62 = vsub.f32 0.0, %v673_v22  ;;  %8780 = vst [vmem:[#allocation89_spill] sm:$0xff] %v6812_v44  ;;  %v6814_v26 = vpop.permute.xlu0 %2711  ;;  %v6820_v25 = vrot.slane %v6390_v35, %v6388_v34 }
 0x1b9   : > { %8779 = vst [vmem:[#allocation88_spill] sm:$0xff] %v6810_v47  ;;  %8781 = vst [vmem:[#allocation90_spill] sm:$0xff] %v6814_v26  ;;  %5843 = vpow2.f32 %v689_v42 }
 0x1ba   : > { %5845 = vpow2.f32 %v737_v50  ;;  %8782 = vst [vmem:[#allocation91_spill] sm:$0xff] %v6820_v25  ;;  %v693_v36 = vmul.f32 1.442695, %v681_v62  ;;  %v6830_v50 = vrot.slane %v6390_v35, %v6400_v37  ;;  %v6199_v62 = vmov 1966171168  }
 0x1bb   : > { %2991 = vbcast.lane.b32.xlu1 %v6803_v33, 266  ;;  %2987 = vbcast.lane.b32.xlu0 %v6803_v33, 258  ;;  %5847 = vpow2.f32 %v695_v60  ;;  %v6824_v42 = vpop.permute.xlu1 %2727  ;;  %v751_v60 = vunpack.c.l.s4 %v6199_v62 }
 0x1bc   : > { %8783 = vst [vmem:[#allocation92_spill] sm:$0xff] %v6824_v42  ;;  %v6826_v33 = vpop.permute.xlu0 %2723  ;;  %8785 = vst [vmem:[#allocation94_spill] sm:$0xff] %v6830_v50 }
 0x1bd   : > { %8784 = vst [vmem:[#allocation93_spill] sm:$0xff] %v6826_v33 }
 0x1bf   : > { %v5836_v43 = vpop.eup %5835  ;;  %3003 = vbcast.lane.b32.xlu1 %v6810_v47, 266  ;;  %2999 = vbcast.lane.b32.xlu0 %v6810_v47, 258 }
 0x1c0   : > { %v702_v48 = vadd.f32 1.0, %v5836_v43 }
 0x1c1   : > { %v5838_v38 = vpop.eup %5837 }
 0x1c2   : > { %5849 = vlog2.f32 %v702_v48  ;;  %v701_v22 = vadd.f32 1.0, %v5838_v38  ;;  %v6836_v48 = vrot.slane %v6390_v35, %v6410_v39  ;;  %v6838_v38 = vpop.permute.xlu1 %2739 }
 0x1c3   : > { %v5840_v31 = vpop.eup %5839  ;;  %3015 = vbcast.lane.b32.xlu1 %v6820_v25, 266  ;;  %3011 = vbcast.lane.b32.xlu0 %v6820_v25, 258  ;;  %8787 = vst [vmem:[#allocation96_spill] sm:$0xff] %v6838_v38 }
 0x1c4   : > { %5851 = vlog2.f32 %v701_v22  ;;  %v704_v43 = vadd.f32 1.0, %v5840_v31  ;;  %8786 = vst [vmem:[#allocation95_spill] sm:$0xff] %v6836_v48  ;;  %v6840_v22 = vpop.permute.xlu0 %2735 }
 0x1c5   : > { %5853 = vpow2.f32 %v693_v36  ;;  %8788 = vst [vmem:[#allocation97_spill] sm:$0xff] %v6840_v22  ;;  %v5842_v36 = vpop.eup %5841 }
 0x1c6   : > { %5855 = vlog2.f32 %v704_v43  ;;  %v5844_v31 = vpop.eup %5843  ;;  %v752_v43 = vunpack.c.0.s8 %v751_v60  ;;  %v6848_v42 = vsub.f32 0.0, %v5842_v36  ;;  %v6858_v44 = vpop.permute.xlu1 %2751 }
 0x1c7   : > { %3027 = vbcast.lane.b32.xlu1 %v6830_v50, 266  ;;  %3023 = vbcast.lane.b32.xlu0 %v6830_v50, 258  ;;  %v5846_v25 = vpop.eup %5845  ;;  %v6846_v50 = vrot.slane %v6390_v35, %v6418_v41  ;;  %v703_v33 = vadd.f32 1.0, %v5844_v31  ;;  %8790 = vst [vmem:[#allocation99_spill] sm:$0xff] %v6858_v44  ;;  %v6864_v31 = vrot.slane %v6380_v32, %v6372_v30 }
 0x1c8   : > { %v5848_v62 = vpop.eup %5847  ;;  %v6852_v22 = vsub.f32 0.0, %v5846_v25  ;;  %v6856_v60 = vsub.s32 %v752_v43, %v6332_v18  ;;  %v6860_v35 = vpop.permute.xlu0 %2747  ;;  %v6868_v25 = vrot.slane %v6380_v32, %v6388_v34  ;;  %v661_v43 = vmax.f32 %v6757_v29, 0.0 }
 0x1c9   : > { %8789 = vst [vmem:[#allocation98_spill] sm:$0xff] %v6846_v50  ;;  %8791 = vst [vmem:[#allocation100_spill] sm:$0xff] %v6860_v35  ;;  %v706_v36 = vadd.f32 1.0, %v5848_v62  ;;  %v6877_v62 = vrot.slane %v6380_v32, %v6410_v39  ;;  %5857 = vlog2.f32 %v703_v33  ;;  %v6885_v34 = vrot.slane %v6380_v32, %v6418_v41 }
 0x1ca   : > { %8792 = vst [vmem:[#allocation101_spill] sm:$0xff] %v6864_v31  ;;  %8793 = vst [vmem:[#allocation102_spill] sm:$0xff] %v6868_v25 }
 0x1cb   : > { %3039 = vbcast.lane.b32.xlu1 %v6836_v48, 266  ;;  %3035 = vbcast.lane.b32.xlu0 %v6836_v48, 258  ;;  %v662_v48 = vmax.f32 %v6748_v40, 0.0  ;;  %v6872_v40 = vrot.slane %v6380_v32, %v6400_v37  ;;  %8795 = vst [vmem:[#allocation104_spill] sm:$0xff] %v6877_v62  ;;  %8796 = vst [vmem:[#allocation105_spill] sm:$0xff] %v6885_v34  ;;  %5859 = vlog2.f32 %v706_v36 }
 0x1cc   : > { %v6900_v46 = vpop.permute.xlu0 %2759 }
 0x1cd   : > { %8794 = vst [vmem:[#allocation103_spill] sm:$0xff] %v6872_v40  ;;  %8799 = vst [vmem:[#allocation108_spill] sm:$0xff] %v6900_v46 }
 0x1cf   : > { %v5850_v47 = vpop.eup %5849  ;;  %3051 = vbcast.lane.b32.xlu1 %v6846_v50, 266  ;;  %3047 = vbcast.lane.b32.xlu0 %v6846_v50, 258 }
 0x1d0   : > { %v712_v38 = vmul.f32 0.6931472, %v5850_v47 }
 0x1d1   : > { %v5852_v26 = vpop.eup %5851 }
 0x1d2   : > { %v5854_v18 = vpop.eup %5853  ;;  %v726_v47 = vadd.f32 %v712_v38, %v662_v48  ;;  %v710_v50 = vmul.f32 0.6931472, %v5852_v26 }
 0x1d3   : > { %v5856_v35 = vpop.eup %5855  ;;  %3099 = vbcast.lane.b32.xlu1 %v6864_v31, 266  ;;  %3095 = vbcast.lane.b32.xlu0 %v6864_v31, 258  ;;  %v6894_v33 = vadd.f32 1.0, %v5854_v18  ;;  %v6898_v31 = vpop.permute.xlu1 %2763 }
 0x1d4   : > { %v798_v29 = vcombine.high %v726_v47, %v726_v47  ;;  %v805_v37 = vrot.slane %v726_v47, %v6856_v60  ;;  %v1974_v39 = vmul.f32 %v726_v47, %v6294_v9  ;;  %v6889_v26 = vadd.f32 %v710_v50, %v661_v43  ;;  %8798 = vst [vmem:[#allocation107_spill] sm:$0xff] %v6898_v31 }
 0x1d5   : > { %v6891_v48 = vmul.f32 0.6931472, %v5856_v35  ;;  %8797 = vst [vmem:[#allocation106_spill] sm:$0xff] %v6894_v33 }
 0x1d6   : > { %v812_v44 = vrot.slane %v798_v29, %v6856_v60  ;;  %v813_v30 = vcombine.high %v805_v37, %v805_v37  ;;  %v821_v32 = vrot.slane %v805_v37, %v6856_v60  ;;  %v2038_v41 = vcombine.high %v1974_v39, %v1974_v39  ;;  %v6957_v2 = vpop.eup %5857 }
 0x1d7   : > { %v6903_v50 = vrot.slane %v1974_v39, %v6856_v60  ;;  %v6909_v36 = vrot.slane %v6889_v26, %v6856_v60  ;;  %v6913_v18 = vmul.f32 %v6889_v26, %v6289_v5  ;;  %3111 = vbcast.lane.b32.xlu1 %v6868_v25, 266  ;;  %3107 = vbcast.lane.b32.xlu0 %v6868_v25, 258  ;;  %v6939_v33 = vpop.permute.xlu1 %2583 }
 0x1d8   : > { %v814_v47 = vcombine.high %v812_v44, %v812_v44  ;;  %v828_v43 = vrot.slane %v812_v44, %v6856_v60  ;;  %v835_v29 = vrot.slane %v813_v30, %v6856_v60  ;;  %v843_v37 = vcombine.high %v821_v32, %v821_v32  ;;  %8800 = vst [vmem:[#allocation109_spill] sm:$0xff] %v6939_v33  ;;  %v6965_v52 = vpop.eup %5859 }
 0x1d9   : > { %v1176_v39 = vrot.slane %v821_v32, %v6335_v19  ;;  %v6921_v38 = vrot.slane %v2038_v41, %v6856_v60  ;;  %v2053_v35 = vcombine.high %v6903_v50, %v6903_v50  ;;  %v6927_v9 = vrot.slane %v6903_v50, %v6856_v60  ;;  %8802 = vst [vmem:[#allocation111_spill] sm:$0xff] %v6957_v2 }
 0x1da   : > { %v842_v5 = vrot.slane %v814_v47, %v6856_v60  ;;  %v844_v44 = vcombine.high %v828_v43, %v828_v43  ;;  %v845_v46 = vcombine.high %v835_v29, %v835_v29  ;;  %v1180_v30 = vrot.slane %v835_v29, %v6335_v19  ;;  %v6941_v29 = vpop.permute.xlu0 %2579  ;;  %8803 = vst [vmem:[#allocation112_spill] sm:$0xff] %v6965_v52 }
 0x1db   : > { %v1184_v25 = vrot.slane %v843_v37, %v6335_v19  ;;  %v1192_v32 = vrot.slane %v828_v43, %v6335_v19  ;;  %v1477_v41 = vmul.f32 %v1176_v39, %v6848_v42  ;;  %v1478_v31 = vmul.f32 %v1176_v39, %v6852_v22  ;;  %3123 = vbcast.lane.b32.xlu1 %v6872_v40, 266 }
 0x1dc   : > { %v846_v21 = vcombine.high %v842_v5, %v842_v5  ;;  %v1188_v50 = vrot.slane %v845_v46, %v6335_v19  ;;  %v1196_v45 = vrot.slane %v842_v5, %v6335_v19  ;;  %v1200_v47 = vrot.slane %v844_v44, %v6335_v19  ;;  %8801 = vst [vmem:[#allocation110_spill] sm:$0xff] %v6941_v29 }
 0x1dd   : > { %3119 = vbcast.lane.b32.xlu0 %v6872_v40, 258  ;;  %v1479_v43 = vmul.f32 %v1180_v30, %v6848_v42  ;;  %v1480_v37 = vmul.f32 %v1180_v30, %v6852_v22  ;;  %v1481_v39 = vmul.f32 %v1184_v25, %v6848_v42  ;;  %v1482_v15 = vmul.f32 %v1184_v25, %v6852_v22 }
 0x1de   : > { %v1204_v46 = vrot.slane %v846_v21, %v6335_v19  ;;  %v1483_v5 = vmul.f32 %v1188_v50, %v6848_v42  ;;  %v1484_v44 = vmul.f32 %v1188_v50, %v6852_v22  ;;  %v1485_v33 = vmul.f32 %v1192_v32, %v6848_v42  ;;  %v6969_v16 = vpop.permute.xlu0 %2591 }
 0x1df   : > { %v1486_v29 = vmul.f32 %v1192_v32, %v6852_v22  ;;  %v1487_v40 = vmul.f32 %v1196_v45, %v6848_v42  ;;  %v1488_v59 = vmul.f32 %v1196_v45, %v6852_v22  ;;  %v1489_v30 = vmul.f32 %v1200_v47, %v6848_v42  ;;  %3135 = vbcast.lane.b32.xlu1 %v6877_v62, 266 }
 0x1e0   : > { %v1490_v21 = vmul.f32 %v1200_v47, %v6852_v22  ;;  %v1491_v25 = vmul.f32 %v1204_v46, %v6848_v42  ;;  %v1492_v50 = vmul.f32 %v1204_v46, %v6852_v22  ;;  %v1621_v61 = vmul.f32 1.442695, %v1477_v41  ;;  %v6967_v47 = vpop.permute.xlu1 %2595 }
 0x1e1   : > { %3131 = vbcast.lane.b32.xlu0 %v6877_v62, 258  ;;  %v1623_v32 = vmul.f32 1.442695, %v1478_v31  ;;  %v1625_v63 = vmul.f32 1.442695, %v1479_v43  ;;  %v2054_v45 = vcombine.high %v6921_v38, %v6921_v38 }
 0x1e2   : > { %v1627_v12 = vmul.f32 1.442695, %v1480_v37  ;;  %5861 = vpow2.f32 %v1621_v61  ;;  %v1629_v6 = vmul.f32 1.442695, %v1481_v39  ;;  %v1631_v2 = vmul.f32 1.442695, %v1482_v15 }
 0x1e3   : > { %v1633_v51 = vmul.f32 1.442695, %v1483_v5  ;;  %5863 = vpow2.f32 %v1623_v32  ;;  %v1635_v41 = vmul.f32 1.442695, %v1484_v44  ;;  %v1637_v46 = vmul.f32 1.442695, %v1485_v33 }
 0x1e4   : > { %v1639_v62 = vmul.f32 1.442695, %v1486_v29  ;;  %5865 = vpow2.f32 %v1625_v63  ;;  %v1641_v31 = vmul.f32 1.442695, %v1487_v40  ;;  %v1643_v43 = vmul.f32 1.442695, %v1488_v59  ;;  %v6991_v29 = vpop.permute.xlu0 %2603 }
 0x1e5   : > { %v1645_v37 = vmul.f32 1.442695, %v1489_v30  ;;  %5867 = vpow2.f32 %v1627_v12  ;;  %v1647_v55 = vmul.f32 1.442695, %v1490_v21  ;;  %v1649_v28 = vmul.f32 1.442695, %v1491_v25 }
 0x1e6   : > { %v6971_v52 = vmul.f32 1.442695, %v1492_v50  ;;  %5869 = vpow2.f32 %v1629_v6  ;;  %v2068_v15 = vrot.slane %v6921_v38, %v6856_v60  ;;  %v2075_v61 = vrot.slane %v2053_v35, %v6856_v60  ;;  %3147 = vbcast.lane.b32.xlu1 %v6885_v34, 266  ;;  %3143 = vbcast.lane.b32.xlu0 %v6885_v34, 258  ;;  %v6989_v35 = vpop.permute.xlu1 %2607 }
 0x1e7   : > { %v2082_v39 = vrot.slane %v2054_v45, %v6856_v60  ;;  %5871 = vpow2.f32 %v1631_v2  ;;  %v2083_v12 = vcombine.high %v6927_v9, %v6927_v9  ;;  %v3184_v59 = vrot.slane %v6927_v9, %v6335_v19 }
 0x1e8   : > { %v8804_v63 = vcombine.high %v6889_v26, %v6889_v26  ;;  %5873 = vpow2.f32 %v1633_v51  ;;  %v2084_v40 = vcombine.high %v2068_v15, %v2068_v15  ;;  %v2085_v38 = vcombine.high %v2075_v61, %v2075_v61 }
 0x1e9   : > { %v2086_v33 = vcombine.high %v2082_v39, %v2082_v39  ;;  %5875 = vpow2.f32 %v1635_v41  ;;  %v3188_v2 = vrot.slane %v2075_v61, %v6335_v19  ;;  %v3192_v5 = vrot.slane %v2083_v12, %v6335_v19 }
 0x1ea   : > { %v6987_v6 = vrot.slane %v8804_v63, %v6856_v60  ;;  %v3200_v9 = vrot.slane %v2068_v15, %v6335_v19  ;;  %5877 = vpow2.f32 %v1637_v46  ;;  %v3196_v26 = vrot.slane %v2085_v38, %v6335_v19 }
 0x1eb   : > { %v3204_v44 = vrot.slane %v2082_v39, %v6335_v19  ;;  %v3208_v51 = vrot.slane %v2084_v40, %v6335_v19  ;;  %5879 = vpow2.f32 %v1639_v62  ;;  %v3212_v30 = vrot.slane %v2086_v33, %v6335_v19 }
 0x1ec   : > { %v3485_v21 = vmul.f32 %v3184_v59, %v6555_v1  ;;  %v3486_v25 = vmul.f32 %v3184_v59, %v6553_v0  ;;  %5881 = vpow2.f32 %v1641_v31  ;;  %v3487_v50 = vmul.f32 %v3188_v2, %v6565_v4  ;;  %v7016_v4 = vpop.permute.xlu1 %2619 }
 0x1ed   : > { %v3488_v32 = vmul.f32 %v3188_v2, %v6563_v3  ;;  %v3489_v45 = vmul.f32 %v3192_v5, %v6575_v8  ;;  %5883 = vpow2.f32 %v1643_v43  ;;  %v3490_v41 = vmul.f32 %v3192_v5, %v6573_v7  ;;  %v7018_v7 = vpop.permute.xlu0 %2615 }
 0x1ee   : > { %v3491_v46 = vmul.f32 %v3196_v26, %v6585_v20  ;;  %v3492_v62 = vmul.f32 %v3196_v26, %v6583_v17  ;;  %3613 = vst.msk [vmem:[#allocation3 + $0x80] sm:$0xff] %vm389_vm0, %v3485_v21  ;;  %3614 = vst.msk [vmem:[#allocation3 + $0x88] sm:$0xff] %vm389_vm0, %v3486_v25  ;;  %5885 = vpow2.f32 %v1645_v37  ;;  %v3493_v0 = vmul.f32 %v3200_v9, %v6595_v27 }
 0x1ef   : > { %v3494_v1 = vmul.f32 %v3200_v9, %v6593_v24  ;;  %v3495_v3 = vmul.f32 %v3204_v44, %v6605_v13  ;;  %3615 = vst.msk [vmem:[#allocation3 + $0x90] sm:$0xff] %vm389_vm0, %v3487_v50  ;;  %3616 = vst.msk [vmem:[#allocation3 + $0x98] sm:$0xff] %vm389_vm0, %v3488_v32  ;;  %v5862_v8 = vpop.eup %5861  ;;  %5887 = vpow2.f32 %v1647_v55  ;;  %v3496_v17 = vmul.f32 %v3204_v44, %v6603_v14 }
 0x1f0   : > { %3617 = vst.msk [vmem:[#allocation3 + $0xa0] sm:$0xff] %vm389_vm0, %v3489_v45  ;;  %v3497_v20 = vmul.f32 %v3208_v51, %v6615_v10  ;;  %v3498_v24 = vmul.f32 %v3208_v51, %v6613_v11  ;;  %3618 = vst.msk [vmem:[#allocation3 + $0xa8] sm:$0xff] %vm389_vm0, %v3490_v41  ;;  %v5864_v13 = vpop.eup %5863  ;;  %5889 = vpow2.f32 %v1649_v28  ;;  %v3499_v27 = vmul.f32 %v3212_v30, %v6629_v57  ;;  %v7069_v40 = vpop.permute.xlu1 %2631 }
 0x1f1   : > { %3619 = vst.msk [vmem:[#allocation3 + $0xb0] sm:$0xff] %vm389_vm0, %v3491_v46  ;;  %3620 = vst.msk [vmem:[#allocation3 + $0xb8] sm:$0xff] %vm389_vm0, %v3492_v62  ;;  %v3500_v55 = vmul.f32 %v3212_v30, %v6627_v58  ;;  %v764_v10 = vcombine.high %v6909_v36, %v6909_v36  ;;  %v5866_v11 = vpop.eup %5865  ;;  %5891 = vpow2.f32 %v6971_v52  ;;  %v765_v14 = vcombine.high %v6987_v6, %v6987_v6  ;;  %v7071_v38 = vpop.permute.xlu0 %2627 }
 0x1f2   : > { %1861 = vst.msk [vmem:[#allocation2 + $0x80] sm:$0xff] %vm389_vm0, %v5862_v8  ;;  %3621 = vst.msk [vmem:[#allocation3 + $0xc0] sm:$0xff] %vm389_vm0, %v3493_v0  ;;  %v772_v57 = vrot.slane %v6909_v36, %v6856_v60  ;;  %v779_v58 = vrot.slane %v6987_v6, %v6856_v60  ;;  %v5868_v28 = vpop.eup %5867  ;;  %v1989_v31 = vcombine.high %v6913_v18, %v6913_v18  ;;  %v8805_v36 = vmax.f32 %v6764_v49, 0.0 }
 0x1f3   : > { %3622 = vst.msk [vmem:[#allocation3 + $0xc8] sm:$0xff] %vm389_vm0, %v3494_v1  ;;  %3623 = vst.msk [vmem:[#allocation3 + $0xd0] sm:$0xff] %vm389_vm0, %v3495_v3  ;;  %v786_v52 = vrot.slane %v764_v10, %v6856_v60  ;;  %v7053_v43 = vrot.slane %v6913_v18, %v6856_v60  ;;  %v5870_v15 = vpop.eup %5869  ;;  %v793_v61 = vrot.slane %v765_v14, %v6856_v60 }
 0x1f4   : > { %1862 = vst.msk [vmem:[#allocation2 + $0x88] sm:$0xff] %vm389_vm0, %v5864_v13  ;;  %3624 = vst.msk [vmem:[#allocation3 + $0xd8] sm:$0xff] %vm389_vm0, %v3496_v17  ;;  %v7058_v37 = vadd.f32 %v6891_v48, %v8805_v36  ;;  %v794_v39 = vcombine.high %v772_v57, %v772_v57  ;;  %v795_v12 = vcombine.high %v779_v58, %v779_v58  ;;  %v5872_v63 = vpop.eup %5871 }
 0x1f5   : > { %3625 = vst.msk [vmem:[#allocation3 + $0xe0] sm:$0xff] %vm389_vm0, %v3497_v20  ;;  %3626 = vst.msk [vmem:[#allocation3 + $0xe8] sm:$0xff] %vm389_vm0, %v3498_v24  ;;  %v1144_v59 = vrot.slane %v772_v57, %v6335_v19  ;;  %v796_v6 = vcombine.high %v786_v52, %v786_v52  ;;  %v1148_v18 = vrot.slane %v786_v52, %v6335_v19  ;;  %v5874_v33 = vpop.eup %5873 }
 0x1f6   : > { %1863 = vst.msk [vmem:[#allocation2 + $0x90] sm:$0xff] %vm389_vm0, %v5866_v11  ;;  %3627 = vst.msk [vmem:[#allocation3 + $0xf0] sm:$0xff] %vm389_vm0, %v3499_v27  ;;  %v1160_v49 = vrot.slane %v779_v58, %v6335_v19  ;;  %v7067_v48 = vrot.slane %v1989_v31, %v6856_v60  ;;  %v797_v2 = vcombine.high %v793_v61, %v793_v61  ;;  %v5876_v44 = vpop.eup %5875  ;;  %v7100_v58 = vpop.permute.xlu1 %2643 }
 0x1f7   : > { %3628 = vst.msk [vmem:[#allocation3 + $0xf8] sm:$0xff] %vm389_vm0, %v3500_v55  ;;  %1864 = vst.msk [vmem:[#allocation2 + $0x98] sm:$0xff] %vm389_vm0, %v5868_v28  ;;  %v1152_v5 = vrot.slane %v794_v39, %v6335_v19  ;;  %v1164_v9 = vrot.slane %v793_v61, %v6335_v19  ;;  %v1168_v26 = vrot.slane %v795_v12, %v6335_v19  ;;  %v5878_v50 = vpop.eup %5877  ;;  %v7102_v28 = vpop.permute.xlu0 %2639 }
 0x1f8   : > { %1865 = vst.msk [vmem:[#allocation2 + $0xa0] sm:$0xff] %vm389_vm0, %v5870_v15  ;;  %1866 = vst.msk [vmem:[#allocation2 + $0xa8] sm:$0xff] %vm389_vm0, %v5872_v63  ;;  %v1156_v51 = vrot.slane %v796_v6, %v6335_v19  ;;  %v1461_v30 = vmul.f32 %v1144_v59, %v6848_v42  ;;  %v1462_v21 = vmul.f32 %v1144_v59, %v6852_v22  ;;  %v5880_v62 = vpop.eup %5879 }
 0x1f9   : > { %1867 = vst.msk [vmem:[#allocation2 + $0xb0] sm:$0xff] %vm389_vm0, %v5874_v33  ;;  %v1463_v25 = vmul.f32 %v1148_v18, %v6848_v42  ;;  %1868 = vst.msk [vmem:[#allocation2 + $0xb8] sm:$0xff] %vm389_vm0, %v5876_v44  ;;  %v1172_v32 = vrot.slane %v797_v2, %v6335_v19  ;;  %v1464_v45 = vmul.f32 %v1148_v18, %v6852_v22  ;;  %v5882_v17 = vpop.eup %5881 }
 0x1fa   : > { %v1465_v41 = vmul.f32 %v1152_v5, %v6848_v42  ;;  %v1466_v46 = vmul.f32 %v1152_v5, %v6852_v22  ;;  %1869 = vst.msk [vmem:[#allocation2 + $0xc0] sm:$0xff] %vm389_vm0, %v5878_v50  ;;  %v1467_v0 = vmul.f32 %v1156_v51, %v6848_v42  ;;  %v1468_v1 = vmul.f32 %v1156_v51, %v6852_v22  ;;  %v5884_v55 = vpop.eup %5883 }
 0x1fb   : > { %v1469_v3 = vmul.f32 %v1160_v49, %v6848_v42  ;;  %v1470_v8 = vmul.f32 %v1160_v49, %v6852_v22  ;;  %1870 = vst.msk [vmem:[#allocation2 + $0xc8] sm:$0xff] %vm389_vm0, %v5880_v62  ;;  %v1471_v20 = vmul.f32 %v1164_v9, %v6848_v42  ;;  %v1472_v24 = vmul.f32 %v1164_v9, %v6852_v22  ;;  %v5886_v52 = vpop.eup %5885 }
 0x1fc   : > { %v1473_v13 = vmul.f32 %v1168_v26, %v6848_v42  ;;  %v1474_v27 = vmul.f32 %v1168_v26, %v6852_v22  ;;  %1871 = vst.msk [vmem:[#allocation2 + $0xd0] sm:$0xff] %vm389_vm0, %v5882_v17  ;;  %v1475_v10 = vmul.f32 %v1172_v32, %v6848_v42  ;;  %v1476_v11 = vmul.f32 %v1172_v32, %v6852_v22  ;;  %v5888_v39 = vpop.eup %5887  ;;  %v7118_v32 = vpop.permute.xlu1 %2655 }
 0x1fd   : > { %v1589_v14 = vmul.f32 1.442695, %v1461_v30  ;;  %v1591_v57 = vmul.f32 1.442695, %v1462_v21  ;;  %1872 = vst.msk [vmem:[#allocation2 + $0xd8] sm:$0xff] %vm389_vm0, %v5884_v55  ;;  %v2004_v61 = vcombine.high %v7053_v43, %v7053_v43  ;;  %1873 = vst.msk [vmem:[#allocation2 + $0xe0] sm:$0xff] %vm389_vm0, %v5886_v52  ;;  %v5890_v6 = vpop.eup %5889  ;;  %v2005_v30 = vcombine.high %v7067_v48, %v7067_v48 }
 0x1fe   : > { %v1593_v31 = vmul.f32 1.442695, %v1463_v25  ;;  %v1595_v36 = vmul.f32 1.442695, %v1464_v45  ;;  %v1597_v15 = vmul.f32 1.442695, %v1465_v41  ;;  %v5892_v2 = vpop.eup %5891  ;;  %v2012_v21 = vrot.slane %v7053_v43, %v6856_v60  ;;  %v7120_v45 = vpop.permute.xlu0 %2651 }
 0x1ff   : > { %5893 = vpow2.f32 %v1589_v14  ;;  %v1599_v12 = vmul.f32 1.442695, %v1466_v46  ;;  %v1601_v59 = vmul.f32 1.442695, %v1467_v0  ;;  %v1603_v63 = vmul.f32 1.442695, %v1468_v1 }
 0x200   : > { %1874 = vst.msk [vmem:[#allocation2 + $0xe8] sm:$0xff] %vm389_vm0, %v5888_v39  ;;  %5895 = vpow2.f32 %v1591_v57  ;;  %v1605_v18 = vmul.f32 1.442695, %v1469_v3  ;;  %v1607_v49 = vmul.f32 1.442695, %v1470_v8  ;;  %1875 = vst.msk [vmem:[#allocation2 + $0xf0] sm:$0xff] %vm389_vm0, %v5890_v6  ;;  %v2019_v25 = vrot.slane %v7067_v48, %v6856_v60  ;;  %v7140_v57 = vpop.permute.xlu1 %2667 }
 0x201   : > { %v1609_v33 = vmul.f32 1.442695, %v1471_v20  ;;  %5897 = vpow2.f32 %v1593_v31  ;;  %v1611_v5 = vmul.f32 1.442695, %v1472_v24  ;;  %v1613_v9 = vmul.f32 1.442695, %v1473_v13 }
 0x202   : > { %v1615_v26 = vmul.f32 1.442695, %v1474_v27  ;;  %1876 = vst.msk [vmem:[#allocation2 + $0xf8] sm:$0xff] %vm389_vm0, %v5892_v2  ;;  %5899 = vpow2.f32 %v1595_v36  ;;  %v1617_v44 = vmul.f32 1.442695, %v1475_v10  ;;  %v2026_v50 = vrot.slane %v2004_v61, %v6856_v60  ;;  %v7142_v52 = vpop.permute.xlu0 %2663  ;;  %v8806_v36 = vld [vmem:[#allocation55_spill] sm:$0xff] }
 0x203   : > { %v1619_v51 = vmul.f32 1.442695, %v1476_v11  ;;  %5901 = vpow2.f32 %v1597_v15  ;;  %v2033_v41 = vrot.slane %v2005_v30, %v6856_v60  ;;  %v896_v46 = vcombine.high %v7058_v37, %v7058_v37  ;;  %v8807_v61 = vld [vmem:[#allocation54_spill] sm:$0xff]  ;;  %v8813_v2 = vld [vmem:[#allocation65_spill] sm:$0xff] }
 0x204   : > { %5903 = vpow2.f32 %v1599_v12  ;;  %v7127_v62 = vrot.slane %v7058_v37, %v6856_v60  ;;  %v2034_v43 = vcombine.high %v2012_v21, %v2012_v21  ;;  %v2035_v0 = vcombine.high %v2019_v25, %v2019_v25  ;;  %v8808_v12 = vld [vmem:[#allocation59_spill] sm:$0xff]  ;;  %v8810_v6 = vld [vmem:[#allocation62_spill] sm:$0xff]  ;;  %v8814_v30 = vld [vmem:[#allocation69_spill] sm:$0xff] }
 0x205   : > { %5905 = vpow2.f32 %v1601_v59  ;;  %v2036_v48 = vcombine.high %v2026_v50, %v2026_v50  ;;  %v2037_v1 = vcombine.high %v2033_v41, %v2033_v41  ;;  %v3152_v3 = vrot.slane %v2012_v21, %v6335_v19 }
 0x206   : > { %5907 = vpow2.f32 %v1603_v63  ;;  %v3156_v8 = vrot.slane %v2026_v50, %v6335_v19  ;;  %v3160_v17 = vrot.slane %v2034_v43, %v6335_v19  ;;  %v3168_v24 = vrot.slane %v2019_v25, %v6335_v19  ;;  %v8809_v63 = vld [vmem:[#allocation58_spill] sm:$0xff]  ;;  %v8815_v25 = vld [vmem:[#allocation68_spill] sm:$0xff]  ;;  %v8816_v50 = vld [vmem:[#allocation73_spill] sm:$0xff] }
 0x207   : > { %5909 = vpow2.f32 %v1605_v18  ;;  %v3164_v20 = vrot.slane %v2036_v48, %v6335_v19  ;;  %v3172_v13 = vrot.slane %v2033_v41, %v6335_v19  ;;  %v3176_v27 = vrot.slane %v2035_v0, %v6335_v19 }
 0x208   : > { %5911 = vpow2.f32 %v1607_v49  ;;  %v3180_v55 = vrot.slane %v2037_v1, %v6335_v19  ;;  %v3469_v10 = vmul.f32 %v3152_v3, %v6641_v56  ;;  %v3470_v11 = vmul.f32 %v3152_v3, %v6655_v53  ;;  %v8812_v49 = vld [vmem:[#allocation66_spill] sm:$0xff] }
 0x209   : > { %5913 = vpow2.f32 %v1609_v33  ;;  %v3471_v14 = vmul.f32 %v3156_v8, %v6639_v23  ;;  %v3472_v31 = vmul.f32 %v3156_v8, %v6653_v54  ;;  %v3473_v15 = vmul.f32 %v3160_v17, %v8806_v36  ;;  %v8811_v54 = vld [vmem:[#allocation61_spill] sm:$0xff]  ;;  %v6127_v8 = vld [vmem:[%s6281_s17 + $0x18] sm:$0xff] }
 0x20a   : > { %5915 = vpow2.f32 %v1611_v5  ;;  %v3474_v39 = vmul.f32 %v3160_v17, %v8807_v61  ;;  %v3475_v59 = vmul.f32 %v3164_v20, %v8808_v12  ;;  %v3476_v56 = vmul.f32 %v3164_v20, %v8809_v63  ;;  %3597 = vst.msk [vmem:[#allocation3] sm:$0xff] %vm389_vm0, %v3469_v10  ;;  %3598 = vst.msk [vmem:[#allocation3 + $0x8] sm:$0xff] %vm389_vm0, %v3470_v11  ;;  %v8820_v11 = vld [vmem:[#allocation112_spill] sm:$0xff] }
 0x20b   : > { %5917 = vpow2.f32 %v1613_v9  ;;  %v3477_v53 = vmul.f32 %v3168_v24, %v8810_v6  ;;  %3599 = vst.msk [vmem:[#allocation3 + $0x10] sm:$0xff] %vm389_vm0, %v3471_v14  ;;  %v3478_v18 = vmul.f32 %v3168_v24, %v8811_v54  ;;  %v3479_v33 = vmul.f32 %v3172_v13, %v8812_v49  ;;  %3600 = vst.msk [vmem:[#allocation3 + $0x18] sm:$0xff] %vm389_vm0, %v3472_v31  ;;  %v8819_v24 = vld [vmem:[#allocation106_spill] sm:$0xff] }
 0x20c   : > { %v5894_v23 = vpop.eup %5893  ;;  %5919 = vpow2.f32 %v1615_v26  ;;  %v3480_v5 = vmul.f32 %v3172_v13, %v8813_v2  ;;  %3601 = vst.msk [vmem:[#allocation3 + $0x20] sm:$0xff] %vm389_vm0, %v3473_v15  ;;  %3602 = vst.msk [vmem:[#allocation3 + $0x28] sm:$0xff] %vm389_vm0, %v3474_v39  ;;  %v3481_v21 = vmul.f32 %v3176_v27, %v8814_v30  ;;  %v3482_v26 = vmul.f32 %v3176_v27, %v8815_v25  ;;  %v7188_v13 = vpop.permute.xlu1 %2871  ;;  %v8821_v39 = vld [vmem:[#allocation84_spill] sm:$0xff] }
 0x20d   : > { %v5896_v9 = vpop.eup %5895  ;;  %5921 = vpow2.f32 %v1617_v44  ;;  %1845 = vst.msk [vmem:[#allocation2] sm:$0xff] %vm389_vm0, %v5894_v23  ;;  %v3483_v41 = vmul.f32 %v3180_v55, %v8816_v50  ;;  %3603 = vst.msk [vmem:[#allocation3 + $0x30] sm:$0xff] %vm389_vm0, %v3475_v59  ;;  %v8817_v44 = vld [vmem:[#allocation72_spill] sm:$0xff]  ;;  %v910_v48 = vrot.slane %v896_v46, %v6856_v60  ;;  %v911_v1 = vcombine.high %v7127_v62, %v7127_v62  ;;  %v8818_v46 = vld [vmem:[#allocation111_spill] sm:$0xff]  ;;  %v7190_v27 = vpop.permute.xlu0 %2867 }
 0x20e   : > { %3604 = vst.msk [vmem:[#allocation3 + $0x38] sm:$0xff] %vm389_vm0, %v3476_v56  ;;  %3605 = vst.msk [vmem:[#allocation3 + $0x40] sm:$0xff] %vm389_vm0, %v3477_v53  ;;  %v5898_v43 = vpop.eup %5897  ;;  %5923 = vpow2.f32 %v1619_v51  ;;  %v3484_v0 = vmul.f32 %v3180_v55, %v8817_v44  ;;  %v919_v51 = vrot.slane %v7127_v62, %v6856_v60  ;;  %v7182_v17 = vmul.f32 %v6127_v8, %v7058_v37 }
 0x20f   : > { %1846 = vst.msk [vmem:[#allocation2 + $0x8] sm:$0xff] %vm389_vm0, %v5896_v9  ;;  %3606 = vst.msk [vmem:[#allocation3 + $0x48] sm:$0xff] %vm389_vm0, %v3478_v18  ;;  %v5900_v3 = vpop.eup %5899  ;;  %v7185_v20 = vmul.f32 0.6931472, %v8818_v46  ;;  %5925 = vlog2.f32 %v8819_v24  ;;  %v912_v10 = vcombine.high %v910_v48, %v910_v48  ;;  %v926_v62 = vrot.slane %v910_v48, %v6856_v60 }
 0x210   : > { %3607 = vst.msk [vmem:[#allocation3 + $0x50] sm:$0xff] %vm389_vm0, %v3479_v33  ;;  %3608 = vst.msk [vmem:[#allocation3 + $0x58] sm:$0xff] %vm389_vm0, %v3480_v5  ;;  %v5902_v55 = vpop.eup %5901  ;;  %v933_v37 = vrot.slane %v911_v1, %v6856_v60  ;;  %v7197_v14 = vmul.f32 0.6931472, %v8820_v11  ;;  %v941_v36 = vcombine.high %v919_v51, %v919_v51  ;;  %v1240_v15 = vrot.slane %v919_v51, %v6335_v19  ;;  %v7224_v44 = vpop.permute.xlu1 %2883 }
 0x211   : > { %1847 = vst.msk [vmem:[#allocation2 + $0x10] sm:$0xff] %vm389_vm0, %v5898_v43  ;;  %3609 = vst.msk [vmem:[#allocation3 + $0x60] sm:$0xff] %vm389_vm0, %v3481_v21  ;;  %v5904_v31 = vpop.eup %5903  ;;  %v7203_v61 = vrot.slane %v7182_v17, %v6856_v60  ;;  %v940_v63 = vrot.slane %v912_v10, %v6856_v60  ;;  %v942_v56 = vcombine.high %v926_v62, %v926_v62 }
 0x212   : > { %3610 = vst.msk [vmem:[#allocation3 + $0x68] sm:$0xff] %vm389_vm0, %v3482_v26  ;;  %3611 = vst.msk [vmem:[#allocation3 + $0x70] sm:$0xff] %vm389_vm0, %v3483_v41  ;;  %v5906_v59 = vpop.eup %5905  ;;  %v943_v6 = vcombine.high %v933_v37, %v933_v37  ;;  %v1244_v53 = vrot.slane %v933_v37, %v6335_v19  ;;  %v1248_v54 = vrot.slane %v941_v36, %v6335_v19 }
 0x213   : > { %1848 = vst.msk [vmem:[#allocation2 + $0x18] sm:$0xff] %vm389_vm0, %v5900_v3  ;;  %3612 = vst.msk [vmem:[#allocation3 + $0x78] sm:$0xff] %vm389_vm0, %v3484_v0  ;;  %v5908_v23 = vpop.eup %5907  ;;  %v1256_v18 = vrot.slane %v926_v62, %v6335_v19  ;;  %v1509_v49 = vmul.f32 %v1240_v15, %v6848_v42  ;;  %v2136_v33 = vcombine.high %v7182_v17, %v7182_v17  ;;  %v7226_v0 = vpop.permute.xlu0 %2879 }
 0x214   : > { %1849 = vst.msk [vmem:[#allocation2 + $0x20] sm:$0xff] %vm389_vm0, %v5902_v55  ;;  %1850 = vst.msk [vmem:[#allocation2 + $0x28] sm:$0xff] %vm389_vm0, %v5904_v31  ;;  %v5910_v2 = vpop.eup %5909  ;;  %v944_v5 = vcombine.high %v940_v63, %v940_v63  ;;  %v1252_v9 = vrot.slane %v943_v6, %v6335_v19  ;;  %v1260_v30 = vrot.slane %v940_v63, %v6335_v19 }
 0x215   : > { %1851 = vst.msk [vmem:[#allocation2 + $0x30] sm:$0xff] %vm389_vm0, %v5906_v59  ;;  %1852 = vst.msk [vmem:[#allocation2 + $0x38] sm:$0xff] %vm389_vm0, %v5908_v23  ;;  %v1264_v21 = vrot.slane %v942_v56, %v6335_v19  ;;  %v5912_v25 = vpop.eup %5911  ;;  %v1510_v26 = vmul.f32 %v1240_v15, %v6852_v22  ;;  %v1511_v50 = vmul.f32 %v1244_v53, %v6848_v42  ;;  %v1685_v15 = vmul.f32 1.442695, %v1509_v49 }
 0x216   : > { %1853 = vst.msk [vmem:[#allocation2 + $0x40] sm:$0xff] %vm389_vm0, %v5910_v2  ;;  %v1512_v41 = vmul.f32 %v1244_v53, %v6852_v22  ;;  %v1513_v43 = vmul.f32 %v1248_v54, %v6848_v42  ;;  %v5914_v48 = vpop.eup %5913  ;;  %1854 = vst.msk [vmem:[#allocation2 + $0x48] sm:$0xff] %vm389_vm0, %v5912_v25  ;;  %v1268_v1 = vrot.slane %v944_v5, %v6335_v19 }
 0x217   : > { %v1514_v3 = vmul.f32 %v1248_v54, %v6852_v22  ;;  %v1515_v51 = vmul.f32 %v1252_v9, %v6848_v42  ;;  %v1516_v8 = vmul.f32 %v1252_v9, %v6852_v22  ;;  %v5916_v46 = vpop.eup %5915  ;;  %1855 = vst.msk [vmem:[#allocation2 + $0x50] sm:$0xff] %vm389_vm0, %v5914_v48  ;;  %v1517_v24 = vmul.f32 %v1256_v18, %v6848_v42  ;;  %v7250_v25 = vpop.permute.xlu0 %2891 }
 0x218   : > { %v1518_v55 = vmul.f32 %v1256_v18, %v6852_v22  ;;  %v1519_v10 = vmul.f32 %v1260_v30, %v6848_v42  ;;  %v1520_v62 = vmul.f32 %v1260_v30, %v6852_v22  ;;  %v5918_v37 = vpop.eup %5917  ;;  %1856 = vst.msk [vmem:[#allocation2 + $0x58] sm:$0xff] %vm389_vm0, %v5916_v46  ;;  %v1521_v11 = vmul.f32 %v1264_v21, %v6848_v42 }
 0x219   : > { %v1522_v31 = vmul.f32 %v1264_v21, %v6852_v22  ;;  %v1523_v36 = vmul.f32 %v1268_v1, %v6848_v42  ;;  %v5920_v59 = vpop.eup %5919  ;;  %1857 = vst.msk [vmem:[#allocation2 + $0x60] sm:$0xff] %vm389_vm0, %v5918_v37  ;;  %v1524_v63 = vmul.f32 %v1268_v1, %v6852_v22  ;;  %v1687_v56 = vmul.f32 1.442695, %v1510_v26  ;;  %v7248_v21 = vpop.permute.xlu1 %2895  ;;  %v8824_v37 = vld [vmem:[#allocation82_spill] sm:$0xff] }
 0x21a   : > { %v1689_v6 = vmul.f32 1.442695, %v1511_v50  ;;  %v1691_v53 = vmul.f32 1.442695, %v1512_v41  ;;  %v5922_v23 = vpop.eup %5921  ;;  %1858 = vst.msk [vmem:[#allocation2 + $0x68] sm:$0xff] %vm389_vm0, %v5920_v59  ;;  %5927 = vpow2.f32 %v1685_v15  ;;  %v2151_v2 = vcombine.high %v7203_v61, %v7203_v61 }
 0x21b   : > { %v1693_v54 = vmul.f32 1.442695, %v1513_v43  ;;  %v1695_v18 = vmul.f32 1.442695, %v1514_v3  ;;  %v5924_v5 = vpop.eup %5923  ;;  %1859 = vst.msk [vmem:[#allocation2 + $0x70] sm:$0xff] %vm389_vm0, %v5922_v23  ;;  %5929 = vpow2.f32 %v1687_v56  ;;  %v7260_v46 = vrot.slane %v2136_v33, %v6856_v60  ;;  %v8827_v23 = vld [vmem:[#allocation75_spill] sm:$0xff] }
 0x21c   : > { %v1697_v49 = vmul.f32 1.442695, %v1515_v51  ;;  %v1699_v9 = vmul.f32 1.442695, %v1516_v8  ;;  %v1701_v30 = vmul.f32 1.442695, %v1517_v24  ;;  %v5926_v26 = vpop.eup %5925  ;;  %5931 = vpow2.f32 %v1689_v6 }
 0x21d   : > { %1860 = vst.msk [vmem:[#allocation2 + $0x78] sm:$0xff] %vm389_vm0, %v5924_v5  ;;  %v1703_v50 = vmul.f32 1.442695, %v1518_v55  ;;  %v1705_v41 = vmul.f32 1.442695, %v1519_v10  ;;  %5933 = vpow2.f32 %v1691_v53  ;;  %v2159_v51 = vrot.slane %v7203_v61, %v6856_v60  ;;  %v8822_v55 = vld [vmem:[#allocation78_spill] sm:$0xff]  ;;  %v7278_v59 = vpop.permute.xlu1 %2907 }
 0x21e   : > { %v1707_v43 = vmul.f32 1.442695, %v1520_v62  ;;  %v1709_v48 = vmul.f32 1.442695, %v1521_v11  ;;  %v1711_v1 = vmul.f32 1.442695, %v1522_v31  ;;  %5935 = vpow2.f32 %v1693_v54 }
 0x21f   : > { %v1713_v3 = vmul.f32 1.442695, %v1523_v36  ;;  %v2173_v8 = vrot.slane %v2151_v2, %v6856_v60  ;;  %5937 = vpow2.f32 %v1695_v18  ;;  %v1715_v24 = vmul.f32 1.442695, %v1524_v63  ;;  %v7280_v63 = vpop.permute.xlu0 %2903  ;;  %v8826_v6 = vld [vmem:[#allocation76_spill] sm:$0xff]  ;;  %v8828_v18 = vld [vmem:[#allocation81_spill] sm:$0xff] }
 0x220   : > { %v8823_v10 = vmax.f32 %v8822_v55, 0.0  ;;  %v8825_v11 = vmax.f32 %v8824_v37, 0.0  ;;  %5939 = vpow2.f32 %v1697_v49  ;;  %v2181_v61 = vcombine.high %v2159_v51, %v2159_v51  ;;  %v8829_v5 = vld [vmem:[#allocation80_spill] sm:$0xff]  ;;  %v8833_v37 = vld [vmem:[#allocation89_spill] sm:$0xff] }
 0x221   : > { %v2183_v36 = vcombine.high %v2173_v8, %v2173_v8  ;;  %v3248_v15 = vrot.slane %v2159_v51, %v6335_v19  ;;  %5941 = vpow2.f32 %v1699_v9  ;;  %v3252_v17 = vrot.slane %v2173_v8, %v6335_v19  ;;  %v8830_v9 = vld [vmem:[#allocation86_spill] sm:$0xff]  ;;  %v8831_v8 = vld [vmem:[#allocation85_spill] sm:$0xff] }
 0x222   : > { %v7265_v62 = vadd.f32 %v7185_v20, %v8823_v10  ;;  %v7270_v31 = vadd.f32 %v7197_v14, %v8825_v11  ;;  %v2152_v33 = vcombine.high %v7260_v46, %v7260_v46  ;;  %5943 = vpow2.f32 %v1701_v30  ;;  %v8832_v10 = vld [vmem:[#allocation90_spill] sm:$0xff] }
 0x223   : > { %v3256_v14 = vrot.slane %v2181_v61, %v6335_v19  ;;  %v3260_v56 = vrot.slane %v2183_v36, %v6335_v19  ;;  %v3517_v53 = vmul.f32 %v3248_v15, %v8826_v6  ;;  %5945 = vpow2.f32 %v1703_v50 }
 0x224   : > { %v847_v20 = vcombine.high %v7265_v62, %v7265_v62  ;;  %v3518_v54 = vmul.f32 %v3248_v15, %v8827_v23  ;;  %v3519_v2 = vmul.f32 %v3252_v17, %v8828_v18  ;;  %v3520_v49 = vmul.f32 %v3252_v17, %v8829_v5  ;;  %v8836_v23 = vld [vmem:[#allocation96_spill] sm:$0xff]  ;;  %v8837_v18 = vld [vmem:[#allocation97_spill] sm:$0xff] }
 0x225   : > { %5947 = vpow2.f32 %v1705_v41  ;;  %v3521_v51 = vmul.f32 %v3256_v14, %v8830_v9  ;;  %v3522_v55 = vmul.f32 %v3256_v14, %v8831_v8  ;;  %v3523_v30 = vmul.f32 %v3260_v56, %v8832_v10  ;;  %3645 = vst.msk [vmem:[#allocation3 + $0x180] sm:$0xff] %vm389_vm0, %v3517_v53  ;;  %v7313_v14 = vpop.permute.xlu1 %2919 }
 0x226   : > { %5949 = vpow2.f32 %v1707_v43  ;;  %v3524_v11 = vmul.f32 %v3260_v56, %v8833_v37  ;;  %3646 = vst.msk [vmem:[#allocation3 + $0x188] sm:$0xff] %vm389_vm0, %v3518_v54  ;;  %3647 = vst.msk [vmem:[#allocation3 + $0x190] sm:$0xff] %vm389_vm0, %v3519_v2  ;;  %v7297_v50 = vrot.slane %v2152_v33, %v6856_v60  ;;  %v854_v41 = vrot.slane %v7265_v62, %v6856_v60  ;;  %v7315_v56 = vpop.permute.xlu0 %2915 }
 0x227   : > { %3648 = vst.msk [vmem:[#allocation3 + $0x198] sm:$0xff] %vm389_vm0, %v3520_v49  ;;  %5951 = vpow2.f32 %v1709_v48  ;;  %3649 = vst.msk [vmem:[#allocation3 + $0x1a0] sm:$0xff] %vm389_vm0, %v3521_v51  ;;  %v861_v43 = vrot.slane %v847_v20, %v6856_v60  ;;  %v994_v61 = vcombine.high %v7270_v31, %v7270_v31  ;;  %v7307_v36 = vmul.f32 0.6931472, %v5926_v26  ;;  %v5928_v15 = vpop.eup %5927 }
 0x228   : > { %3650 = vst.msk [vmem:[#allocation3 + $0x1a8] sm:$0xff] %vm389_vm0, %v3522_v55  ;;  %3651 = vst.msk [vmem:[#allocation3 + $0x1b0] sm:$0xff] %vm389_vm0, %v3523_v30  ;;  %5953 = vpow2.f32 %v1711_v1  ;;  %v3268_v48 = vrot.slane %v7297_v50, %v6335_v19  ;;  %v862_v17 = vcombine.high %v854_v41, %v854_v41  ;;  %v870_v33 = vrot.slane %v854_v41, %v6856_v60  ;;  %v5930_v20 = vpop.eup %5929 }
 0x229   : > { %3652 = vst.msk [vmem:[#allocation3 + $0x1b8] sm:$0xff] %vm389_vm0, %v3524_v11  ;;  %8834 = vst [vmem:[#allocation55_spill] sm:$0xff] %v7313_v14  ;;  %5955 = vpow2.f32 %v1713_v3  ;;  %v863_v26 = vcombine.high %v861_v43, %v861_v43  ;;  %v877_v6 = vrot.slane %v861_v43, %v6856_v60  ;;  %v7321_v1 = vrot.slane %v7270_v31, %v6856_v60  ;;  %v5932_v53 = vpop.eup %5931 }
 0x22a   : > { %8835 = vst [vmem:[#allocation54_spill] sm:$0xff] %v7315_v56  ;;  %1893 = vst.msk [vmem:[#allocation2 + $0x180] sm:$0xff] %vm389_vm0, %v5928_v15  ;;  %5957 = vpow2.f32 %v1715_v24  ;;  %v3528_v54 = vmul.f32 %v3268_v48, %v8836_v23  ;;  %v3527_v2 = vmul.f32 %v3268_v48, %v8837_v18  ;;  %v884_v5 = vrot.slane %v862_v17, %v6856_v60  ;;  %v5934_v3 = vpop.eup %5933 }
 0x22b   : > { %1894 = vst.msk [vmem:[#allocation2 + $0x188] sm:$0xff] %vm389_vm0, %v5930_v20  ;;  %1895 = vst.msk [vmem:[#allocation2 + $0x190] sm:$0xff] %vm389_vm0, %v5932_v53  ;;  %v891_v49 = vrot.slane %v863_v26, %v6856_v60  ;;  %v892_v9 = vcombine.high %v870_v33, %v870_v33  ;;  %v893_v51 = vcombine.high %v877_v6, %v877_v6  ;;  %v5936_v55 = vpop.eup %5935  ;;  %v7350_v53 = vpop.permute.xlu0 %2927 }
 0x22c   : > { %v1208_v8 = vrot.slane %v870_v33, %v6335_v19  ;;  %1896 = vst.msk [vmem:[#allocation2 + $0x198] sm:$0xff] %vm389_vm0, %v5934_v3  ;;  %3656 = vst.msk [vmem:[#allocation3 + $0x1d8] sm:$0xff] %vm389_vm0, %v3528_v54  ;;  %v894_v24 = vcombine.high %v884_v5, %v884_v5  ;;  %v1212_v10 = vrot.slane %v884_v5, %v6335_v19  ;;  %v5938_v11 = vpop.eup %5937 }
 0x22d   : > { %3655 = vst.msk [vmem:[#allocation3 + $0x1d0] sm:$0xff] %vm389_vm0, %v3527_v2  ;;  %v1224_v30 = vrot.slane %v877_v6, %v6335_v19  ;;  %v7336_v37 = vrot.slane %v994_v61, %v6856_v60  ;;  %1897 = vst.msk [vmem:[#allocation2 + $0x1a0] sm:$0xff] %vm389_vm0, %v5936_v55  ;;  %v895_v41 = vcombine.high %v891_v49, %v891_v49  ;;  %v5940_v17 = vpop.eup %5939  ;;  %v7348_v6 = vpop.permute.xlu1 %2931 }
 0x22e   : > { %v1216_v43 = vrot.slane %v892_v9, %v6335_v19  ;;  %v1228_v15 = vrot.slane %v891_v49, %v6335_v19  ;;  %v1232_v48 = vrot.slane %v893_v51, %v6335_v19  ;;  %1898 = vst.msk [vmem:[#allocation2 + $0x1a8] sm:$0xff] %vm389_vm0, %v5938_v11  ;;  %v1220_v33 = vrot.slane %v894_v24, %v6335_v19  ;;  %v5942_v23 = vpop.eup %5941 }
 0x22f   : > { %v1493_v20 = vmul.f32 %v1208_v8, %v6848_v42  ;;  %v1494_v61 = vmul.f32 %v1208_v8, %v6852_v22  ;;  %v1009_v26 = vcombine.high %v7321_v1, %v7321_v1  ;;  %8838 = vst [vmem:[#allocation59_spill] sm:$0xff] %v7348_v6  ;;  %8839 = vst [vmem:[#allocation58_spill] sm:$0xff] %v7350_v53  ;;  %v5944_v3 = vpop.eup %5943 }
 0x230   : > { %1899 = vst.msk [vmem:[#allocation2 + $0x1b0] sm:$0xff] %vm389_vm0, %v5940_v17  ;;  %v1236_v54 = vrot.slane %v895_v41, %v6335_v19  ;;  %v1495_v18 = vmul.f32 %v1212_v10, %v6848_v42  ;;  %v1496_v2 = vmul.f32 %v1212_v10, %v6852_v22  ;;  %v1497_v5 = vmul.f32 %v1216_v43, %v6848_v42  ;;  %v5946_v55 = vpop.eup %5945 }
 0x231   : > { %1900 = vst.msk [vmem:[#allocation2 + $0x1b8] sm:$0xff] %vm389_vm0, %v5942_v23  ;;  %v1498_v49 = vmul.f32 %v1216_v43, %v6852_v22  ;;  %v1499_v9 = vmul.f32 %v1220_v33, %v6848_v42  ;;  %v1500_v51 = vmul.f32 %v1220_v33, %v6852_v22  ;;  %v1501_v8 = vmul.f32 %v1224_v30, %v6848_v42  ;;  %v7375_v14 = vpop.permute.xlu1 %2943 }
 0x232   : > { %1901 = vst.msk [vmem:[#allocation2 + $0x1c0] sm:$0xff] %vm389_vm0, %v5944_v3  ;;  %v1502_v24 = vmul.f32 %v1224_v30, %v6852_v22  ;;  %v1503_v10 = vmul.f32 %v1228_v15, %v6848_v42  ;;  %v1504_v11 = vmul.f32 %v1228_v15, %v6852_v22  ;;  %v1505_v41 = vmul.f32 %v1232_v48, %v6848_v42  ;;  %v5948_v17 = vpop.eup %5947 }
 0x233   : > { %1902 = vst.msk [vmem:[#allocation2 + $0x1c8] sm:$0xff] %vm389_vm0, %v5946_v55  ;;  %v1506_v43 = vmul.f32 %v1232_v48, %v6852_v22  ;;  %v1507_v33 = vmul.f32 %v1236_v54, %v6848_v42  ;;  %v1653_v23 = vmul.f32 1.442695, %v1493_v20  ;;  %v1655_v12 = vmul.f32 1.442695, %v1494_v61  ;;  %v5950_v34 = vpop.eup %5949  ;;  %1903 = vst.msk [vmem:[#allocation2 + $0x1d0] sm:$0xff] %vm389_vm0, %v5948_v17  ;;  %v7377_v20 = vpop.permute.xlu0 %2939 }
 0x234   : > { %v1508_v30 = vmul.f32 %v1236_v54, %v6852_v22  ;;  %v1657_v3 = vmul.f32 1.442695, %v1495_v18  ;;  %v1659_v53 = vmul.f32 1.442695, %v1496_v2  ;;  %v1661_v6 = vmul.f32 1.442695, %v1497_v5  ;;  %v5952_v15 = vpop.eup %5951 }
 0x235   : > { %1904 = vst.msk [vmem:[#allocation2 + $0x1d8] sm:$0xff] %vm389_vm0, %v5950_v34  ;;  %5959 = vpow2.f32 %v1653_v23  ;;  %v1663_v56 = vmul.f32 1.442695, %v1498_v49  ;;  %v1665_v55 = vmul.f32 1.442695, %v1499_v9  ;;  %v1010_v48 = vcombine.high %v7336_v37, %v7336_v37  ;;  %8840 = vst [vmem:[#allocation62_spill] sm:$0xff] %v7377_v20  ;;  %v5954_v61 = vpop.eup %5953 }
 0x236   : > { %1905 = vst.msk [vmem:[#allocation2 + $0x1e0] sm:$0xff] %vm389_vm0, %v5952_v15  ;;  %5961 = vpow2.f32 %v1655_v12  ;;  %v1667_v54 = vmul.f32 1.442695, %v1500_v51  ;;  %v1669_v18 = vmul.f32 1.442695, %v1501_v8  ;;  %v5956_v5 = vpop.eup %5955  ;;  %1906 = vst.msk [vmem:[#allocation2 + $0x1e8] sm:$0xff] %vm389_vm0, %v5954_v61  ;;  %v1017_v15 = vrot.slane %v7321_v1, %v6856_v60  ;;  %v7390_v1 = vpop.permute.xlu1 %2955 }
 0x237   : > { %v1671_v2 = vmul.f32 1.442695, %v1502_v24  ;;  %5963 = vpow2.f32 %v1657_v3  ;;  %v1673_v34 = vmul.f32 1.442695, %v1503_v10  ;;  %v1675_v49 = vmul.f32 1.442695, %v1504_v11  ;;  %v5958_v17 = vpop.eup %5957 }
 0x238   : > { %v1677_v9 = vmul.f32 1.442695, %v1505_v41  ;;  %1907 = vst.msk [vmem:[#allocation2 + $0x1f0] sm:$0xff] %vm389_vm0, %v5956_v5  ;;  %5965 = vpow2.f32 %v1659_v53  ;;  %v1679_v23 = vmul.f32 1.442695, %v1506_v43  ;;  %1908 = vst.msk [vmem:[#allocation2 + $0x1f8] sm:$0xff] %vm389_vm0, %v5958_v17  ;;  %v1024_v12 = vrot.slane %v7336_v37, %v6856_v60 }
 0x239   : > { %v1681_v20 = vmul.f32 1.442695, %v1507_v33  ;;  %5967 = vpow2.f32 %v1661_v6  ;;  %v1031_v51 = vrot.slane %v1009_v26, %v6856_v60  ;;  %v1038_v8 = vrot.slane %v1010_v48, %v6856_v60  ;;  %8841 = vst [vmem:[#allocation61_spill] sm:$0xff] %v7390_v1  ;;  %v7392_v33 = vpop.permute.xlu0 %2951 }
 0x23a   : > { %5969 = vpow2.f32 %v1663_v56  ;;  %v1683_v24 = vmul.f32 1.442695, %v1508_v30  ;;  %v1039_v10 = vcombine.high %v1017_v15, %v1017_v15  ;;  %v1304_v53 = vrot.slane %v1017_v15, %v6335_v19  ;;  %8842 = vst [vmem:[#allocation66_spill] sm:$0xff] %v7392_v33 }
 0x23b   : > { %5971 = vpow2.f32 %v1665_v55  ;;  %v1040_v11 = vcombine.high %v1024_v12, %v1024_v12  ;;  %v1041_v41 = vcombine.high %v1031_v51, %v1031_v51  ;;  %v1042_v43 = vcombine.high %v1038_v8, %v1038_v8 }
 0x23c   : > { %5973 = vpow2.f32 %v1667_v54  ;;  %v1308_v37 = vrot.slane %v1031_v51, %v6335_v19  ;;  %v1312_v26 = vrot.slane %v1039_v10, %v6335_v19  ;;  %v7398_v56 = vrot.slane %v7260_v46, %v6856_v60  ;;  %v7415_v51 = vpop.permute.xlu1 %2775 }
 0x23d   : > { %5975 = vpow2.f32 %v1669_v18  ;;  %v1316_v6 = vrot.slane %v1041_v41, %v6335_v19  ;;  %v1320_v30 = vrot.slane %v1024_v12, %v6335_v19  ;;  %v1324_v3 = vrot.slane %v1038_v8, %v6335_v19  ;;  %v7417_v8 = vpop.permute.xlu0 %2771 }
 0x23e   : > { %5977 = vpow2.f32 %v1671_v2  ;;  %v1328_v55 = vrot.slane %v1040_v11, %v6335_v19  ;;  %v1332_v48 = vrot.slane %v1042_v43, %v6335_v19  ;;  %v1541_v61 = vmul.f32 %v1304_v53, %v6848_v42  ;;  %8843 = vst [vmem:[#allocation65_spill] sm:$0xff] %v7417_v8 }
 0x23f   : > { %5979 = vpow2.f32 %v1673_v34  ;;  %v1542_v54 = vmul.f32 %v1304_v53, %v6852_v22  ;;  %v1543_v46 = vmul.f32 %v1308_v37, %v6848_v42  ;;  %v1544_v18 = vmul.f32 %v1308_v37, %v6852_v22 }
 0x240   : > { %5981 = vpow2.f32 %v1675_v49  ;;  %v1545_v5 = vmul.f32 %v1312_v26, %v6848_v42  ;;  %v1546_v17 = vmul.f32 %v1312_v26, %v6852_v22  ;;  %v1547_v2 = vmul.f32 %v1316_v6, %v6848_v42 }
 0x241   : > { %5983 = vpow2.f32 %v1677_v9  ;;  %v1548_v15 = vmul.f32 %v1316_v6, %v6852_v22  ;;  %v1549_v12 = vmul.f32 %v1320_v30, %v6848_v42  ;;  %v1550_v34 = vmul.f32 %v1320_v30, %v6852_v22 }
 0x242   : > { %v5960_v10 = vpop.eup %5959  ;;  %5985 = vpow2.f32 %v1679_v23  ;;  %v1551_v49 = vmul.f32 %v1324_v3, %v6848_v42  ;;  %v1552_v53 = vmul.f32 %v1324_v3, %v6852_v22  ;;  %v1553_v11 = vmul.f32 %v1328_v55, %v6848_v42 }
 0x243   : > { %v5962_v41 = vpop.eup %5961  ;;  %5987 = vpow2.f32 %v1681_v20  ;;  %1877 = vst.msk [vmem:[#allocation2 + $0x100] sm:$0xff] %vm389_vm0, %v5960_v10  ;;  %v1554_v9 = vmul.f32 %v1328_v55, %v6852_v22  ;;  %v1555_v43 = vmul.f32 %v1332_v48, %v6848_v42  ;;  %v1749_v37 = vmul.f32 1.442695, %v1541_v61 }
 0x244   : > { %v5964_v26 = vpop.eup %5963  ;;  %5989 = vpow2.f32 %v1683_v24  ;;  %1878 = vst.msk [vmem:[#allocation2 + $0x108] sm:$0xff] %vm389_vm0, %v5962_v41  ;;  %v1751_v23 = vmul.f32 1.442695, %v1542_v54  ;;  %v1753_v6 = vmul.f32 1.442695, %v1543_v46  ;;  %v1556_v3 = vmul.f32 %v1332_v48, %v6852_v22  ;;  %v7430_v41 = vpop.permute.xlu1 %2787 }
 0x245   : > { %v1755_v30 = vmul.f32 1.442695, %v1544_v18  ;;  %v5966_v33 = vpop.eup %5965  ;;  %1879 = vst.msk [vmem:[#allocation2 + $0x110] sm:$0xff] %vm389_vm0, %v5964_v26  ;;  %5991 = vpow2.f32 %v1749_v37  ;;  %v1757_v20 = vmul.f32 1.442695, %v1545_v5  ;;  %v7432_v48 = vpop.permute.xlu0 %2783 }
 0x246   : > { %v1759_v10 = vmul.f32 1.442695, %v1546_v17  ;;  %v5968_v1 = vpop.eup %5967  ;;  %1880 = vst.msk [vmem:[#allocation2 + $0x118] sm:$0xff] %vm389_vm0, %v5966_v33  ;;  %5993 = vpow2.f32 %v1751_v23  ;;  %v1761_v55 = vmul.f32 1.442695, %v1547_v2  ;;  %v8846_v23 = vld [vmem:[#allocation92_spill] sm:$0xff] }
 0x247   : > { %v1763_v61 = vmul.f32 1.442695, %v1548_v15  ;;  %v1765_v24 = vmul.f32 1.442695, %v1549_v12  ;;  %v5970_v8 = vpop.eup %5969  ;;  %1881 = vst.msk [vmem:[#allocation2 + $0x120] sm:$0xff] %vm389_vm0, %v5968_v1  ;;  %5995 = vpow2.f32 %v1753_v6  ;;  %v2182_v1 = vcombine.high %v7398_v56, %v7398_v56 }
 0x248   : > { %v1767_v54 = vmul.f32 1.442695, %v1550_v34  ;;  %v1769_v46 = vmul.f32 1.442695, %v1551_v49  ;;  %v1771_v18 = vmul.f32 1.442695, %v1552_v53  ;;  %v5972_v5 = vpop.eup %5971  ;;  %5997 = vpow2.f32 %v1755_v30 }
 0x249   : > { %1882 = vst.msk [vmem:[#allocation2 + $0x128] sm:$0xff] %vm389_vm0, %v5970_v8  ;;  %v1773_v33 = vmul.f32 1.442695, %v1553_v11  ;;  %v7435_v17 = vmul.f32 1.442695, %v1554_v9  ;;  %v5974_v15 = vpop.eup %5973  ;;  %1883 = vst.msk [vmem:[#allocation2 + $0x130] sm:$0xff] %vm389_vm0, %v5972_v5  ;;  %5999 = vpow2.f32 %v1757_v20  ;;  %v3264_v12 = vrot.slane %v7398_v56, %v6335_v19 }
 0x24a   : > { %v7437_v2 = vmul.f32 1.442695, %v1555_v43  ;;  %v2184_v34 = vcombine.high %v7297_v50, %v7297_v50  ;;  %v5976_v8 = vpop.eup %5975  ;;  %1884 = vst.msk [vmem:[#allocation2 + $0x138] sm:$0xff] %vm389_vm0, %v5974_v15  ;;  %6001 = vpow2.f32 %v1759_v10  ;;  %v7447_v49 = vmul.f32 1.442695, %v1556_v3  ;;  %v6128_v53 = vld [vmem:[%s6281_s17 + $0x10] sm:$0xff]  ;;  %v7475_v15 = vpop.permute.xlu1 %2799 }
 0x24b   : > { %v7451_v11 = vmul.f32 %v6128_v53, %v7265_v62  ;;  %v8844_v9 = vmax.f32 %v8821_v39, 0.0  ;;  %v5978_v37 = vpop.eup %5977  ;;  %1885 = vst.msk [vmem:[#allocation2 + $0x140] sm:$0xff] %vm389_vm0, %v5976_v8  ;;  %6003 = vpow2.f32 %v1761_v55  ;;  %v3272_v50 = vrot.slane %v2182_v1, %v6335_v19  ;;  %v8845_v56 = vld [vmem:[#allocation93_spill] sm:$0xff]  ;;  %v8847_v20 = vld [vmem:[#allocation99_spill] sm:$0xff]  ;;  %v8848_v55 = vld [vmem:[#allocation100_spill] sm:$0xff]  ;;  %v7477_v1 = vpop.permute.xlu0 %2795 }
 0x24c   : > { %v3525_v26 = vmul.f32 %v3264_v12, %v8845_v56  ;;  %v3526_v6 = vmul.f32 %v3264_v12, %v8846_v23  ;;  %v5980_v30 = vpop.eup %5979  ;;  %1886 = vst.msk [vmem:[#allocation2 + $0x148] sm:$0xff] %vm389_vm0, %v5978_v37  ;;  %6005 = vpow2.f32 %v1763_v61  ;;  %v3276_v62 = vrot.slane %v2184_v34, %v6335_v19  ;;  %v8850_v8 = vld [vmem:[#allocation108_spill] sm:$0xff] }
 0x24d   : > { %v7456_v43 = vadd.f32 %v7307_v36, %v8844_v9  ;;  %v2094_v39 = vrot.slane %v7451_v11, %v6856_v60  ;;  %v5982_v3 = vpop.eup %5981  ;;  %1887 = vst.msk [vmem:[#allocation2 + $0x150] sm:$0xff] %vm389_vm0, %v5980_v30  ;;  %6007 = vpow2.f32 %v1765_v24  ;;  %v3530_v10 = vmul.f32 %v3272_v50, %v8847_v20  ;;  %v8849_v24 = vld [vmem:[#allocation107_spill] sm:$0xff] }
 0x24e   : > { %3653 = vst.msk [vmem:[#allocation3 + $0x1c0] sm:$0xff] %vm389_vm0, %v3525_v26  ;;  %3654 = vst.msk [vmem:[#allocation3 + $0x1c8] sm:$0xff] %vm389_vm0, %v3526_v6  ;;  %v3529_v61 = vmul.f32 %v3272_v50, %v8848_v55  ;;  %v5984_v12 = vpop.eup %5983  ;;  %6009 = vpow2.f32 %v1767_v54  ;;  %v3532_v34 = vmul.f32 %v3276_v62, %v8849_v24  ;;  %v3531_v53 = vmul.f32 %v3276_v62, %v8850_v8 }
 0x24f   : > { %v945_v36 = vcombine.high %v7456_v43, %v7456_v43  ;;  %v952_v5 = vrot.slane %v7456_v43, %v6856_v60  ;;  %1888 = vst.msk [vmem:[#allocation2 + $0x158] sm:$0xff] %vm389_vm0, %v5982_v3  ;;  %v2110_v9 = vrot.slane %v2094_v39, %v6856_v60  ;;  %v5986_v37 = vpop.eup %5985  ;;  %1889 = vst.msk [vmem:[#allocation2 + $0x160] sm:$0xff] %vm389_vm0, %v5984_v12  ;;  %6011 = vpow2.f32 %v1769_v46  ;;  %v7506_v8 = vpop.permute.xlu0 %2807 }
 0x250   : > { %3658 = vst.msk [vmem:[#allocation3 + $0x1e8] sm:$0xff] %vm389_vm0, %v3530_v10  ;;  %3657 = vst.msk [vmem:[#allocation3 + $0x1e0] sm:$0xff] %vm389_vm0, %v3529_v61  ;;  %v2102_v50 = vcombine.high %v2094_v39, %v2094_v39  ;;  %v5988_v23 = vpop.eup %5987  ;;  %6013 = vpow2.f32 %v1771_v18  ;;  %v8851_v18 = vld [vmem:[#allocation109_spill] sm:$0xff]  ;;  %v8852_v10 = vld [vmem:[#allocation110_spill] sm:$0xff] }
 0x251   : > { %v959_v56 = vrot.slane %v945_v36, %v6856_v60  ;;  %v960_v26 = vcombine.high %v952_v5, %v952_v5  ;;  %1890 = vst.msk [vmem:[#allocation2 + $0x168] sm:$0xff] %vm389_vm0, %v5986_v37  ;;  %3660 = vst.msk [vmem:[#allocation3 + $0x1f8] sm:$0xff] %vm389_vm0, %v3532_v34  ;;  %v3216_v54 = vrot.slane %v2110_v9, %v6335_v19  ;;  %v5990_v30 = vpop.eup %5989  ;;  %6015 = vpow2.f32 %v1773_v33  ;;  %v7504_v34 = vpop.permute.xlu1 %2811 }
 0x252   : > { %3659 = vst.msk [vmem:[#allocation3 + $0x1f0] sm:$0xff] %vm389_vm0, %v3531_v53  ;;  %v2132_v6 = vcombine.high %v2110_v9, %v2110_v9  ;;  %v968_v46 = vrot.slane %v952_v5, %v6856_v60  ;;  %1891 = vst.msk [vmem:[#allocation2 + $0x170] sm:$0xff] %vm389_vm0, %v5988_v23  ;;  %v2124_v62 = vrot.slane %v2102_v50, %v6856_v60  ;;  %v5992_v3 = vpop.eup %5991  ;;  %6017 = vpow2.f32 %v7435_v17 }
 0x253   : > { %v961_v39 = vcombine.high %v959_v56, %v959_v56  ;;  %v975_v36 = vrot.slane %v959_v56, %v6856_v60  ;;  %1892 = vst.msk [vmem:[#allocation2 + $0x178] sm:$0xff] %vm389_vm0, %v5990_v30  ;;  %v3502_v20 = vmul.f32 %v3216_v54, %v8851_v18  ;;  %v3501_v55 = vmul.f32 %v3216_v54, %v8852_v10  ;;  %v5994_v5 = vpop.eup %5993 }
 0x254   : > { %v3224_v61 = vrot.slane %v2132_v6, %v6335_v19  ;;  %6019 = vpow2.f32 %v7437_v2  ;;  %1925 = vst.msk [vmem:[#allocation2 + $0x280] sm:$0xff] %vm389_vm0, %v5992_v3  ;;  %v3220_v33 = vrot.slane %v2124_v62, %v6335_v19  ;;  %v2134_v12 = vcombine.high %v2124_v62, %v2124_v62  ;;  %v5996_v17 = vpop.eup %5995  ;;  %1926 = vst.msk [vmem:[#allocation2 + $0x288] sm:$0xff] %vm389_vm0, %v5994_v5 }
 0x255   : > { %v982_v24 = vrot.slane %v960_v26, %v6856_v60  ;;  %6021 = vpow2.f32 %v7447_v49  ;;  %3630 = vst.msk [vmem:[#allocation3 + $0x108] sm:$0xff] %vm389_vm0, %v3502_v20  ;;  %3629 = vst.msk [vmem:[#allocation3 + $0x100] sm:$0xff] %vm389_vm0, %v3501_v55  ;;  %v989_v9 = vrot.slane %v961_v39, %v6856_v60  ;;  %v5998_v37 = vpop.eup %5997  ;;  %v990_v26 = vcombine.high %v968_v46, %v968_v46  ;;  %v7542_v5 = vpop.permute.xlu1 %2823 }
 0x256   : > { %v3506_v2 = vmul.f32 %v3224_v61, %v6989_v35  ;;  %v3505_v53 = vmul.f32 %v3224_v61, %v6991_v29  ;;  %1927 = vst.msk [vmem:[#allocation2 + $0x290] sm:$0xff] %vm389_vm0, %v5996_v17  ;;  %v3504_v50 = vmul.f32 %v3220_v33, %v6967_v47  ;;  %v3503_v56 = vmul.f32 %v3220_v33, %v6969_v16  ;;  %v6000_v23 = vpop.eup %5999  ;;  %v7544_v33 = vpop.permute.xlu0 %2819 }
 0x257   : > { %v3228_v49 = vrot.slane %v2134_v12, %v6335_v19  ;;  %1928 = vst.msk [vmem:[#allocation2 + $0x298] sm:$0xff] %vm389_vm0, %v5998_v37  ;;  %v991_v35 = vcombine.high %v975_v36, %v975_v36  ;;  %v992_v29 = vcombine.high %v982_v24, %v982_v24  ;;  %v993_v54 = vcombine.high %v989_v9, %v989_v9  ;;  %v6002_v30 = vpop.eup %6001 }
 0x258   : > { %3634 = vst.msk [vmem:[#allocation3 + $0x128] sm:$0xff] %vm389_vm0, %v3506_v2  ;;  %3633 = vst.msk [vmem:[#allocation3 + $0x120] sm:$0xff] %vm389_vm0, %v3505_v53  ;;  %v1272_v6 = vrot.slane %v968_v46, %v6335_v19  ;;  %v1276_v62 = vrot.slane %v982_v24, %v6335_v19  ;;  %v1280_v39 = vrot.slane %v990_v26, %v6335_v19  ;;  %v6004_v3 = vpop.eup %6003  ;;  %v6129_v53 = vld [vmem:[%s6281_s17 + $0x28] sm:$0xff] }
 0x259   : > { %1929 = vst.msk [vmem:[#allocation2 + $0x2a0] sm:$0xff] %vm389_vm0, %v6000_v23  ;;  %3632 = vst.msk [vmem:[#allocation3 + $0x118] sm:$0xff] %vm389_vm0, %v3504_v50  ;;  %v3508_v16 = vmul.f32 %v3228_v49, %v7016_v4  ;;  %v3507_v47 = vmul.f32 %v3228_v49, %v7018_v7  ;;  %v1284_v46 = vrot.slane %v992_v29, %v6335_v19  ;;  %v6006_v55 = vpop.eup %6005 }
 0x25a   : > { %3631 = vst.msk [vmem:[#allocation3 + $0x110] sm:$0xff] %vm389_vm0, %v3503_v56  ;;  %1930 = vst.msk [vmem:[#allocation2 + $0x2a8] sm:$0xff] %vm389_vm0, %v6002_v30  ;;  %v1288_v18 = vrot.slane %v975_v36, %v6335_v19  ;;  %v1292_v20 = vrot.slane %v989_v9, %v6335_v19  ;;  %v1296_v10 = vrot.slane %v991_v35, %v6335_v19  ;;  %v6008_v12 = vpop.eup %6007 }
 0x25b   : > { %1931 = vst.msk [vmem:[#allocation2 + $0x2b0] sm:$0xff] %vm389_vm0, %v6004_v3  ;;  %3636 = vst.msk [vmem:[#allocation3 + $0x138] sm:$0xff] %vm389_vm0, %v3508_v16  ;;  %v1300_v4 = vrot.slane %v993_v54, %v6335_v19  ;;  %v1525_v7 = vmul.f32 %v1272_v6, %v6848_v42  ;;  %v1526_v61 = vmul.f32 %v1272_v6, %v6852_v22  ;;  %v6010_v37 = vpop.eup %6009  ;;  %v5769_v6 = vpop.f32.mrf.mxu1 }
 0x25c   : > { %3635 = vst.msk [vmem:[#allocation3 + $0x130] sm:$0xff] %vm389_vm0, %v3507_v47  ;;  %v1527_v36 = vmul.f32 %v1276_v62, %v6848_v42  ;;  %1932 = vst.msk [vmem:[#allocation2 + $0x2b8] sm:$0xff] %vm389_vm0, %v6006_v55  ;;  %v1528_v24 = vmul.f32 %v1276_v62, %v6852_v22  ;;  %v1529_v17 = vmul.f32 %v1280_v39, %v6848_v42  ;;  %v6012_v23 = vpop.eup %6011 }
 0x25d   : > { %v1530_v2 = vmul.f32 %v1280_v39, %v6852_v22  ;;  %v7552_v9 = vmul.f32 %v6129_v53, %v7270_v31  ;;  %1933 = vst.msk [vmem:[#allocation2 + $0x2c0] sm:$0xff] %vm389_vm0, %v6008_v12  ;;  %v1531_v50 = vmul.f32 %v1284_v46, %v6848_v42  ;;  %v1532_v56 = vmul.f32 %v1284_v46, %v6852_v22  ;;  %v6014_v30 = vpop.eup %6013 }
 0x25e   : > { %v1533_v49 = vmul.f32 %v1288_v18, %v6848_v42  ;;  %v1534_v26 = vmul.f32 %v1288_v18, %v6852_v22  ;;  %1934 = vst.msk [vmem:[#allocation2 + $0x2c8] sm:$0xff] %vm389_vm0, %v6010_v37  ;;  %v1535_v35 = vmul.f32 %v1292_v20, %v6848_v42  ;;  %v1536_v29 = vmul.f32 %v1292_v20, %v6852_v22  ;;  %v6016_v3 = vpop.eup %6015 }
 0x25f   : > { %v1537_v31 = vmul.f32 %v1296_v10, %v6848_v42  ;;  %v1538_v54 = vmul.f32 %v1296_v10, %v6852_v22  ;;  %1935 = vst.msk [vmem:[#allocation2 + $0x2d0] sm:$0xff] %vm389_vm0, %v6012_v23  ;;  %v1539_v16 = vmul.f32 %v1300_v4, %v6848_v42  ;;  %v1717_v47 = vmul.f32 1.442695, %v1525_v7  ;;  %1936 = vst.msk [vmem:[#allocation2 + $0x2d8] sm:$0xff] %vm389_vm0, %v6014_v30  ;;  %v6018_v10 = vpop.eup %6017  ;;  %v7571_v7 = vpop.permute.xlu1 %2835 }
 0x260   : > { %v1719_v62 = vmul.f32 1.442695, %v1526_v61  ;;  %v1721_v39 = vmul.f32 1.442695, %v1527_v36  ;;  %v1540_v46 = vmul.f32 %v1300_v4, %v6852_v22  ;;  %v1723_v18 = vmul.f32 1.442695, %v1528_v24  ;;  %v7573_v61 = vpop.permute.xlu0 %2831 }
 0x261   : > { %v1725_v20 = vmul.f32 1.442695, %v1529_v17  ;;  %v2087_v55 = vcombine.high %v7451_v11, %v7451_v11  ;;  %1937 = vst.msk [vmem:[#allocation2 + $0x2e0] sm:$0xff] %vm389_vm0, %v6016_v3  ;;  %6023 = vpow2.f32 %v1717_v47  ;;  %v1727_v12 = vmul.f32 1.442695, %v1530_v2  ;;  %v6020_v36 = vpop.eup %6019  ;;  %1938 = vst.msk [vmem:[#allocation2 + $0x2e8] sm:$0xff] %vm389_vm0, %v6018_v10  ;;  %v652_v11 = vpop.f32.mrf.mxu1 }
 0x262   : > { %v1729_v53 = vmul.f32 1.442695, %v1531_v50  ;;  %v1731_v37 = vmul.f32 1.442695, %v1532_v56  ;;  %6025 = vpow2.f32 %v1719_v62  ;;  %v1733_v4 = vmul.f32 1.442695, %v1533_v49  ;;  %v6022_v23 = vpop.eup %6021 }
 0x263   : > { %v1735_v24 = vmul.f32 1.442695, %v1534_v26  ;;  %v1737_v17 = vmul.f32 1.442695, %v1535_v35  ;;  %1939 = vst.msk [vmem:[#allocation2 + $0x2f0] sm:$0xff] %vm389_vm0, %v6020_v36  ;;  %6027 = vpow2.f32 %v1721_v39  ;;  %1940 = vst.msk [vmem:[#allocation2 + $0x2f8] sm:$0xff] %vm389_vm0, %v6022_v23  ;;  %v2101_v47 = vrot.slane %v2087_v55, %v6856_v60 }
 0x264   : > { %v1739_v2 = vmul.f32 1.442695, %v1536_v29  ;;  %v1741_v50 = vmul.f32 1.442695, %v1537_v31  ;;  %v1743_v56 = vmul.f32 1.442695, %v1538_v54  ;;  %6029 = vpow2.f32 %v1723_v18 }
 0x265   : > { %v1745_v30 = vmul.f32 1.442695, %v1539_v16  ;;  %v2241_v49 = vrot.slane %v7552_v9, %v6856_v60  ;;  %6031 = vpow2.f32 %v1725_v20  ;;  %v1747_v26 = vmul.f32 1.442695, %v1540_v46  ;;  %v6130_v35 = vld [vmem:[%s6731_s9] ss:$0 sm:$0xff]  ;;  %v7591_v20 = vpop.permute.xlu1 %2847  ;;  %v7593_v46 = vpop.permute.xlu0 %2843 }
 0x266   : > { %v7582_v62 = vadd.f32 %v6130_v35, %v5769_v6  ;;  %v7584_v3 = vadd.f32 %v6130_v35, %v652_v11  ;;  %6033 = vpow2.f32 %v1727_v12  ;;  %v2117_v29 = vrot.slane %v2101_v47, %v6856_v60 }
 0x267   : > { %v2103_v31 = vcombine.high %v2101_v47, %v2101_v47  ;;  %v2257_v54 = vrot.slane %v2241_v49, %v6856_v60  ;;  %6035 = vpow2.f32 %v1729_v53  ;;  %v2249_v16 = vcombine.high %v2241_v49, %v2241_v49 }
 0x268   : > { %v676_v39 = vand.u32 2147483647, %v7582_v62  ;;  %v2234_v18 = vcombine.high %v7552_v9, %v7552_v9  ;;  %6037 = vpow2.f32 %v1731_v37  ;;  %v3232_v6 = vrot.slane %v2117_v29, %v6335_v19 }
 0x269   : > { %v2131_v55 = vrot.slane %v2103_v31, %v6856_v60  ;;  %v2133_v10 = vcombine.high %v2117_v29, %v2117_v29  ;;  %6039 = vpow2.f32 %v1733_v4  ;;  %v3312_v12 = vrot.slane %v2257_v54, %v6335_v19 }
 0x26a   : > { %v2271_v53 = vrot.slane %v2249_v16, %v6856_v60  ;;  %v2279_v36 = vcombine.high %v2257_v54, %v2257_v54  ;;  %6041 = vpow2.f32 %v1735_v24  ;;  %v3510_v11 = vmul.f32 %v3232_v6, %v7069_v40 }
 0x26b   : > { %v3509_v23 = vmul.f32 %v3232_v6, %v7071_v38  ;;  %v3236_v47 = vrot.slane %v2131_v55, %v6335_v19  ;;  %6043 = vpow2.f32 %v1737_v17  ;;  %v3240_v37 = vrot.slane %v2133_v10, %v6335_v19 }
 0x26c   : > { %v2135_v49 = vcombine.high %v2131_v55, %v2131_v55  ;;  %v3550_v35 = vmul.f32 %v3312_v12, %v7188_v13  ;;  %6045 = vpow2.f32 %v1739_v2  ;;  %3638 = vst.msk [vmem:[#allocation3 + $0x148] sm:$0xff] %vm389_vm0, %v3510_v11  ;;  %v3549_v40 = vmul.f32 %v3312_v12, %v7190_v27  ;;  %v7613_v13 = vpop.permute.xlu1 %2859  ;;  %v7615_v2 = vpop.permute.xlu0 %2855 }
 0x26d   : > { %3637 = vst.msk [vmem:[#allocation3 + $0x140] sm:$0xff] %vm389_vm0, %v3509_v23  ;;  %v3512_v4 = vmul.f32 %v3236_v47, %v7100_v58  ;;  %v3511_v24 = vmul.f32 %v3236_v47, %v7102_v28  ;;  %6047 = vpow2.f32 %v1741_v50  ;;  %v3514_v38 = vmul.f32 %v3240_v37, %v7118_v32 }
 0x26e   : > { %v3513_v17 = vmul.f32 %v3240_v37, %v7120_v45  ;;  %v3244_v29 = vrot.slane %v2135_v49, %v6335_v19  ;;  %3678 = vst.msk [vmem:[#allocation3 + $0x288] sm:$0xff] %vm389_vm0, %v3550_v35  ;;  %v6024_v31 = vpop.eup %6023  ;;  %6049 = vpow2.f32 %v1743_v56  ;;  %3677 = vst.msk [vmem:[#allocation3 + $0x280] sm:$0xff] %vm389_vm0, %v3549_v40  ;;  %v3316_v58 = vrot.slane %v2271_v53, %v6335_v19 }
 0x26f   : > { %3640 = vst.msk [vmem:[#allocation3 + $0x158] sm:$0xff] %vm389_vm0, %v3512_v4  ;;  %3639 = vst.msk [vmem:[#allocation3 + $0x150] sm:$0xff] %vm389_vm0, %v3511_v24  ;;  %v3320_v28 = vrot.slane %v2279_v36, %v6335_v19  ;;  %v684_v32 = vsub.f32 0.0, %v676_v39  ;;  %v6026_v45 = vpop.eup %6025  ;;  %6051 = vpow2.f32 %v1745_v30  ;;  %v2281_v56 = vcombine.high %v2271_v53, %v2271_v53 }
 0x270   : > { %1909 = vst.msk [vmem:[#allocation2 + $0x200] sm:$0xff] %vm389_vm0, %v6024_v31  ;;  %3642 = vst.msk [vmem:[#allocation3 + $0x168] sm:$0xff] %vm389_vm0, %v3514_v38  ;;  %v3516_v27 = vmul.f32 %v3244_v29, %v7140_v57  ;;  %v3515_v50 = vmul.f32 %v3244_v29, %v7142_v52  ;;  %v6028_v54 = vpop.eup %6027  ;;  %6053 = vpow2.f32 %v1747_v26  ;;  %v3552_v16 = vmul.f32 %v3316_v58, %v7224_v44  ;;  %v7651_v36 = vpop.permute.xlu1 %3063 }
 0x271   : > { %3641 = vst.msk [vmem:[#allocation3 + $0x160] sm:$0xff] %vm389_vm0, %v3513_v17  ;;  %1910 = vst.msk [vmem:[#allocation2 + $0x208] sm:$0xff] %vm389_vm0, %v6026_v45  ;;  %v3551_v39 = vmul.f32 %v3316_v58, %v7226_v0  ;;  %v3554_v30 = vmul.f32 %v3320_v28, %v7248_v21  ;;  %v6030_v6 = vpop.eup %6029  ;;  %v3553_v57 = vmul.f32 %v3320_v28, %v7250_v25  ;;  %v699_v52 = vmul.f32 1.442695, %v684_v32  ;;  %v6131_v21 = vld [vmem:[%s6281_s17 + $0x20] sm:$0xff]  ;;  %v7653_v11 = vpop.permute.xlu0 %3059  ;;  %v8853_v58 = vld [vmem:[#allocation55_spill] sm:$0xff] }
 0x272   : > { %1911 = vst.msk [vmem:[#allocation2 + $0x210] sm:$0xff] %vm389_vm0, %v6028_v54  ;;  %3644 = vst.msk [vmem:[#allocation3 + $0x178] sm:$0xff] %vm389_vm0, %v3516_v27  ;;  %v3324_v26 = vrot.slane %v2281_v56, %v6335_v19  ;;  %v6032_v55 = vpop.eup %6031  ;;  %v675_v44 = vand.u32 2147483647, %v7584_v3  ;;  %v2248_v0 = vrot.slane %v2234_v18, %v6856_v60  ;;  %v1977_v25 = vmul.f32 %v6131_v21, %v7456_v43  ;;  %v8854_v32 = vld [vmem:[#allocation54_spill] sm:$0xff] }
 0x273   : > { %3643 = vst.msk [vmem:[#allocation3 + $0x170] sm:$0xff] %vm389_vm0, %v3515_v50  ;;  %1912 = vst.msk [vmem:[#allocation2 + $0x218] sm:$0xff] %vm389_vm0, %v6030_v6  ;;  %v6034_v10 = vpop.eup %6033  ;;  %6055 = vpow2.f32 %v699_v52  ;;  %v8855_v52 = vld [vmem:[#allocation59_spill] sm:$0xff] }
 0x274   : > { %3680 = vst.msk [vmem:[#allocation3 + $0x298] sm:$0xff] %vm389_vm0, %v3552_v16  ;;  %3679 = vst.msk [vmem:[#allocation3 + $0x290] sm:$0xff] %vm389_vm0, %v3551_v39  ;;  %v3556_v12 = vmul.f32 %v3324_v26, %v7278_v59  ;;  %v3555_v53 = vmul.f32 %v3324_v26, %v7280_v63  ;;  %v6036_v23 = vpop.eup %6035  ;;  %v683_v9 = vsub.f32 0.0, %v675_v44  ;;  %v2264_v43 = vrot.slane %v2248_v0, %v6856_v60 }
 0x275   : > { %3682 = vst.msk [vmem:[#allocation3 + $0x2a8] sm:$0xff] %vm389_vm0, %v3554_v30  ;;  %1913 = vst.msk [vmem:[#allocation2 + $0x220] sm:$0xff] %vm389_vm0, %v6032_v55  ;;  %v2250_v18 = vcombine.high %v2248_v0, %v2248_v0  ;;  %v2192_v47 = vrot.slane %v1977_v25, %v6856_v60  ;;  %v6038_v37 = vpop.eup %6037  ;;  %v2185_v59 = vcombine.high %v1977_v25, %v1977_v25  ;;  %v7675_v30 = vpop.permute.xlu1 %3075  ;;  %v8856_v55 = vld [vmem:[#allocation58_spill] sm:$0xff] }
 0x276   : > { %3681 = vst.msk [vmem:[#allocation3 + $0x2a0] sm:$0xff] %vm389_vm0, %v3553_v57  ;;  %1914 = vst.msk [vmem:[#allocation2 + $0x228] sm:$0xff] %vm389_vm0, %v6034_v10  ;;  %v6040_v63 = vpop.eup %6039  ;;  %v697_v49 = vmul.f32 1.442695, %v683_v9  ;;  %v3328_v35 = vrot.slane %v2264_v43, %v6335_v19  ;;  %v2280_v24 = vcombine.high %v2264_v43, %v2264_v43  ;;  %v7677_v6 = vpop.permute.xlu0 %3071 }
 0x277   : > { %1915 = vst.msk [vmem:[#allocation2 + $0x230] sm:$0xff] %vm389_vm0, %v6036_v23  ;;  %3684 = vst.msk [vmem:[#allocation3 + $0x2b8] sm:$0xff] %vm389_vm0, %v3556_v12  ;;  %v2278_v4 = vrot.slane %v2250_v18, %v6856_v60  ;;  %v6042_v40 = vpop.eup %6041  ;;  %v2208_v38 = vrot.slane %v2192_v47, %v6856_v60  ;;  %v2200_v17 = vcombine.high %v2192_v47, %v2192_v47  ;;  %v8857_v12 = vld [vmem:[#allocation62_spill] sm:$0xff]  ;;  %v8858_v18 = vld [vmem:[#allocation65_spill] sm:$0xff] }
 0x278   : > { %3683 = vst.msk [vmem:[#allocation3 + $0x2b0] sm:$0xff] %vm389_vm0, %v3555_v53  ;;  %1916 = vst.msk [vmem:[#allocation2 + $0x238] sm:$0xff] %vm389_vm0, %v6038_v37  ;;  %v2199_v29 = vrot.slane %v2185_v59, %v6856_v60  ;;  %v6044_v31 = vpop.eup %6043  ;;  %6057 = vpow2.f32 %v697_v49  ;;  %v3558_v28 = vmul.f32 %v3328_v35, %v8853_v58  ;;  %v3557_v45 = vmul.f32 %v3328_v35, %v8854_v32  ;;  %v8860_v35 = vld [vmem:[#allocation66_spill] sm:$0xff] }
 0x279   : > { %1917 = vst.msk [vmem:[#allocation2 + $0x240] sm:$0xff] %vm389_vm0, %v6040_v63  ;;  %1918 = vst.msk [vmem:[#allocation2 + $0x248] sm:$0xff] %vm389_vm0, %v6042_v40  ;;  %v3332_v27 = vrot.slane %v2278_v4, %v6335_v19  ;;  %v6046_v50 = vpop.eup %6045  ;;  %v3336_v56 = vrot.slane %v2280_v24, %v6335_v19  ;;  %v2282_v54 = vcombine.high %v2278_v4, %v2278_v4 }
 0x27a   : > { %1919 = vst.msk [vmem:[#allocation2 + $0x250] sm:$0xff] %vm389_vm0, %v6044_v31  ;;  %v3280_v16 = vrot.slane %v2208_v38, %v6335_v19  ;;  %v2222_v39 = vrot.slane %v2200_v17, %v6856_v60  ;;  %v6048_v57 = vpop.eup %6047  ;;  %1920 = vst.msk [vmem:[#allocation2 + $0x258] sm:$0xff] %vm389_vm0, %v6046_v50  ;;  %v2230_v0 = vcombine.high %v2208_v38, %v2208_v38 }
 0x27b   : > { %3686 = vst.msk [vmem:[#allocation3 + $0x2c8] sm:$0xff] %vm389_vm0, %v3558_v28  ;;  %3685 = vst.msk [vmem:[#allocation3 + $0x2c0] sm:$0xff] %vm389_vm0, %v3557_v45  ;;  %v3560_v26 = vmul.f32 %v3332_v27, %v8855_v52  ;;  %v3559_v44 = vmul.f32 %v3332_v27, %v8856_v55  ;;  %v2215_v21 = vrot.slane %v2199_v29, %v6856_v60  ;;  %v6050_v25 = vpop.eup %6049  ;;  %v7715_v27 = vpop.permute.xlu1 %3087 }
 0x27c   : > { %1921 = vst.msk [vmem:[#allocation2 + $0x260] sm:$0xff] %vm389_vm0, %v6048_v57  ;;  %v3562_v10 = vmul.f32 %v3336_v56, %v7375_v14  ;;  %v3561_v53 = vmul.f32 %v3336_v56, %v8857_v12  ;;  %v3340_v23 = vrot.slane %v2282_v54, %v6335_v19  ;;  %v3534_v9 = vmul.f32 %v3280_v16, %v7415_v51  ;;  %v6052_v43 = vpop.eup %6051  ;;  %v8859_v51 = vld [vmem:[#allocation61_spill] sm:$0xff] }
 0x27d   : > { %1922 = vst.msk [vmem:[#allocation2 + $0x268] sm:$0xff] %vm389_vm0, %v6050_v25  ;;  %3688 = vst.msk [vmem:[#allocation3 + $0x2d8] sm:$0xff] %vm389_vm0, %v3560_v26  ;;  %v3533_v47 = vmul.f32 %v3280_v16, %v8858_v18  ;;  %v3284_v37 = vrot.slane %v2222_v39, %v6335_v19  ;;  %v3288_v59 = vrot.slane %v2230_v0, %v6335_v19  ;;  %v6054_v63 = vpop.eup %6053  ;;  %v668_v0 = vmax.f32 %v7582_v62, 0.0 }
 0x27e   : > { %3687 = vst.msk [vmem:[#allocation3 + $0x2d0] sm:$0xff] %vm389_vm0, %v3559_v44  ;;  %v2232_v14 = vcombine.high %v2222_v39, %v2222_v39  ;;  %1923 = vst.msk [vmem:[#allocation2 + $0x270] sm:$0xff] %vm389_vm0, %v6052_v43  ;;  %v3564_v49 = vmul.f32 %v3340_v23, %v8859_v51  ;;  %v3563_v4 = vmul.f32 %v3340_v23, %v8860_v35  ;;  %v6132_v43 = vld [vmem:[%s6281_s17 + $0x38] sm:$0xff] }
 0x27f   : > { %3690 = vst.msk [vmem:[#allocation3 + $0x2e8] sm:$0xff] %vm389_vm0, %v3562_v10  ;;  %3689 = vst.msk [vmem:[#allocation3 + $0x2e0] sm:$0xff] %vm389_vm0, %v3561_v53  ;;  %v3296_v24 = vrot.slane %v2215_v21, %v6335_v19  ;;  %v2201_v40 = vcombine.high %v2199_v29, %v2199_v29  ;;  %v3536_v38 = vmul.f32 %v3284_v37, %v7430_v41  ;;  %v7717_v41 = vpop.permute.xlu0 %3083  ;;  %v7738_v26 = vpop.permute.xlu1 %2967 }
 0x280   : > { %3662 = vst.msk [vmem:[#allocation3 + $0x208] sm:$0xff] %vm389_vm0, %v3534_v9  ;;  %1924 = vst.msk [vmem:[#allocation2 + $0x278] sm:$0xff] %vm389_vm0, %v6054_v63  ;;  %v3535_v17 = vmul.f32 %v3284_v37, %v7432_v48  ;;  %v3538_v31 = vmul.f32 %v3288_v59, %v7475_v15  ;;  %v3537_v58 = vmul.f32 %v3288_v59, %v7477_v1  ;;  %v6056_v48 = vpop.eup %6055 }
 0x281   : > { %3661 = vst.msk [vmem:[#allocation3 + $0x200] sm:$0xff] %vm389_vm0, %v3533_v47  ;;  %3692 = vst.msk [vmem:[#allocation3 + $0x2f8] sm:$0xff] %vm389_vm0, %v3564_v49  ;;  %v3292_v28 = vrot.slane %v2232_v14, %v6335_v19  ;;  %v3542_v29 = vmul.f32 %v3296_v24, %v7542_v5  ;;  %v3541_v32 = vmul.f32 %v3296_v24, %v7544_v33  ;;  %v708_v1 = vadd.f32 1.0, %v6056_v48 }
 0x282   : > { %3691 = vst.msk [vmem:[#allocation3 + $0x2f0] sm:$0xff] %vm389_vm0, %v3563_v4  ;;  %v2229_v45 = vrot.slane %v2201_v40, %v6856_v60  ;;  %3664 = vst.msk [vmem:[#allocation3 + $0x218] sm:$0xff] %vm389_vm0, %v3536_v38  ;;  %v2231_v15 = vcombine.high %v2215_v21, %v2215_v21 }
 0x283   : > { %3663 = vst.msk [vmem:[#allocation3 + $0x210] sm:$0xff] %vm389_vm0, %v3535_v17  ;;  %3666 = vst.msk [vmem:[#allocation3 + $0x228] sm:$0xff] %vm389_vm0, %v3538_v31  ;;  %v3540_v5 = vmul.f32 %v3292_v28, %v7504_v34  ;;  %v3539_v33 = vmul.f32 %v3292_v28, %v7506_v8  ;;  %6059 = vlog2.f32 %v708_v1  ;;  %v7740_v55 = vpop.permute.xlu0 %2963 }
 0x284   : > { %3665 = vst.msk [vmem:[#allocation3 + $0x220] sm:$0xff] %vm389_vm0, %v3537_v58  ;;  %3670 = vst.msk [vmem:[#allocation3 + $0x248] sm:$0xff] %vm389_vm0, %v3542_v29  ;;  %v3300_v50 = vrot.slane %v2229_v45, %v6335_v19  ;;  %v3304_v56 = vrot.slane %v2231_v15, %v6335_v19  ;;  %v2233_v54 = vcombine.high %v2229_v45, %v2229_v45 }
 0x285   : > { %3669 = vst.msk [vmem:[#allocation3 + $0x240] sm:$0xff] %vm389_vm0, %v3541_v32  ;;  %3668 = vst.msk [vmem:[#allocation3 + $0x238] sm:$0xff] %vm389_vm0, %v3540_v5  ;;  %v6058_v52 = vpop.eup %6057 }
 0x286   : > { %3667 = vst.msk [vmem:[#allocation3 + $0x230] sm:$0xff] %vm389_vm0, %v3539_v33  ;;  %v3544_v16 = vmul.f32 %v3300_v50, %v7571_v7  ;;  %v3543_v34 = vmul.f32 %v3300_v50, %v7573_v61  ;;  %v3546_v8 = vmul.f32 %v3304_v56, %v7591_v20  ;;  %v3545_v39 = vmul.f32 %v3304_v56, %v7593_v46  ;;  %v7748_v20 = vpop.permute.xlu1 %2979 }
 0x287   : > { %v3308_v57 = vrot.slane %v2233_v54, %v6335_v19  ;;  %v707_v44 = vadd.f32 1.0, %v6058_v52  ;;  %v7750_v46 = vpop.permute.xlu0 %2975 }
 0x288   : > { %3672 = vst.msk [vmem:[#allocation3 + $0x258] sm:$0xff] %vm389_vm0, %v3544_v16  ;;  %3671 = vst.msk [vmem:[#allocation3 + $0x250] sm:$0xff] %vm389_vm0, %v3543_v34 }
 0x289   : > { %3674 = vst.msk [vmem:[#allocation3 + $0x268] sm:$0xff] %vm389_vm0, %v3546_v8  ;;  %3673 = vst.msk [vmem:[#allocation3 + $0x260] sm:$0xff] %vm389_vm0, %v3545_v39  ;;  %v3548_v7 = vmul.f32 %v3308_v57, %v7613_v13  ;;  %v3547_v61 = vmul.f32 %v3308_v57, %v7615_v2  ;;  %6061 = vlog2.f32 %v707_v44  ;;  %v667_v2 = vmax.f32 %v7584_v3, 0.0 }
 0x28a   : > { %v7753_v10 = vpop.permute.xlu1 %2991 }
 0x28b   : > { %3676 = vst.msk [vmem:[#allocation3 + $0x278] sm:$0xff] %vm389_vm0, %v3548_v7  ;;  %3675 = vst.msk [vmem:[#allocation3 + $0x270] sm:$0xff] %vm389_vm0, %v3547_v61  ;;  %v7755_v12 = vpop.permute.xlu0 %2987 }
 0x28e   : > { %v7764_v14 = vpop.permute.xlu1 %3003 }
 0x28f   : > { %v7766_v63 = vpop.permute.xlu0 %2999 }
 0x290   : > { %v6060_v21 = vpop.eup %6059 }
 0x291   : > { %v724_v25 = vmul.f32 0.6931472, %v6060_v21 }
 0x292   : > { %v7797_v54 = vpop.permute.xlu1 %3015 }
 0x293   : > { %v732_v13 = vadd.f32 %v724_v25, %v668_v0  ;;  %v7799_v16 = vpop.permute.xlu0 %3011 }
 0x295   : > { %v1092_v23 = vcombine.high %v732_v13, %v732_v13  ;;  %v1099_v9 = vrot.slane %v732_v13, %v6856_v60  ;;  %v7760_v18 = vmul.f32 %v6132_v43, %v732_v13 }
 0x296   : > { %v6062_v53 = vpop.eup %6061 }
 0x297   : > { %v722_v47 = vmul.f32 0.6931472, %v6062_v53  ;;  %v1106_v37 = vrot.slane %v1092_v23, %v6856_v60  ;;  %v1107_v62 = vcombine.high %v1099_v9, %v1099_v9  ;;  %v1115_v59 = vrot.slane %v1099_v9, %v6856_v60 }
 0x298   : > { %v7772_v3 = vrot.slane %v7760_v18, %v6856_v60  ;;  %v2332_v31 = vcombine.high %v7760_v18, %v7760_v18 }
 0x299   : > { %v7768_v51 = vadd.f32 %v722_v47, %v667_v2  ;;  %v1108_v49 = vcombine.high %v1106_v37, %v1106_v37  ;;  %v1122_v35 = vrot.slane %v1106_v37, %v6856_v60  ;;  %v1129_v4 = vrot.slane %v1107_v62, %v6856_v60 }
 0x29a   : > { %v1137_v24 = vcombine.high %v1115_v59, %v1115_v59  ;;  %v1368_v40 = vrot.slane %v1115_v59, %v6335_v19  ;;  %v7792_v1 = vrot.slane %v7772_v3, %v6856_v60 }
 0x29b   : > { %v1043_v38 = vcombine.high %v7768_v51, %v7768_v51  ;;  %v7781_v17 = vrot.slane %v7768_v51, %v6856_v60  ;;  %v1136_v58 = vrot.slane %v1108_v49, %v6856_v60  ;;  %v1138_v28 = vcombine.high %v1122_v35, %v1122_v35 }
 0x29c   : > { %v1139_v29 = vcombine.high %v1129_v4, %v1129_v4  ;;  %v1372_v32 = vrot.slane %v1129_v4, %v6335_v19  ;;  %v1376_v45 = vrot.slane %v1137_v24, %v6335_v19  ;;  %v1384_v48 = vrot.slane %v1122_v35, %v6335_v19  ;;  %v7818_v4 = vpop.permute.xlu1 %3027  ;;  %v7820_v24 = vpop.permute.xlu0 %3023 }
 0x29d   : > { %v1573_v15 = vmul.f32 %v1368_v40, %v6848_v42  ;;  %v1140_v5 = vcombine.high %v1136_v58, %v1136_v58  ;;  %v1388_v50 = vrot.slane %v1136_v58, %v6335_v19  ;;  %v1392_v56 = vrot.slane %v1138_v28, %v6335_v19 }
 0x29e   : > { %v1380_v33 = vrot.slane %v1139_v29, %v6335_v19  ;;  %v1574_v34 = vmul.f32 %v1368_v40, %v6852_v22  ;;  %v1575_v8 = vmul.f32 %v1372_v32, %v6848_v42  ;;  %v1576_v39 = vmul.f32 %v1372_v32, %v6852_v22 }
 0x29f   : > { %v1577_v57 = vmul.f32 %v1376_v45, %v6848_v42  ;;  %v1396_v52 = vrot.slane %v1140_v5, %v6335_v19  ;;  %v1578_v44 = vmul.f32 %v1376_v45, %v6852_v22  ;;  %v1581_v0 = vmul.f32 %v1384_v48, %v6848_v42 }
 0x2a0   : > { %v1579_v7 = vmul.f32 %v1380_v33, %v6848_v42  ;;  %v1580_v61 = vmul.f32 %v1380_v33, %v6852_v22  ;;  %v1582_v21 = vmul.f32 %v1384_v48, %v6852_v22  ;;  %v1583_v25 = vmul.f32 %v1388_v50, %v6848_v42 }
 0x2a1   : > { %v1584_v13 = vmul.f32 %v1388_v50, %v6852_v22  ;;  %v1585_v2 = vmul.f32 %v1392_v56, %v6848_v42  ;;  %v1586_v53 = vmul.f32 %v1392_v56, %v6852_v22  ;;  %v1587_v23 = vmul.f32 %v1396_v52, %v6848_v42 }
 0x2a2   : > { %v1813_v9 = vmul.f32 1.442695, %v1573_v15  ;;  %v1588_v43 = vmul.f32 %v1396_v52, %v6852_v22  ;;  %v1815_v47 = vmul.f32 1.442695, %v1574_v34  ;;  %v1817_v37 = vmul.f32 1.442695, %v1575_v8 }
 0x2a3   : > { %v1819_v62 = vmul.f32 1.442695, %v1576_v39  ;;  %v1821_v59 = vmul.f32 1.442695, %v1577_v57  ;;  %v1823_v49 = vmul.f32 1.442695, %v1578_v44  ;;  %v1057_v35 = vrot.slane %v1043_v38, %v6856_v60  ;;  %v7831_v44 = vpop.permute.xlu1 %3039 }
 0x2a4   : > { %6063 = vpow2.f32 %v1813_v9  ;;  %v1825_v40 = vmul.f32 1.442695, %v1579_v7  ;;  %v1827_v58 = vmul.f32 1.442695, %v1580_v61  ;;  %v1829_v28 = vmul.f32 1.442695, %v1581_v0  ;;  %v7833_v7 = vpop.permute.xlu0 %3035 }
 0x2a5   : > { %6065 = vpow2.f32 %v1815_v47  ;;  %v1831_v29 = vmul.f32 1.442695, %v1582_v21  ;;  %v1833_v32 = vmul.f32 1.442695, %v1583_v25  ;;  %v1835_v45 = vmul.f32 1.442695, %v1584_v13 }
 0x2a6   : > { %6067 = vpow2.f32 %v1817_v37  ;;  %v1837_v48 = vmul.f32 1.442695, %v1585_v2  ;;  %v1839_v15 = vmul.f32 1.442695, %v1586_v53  ;;  %v1841_v5 = vmul.f32 1.442695, %v1587_v23 }
 0x2a7   : > { %6069 = vpow2.f32 %v1819_v62  ;;  %v1058_v38 = vcombine.high %v7781_v17, %v7781_v17  ;;  %v1059_v33 = vcombine.high %v1057_v35, %v1057_v35  ;;  %v1066_v50 = vrot.slane %v7781_v17, %v6856_v60 }
 0x2a8   : > { %6071 = vpow2.f32 %v1821_v59  ;;  %v1843_v56 = vmul.f32 1.442695, %v1588_v43  ;;  %v1073_v34 = vrot.slane %v1057_v35, %v6856_v60  ;;  %v3376_v8 = vrot.slane %v7792_v1, %v6335_v19 }
 0x2a9   : > { %6073 = vpow2.f32 %v1823_v49  ;;  %v1080_v39 = vrot.slane %v1058_v38, %v6856_v60  ;;  %v1087_v57 = vrot.slane %v1059_v33, %v6856_v60  ;;  %v1088_v52 = vcombine.high %v1066_v50, %v1066_v50 }
 0x2aa   : > { %6075 = vpow2.f32 %v1825_v40  ;;  %v1089_v61 = vcombine.high %v1073_v34, %v1073_v34  ;;  %v1336_v17 = vrot.slane %v1066_v50, %v6335_v19  ;;  %v2347_v0 = vcombine.high %v7772_v3, %v7772_v3 }
 0x2ab   : > { %6077 = vpow2.f32 %v1827_v58  ;;  %v1090_v21 = vcombine.high %v1080_v39, %v1080_v39  ;;  %v1091_v25 = vcombine.high %v1087_v57, %v1087_v57  ;;  %v1340_v13 = vrot.slane %v1080_v39, %v6335_v19  ;;  %v7851_v58 = vpop.permute.xlu1 %3051 }
 0x2ac   : > { %6079 = vpow2.f32 %v1829_v28  ;;  %v1344_v2 = vrot.slane %v1088_v52, %v6335_v19  ;;  %v1352_v53 = vrot.slane %v1073_v34, %v6335_v19  ;;  %v1356_v23 = vrot.slane %v1087_v57, %v6335_v19  ;;  %v7853_v28 = vpop.permute.xlu0 %3047 }
 0x2ad   : > { %6081 = vpow2.f32 %v1831_v29  ;;  %v1348_v9 = vrot.slane %v1090_v21, %v6335_v19  ;;  %v1360_v43 = vrot.slane %v1089_v61, %v6335_v19  ;;  %v1364_v47 = vrot.slane %v1091_v25, %v6335_v19 }
 0x2ae   : > { %6083 = vpow2.f32 %v1833_v32  ;;  %v1557_v37 = vmul.f32 %v1336_v17, %v6848_v42  ;;  %v1558_v62 = vmul.f32 %v1336_v17, %v6852_v22  ;;  %v1559_v59 = vmul.f32 %v1340_v13, %v6848_v42 }
 0x2af   : > { %6085 = vpow2.f32 %v1835_v45  ;;  %v1560_v49 = vmul.f32 %v1340_v13, %v6852_v22  ;;  %v1561_v35 = vmul.f32 %v1344_v2, %v6848_v42  ;;  %v1562_v40 = vmul.f32 %v1344_v2, %v6852_v22 }
 0x2b0   : > { %6087 = vpow2.f32 %v1837_v48  ;;  %v1563_v32 = vmul.f32 %v1348_v9, %v6848_v42  ;;  %v1564_v45 = vmul.f32 %v1348_v9, %v6852_v22  ;;  %v1565_v38 = vmul.f32 %v1352_v53, %v6848_v42 }
 0x2b1   : > { %v6064_v29 = vpop.eup %6063  ;;  %6089 = vpow2.f32 %v1839_v15  ;;  %v1566_v48 = vmul.f32 %v1352_v53, %v6852_v22  ;;  %v1567_v50 = vmul.f32 %v1356_v23, %v6848_v42  ;;  %v1568_v34 = vmul.f32 %v1356_v23, %v6852_v22 }
 0x2b2   : > { %v6066_v33 = vpop.eup %6065  ;;  %6091 = vpow2.f32 %v1841_v5  ;;  %1957 = vst.msk [vmem:[#allocation2 + $0x380] sm:$0xff] %vm389_vm0, %v6064_v29  ;;  %v1569_v15 = vmul.f32 %v1360_v43, %v6848_v42  ;;  %v1570_v57 = vmul.f32 %v1360_v43, %v6852_v22  ;;  %v1571_v52 = vmul.f32 %v1364_v47, %v6848_v42 }
 0x2b3   : > { %v6068_v39 = vpop.eup %6067  ;;  %6093 = vpow2.f32 %v1843_v56  ;;  %1958 = vst.msk [vmem:[#allocation2 + $0x388] sm:$0xff] %vm389_vm0, %v6066_v33  ;;  %v1781_v5 = vmul.f32 1.442695, %v1557_v37  ;;  %v1783_v17 = vmul.f32 1.442695, %v1558_v62  ;;  %v3582_v25 = vmul.f32 %v3376_v8, %v7651_v36  ;;  %v7873_v62 = vpop.permute.xlu1 %3099 }
 0x2b4   : > { %v6070_v61 = vpop.eup %6069  ;;  %1959 = vst.msk [vmem:[#allocation2 + $0x390] sm:$0xff] %vm389_vm0, %v6068_v39  ;;  %v1785_v21 = vmul.f32 1.442695, %v1559_v59  ;;  %v1572_v56 = vmul.f32 %v1364_v47, %v6852_v22  ;;  %v1787_v2 = vmul.f32 1.442695, %v1560_v49  ;;  %v3581_v23 = vmul.f32 %v3376_v8, %v7653_v11  ;;  %v7875_v36 = vpop.permute.xlu0 %3095 }
 0x2b5   : > { %v6072_v13 = vpop.eup %6071  ;;  %1960 = vst.msk [vmem:[#allocation2 + $0x398] sm:$0xff] %vm389_vm0, %v6070_v61  ;;  %v1789_v53 = vmul.f32 1.442695, %v1561_v35  ;;  %6095 = vpow2.f32 %v1781_v5  ;;  %v1791_v42 = vmul.f32 1.442695, %v1562_v40  ;;  %3710 = vst.msk [vmem:[#allocation3 + $0x388] sm:$0xff] %vm389_vm0, %v3582_v25  ;;  %v7900_v39 = vrot.slane %v2332_v31, %v6856_v60 }
 0x2b6   : > { %v6074_v9 = vpop.eup %6073  ;;  %1961 = vst.msk [vmem:[#allocation2 + $0x3a0] sm:$0xff] %vm389_vm0, %v6072_v13  ;;  %v1793_v43 = vmul.f32 1.442695, %v1563_v32  ;;  %v1795_v37 = vmul.f32 1.442695, %v1564_v45  ;;  %6097 = vpow2.f32 %v1783_v17  ;;  %3709 = vst.msk [vmem:[#allocation3 + $0x380] sm:$0xff] %vm389_vm0, %v3581_v23  ;;  %v2369_v45 = vrot.slane %v2347_v0, %v6856_v60 }
 0x2b7   : > { %v6076_v59 = vpop.eup %6075  ;;  %1962 = vst.msk [vmem:[#allocation2 + $0x3a8] sm:$0xff] %vm389_vm0, %v6074_v9  ;;  %v1797_v22 = vmul.f32 1.442695, %v1565_v38  ;;  %v1799_v47 = vmul.f32 1.442695, %v1566_v48  ;;  %6099 = vpow2.f32 %v1785_v21  ;;  %v2377_v38 = vcombine.high %v7792_v1, %v7792_v1  ;;  %v7907_v61 = vpop.permute.xlu1 %3111 }
 0x2b8   : > { %v1801_v11 = vmul.f32 1.442695, %v1567_v50  ;;  %v6078_v8 = vpop.eup %6077  ;;  %1963 = vst.msk [vmem:[#allocation2 + $0x3b0] sm:$0xff] %vm389_vm0, %v6076_v59  ;;  %v1803_v49 = vmul.f32 1.442695, %v1568_v34  ;;  %6101 = vpow2.f32 %v1787_v2  ;;  %v6133_v50 = vld [vmem:[%s6281_s17 + $0x30] sm:$0xff]  ;;  %v3380_v1 = vrot.slane %v2369_v45, %v6335_v19  ;;  %v7913_v31 = vpop.permute.xlu0 %3107 }
 0x2b9   : > { %v1805_v35 = vmul.f32 1.442695, %v1569_v15  ;;  %v7880_v40 = vmul.f32 1.442695, %v1570_v57  ;;  %v6080_v29 = vpop.eup %6079  ;;  %1964 = vst.msk [vmem:[#allocation2 + $0x3b8] sm:$0xff] %vm389_vm0, %v6078_v8  ;;  %6103 = vpow2.f32 %v1789_v53  ;;  %v1979_v34 = vmul.f32 %v6133_v50, %v7768_v51 }
 0x2ba   : > { %v7883_v32 = vmul.f32 1.442695, %v1571_v52  ;;  %v6082_v33 = vpop.eup %6081  ;;  %1965 = vst.msk [vmem:[#allocation2 + $0x3c0] sm:$0xff] %vm389_vm0, %v6080_v29  ;;  %v7892_v48 = vmul.f32 1.442695, %v1572_v56  ;;  %6105 = vpow2.f32 %v1791_v42  ;;  %v3384_v0 = vrot.slane %v2377_v38, %v6335_v19 }
 0x2bb   : > { %v6084_v3 = vpop.eup %6083  ;;  %1966 = vst.msk [vmem:[#allocation2 + $0x3c8] sm:$0xff] %vm389_vm0, %v6082_v33  ;;  %v2379_v15 = vcombine.high %v2369_v45, %v2369_v45  ;;  %6107 = vpow2.f32 %v1793_v43  ;;  %v2290_v51 = vrot.slane %v1979_v34, %v6856_v60  ;;  %v2283_v52 = vcombine.high %v1979_v34, %v1979_v34  ;;  %v7942_v29 = vpop.permute.xlu1 %3123 }
 0x2bc   : > { %v6086_v57 = vpop.eup %6085  ;;  %1967 = vst.msk [vmem:[#allocation2 + $0x3d0] sm:$0xff] %vm389_vm0, %v6084_v3  ;;  %v7911_v18 = vrot.slane %v7900_v39, %v6856_v60  ;;  %6109 = vpow2.f32 %v1795_v37  ;;  %v3584_v17 = vmul.f32 %v3380_v1, %v7675_v30  ;;  %v3583_v21 = vmul.f32 %v3380_v1, %v7677_v6  ;;  %v7944_v45 = vpop.permute.xlu0 %3119 }
 0x2bd   : > { %v6088_v5 = vpop.eup %6087  ;;  %1968 = vst.msk [vmem:[#allocation2 + $0x3d8] sm:$0xff] %vm389_vm0, %v6086_v57  ;;  %v3586_v25 = vmul.f32 %v3384_v0, %v7715_v27  ;;  %6111 = vpow2.f32 %v1797_v22  ;;  %v3585_v56 = vmul.f32 %v3384_v0, %v7717_v41  ;;  %v2306_v2 = vrot.slane %v2290_v51, %v6856_v60 }
 0x2be   : > { %v6090_v13 = vpop.eup %6089  ;;  %1969 = vst.msk [vmem:[#allocation2 + $0x3e0] sm:$0xff] %vm389_vm0, %v6088_v5  ;;  %v2298_v53 = vcombine.high %v2290_v51, %v2290_v51  ;;  %6113 = vpow2.f32 %v1799_v47  ;;  %3712 = vst.msk [vmem:[#allocation3 + $0x398] sm:$0xff] %vm389_vm0, %v3584_v17  ;;  %v2297_v30 = vrot.slane %v2283_v52, %v6856_v60  ;;  %v3388_v6 = vrot.slane %v2379_v15, %v6335_v19 }
 0x2bf   : > { %v6092_v23 = vpop.eup %6091  ;;  %1970 = vst.msk [vmem:[#allocation2 + $0x3e8] sm:$0xff] %vm389_vm0, %v6090_v13  ;;  %3711 = vst.msk [vmem:[#allocation3 + $0x390] sm:$0xff] %vm389_vm0, %v3583_v21  ;;  %v7930_v27 = vrot.slane %v7911_v18, %v6335_v19  ;;  %6115 = vpow2.f32 %v1801_v11  ;;  %v3344_v9 = vrot.slane %v2306_v2, %v6335_v19  ;;  %v2328_v43 = vcombine.high %v2306_v2, %v2306_v2 }
 0x2c0   : > { %3714 = vst.msk [vmem:[#allocation3 + $0x3a8] sm:$0xff] %vm389_vm0, %v3586_v25  ;;  %v6094_v41 = vpop.eup %6093  ;;  %1971 = vst.msk [vmem:[#allocation2 + $0x3f0] sm:$0xff] %vm389_vm0, %v6092_v23  ;;  %v2320_v42 = vrot.slane %v2298_v53, %v6856_v60  ;;  %6117 = vpow2.f32 %v1803_v49  ;;  %v2313_v37 = vrot.slane %v2297_v30, %v6856_v60  ;;  %v2299_v59 = vcombine.high %v2297_v30, %v2297_v30  ;;  %v3132_v17 = vpop.permute.xlu0 %3131 }
 0x2c1   : > { %3713 = vst.msk [vmem:[#allocation3 + $0x3a0] sm:$0xff] %vm389_vm0, %v3585_v56  ;;  %1972 = vst.msk [vmem:[#allocation2 + $0x3f8] sm:$0xff] %vm389_vm0, %v6094_v41  ;;  %v3588_v22 = vmul.f32 %v3388_v6, %v7873_v62  ;;  %6119 = vpow2.f32 %v1805_v35  ;;  %v3566_v47 = vmul.f32 %v3344_v9, %v7738_v26  ;;  %v3565_v11 = vmul.f32 %v3344_v9, %v7740_v55 }
 0x2c2   : > { %v3348_v8 = vrot.slane %v2320_v42, %v6335_v19  ;;  %v6096_v38 = vpop.eup %6095  ;;  %6121 = vpow2.f32 %v7880_v40  ;;  %v3352_v49 = vrot.slane %v2328_v43, %v6335_v19  ;;  %v2330_v33 = vcombine.high %v2320_v42, %v2320_v42 }
 0x2c3   : > { %v3360_v50 = vrot.slane %v2313_v37, %v6335_v19  ;;  %3716 = vst.msk [vmem:[#allocation3 + $0x3b8] sm:$0xff] %vm389_vm0, %v3588_v22  ;;  %v6098_v62 = vpop.eup %6097  ;;  %6123 = vpow2.f32 %v7883_v32  ;;  %1941 = vst.msk [vmem:[#allocation2 + $0x300] sm:$0xff] %vm389_vm0, %v6096_v38  ;;  %v2327_v35 = vrot.slane %v2299_v59, %v6856_v60  ;;  %v2329_v0 = vcombine.high %v2313_v37, %v2313_v37 }
 0x2c4   : > { %3694 = vst.msk [vmem:[#allocation3 + $0x308] sm:$0xff] %vm389_vm0, %v3566_v47  ;;  %3693 = vst.msk [vmem:[#allocation3 + $0x300] sm:$0xff] %vm389_vm0, %v3565_v11  ;;  %v3568_v26 = vmul.f32 %v3348_v8, %v7748_v20  ;;  %v3567_v55 = vmul.f32 %v3348_v8, %v7750_v46  ;;  %v6100_v40 = vpop.eup %6099  ;;  %6125 = vpow2.f32 %v7892_v48  ;;  %v3570_v34 = vmul.f32 %v3352_v49, %v7753_v10 }
 0x2c5   : > { %1942 = vst.msk [vmem:[#allocation2 + $0x308] sm:$0xff] %vm389_vm0, %v6098_v62  ;;  %v3569_v32 = vmul.f32 %v3352_v49, %v7755_v12  ;;  %v3356_v3 = vrot.slane %v2330_v33, %v6335_v19  ;;  %v6102_v1 = vpop.eup %6101  ;;  %1943 = vst.msk [vmem:[#allocation2 + $0x310] sm:$0xff] %vm389_vm0, %v6100_v40  ;;  %v3574_v20 = vmul.f32 %v3360_v50, %v7797_v54  ;;  %v6191_v8 = vmov 0.0  }
 0x2c6   : > { %3696 = vst.msk [vmem:[#allocation3 + $0x318] sm:$0xff] %vm389_vm0, %v3568_v26  ;;  %3695 = vst.msk [vmem:[#allocation3 + $0x310] sm:$0xff] %vm389_vm0, %v3567_v55  ;;  %v3573_v46 = vmul.f32 %v3360_v50, %v7799_v16  ;;  %v3364_v48 = vrot.slane %v2327_v35, %v6335_v19  ;;  %v6104_v15 = vpop.eup %6103  ;;  %v2331_v57 = vcombine.high %v2327_v35, %v2327_v35 }
 0x2c7   : > { %1944 = vst.msk [vmem:[#allocation2 + $0x318] sm:$0xff] %vm389_vm0, %v6102_v1  ;;  %3698 = vst.msk [vmem:[#allocation3 + $0x328] sm:$0xff] %vm389_vm0, %v3570_v34  ;;  %v3572_v10 = vmul.f32 %v3356_v3, %v7764_v14  ;;  %v3571_v12 = vmul.f32 %v3356_v3, %v7766_v63  ;;  %v3587_v51 = vmul.f32 %v3388_v6, %v7875_v36  ;;  %v6106_v54 = vpop.eup %6105  ;;  %v3136_v63 = vpop.permute.xlu1 %3135 }
 0x2c8   : > { %3697 = vst.msk [vmem:[#allocation3 + $0x320] sm:$0xff] %vm389_vm0, %v3569_v32  ;;  %1945 = vst.msk [vmem:[#allocation2 + $0x320] sm:$0xff] %vm389_vm0, %v6104_v15  ;;  %v3576_v16 = vmul.f32 %v3364_v48, %v7818_v4  ;;  %v3575_v52 = vmul.f32 %v3364_v48, %v7820_v24  ;;  %v3368_v5 = vrot.slane %v2329_v0, %v6335_v19  ;;  %v6108_v21 = vpop.eup %6107 }
 0x2c9   : > { %3702 = vst.msk [vmem:[#allocation3 + $0x348] sm:$0xff] %vm389_vm0, %v3574_v20  ;;  %3701 = vst.msk [vmem:[#allocation3 + $0x340] sm:$0xff] %vm389_vm0, %v3573_v46  ;;  %v3590_v14 = vmul.f32 %v7930_v27, %v7907_v61  ;;  %v3372_v36 = vrot.slane %v2331_v57, %v6335_v19  ;;  %v3589_v4 = vmul.f32 %v7930_v27, %v7913_v31  ;;  %v6110_v25 = vpop.eup %6109  ;;  %v3144_v27 = vpop.permute.xlu0 %3143 }
 0x2ca   : > { %1946 = vst.msk [vmem:[#allocation2 + $0x328] sm:$0xff] %vm389_vm0, %v6106_v54  ;;  %3700 = vst.msk [vmem:[#allocation3 + $0x338] sm:$0xff] %vm389_vm0, %v3572_v10  ;;  %v2348_v24 = vcombine.high %v7900_v39, %v7900_v39  ;;  %v2378_v61 = vcombine.high %v7911_v18, %v7911_v18  ;;  %v3578_v13 = vmul.f32 %v3368_v5, %v7831_v44  ;;  %v6112_v31 = vpop.eup %6111 }
 0x2cb   : > { %3699 = vst.msk [vmem:[#allocation3 + $0x330] sm:$0xff] %vm389_vm0, %v3571_v12  ;;  %3715 = vst.msk [vmem:[#allocation3 + $0x3b0] sm:$0xff] %vm389_vm0, %v3587_v51  ;;  %v3577_v56 = vmul.f32 %v3368_v5, %v7833_v7  ;;  %v3580_v39 = vmul.f32 %v3372_v36, %v7851_v58  ;;  %v3579_v18 = vmul.f32 %v3372_v36, %v7853_v28  ;;  %v6114_v23 = vpop.eup %6113  ;;  %v3148_v6 = vpop.permute.xlu1 %3147 }
 0x2cc   : > { %1947 = vst.msk [vmem:[#allocation2 + $0x330] sm:$0xff] %vm389_vm0, %v6108_v21  ;;  %3704 = vst.msk [vmem:[#allocation3 + $0x358] sm:$0xff] %vm389_vm0, %v3576_v16  ;;  %v2376_v2 = vrot.slane %v2348_v24, %v6856_v60  ;;  %v3400_v53 = vrot.slane %v2378_v61, %v6335_v19  ;;  %v6116_v44 = vpop.eup %6115 }
 0x2cd   : > { %3703 = vst.msk [vmem:[#allocation3 + $0x350] sm:$0xff] %vm389_vm0, %v3575_v52  ;;  %3718 = vst.msk [vmem:[#allocation3 + $0x3c8] sm:$0xff] %vm389_vm0, %v3590_v14  ;;  %v6118_v30 = vpop.eup %6117 }
 0x2ce   : > { %1948 = vst.msk [vmem:[#allocation2 + $0x338] sm:$0xff] %vm389_vm0, %v6110_v25  ;;  %3717 = vst.msk [vmem:[#allocation3 + $0x3c0] sm:$0xff] %vm389_vm0, %v3589_v4  ;;  %v3396_v7 = vrot.slane %v2376_v2, %v6335_v19  ;;  %v3594_v58 = vmul.f32 %v3400_v53, %v3136_v63  ;;  %v3593_v60 = vmul.f32 %v3400_v53, %v3132_v17  ;;  %v6120_v41 = vpop.eup %6119 }
 0x2cf   : > { %1949 = vst.msk [vmem:[#allocation2 + $0x340] sm:$0xff] %vm389_vm0, %v6112_v31  ;;  %3706 = vst.msk [vmem:[#allocation3 + $0x368] sm:$0xff] %vm389_vm0, %v3578_v13  ;;  %v2380_v28 = vcombine.high %v2376_v2, %v2376_v2  ;;  %v6122_v37 = vpop.eup %6121 }
 0x2d0   : > { %3705 = vst.msk [vmem:[#allocation3 + $0x360] sm:$0xff] %vm389_vm0, %v3577_v56  ;;  %1950 = vst.msk [vmem:[#allocation2 + $0x348] sm:$0xff] %vm389_vm0, %v6114_v23  ;;  %v3592_v9 = vmul.f32 %v3396_v7, %v7942_v29  ;;  %v3591_v42 = vmul.f32 %v3396_v7, %v7944_v45  ;;  %v6124_v59 = vpop.eup %6123 }
 0x2d1   : > { %3708 = vst.msk [vmem:[#allocation3 + $0x378] sm:$0xff] %vm389_vm0, %v3580_v39  ;;  %3707 = vst.msk [vmem:[#allocation3 + $0x370] sm:$0xff] %vm389_vm0, %v3579_v18  ;;  %v3404_v43 = vrot.slane %v2380_v28, %v6335_v19  ;;  %v6126_v11 = vpop.eup %6125  ;;  %v6187_v19 = vmov 0.0  }
 0x2d2   : > { %1951 = vst.msk [vmem:[#allocation2 + $0x350] sm:$0xff] %vm389_vm0, %v6116_v44  ;;  %1952 = vst.msk [vmem:[#allocation2 + $0x358] sm:$0xff] %vm389_vm0, %v6118_v30 }
 0x2d3   : > { %3722 = vst.msk [vmem:[#allocation3 + $0x3e8] sm:$0xff] %vm389_vm0, %v3594_v58  ;;  %3721 = vst.msk [vmem:[#allocation3 + $0x3e0] sm:$0xff] %vm389_vm0, %v3593_v60  ;;  %v3596_v22 = vmul.f32 %v3404_v43, %v3148_v6  ;;  %v3595_v47 = vmul.f32 %v3404_v43, %v3144_v27 }
 0x2d4   : > { %1953 = vst.msk [vmem:[#allocation2 + $0x360] sm:$0xff] %vm389_vm0, %v6120_v41  ;;  %1954 = vst.msk [vmem:[#allocation2 + $0x368] sm:$0xff] %vm389_vm0, %v6122_v37 }
 0x2d5   : > { %3720 = vst.msk [vmem:[#allocation3 + $0x3d8] sm:$0xff] %vm389_vm0, %v3592_v9  ;;  %3719 = vst.msk [vmem:[#allocation3 + $0x3d0] sm:$0xff] %vm389_vm0, %v3591_v42 }
 0x2d6   : > { %1955 = vst.msk [vmem:[#allocation2 + $0x370] sm:$0xff] %vm389_vm0, %v6124_v59  ;;  %1956 = vst.msk [vmem:[#allocation2 + $0x378] sm:$0xff] %vm389_vm0, %v6126_v11 }
 0x2d7   : > { %3724 = vst.msk [vmem:[#allocation3 + $0x3f8] sm:$0xff] %vm389_vm0, %v3596_v22  ;;  %3723 = vst.msk [vmem:[#allocation3 + $0x3f0] sm:$0xff] %vm389_vm0, %v3595_v47 }
 0x2d8 LB: >> { %s5697_s15 = sshll.u32 %s6197_s14, 4  ;;  %s3730_s14 = sadd.s32 1, %s6197_s14   ;;  %s6197_s14 = sphi %s6195_s14, %s3730_s14   ;;  %v6193_v8 = vphi %v6191_v8, %v3742_v8   ;;  %v6189_v19 = vphi %v6187_v19, %v3743_v19  }
 0x2d9   : >> { %s3734_s16 = scalar_lea.vmem [#allocation2], %s5697_s15  ;;  %s3739_s17 = scalar_lea.vmem [#allocation3], %s5697_s15 }
 0x2da   : >> { %s3744_s18 = scalar_lea.vmem [#allocation4], %s5697_s15  ;;  %p3727_p7 = scmp.ge.s32.totalorder %s3730_s14, 64  }
 0x2db   : > { %v8861_v62 = vld [vmem:[#allocation21_spill] sm:$0xff] (%p3727_p7)  ;;  %v8862_v26 = vld [vmem:[#allocation22_spill] sm:$0xff] (%p3727_p7)  ;;  %v8863_v55 = vld [vmem:[#allocation23_spill] sm:$0xff] (%p3727_p7)  ;;  %vm5363_vm3 = vcmask (%p3727_p7), 1041409   ;;  %vm5366_vm4 = vcmask (%p3727_p7), 1042434   ;;  %vm5369_vm5 = vcmask (%p3727_p7), 1043459  }
 0x2dc   : > { %3885 = vbcast.lane.b32.xlu1 (%p3727_p7), %v8861_v62, 274  ;;  %3877 = vbcast.lane.b32.xlu0 (%p3727_p7), %v8862_v26, 274  ;;  %v8864_v35 = vld [vmem:[#allocation24_spill] sm:$0xff] (%p3727_p7)  ;;  %v8865_v40 = vld [vmem:[#allocation25_spill] sm:$0xff] (%p3727_p7)  ;;  %v8866_v34 = vld [vmem:[#allocation26_spill] sm:$0xff] (%p3727_p7)  ;;  %vm5372_vm6 = vcmask (%p3727_p7), 1044484  }
 0x2dd   : >> { %v3735_v29 = vld [vmem:[%s3734_s16] sm:$0xff]  ;;  %v3736_v38 = vld [vmem:[%s3734_s16 + $0x8] sm:$0xff]  ;;  %v8867_v32 = vld [vmem:[#allocation27_spill] sm:$0xff] (%p3727_p7)  ;;  %vm5375_vm7 = vcmask (%p3727_p7), 1045509   ;;  %vm5378_vm8 = vcmask (%p3727_p7), 1046534   ;;  %vm5381_vm9 = vcmask (%p3727_p7), 1047559  }
 0x2de   : >> { %v3740_v45 = vld [vmem:[%s3739_s17] sm:$0xff]  ;;  %v3737_v49 = vmul.f32 %v6193_v8, %v3735_v29  ;;  %v3738_v33 = vmul.f32 %v6189_v19, %v3736_v38  ;;  %v3741_v50 = vld [vmem:[%s3739_s17 + $0x8] sm:$0xff]  ;;  %3729 = sbr.rel (!%p3727_p7) target bundleno = 728 (0x2d8), region = 99  ;;  %v8868_v3 = vld [vmem:[#allocation28_spill] sm:$0xff] (%p3727_p7) }
 0x2df   : > { %v8869_v1 = vld [vmem:[#allocation13_spill] sm:$0xff] (%p3727_p7)  ;;  %v8870_v20 = vld [vmem:[#allocation14_spill] sm:$0xff] (%p3727_p7)  ;;  %v8871_v46 = vld [vmem:[#allocation15_spill] sm:$0xff] (%p3727_p7) }
 0x2e0   : >> { %v3742_v8 = vadd.f32 %v3740_v45, %v3737_v49   ;;  %v3743_v19 = vadd.f32 %v3741_v50, %v3738_v33   ;;  %3889 = vbcast.lane.b32.xlu1 (%p3727_p7), %v8861_v62, 282  ;;  %3881 = vbcast.lane.b32.xlu0 (%p3727_p7), %v8862_v26, 282  ;;  %v8872_v48 = vld [vmem:[#allocation16_spill] sm:$0xff] (%p3727_p7)  ;;  %v8873_v0 = vld [vmem:[#allocation17_spill] sm:$0xff] (%p3727_p7)  ;;  %v8874_v15 = vld [vmem:[#allocation18_spill] sm:$0xff] (%p3727_p7) }
 0x2e1   : > { %v8875_v10 = vld [vmem:[#allocation19_spill] sm:$0xff] (%p3727_p7)  ;;  %v8876_v12 = vld [vmem:[#allocation20_spill] sm:$0xff] (%p3727_p7)  ;;  %v8877_v57 = vld [vmem:[#allocation37_spill] sm:$0xff] (%p3727_p7) }
 0x2e2   : >> { %3745 = vst.msk [vmem:[%s3744_s18] sm:$0xff] %vm389_vm0, %v3742_v8  ;;  %3746 = vst.msk [vmem:[%s3744_s18 + $0x8] sm:$0xff] %vm389_vm0, %v3743_v19  ;;  %v8878_v51 = vld [vmem:[#allocation38_spill] sm:$0xff] (%p3727_p7)  ;;  %v8879_v54 = vld [vmem:[#allocation39_spill] sm:$0xff] (%p3727_p7) }
 0x2e3   : > { %v8880_v16 = vld [vmem:[#allocation40_spill] sm:$0xff]  ;;  %v8881_v52 = vld [vmem:[#allocation41_spill] sm:$0xff]  ;;  %v8882_v5 = vld [vmem:[#allocation42_spill] sm:$0xff] }
 0x2e4   : > { %3897 = vbcast.lane.b32.xlu1 %v8863_v55, 282  ;;  %3893 = vbcast.lane.b32.xlu0 %v8863_v55, 274  ;;  %v8883_v14 = vld [vmem:[#allocation43_spill] sm:$0xff]  ;;  %v8884_v63 = vld [vmem:[#allocation44_spill] sm:$0xff]  ;;  %v8885_v17 = vld [vmem:[#allocation29_spill] sm:$0xff] }
 0x2e5   : > { %v8886_v21 = vld [vmem:[#allocation30_spill] sm:$0xff]  ;;  %v8887_v36 = vld [vmem:[#allocation31_spill] sm:$0xff]  ;;  %v8888_v4 = vld [vmem:[#allocation32_spill] sm:$0xff] }
 0x2e6   : > { %v8889_v24 = vld [vmem:[#allocation33_spill] sm:$0xff]  ;;  %v8890_v56 = vld [vmem:[#allocation34_spill] sm:$0xff]  ;;  %v8891_v60 = vld [vmem:[#allocation35_spill] sm:$0xff] }
 0x2e7   : > { %v8892_v11 = vld [vmem:[#allocation36_spill] sm:$0xff] }
 0x2e8   : > { %3905 = vbcast.lane.b32.xlu1 %v8864_v35, 282  ;;  %3901 = vbcast.lane.b32.xlu0 %v8864_v35, 274 }
 0x2e9   : > { %v3749_v25 = vld [vmem:[#allocation4 + $0x10] sm:$0xff]  ;;  %v3750_v31 = vld [vmem:[#allocation4 + $0x18] sm:$0xff]  ;;  %v3748_v39 = vld [vmem:[#allocation4 + $0x8] sm:$0xff] }
 0x2ea   : > { %v3747_v2 = vld [vmem:[#allocation4] sm:$0xff]  ;;  %v3752_v28 = vld [vmem:[#allocation4 + $0x28] sm:$0xff]  ;;  %v3754_v19 = vld [vmem:[#allocation4 + $0x38] sm:$0xff] }
 0x2eb   : > { %v3751_v30 = vld [vmem:[#allocation4 + $0x20] sm:$0xff]  ;;  %v3753_v8 = vld [vmem:[#allocation4 + $0x30] sm:$0xff] }
 0x2ec   : > { %3913 = vbcast.lane.b32.xlu1 %v8865_v40, 282  ;;  %3909 = vbcast.lane.b32.xlu0 %v8865_v40, 274  ;;  %v8893_v40 = vld [vmem:[#allocation53_spill] sm:$0xff] }
 0x2f0   : > { %3921 = vbcast.lane.b32.xlu1 %v8866_v34, 282  ;;  %3917 = vbcast.lane.b32.xlu0 %v8866_v34, 274  ;;  %v3756_v34 = vld [vmem:[#allocation4 + $0x48] sm:$0xff] }
 0x2f4   : > { %3929 = vbcast.lane.b32.xlu1 %v8867_v32, 282  ;;  %3925 = vbcast.lane.b32.xlu0 %v8867_v32, 274  ;;  %v3755_v32 = vld [vmem:[#allocation4 + $0x40] sm:$0xff] }
 0x2f8   : > { %3937 = vbcast.lane.b32.xlu1 %v8868_v3, 282  ;;  %3933 = vbcast.lane.b32.xlu0 %v8868_v3, 274 }
 0x2fc   : > { %3945 = vbcast.lane.b32.xlu1 %v8869_v1, 282  ;;  %3941 = vbcast.lane.b32.xlu0 %v8869_v1, 274 }
 0x300   : > { %3953 = vbcast.lane.b32.xlu1 %v8870_v20, 282  ;;  %3949 = vbcast.lane.b32.xlu0 %v8870_v20, 274 }
 0x304   : > { %3961 = vbcast.lane.b32.xlu1 %v8871_v46, 282  ;;  %3957 = vbcast.lane.b32.xlu0 %v8871_v46, 274 }
 0x308   : > { %3969 = vbcast.lane.b32.xlu1 %v8872_v48, 282  ;;  %3965 = vbcast.lane.b32.xlu0 %v8872_v48, 274 }
 0x30c   : > { %3977 = vbcast.lane.b32.xlu1 %v8873_v0, 282  ;;  %3973 = vbcast.lane.b32.xlu0 %v8873_v0, 274 }
 0x310   : > { %3985 = vbcast.lane.b32.xlu1 %v8874_v15, 282  ;;  %3981 = vbcast.lane.b32.xlu0 %v8874_v15, 274 }
 0x314   : > { %3993 = vbcast.lane.b32.xlu1 %v8875_v10, 282  ;;  %3989 = vbcast.lane.b32.xlu0 %v8875_v10, 274 }
 0x318   : > { %4001 = vbcast.lane.b32.xlu1 %v8876_v12, 282  ;;  %3997 = vbcast.lane.b32.xlu0 %v8876_v12, 274  ;;  %v8104_v12 = vld [vmem:[%s6275_s10] ss:$0 sm:$0xff] }
 0x31c   : > { %4009 = vbcast.lane.b32.xlu1 %v8877_v57, 282  ;;  %4005 = vbcast.lane.b32.xlu0 %v8877_v57, 274 }
 0x320   : > { %4017 = vbcast.lane.b32.xlu1 %v8878_v51, 282  ;;  %4013 = vbcast.lane.b32.xlu0 %v8878_v51, 274 }
 0x324   : > { %4025 = vbcast.lane.b32.xlu1 %v8879_v54, 282  ;;  %4021 = vbcast.lane.b32.xlu0 %v8879_v54, 274 }
 0x328   : > { %4033 = vbcast.lane.b32.xlu1 %v8880_v16, 282  ;;  %4029 = vbcast.lane.b32.xlu0 %v8880_v16, 274 }
 0x32c   : > { %4041 = vbcast.lane.b32.xlu1 %v8881_v52, 282  ;;  %4037 = vbcast.lane.b32.xlu0 %v8881_v52, 274  ;;  %v8894_v52 = vld [vmem:[#allocation56_spill] sm:$0xff] }
 0x330   : > { %4049 = vbcast.lane.b32.xlu1 %v8882_v5, 282  ;;  %4045 = vbcast.lane.b32.xlu0 %v8882_v5, 274  ;;  %v3758_v5 = vld [vmem:[#allocation4 + $0x58] sm:$0xff] }
 0x334   : > { %4057 = vbcast.lane.b32.xlu1 %v8883_v14, 282  ;;  %4053 = vbcast.lane.b32.xlu0 %v8883_v14, 274  ;;  %v3757_v14 = vld [vmem:[#allocation4 + $0x50] sm:$0xff] }
 0x338   : > { %4065 = vbcast.lane.b32.xlu1 %v8884_v63, 282  ;;  %4061 = vbcast.lane.b32.xlu0 %v8884_v63, 274 }
 0x33c   : > { %4073 = vbcast.lane.b32.xlu1 %v8885_v17, 282  ;;  %4069 = vbcast.lane.b32.xlu0 %v8885_v17, 274 }
 0x340   : > { %4081 = vbcast.lane.b32.xlu1 %v8886_v21, 282  ;;  %4077 = vbcast.lane.b32.xlu0 %v8886_v21, 274 }
 0x344   : > { %4089 = vbcast.lane.b32.xlu1 %v8887_v36, 282  ;;  %4085 = vbcast.lane.b32.xlu0 %v8887_v36, 274 }
 0x348   : > { %4097 = vbcast.lane.b32.xlu1 %v8888_v4, 282  ;;  %4093 = vbcast.lane.b32.xlu0 %v8888_v4, 274  ;;  %v8895_v4 = vld [vmem:[#allocation5_spill] sm:$0xff] }
 0x34c   : > { %4105 = vbcast.lane.b32.xlu1 %v8889_v24, 282  ;;  %4101 = vbcast.lane.b32.xlu0 %v8889_v24, 274  ;;  %v8112_v24 = vmul.f32 %v8104_v12, %v8895_v4 }
 0x34e   : > { %v3886_v61 = vpop.permute.xlu1 %3885  ;;  %v3878_v13 = vpop.permute.xlu0 %3877 }
 0x34f   : > { %v4389_v18 = vmul.f32 %v3886_v61, %v3749_v25  ;;  %v4387_v58 = vmul.f32 %v3878_v13, %v3747_v2 }
 0x350   : > { %4113 = vbcast.lane.b32.xlu1 %v8890_v56, 282  ;;  %4109 = vbcast.lane.b32.xlu0 %v8890_v56, 274 }
 0x351   : > { %v4524_v6 = vsel %vm389_vm0, %v4389_v18, 0.0  ;;  %v4515_v22 = vsel %vm389_vm0, %v4387_v58, 0.0 }
 0x352   : > { %v3890_v53 = vpop.permute.xlu1 %3889  ;;  %v3882_v23 = vpop.permute.xlu0 %3881 }
 0x353   : > { %v4390_v44 = vmul.f32 %v3890_v53, %v3750_v31  ;;  %v4388_v7 = vmul.f32 %v3882_v23, %v3748_v39  ;;  %v8896_v53 = vld [vmem:[#allocation57_spill] sm:$0xff]  ;;  %v3760_v23 = vld [vmem:[#allocation4 + $0x68] sm:$0xff] }
 0x354   : > { %4121 = vbcast.lane.b32.xlu1 %v8891_v60, 282  ;;  %4117 = vbcast.lane.b32.xlu0 %v8891_v60, 274 }
 0x355   : > { %v4525_v27 = vsel %vm389_vm0, %v4390_v44, 0.0  ;;  %v4516_v9 = vsel %vm389_vm0, %v4388_v7, 0.0  ;;  %v3759_v44 = vld [vmem:[#allocation4 + $0x60] sm:$0xff] }
 0x356   : > { %v4526_v41 = vadd.f32 %v4525_v27, %v4524_v6  ;;  %v3898_v42 = vpop.permute.xlu1 %3897  ;;  %v3894_v43 = vpop.permute.xlu0 %3893  ;;  %v4517_v29 = vadd.f32 %v4516_v9, %v4515_v22  ;;  %v5114_v6 = vrot.slane %v8112_v24, 1  ;;  %v5115_v27 = vrot.slane %v8112_v24, 2 }
 0x357   : > { %v4392_v37 = vmul.f32 %v3898_v42, %v3752_v28  ;;  %v4391_v59 = vmul.f32 %v3894_v43, %v3751_v30 }
 0x358   : > { %v4527_v47 = vrot.slane %v4526_v41, 4  ;;  %4129 = vbcast.lane.b32.xlu1 %v8892_v11, 282  ;;  %4125 = vbcast.lane.b32.xlu0 %v8892_v11, 274  ;;  %v4518_v3 = vrot.slane %v4517_v29, 4  ;;  %v5116_v11 = vrot.slane %v8112_v24, 3 }
 0x359   : > { %v4534_v45 = vsel %vm389_vm0, %v4392_v37, 0.0  ;;  %v4533_v38 = vsel %vm389_vm0, %v4391_v59, 0.0 }
 0x35a   : > { %v4528_v49 = vadd.f32 %v4527_v47, %v4526_v41  ;;  %v4535_v33 = vadd.f32 %v4534_v45, %v4533_v38  ;;  %v3906_v50 = vpop.permute.xlu1 %3905  ;;  %v3902_v62 = vpop.permute.xlu0 %3901  ;;  %v4519_v63 = vadd.f32 %v4518_v3, %v4517_v29  ;;  %v3762_v29 = vld [vmem:[#allocation4 + $0x78] sm:$0xff]  ;;  %v3761_v45 = vld [vmem:[#allocation4 + $0x70] sm:$0xff] }
 0x35b   : > { %v4394_v26 = vmul.f32 %v3906_v50, %v3754_v19  ;;  %v4393_v55 = vmul.f32 %v3902_v62, %v3753_v8  ;;  %v8897_v8 = vld [vmem:[#allocation60_spill] sm:$0xff] }
 0x35c   : > { %v4536_v35 = vrot.slane %v4535_v33, 4  ;;  %4137 = vbcast.lane.b32.xlu1 %v8893_v40, 282  ;;  %4133 = vbcast.lane.b32.xlu0 %v8893_v40, 274  ;;  %v4529_v46 = vrot.slane %v4528_v49, 2  ;;  %v4520_v7 = vrot.slane %v4519_v63, 2 }
 0x35d   : > { %v4543_v1 = vsel %vm389_vm0, %v4394_v26, 0.0  ;;  %v4542_v20 = vsel %vm389_vm0, %v4393_v55, 0.0  ;;  %v5117_v26 = vrot.slane %v8112_v24, 4 }
 0x35e   : > { %v4537_v48 = vadd.f32 %v4536_v35, %v4535_v33  ;;  %v4544_v0 = vadd.f32 %v4543_v1, %v4542_v20  ;;  %v3914_v15 = vpop.permute.xlu1 %3913  ;;  %v3910_v10 = vpop.permute.xlu0 %3909  ;;  %v4530_v36 = vadd.f32 %v4529_v46, %v4528_v49  ;;  %v4521_v38 = vadd.f32 %v4520_v7, %v4519_v63  ;;  %v3764_v46 = vld [vmem:[#allocation4 + $0x88] sm:$0xff] }
 0x35f   : > { %v4396_v57 = vmul.f32 %v3914_v15, %v3756_v34  ;;  %v4395_v51 = vmul.f32 %v3910_v10, %v3755_v32  ;;  %v8898_v10 = vld [vmem:[#allocation63_spill] sm:$0xff] }
 0x360   : > { %v4538_v54 = vrot.slane %v4537_v48, 2  ;;  %v4545_v16 = vrot.slane %v4544_v0, 4  ;;  %4145 = vbcast.lane.b32.xlu1 %v8894_v52, 282  ;;  %4141 = vbcast.lane.b32.xlu0 %v8894_v52, 274  ;;  %v4531_v30 = vrot.slane %v4530_v36, 1 }
 0x361   : > { %v4552_v17 = vsel %vm389_vm0, %v4396_v57, 0.0  ;;  %v4551_v21 = vsel %vm389_vm0, %v4395_v51, 0.0  ;;  %v3763_v57 = vld [vmem:[#allocation4 + $0x80] sm:$0xff]  ;;  %v4522_v51 = vrot.slane %v4521_v38, 1 }
 0x362   : > { %v4546_v61 = vadd.f32 %v4545_v16, %v4544_v0  ;;  %v3922_v25 = vpop.permute.xlu1 %3921  ;;  %v3918_v13 = vpop.permute.xlu0 %3917  ;;  %v4539_v56 = vadd.f32 %v4538_v54, %v4537_v48  ;;  %v4553_v31 = vadd.f32 %v4552_v17, %v4551_v21  ;;  %v4532_v62 = vadd.f32 %v4531_v30, %v4530_v36 }
 0x363   : > { %v4398_v39 = vmul.f32 %v3922_v25, %v3758_v5  ;;  %v4397_v18 = vmul.f32 %v3918_v13, %v3757_v14 }
 0x364   : > { %v4547_v2 = vrot.slane %v4546_v61, 2  ;;  %4153 = vbcast.lane.b32.xlu1 %v8896_v53, 282  ;;  %4149 = vbcast.lane.b32.xlu0 %v8896_v53, 274  ;;  %v4554_v58 = vrot.slane %v4553_v31, 4  ;;  %v4540_v43 = vrot.slane %v4539_v56, 1  ;;  %v5235_v5 = vadd.f32 %v5114_v6, %v4532_v62  ;;  %v8899_v53 = vld [vmem:[#allocation64_spill] sm:$0xff] }
 0x365   : > { %v4561_v60 = vsel %vm389_vm0, %v4398_v39, 0.0  ;;  %v4560_v28 = vsel %vm389_vm0, %v4397_v18, 0.0 }
 0x366   : > { %v4562_v41 = vadd.f32 %v4561_v60, %v4560_v28  ;;  %v3930_v9 = vpop.permute.xlu1 %3929  ;;  %v3926_v42 = vpop.permute.xlu0 %3925  ;;  %v4555_v37 = vadd.f32 %v4554_v58, %v4553_v31  ;;  %v4548_v47 = vadd.f32 %v4547_v2, %v4546_v61  ;;  %v4541_v32 = vadd.f32 %v4540_v43, %v4539_v56  ;;  %v3766_v56 = vld [vmem:[#allocation4 + $0x98] sm:$0xff] }
 0x367   : > { %v4400_v59 = vmul.f32 %v3930_v9, %v3760_v23  ;;  %v4399_v22 = vmul.f32 %v3926_v42, %v3759_v44  ;;  %v5118_v61 = vrot.slane %v8112_v24, 5  ;;  %v3765_v23 = vld [vmem:[#allocation4 + $0x90] sm:$0xff]  ;;  %v4523_v44 = vadd.f32 %v4522_v51, %v4521_v38  ;;  %v3767_v38 = vld [vmem:[#allocation4 + $0xa0] sm:$0xff] }
 0x368   : > { %v4563_v19 = vrot.slane %v4562_v41, 4  ;;  %4161 = vbcast.lane.b32.xlu1 %v8897_v8, 282  ;;  %4157 = vbcast.lane.b32.xlu0 %v8897_v8, 274  ;;  %v4556_v49 = vrot.slane %v4555_v37, 2  ;;  %v4549_v48 = vrot.slane %v4548_v47, 1  ;;  %v5236_v4 = vadd.f32 %v5115_v27, %v4541_v32 }
 0x369   : > { %v4570_v33 = vsel %vm389_vm0, %v4400_v59, 0.0  ;;  %v4569_v50 = vsel %vm389_vm0, %v4399_v22, 0.0  ;;  %v5119_v58 = vrot.slane %v8112_v24, 6  ;;  %v5120_v60 = vrot.slane %v8112_v24, 7  ;;  %v3768_v22 = vld [vmem:[#allocation4 + $0xa8] sm:$0xff] }
 0x36a   : > { %v4564_v55 = vadd.f32 %v4563_v19, %v4562_v41  ;;  %v4571_v35 = vadd.f32 %v4570_v33, %v4569_v50  ;;  %v3938_v40 = vpop.permute.xlu1 %3937  ;;  %v3934_v34 = vpop.permute.xlu0 %3933  ;;  %v4557_v3 = vadd.f32 %v4556_v49, %v4555_v37  ;;  %v4550_v31 = vadd.f32 %v4549_v48, %v4548_v47 }
 0x36b   : > { %v4402_v1 = vmul.f32 %v3938_v40, %v3762_v29  ;;  %v4401_v20 = vmul.f32 %v3934_v34, %v3761_v45  ;;  %v5362_v28 = vrot.slane %v5235_v5, 7  ;;  %v5365_v47 = vrot.slane %v5236_v4, 6  ;;  %v8900_v45 = vld [vmem:[#allocation67_spill] sm:$0xff] }
 0x36c   : > { %v4565_v0 = vrot.slane %v4564_v55, 2  ;;  %v4572_v15 = vrot.slane %v4571_v35, 4  ;;  %4169 = vbcast.lane.b32.xlu1 %v8898_v10, 282  ;;  %4165 = vbcast.lane.b32.xlu0 %v8898_v10, 274  ;;  %v4558_v54 = vrot.slane %v4557_v3, 1  ;;  %v5237_v19 = vadd.f32 %v5116_v11, %v4550_v31  ;;  %v3770_v10 = vld [vmem:[#allocation4 + $0xb8] sm:$0xff] }
 0x36d   : > { %v4579_v16 = vsel %vm389_vm0, %v4402_v1, 0.0  ;;  %v4578_v52 = vsel %vm389_vm0, %v4401_v20, 0.0  ;;  %v5234_v49 = vadd.f32 %v8112_v24, %v4523_v44 }
 0x36e   : > { %v4566_v14 = vadd.f32 %v4565_v0, %v4564_v55  ;;  %v4573_v63 = vadd.f32 %v4572_v15, %v4571_v35  ;;  %v4580_v17 = vadd.f32 %v4579_v16, %v4578_v52  ;;  %v3946_v21 = vpop.permute.xlu1 %3945  ;;  %v3942_v36 = vpop.permute.xlu0 %3941  ;;  %v4559_v7 = vadd.f32 %v4558_v54, %v4557_v3  ;;  %v8901_v15 = vld [vmem:[#allocation70_spill] sm:$0xff] }
 0x36f   : > { %v4404_v25 = vmul.f32 %v3946_v21, %v3764_v46  ;;  %v4403_v13 = vmul.f32 %v3942_v36, %v3763_v57  ;;  %v5364_v3 = vsel %vm5363_vm3, %v5362_v28, %v5234_v49  ;;  %v5368_v0 = vrot.slane %v5237_v19, 5  ;;  %v3769_v57 = vld [vmem:[#allocation4 + $0xb0] sm:$0xff]  ;;  %v3774_v19 = vld [vmem:[#allocation4 + $0xd8] sm:$0xff] }
 0x370   : > { %v4567_v39 = vrot.slane %v4566_v14, 1  ;;  %v4574_v18 = vrot.slane %v4573_v63, 2  ;;  %v4581_v2 = vrot.slane %v4580_v17, 4  ;;  %4177 = vbcast.lane.b32.xlu1 %v8899_v53, 282  ;;  %4173 = vbcast.lane.b32.xlu0 %v8899_v53, 274  ;;  %v5238_v33 = vadd.f32 %v5117_v26, %v4559_v7  ;;  %v3771_v53 = vld [vmem:[#allocation4 + $0xc0] sm:$0xff] }
 0x371   : > { %v4588_v42 = vsel %vm389_vm0, %v4404_v25, 0.0  ;;  %v4587_v43 = vsel %vm389_vm0, %v4403_v13, 0.0  ;;  %v5367_v48 = vsel %vm5366_vm4, %v5365_v47, %v5364_v3  ;;  %v8903_v47 = vld [vmem:[#allocation46_spill] sm:$0xff] }
 0x372   : > { %v4568_v30 = vadd.f32 %v4567_v39, %v4566_v14  ;;  %v4575_v6 = vadd.f32 %v4574_v18, %v4573_v63  ;;  %v4582_v27 = vadd.f32 %v4581_v2, %v4580_v17  ;;  %v3954_v41 = vpop.permute.xlu1 %3953  ;;  %v3950_v9 = vpop.permute.xlu0 %3949  ;;  %v4589_v40 = vadd.f32 %v4588_v42, %v4587_v43  ;;  %v8902_v18 = vld [vmem:[#allocation45_spill] sm:$0xff]  ;;  %v3772_v2 = vld [vmem:[#allocation4 + $0xc8] sm:$0xff] }
 0x373   : > { %v4406_v37 = vmul.f32 %v3954_v41, %v3766_v56  ;;  %v4405_v59 = vmul.f32 %v3950_v9, %v3765_v23  ;;  %v5371_v51 = vrot.slane %v5238_v33, 4  ;;  %v5370_v56 = vsel %vm5369_vm5, %v5368_v0, %v5367_v48  ;;  %v3776_v48 = vld [vmem:[#allocation4 + $0xe8] sm:$0xff]  ;;  %v3775_v0 = vld [vmem:[#allocation4 + $0xe0] sm:$0xff] }
 0x374   : > { %v4576_v8 = vrot.slane %v4575_v6, 1  ;;  %v4583_v29 = vrot.slane %v4582_v27, 2  ;;  %4185 = vbcast.lane.b32.xlu1 %v8900_v45, 282  ;;  %4181 = vbcast.lane.b32.xlu0 %v8900_v45, 274  ;;  %v5239_v55 = vadd.f32 %v5118_v61, %v4568_v30  ;;  %v4590_v63 = vrot.slane %v4589_v40, 4 }
 0x375   : > { %v4597_v50 = vsel %vm389_vm0, %v4406_v37, 0.0  ;;  %v4596_v62 = vsel %vm389_vm0, %v4405_v59, 0.0  ;;  %v5373_v23 = vsel %vm5372_vm6, %v5371_v51, %v5370_v56 }
 0x376   : > { %v4577_v35 = vadd.f32 %v4576_v8, %v4575_v6  ;;  %v4584_v11 = vadd.f32 %v4583_v29, %v4582_v27  ;;  %v3962_v34 = vpop.permute.xlu1 %3961  ;;  %v3958_v32 = vpop.permute.xlu0 %3957  ;;  %v4598_v1 = vadd.f32 %v4597_v50, %v4596_v62  ;;  %v5374_v5 = vrot.slane %v5239_v55, 3  ;;  %v3773_v8 = vld [vmem:[#allocation4 + $0xd0] sm:$0xff] }
 0x377   : > { %v4408_v20 = vmul.f32 %v3962_v34, %v3768_v22  ;;  %v4407_v46 = vmul.f32 %v3958_v32, %v3767_v38  ;;  %v8904_v34 = vld [vmem:[#allocation6_spill] sm:$0xff] }
 0x378   : > { %v5240_v24 = vadd.f32 %v5119_v58, %v4577_v35  ;;  %v4585_v26 = vrot.slane %v4584_v11, 1  ;;  %4193 = vbcast.lane.b32.xlu1 %v8901_v15, 282  ;;  %4189 = vbcast.lane.b32.xlu0 %v8901_v15, 274  ;;  %v4599_v54 = vrot.slane %v4598_v1, 4  ;;  %v5376_v28 = vsel %vm5375_vm7, %v5374_v5, %v5373_v23 }
 0x379   : > { %v4606_v16 = vsel %vm389_vm0, %v4408_v20, 0.0  ;;  %v4605_v52 = vsel %vm389_vm0, %v4407_v46, 0.0  ;;  %v8169_v32 = vmul.f32 %v8104_v12, %v8904_v34  ;;  %v8905_v20 = vld [vmem:[#allocation83_spill] sm:$0xff] }
 0x37a   : > { %v4586_v14 = vadd.f32 %v4585_v26, %v4584_v11  ;;  %v4607_v17 = vadd.f32 %v4606_v16, %v4605_v52  ;;  %v3970_v21 = vpop.permute.xlu1 %3969  ;;  %v3966_v36 = vpop.permute.xlu0 %3965  ;;  %v5377_v4 = vrot.slane %v5240_v24, 2  ;;  %v4600_v61 = vadd.f32 %v4599_v54, %v4598_v1  ;;  %v8906_v46 = vld [vmem:[#allocation47_spill] sm:$0xff] }
 0x37b   : > { %v4410_v25 = vmul.f32 %v3970_v21, %v3770_v10  ;;  %v4409_v13 = vmul.f32 %v3966_v36, %v3769_v57  ;;  %v5121_v57 = vrot.slane %v8169_v32, 1  ;;  %v5124_v23 = vrot.slane %v8169_v32, 4 }
 0x37c   : > { %v5241_v31 = vadd.f32 %v5120_v60, %v4586_v14  ;;  %v4608_v39 = vrot.slane %v4607_v17, 4  ;;  %4201 = vbcast.lane.b32.xlu1 %v8902_v18, 282  ;;  %4197 = vbcast.lane.b32.xlu0 %v8902_v18, 274  ;;  %v4601_v44 = vrot.slane %v4600_v61, 2  ;;  %v4591_v60 = vadd.f32 %v4590_v63, %v4589_v40 }
 0x37d   : > { %v4615_v7 = vsel %vm389_vm0, %v4410_v25, 0.0  ;;  %v4614_v58 = vsel %vm389_vm0, %v4409_v13, 0.0  ;;  %v5379_v9 = vsel %vm5378_vm8, %v5377_v4, %v5376_v28  ;;  %v5122_v14 = vrot.slane %v8169_v32, 2  ;;  %v3778_v25 = vld [vmem:[#allocation4 + $0xf8] sm:$0xff]  ;;  %v3777_v13 = vld [vmem:[#allocation4 + $0xf0] sm:$0xff] }
 0x37e   : > { %v5380_v30 = vrot.slane %v5241_v31, 1  ;;  %v4616_v6 = vadd.f32 %v4615_v7, %v4614_v58  ;;  %v3978_v27 = vpop.permute.xlu1 %3977  ;;  %v3974_v41 = vpop.permute.xlu0 %3973  ;;  %v4609_v42 = vadd.f32 %v4608_v39, %v4607_v17  ;;  %v4602_v29 = vadd.f32 %v4601_v44, %v4600_v61  ;;  %v8907_v61 = vld [vmem:[#allocation74_spill] sm:$0xff] }
 0x37f   : > { %v4412_v43 = vmul.f32 %v3978_v27, %v3772_v2  ;;  %v4411_v37 = vmul.f32 %v3974_v41, %v3771_v53  ;;  %v4592_v49 = vrot.slane %v4591_v60, 2  ;;  %v5123_v31 = vrot.slane %v8169_v32, 3  ;;  %v3780_v27 = vld [vmem:[#allocation4 + $0x108] sm:$0xff] }
 0x380   : > { %v5382_v59 = vsel %vm5381_vm9, %v5380_v30, %v5379_v9  ;;  %v4617_v22 = vrot.slane %v4616_v6, 4  ;;  %4209 = vbcast.lane.b32.xlu1 %v8903_v47, 282  ;;  %4205 = vbcast.lane.b32.xlu0 %v8903_v47, 274  ;;  %v4610_v35 = vrot.slane %v4609_v42, 2  ;;  %v4603_v24 = vrot.slane %v4602_v29, 1 }
 0x381   : > { %5489 = vst.msk [vmem:[%s6286_s20] sm:$0xff] %vm389_vm0, %v5382_v59  ;;  %v4624_v45 = vsel %vm389_vm0, %v4412_v43, 0.0  ;;  %v4623_v38 = vsel %vm389_vm0, %v4411_v37, 0.0  ;;  %v4593_v10 = vadd.f32 %v4592_v49, %v4591_v60  ;;  %v3779_v43 = vld [vmem:[#allocation4 + $0x100] sm:$0xff] }
 0x382   : > { %v4618_v33 = vadd.f32 %v4617_v22, %v4616_v6  ;;  %v4625_v50 = vadd.f32 %v4624_v45, %v4623_v38  ;;  %v3986_v62 = vpop.permute.xlu1 %3985  ;;  %v3982_v55 = vpop.permute.xlu0 %3981  ;;  %v4611_v5 = vadd.f32 %v4610_v35, %v4609_v42  ;;  %v4604_v56 = vadd.f32 %v4603_v24, %v4602_v29 }
 0x383   : > { %v4414_v11 = vmul.f32 %v3986_v62, %v3774_v19  ;;  %v4413_v40 = vmul.f32 %v3982_v55, %v3773_v8  ;;  %v4594_v2 = vrot.slane %v4593_v10, 1  ;;  %v5125_v29 = vrot.slane %v8169_v32, 5 }
 0x384   : > { %v4619_v3 = vrot.slane %v4618_v33, 2  ;;  %v4626_v1 = vrot.slane %v4625_v50, 4  ;;  %4269 = vbcast.lane.b32.xlu1 %v8905_v20, 274  ;;  %4213 = vbcast.lane.b32.xlu0 %v8906_v46, 274  ;;  %v4612_v28 = vrot.slane %v4611_v5, 1  ;;  %v5243_v37 = vadd.f32 %v5121_v57, %v4604_v56 }
 0x385   : > { %v4633_v26 = vsel %vm389_vm0, %v4414_v11, 0.0  ;;  %v4632_v15 = vsel %vm389_vm0, %v4413_v40, 0.0  ;;  %v4595_v19 = vadd.f32 %v4594_v2, %v4593_v10  ;;  %v5127_v24 = vrot.slane %v8169_v32, 7 }
 0x386   : > { %v4627_v51 = vadd.f32 %v4626_v1, %v4625_v50  ;;  %v4634_v54 = vadd.f32 %v4633_v26, %v4632_v15  ;;  %v3994_v16 = vpop.permute.xlu1 %3993  ;;  %v3990_v52 = vpop.permute.xlu0 %3989  ;;  %v4620_v21 = vadd.f32 %v4619_v3, %v4618_v33  ;;  %v4613_v33 = vadd.f32 %v4612_v28, %v4611_v5  ;;  %v8908_v3 = vld [vmem:[#allocation87_spill] sm:$0xff]  ;;  %v3782_v1 = vld [vmem:[#allocation4 + $0x118] sm:$0xff] }
 0x387   : > { %v4416_v63 = vmul.f32 %v3994_v16, %v3776_v48  ;;  %v4415_v17 = vmul.f32 %v3990_v52, %v3775_v0  ;;  %v5126_v0 = vrot.slane %v8169_v32, 6 }
 0x388   : > { %v4628_v36 = vrot.slane %v4627_v51, 2  ;;  %v4635_v4 = vrot.slane %v4634_v54, 4  ;;  %4333 = vbcast.lane.b32.xlu1 %v8907_v61, 274  ;;  %4273 = vbcast.lane.b32.xlu0 %v8905_v20, 282  ;;  %v4621_v41 = vrot.slane %v4620_v21, 1  ;;  %v3781_v20 = vld [vmem:[#allocation4 + $0x110] sm:$0xff]  ;;  %v5244_v16 = vadd.f32 %v5122_v14, %v4613_v33 }
 0x389   : > { %v4642_v39 = vsel %vm389_vm0, %v4416_v63, 0.0  ;;  %v4641_v18 = vsel %vm389_vm0, %v4415_v17, 0.0  ;;  %v5242_v17 = vadd.f32 %v8169_v32, %v4595_v19 }
 0x38a   : > { %v4629_v53 = vadd.f32 %v4628_v36, %v4627_v51  ;;  %v4636_v44 = vadd.f32 %v4635_v4, %v4634_v54  ;;  %v4002_v7 = vpop.permute.xlu1 %4001  ;;  %v3998_v58 = vpop.permute.xlu0 %3997  ;;  %v4643_v30 = vadd.f32 %v4642_v39, %v4641_v18  ;;  %v4622_v35 = vadd.f32 %v4621_v41, %v4620_v21 }
 0x38b   : > { %v4418_v60 = vmul.f32 %v4002_v7, %v3778_v25  ;;  %v4417_v6 = vmul.f32 %v3998_v58, %v3777_v13  ;;  %v3784_v25 = vld [vmem:[#allocation4 + $0x128] sm:$0xff]  ;;  %v3783_v13 = vld [vmem:[#allocation4 + $0x120] sm:$0xff]  ;;  %v5385_v7 = vrot.slane %v5244_v16, 6 }
 0x38c   : > { %v4630_v9 = vrot.slane %v4629_v53, 1  ;;  %v4637_v42 = vrot.slane %v4636_v44, 2  ;;  %4217 = vbcast.lane.b32.xlu1 %v8906_v46, 282  ;;  %4337 = vbcast.lane.b32.xlu0 %v8907_v61, 282  ;;  %v4644_v59 = vrot.slane %v4643_v30, 4  ;;  %v5383_v46 = vrot.slane %v5243_v37, 7 }
 0x38d   : > { %v4651_v22 = vsel %vm389_vm0, %v4418_v60, 0.0  ;;  %v4650_v47 = vsel %vm389_vm0, %v4417_v6, 0.0  ;;  %v5245_v21 = vadd.f32 %v5123_v31, %v4622_v35  ;;  %v8909_v61 = vld [vmem:[#allocation77_spill] sm:$0xff]  ;;  %v3786_v60 = vld [vmem:[#allocation4 + $0x138] sm:$0xff]  ;;  %v3785_v6 = vld [vmem:[#allocation4 + $0x130] sm:$0xff] }
 0x38e   : > { %v4638_v8 = vadd.f32 %v4637_v42, %v4636_v44  ;;  %v4652_v45 = vadd.f32 %v4651_v22, %v4650_v47  ;;  %v4010_v38 = vpop.permute.xlu1 %4009  ;;  %v4006_v49 = vpop.permute.xlu0 %4005  ;;  %v4645_v50 = vadd.f32 %v4644_v59, %v4643_v30  ;;  %v4631_v11 = vadd.f32 %v4630_v9, %v4629_v53 }
 0x38f   : > { %v4420_v62 = vmul.f32 %v4010_v38, %v3780_v27  ;;  %v4419_v55 = vmul.f32 %v4006_v49, %v3779_v43  ;;  %v5384_v2 = vsel %vm5363_vm3, %v5383_v46, %v5242_v17  ;;  %v5387_v27 = vrot.slane %v5245_v21, 5  ;;  %v8910_v43 = vld [vmem:[#allocation48_spill] sm:$0xff]  ;;  %v8912_v17 = vld [vmem:[#allocation7_spill] sm:$0xff] }
 0x390   : > { %v4639_v40 = vrot.slane %v4638_v8, 1  ;;  %v4653_v34 = vrot.slane %v4652_v45, 4  ;;  %4281 = vbcast.lane.b32.xlu1 %v8908_v3, 282  ;;  %4277 = vbcast.lane.b32.xlu0 %v8908_v3, 274  ;;  %v4646_v48 = vrot.slane %v4645_v50, 2  ;;  %v5246_v36 = vadd.f32 %v5124_v23, %v4631_v11  ;;  %v3788_v3 = vld [vmem:[#allocation4 + $0x148] sm:$0xff] }
 0x391   : > { %v4660_v10 = vsel %vm389_vm0, %v4420_v62, 0.0  ;;  %v4659_v57 = vsel %vm389_vm0, %v4419_v55, 0.0  ;;  %v5386_v33 = vsel %vm5366_vm4, %v5385_v7, %v5384_v2  ;;  %v8218_v21 = vmul.f32 %v8104_v12, %v8912_v17 }
 0x392   : > { %v4640_v26 = vadd.f32 %v4639_v40, %v4638_v8  ;;  %v4654_v15 = vadd.f32 %v4653_v34, %v4652_v45  ;;  %v4018_v51 = vpop.permute.xlu1 %4017  ;;  %v4014_v54 = vpop.permute.xlu0 %4013  ;;  %v4647_v52 = vadd.f32 %v4646_v48, %v4645_v50  ;;  %v4661_v39 = vadd.f32 %v4660_v10, %v4659_v57  ;;  %v8911_v34 = vld [vmem:[#allocation79_spill] sm:$0xff] }
 0x393   : > { %v4422_v5 = vmul.f32 %v4018_v51, %v3782_v1  ;;  %v4421_v63 = vmul.f32 %v4014_v54, %v3781_v20  ;;  %v5389_v41 = vrot.slane %v5246_v36, 4  ;;  %v5388_v35 = vsel %vm5369_vm5, %v5387_v27, %v5386_v33  ;;  %v3787_v1 = vld [vmem:[#allocation4 + $0x140] sm:$0xff]  ;;  %v8913_v36 = vld [vmem:[#allocation88_spill] sm:$0xff] }
 0x394   : > { %v4655_v4 = vrot.slane %v4654_v15, 2  ;;  %4345 = vbcast.lane.b32.xlu1 %v8909_v61, 282  ;;  %4341 = vbcast.lane.b32.xlu0 %v8909_v61, 274  ;;  %v4648_v56 = vrot.slane %v4647_v52, 1  ;;  %v5247_v53 = vadd.f32 %v5125_v29, %v4640_v26  ;;  %v4662_v59 = vrot.slane %v4661_v39, 4  ;;  %v3789_v61 = vld [vmem:[#allocation4 + $0x150] sm:$0xff] }
 0x395   : > { %v4669_v18 = vsel %vm389_vm0, %v4422_v5, 0.0  ;;  %v4668_v14 = vsel %vm389_vm0, %v4421_v63, 0.0  ;;  %v5390_v20 = vsel %vm5372_vm6, %v5389_v41, %v5388_v35  ;;  %v5129_v7 = vrot.slane %v8218_v21, 2  ;;  %v8915_v33 = vld [vmem:[#allocation101_spill] sm:$0xff] }
 0x396   : > { %v4656_v44 = vadd.f32 %v4655_v4, %v4654_v15  ;;  %v4670_v32 = vadd.f32 %v4669_v18, %v4668_v14  ;;  %v4026_v31 = vpop.permute.xlu1 %4025  ;;  %v4022_v23 = vpop.permute.xlu0 %4021  ;;  %v4649_v58 = vadd.f32 %v4648_v56, %v4647_v52  ;;  %v5391_v19 = vrot.slane %v5247_v53, 3  ;;  %v3790_v4 = vld [vmem:[#allocation4 + $0x158] sm:$0xff] }
 0x397   : > { %v4424_v28 = vmul.f32 %v4026_v31, %v3784_v25  ;;  %v4423_v30 = vmul.f32 %v4022_v23, %v3783_v13  ;;  %v4663_v46 = vadd.f32 %v4662_v59, %v4661_v39  ;;  %v5128_v14 = vrot.slane %v8218_v21, 1 }
 0x398   : > { %v4657_v9 = vrot.slane %v4656_v44, 1  ;;  %v4671_v42 = vrot.slane %v4670_v32, 4  ;;  %4225 = vbcast.lane.b32.xlu1 %v8910_v43, 282  ;;  %4221 = vbcast.lane.b32.xlu0 %v8910_v43, 274  ;;  %v5248_v37 = vadd.f32 %v5126_v0, %v4649_v58  ;;  %v5392_v26 = vsel %vm5375_vm7, %v5391_v19, %v5390_v20 }
 0x399   : > { %v4678_v22 = vsel %vm389_vm0, %v4424_v28, 0.0  ;;  %v4677_v47 = vsel %vm389_vm0, %v4423_v30, 0.0  ;;  %v4664_v18 = vrot.slane %v4663_v46, 2  ;;  %v8914_v28 = vld [vmem:[#allocation71_spill] sm:$0xff]  ;;  %v3792_v30 = vld [vmem:[#allocation4 + $0x168] sm:$0xff]  ;;  %v5130_v43 = vrot.slane %v8218_v21, 3 }
 0x39a   : > { %v4658_v8 = vadd.f32 %v4657_v9, %v4656_v44  ;;  %v4672_v29 = vadd.f32 %v4671_v42, %v4670_v32  ;;  %v4679_v45 = vadd.f32 %v4678_v22, %v4677_v47  ;;  %v4034_v38 = vpop.permute.xlu1 %4033  ;;  %v4030_v49 = vpop.permute.xlu0 %4029  ;;  %v5393_v50 = vrot.slane %v5248_v37, 2 }
 0x39b   : > { %v4426_v62 = vmul.f32 %v4034_v38, %v3786_v60  ;;  %v4425_v55 = vmul.f32 %v4030_v49, %v3785_v6  ;;  %v3791_v60 = vld [vmem:[#allocation4 + $0x160] sm:$0xff]  ;;  %v4665_v42 = vadd.f32 %v4664_v18, %v4663_v46  ;;  %v5131_v35 = vrot.slane %v8218_v21, 4 }
 0x39c   : > { %v5249_v11 = vadd.f32 %v5127_v24, %v4658_v8  ;;  %v4680_v40 = vrot.slane %v4679_v45, 4  ;;  %4265 = vbcast.lane.b32.xlu1 %v8911_v34, 282  ;;  %4261 = vbcast.lane.b32.xlu0 %v8911_v34, 274  ;;  %v4673_v10 = vrot.slane %v4672_v29, 2  ;;  %v5394_v54 = vsel %vm5378_vm8, %v5393_v50, %v5392_v26  ;;  %v3794_v50 = vld [vmem:[#allocation4 + $0x178] sm:$0xff] }
 0x39d   : > { %v4687_v48 = vsel %vm389_vm0, %v4426_v62, 0.0  ;;  %v4686_v0 = vsel %vm389_vm0, %v4425_v55, 0.0  ;;  %v3793_v62 = vld [vmem:[#allocation4 + $0x170] sm:$0xff]  ;;  %v4666_v34 = vrot.slane %v4665_v42, 1 }
 0x39e   : > { %v5395_v15 = vrot.slane %v5249_v11, 1  ;;  %v4681_v24 = vadd.f32 %v4680_v40, %v4679_v45  ;;  %v4042_v57 = vpop.permute.xlu1 %4041  ;;  %v4038_v51 = vpop.permute.xlu0 %4037  ;;  %v4688_v16 = vadd.f32 %v4687_v48, %v4686_v0  ;;  %v4674_v44 = vadd.f32 %v4673_v10, %v4672_v29 }
 0x39f   : > { %v4428_v52 = vmul.f32 %v4042_v57, %v3788_v3  ;;  %v4427_v5 = vmul.f32 %v4038_v51, %v3787_v1 }
 0x3a0   : > { %v5396_v63 = vsel %vm5381_vm9, %v5395_v15, %v5394_v54  ;;  %4289 = vbcast.lane.b32.xlu1 %v8913_v36, 282  ;;  %4285 = vbcast.lane.b32.xlu0 %v8913_v36, 274  ;;  %v4682_v25 = vrot.slane %v4681_v24, 2  ;;  %v4689_v13 = vrot.slane %v4688_v16, 4  ;;  %v4675_v19 = vrot.slane %v4674_v44, 1 }
 0x3a1   : > { %5490 = vst.msk [vmem:[%s6286_s20 + $0x8] sm:$0xff] %vm389_vm0, %v5396_v63  ;;  %v4696_v56 = vsel %vm389_vm0, %v4428_v52, 0.0  ;;  %v4695_v39 = vsel %vm389_vm0, %v4427_v5, 0.0  ;;  %v3795_v52 = vld [vmem:[#allocation4 + $0x180] sm:$0xff]  ;;  %v5132_v63 = vrot.slane %v8218_v21, 5 }
 0x3a2   : > { %v4697_v2 = vadd.f32 %v4696_v56, %v4695_v39  ;;  %v4050_v12 = vpop.permute.xlu1 %4049  ;;  %v4046_v53 = vpop.permute.xlu0 %4045  ;;  %v4690_v32 = vadd.f32 %v4689_v13, %v4688_v16  ;;  %v4683_v6 = vadd.f32 %v4682_v25, %v4681_v24  ;;  %v4676_v0 = vadd.f32 %v4675_v19, %v4674_v44  ;;  %v3796_v24 = vld [vmem:[#allocation4 + $0x188] sm:$0xff]  ;;  %v8916_v16 = vld [vmem:[#allocation49_spill] sm:$0xff]  ;;  %v3798_v44 = vld [vmem:[#allocation4 + $0x198] sm:$0xff] }
 0x3a3   : > { %v4430_v31 = vmul.f32 %v4050_v12, %v3790_v4  ;;  %v4429_v23 = vmul.f32 %v4046_v53, %v3789_v61  ;;  %v4667_v4 = vadd.f32 %v4666_v34, %v4665_v42 }
 0x3a4   : > { %v4698_v58 = vrot.slane %v4697_v2, 4  ;;  %4329 = vbcast.lane.b32.xlu1 %v8914_v28, 282  ;;  %4325 = vbcast.lane.b32.xlu0 %v8914_v28, 274  ;;  %v4691_v27 = vrot.slane %v4690_v32, 2  ;;  %v4684_v55 = vrot.slane %v4683_v6, 1  ;;  %v5251_v18 = vadd.f32 %v5128_v14, %v4676_v0  ;;  %v8917_v28 = vld [vmem:[#allocation91_spill] sm:$0xff] }
 0x3a5   : > { %v4705_v41 = vsel %vm389_vm0, %v4430_v31, 0.0  ;;  %v4704_v9 = vsel %vm389_vm0, %v4429_v23, 0.0  ;;  %v5134_v14 = vrot.slane %v8218_v21, 7 }
 0x3a6   : > { %v4699_v37 = vadd.f32 %v4698_v58, %v4697_v2  ;;  %v4706_v59 = vadd.f32 %v4705_v41, %v4704_v9  ;;  %v4058_v22 = vpop.permute.xlu1 %4057  ;;  %v4054_v47 = vpop.permute.xlu0 %4053  ;;  %v4692_v8 = vadd.f32 %v4691_v27, %v4690_v32  ;;  %v4685_v5 = vadd.f32 %v4684_v55, %v4683_v6 }
 0x3a7   : > { %v4432_v29 = vmul.f32 %v4058_v22, %v3792_v30  ;;  %v4431_v45 = vmul.f32 %v4054_v47, %v3791_v60  ;;  %v3797_v30 = vld [vmem:[#allocation4 + $0x190] sm:$0xff]  ;;  %v5133_v6 = vrot.slane %v8218_v21, 6  ;;  %v5397_v47 = vrot.slane %v5251_v18, 7 }
 0x3a8   : > { %v4700_v38 = vrot.slane %v4699_v37, 2  ;;  %v4707_v49 = vrot.slane %v4706_v59, 4  ;;  %4353 = vbcast.lane.b32.xlu1 %v8915_v33, 282  ;;  %4349 = vbcast.lane.b32.xlu0 %v8915_v33, 274  ;;  %v4693_v26 = vrot.slane %v4692_v8, 1  ;;  %v5252_v60 = vadd.f32 %v5129_v7, %v4685_v5  ;;  %v8918_v33 = vld [vmem:[#allocation102_spill] sm:$0xff] }
 0x3a9   : > { %v4714_v11 = vsel %vm389_vm0, %v4432_v29, 0.0  ;;  %v4713_v40 = vsel %vm389_vm0, %v4431_v45, 0.0  ;;  %v5250_v7 = vadd.f32 %v8218_v21, %v4667_v4 }
 0x3aa   : > { %v4701_v3 = vadd.f32 %v4700_v38, %v4699_v37  ;;  %v4708_v1 = vadd.f32 %v4707_v49, %v4706_v59  ;;  %v4715_v20 = vadd.f32 %v4714_v11, %v4713_v40  ;;  %v4066_v46 = vpop.permute.xlu1 %4065  ;;  %v4062_v48 = vpop.permute.xlu0 %4061  ;;  %v4694_v2 = vadd.f32 %v4693_v26, %v4692_v8 }
 0x3ab   : > { %v4434_v15 = vmul.f32 %v4066_v46, %v3794_v50  ;;  %v4433_v10 = vmul.f32 %v4062_v48, %v3793_v62  ;;  %v3800_v50 = vld [vmem:[#allocation4 + $0x1a8] sm:$0xff]  ;;  %v3799_v62 = vld [vmem:[#allocation4 + $0x1a0] sm:$0xff]  ;;  %v5398_v46 = vsel %vm5363_vm3, %v5397_v47, %v5250_v7  ;;  %v8921_v7 = vld [vmem:[#allocation103_spill] sm:$0xff] }
 0x3ac   : > { %v4702_v57 = vrot.slane %v4701_v3, 1  ;;  %v4709_v51 = vrot.slane %v4708_v1, 2  ;;  %v4716_v54 = vrot.slane %v4715_v20, 4  ;;  %4233 = vbcast.lane.b32.xlu1 %v8916_v16, 282  ;;  %4229 = vbcast.lane.b32.xlu0 %v8916_v16, 274  ;;  %v5253_v19 = vadd.f32 %v5130_v43, %v4694_v2  ;;  %v3801_v16 = vld [vmem:[#allocation4 + $0x1b0] sm:$0xff] }
 0x3ad   : > { %v4723_v17 = vsel %vm389_vm0, %v4434_v15, 0.0  ;;  %v4722_v36 = vsel %vm389_vm0, %v4433_v10, 0.0  ;;  %v5399_v43 = vrot.slane %v5252_v60, 6  ;;  %v3802_v15 = vld [vmem:[#allocation4 + $0x1b8] sm:$0xff] }
 0x3ae   : > { %v4710_v61 = vadd.f32 %v4709_v51, %v4708_v1  ;;  %v4717_v25 = vadd.f32 %v4716_v54, %v4715_v20  ;;  %v4724_v13 = vadd.f32 %v4723_v17, %v4722_v36  ;;  %v4074_v56 = vpop.permute.xlu1 %4073  ;;  %v4070_v39 = vpop.permute.xlu0 %4069  ;;  %v4703_v32 = vadd.f32 %v4702_v57, %v4701_v3  ;;  %v8919_v54 = vld [vmem:[#allocation50_spill] sm:$0xff] }
 0x3af   : > { %v4436_v12 = vmul.f32 %v4074_v56, %v3796_v24  ;;  %v4435_v53 = vmul.f32 %v4070_v39, %v3795_v52  ;;  %v5401_v48 = vrot.slane %v5253_v19, 5  ;;  %v5400_v36 = vsel %vm5366_vm4, %v5399_v43, %v5398_v46  ;;  %v8282_v43 = vld [vmem:[%s6275_s10] ss:$0 sm:$0xff] }
 0x3b0   : > { %v4711_v31 = vrot.slane %v4710_v61, 1  ;;  %v4718_v23 = vrot.slane %v4717_v25, 2  ;;  %v4725_v58 = vrot.slane %v4724_v13, 4  ;;  %4297 = vbcast.lane.b32.xlu1 %v8917_v28, 282  ;;  %4293 = vbcast.lane.b32.xlu0 %v8917_v28, 274  ;;  %v5254_v45 = vadd.f32 %v5131_v35, %v4703_v32 }
 0x3b1   : > { %v4732_v27 = vsel %vm389_vm0, %v4436_v12, 0.0  ;;  %v4731_v37 = vsel %vm389_vm0, %v4435_v53, 0.0  ;;  %v5402_v39 = vsel %vm5369_vm5, %v5401_v48, %v5400_v36 }
 0x3b2   : > { %v4712_v41 = vadd.f32 %v4711_v31, %v4710_v61  ;;  %v4719_v9 = vadd.f32 %v4718_v23, %v4717_v25  ;;  %v4726_v42 = vadd.f32 %v4725_v58, %v4724_v13  ;;  %v4082_v59 = vpop.permute.xlu1 %4081  ;;  %v4078_v22 = vpop.permute.xlu0 %4077  ;;  %v4733_v11 = vadd.f32 %v4732_v27, %v4731_v37  ;;  %v8920_v31 = vld [vmem:[#allocation94_spill] sm:$0xff]  ;;  %v3803_v58 = vld [vmem:[#allocation4 + $0x1c0] sm:$0xff] }
 0x3b3   : > { %v4438_v8 = vmul.f32 %v4082_v59, %v3798_v44  ;;  %v4437_v29 = vmul.f32 %v4078_v22, %v3797_v30  ;;  %v5403_v10 = vrot.slane %v5254_v45, 4  ;;  %v3804_v23 = vld [vmem:[#allocation4 + $0x1c8] sm:$0xff]  ;;  %v3806_v45 = vld [vmem:[#allocation4 + $0x1d8] sm:$0xff] }
 0x3b4   : > { %v4720_v38 = vrot.slane %v4719_v9, 1  ;;  %v4727_v49 = vrot.slane %v4726_v42, 2  ;;  %4361 = vbcast.lane.b32.xlu1 %v8918_v33, 282  ;;  %4357 = vbcast.lane.b32.xlu0 %v8918_v33, 274  ;;  %v5255_v55 = vadd.f32 %v5132_v63, %v4712_v41  ;;  %v4734_v5 = vrot.slane %v4733_v11, 4 }
 0x3b5   : > { %v4741_v40 = vsel %vm389_vm0, %v4438_v8, 0.0  ;;  %v4740_v34 = vsel %vm389_vm0, %v4437_v29, 0.0  ;;  %v5404_v53 = vsel %vm5372_vm6, %v5403_v10, %v5402_v39  ;;  %v3810_v39 = vld [vmem:[#allocation4 + $0x1f8] sm:$0xff] }
 0x3b6   : > { %v4721_v3 = vadd.f32 %v4720_v38, %v4719_v9  ;;  %v4728_v1 = vadd.f32 %v4727_v49, %v4726_v42  ;;  %v4742_v20 = vadd.f32 %v4741_v40, %v4740_v34  ;;  %v4090_v21 = vpop.permute.xlu1 %4089  ;;  %v4086_v35 = vpop.permute.xlu0 %4085  ;;  %v5405_v52 = vrot.slane %v5255_v55, 3  ;;  %v3805_v38 = vld [vmem:[#allocation4 + $0x1d0] sm:$0xff] }
 0x3b7   : > { %v4440_v0 = vmul.f32 %v4090_v21, %v3800_v50  ;;  %v4439_v26 = vmul.f32 %v4086_v35, %v3799_v62  ;;  %v4735_v30 = vadd.f32 %v4734_v5, %v4733_v11 }
 0x3b8   : > { %v5256_v24 = vadd.f32 %v5133_v6, %v4721_v3  ;;  %v4729_v57 = vrot.slane %v4728_v1, 1  ;;  %v4743_v51 = vrot.slane %v4742_v20, 4  ;;  %4241 = vbcast.lane.b32.xlu1 %v8919_v54, 282  ;;  %4237 = vbcast.lane.b32.xlu0 %v8919_v54, 274  ;;  %v5406_v28 = vsel %vm5375_vm7, %v5405_v52, %v5404_v53  ;;  %v8922_v3 = vld [vmem:[#allocation8_spill] sm:$0xff] }
 0x3b9   : > { %v4750_v63 = vsel %vm389_vm0, %v4440_v0, 0.0  ;;  %v4749_v17 = vsel %vm389_vm0, %v4439_v26, 0.0  ;;  %v4736_v50 = vrot.slane %v4735_v30, 2  ;;  %v8923_v0 = vld [vmem:[#allocation51_spill] sm:$0xff]  ;;  %v3808_v26 = vld [vmem:[#allocation4 + $0x1e8] sm:$0xff] }
 0x3ba   : > { %v4730_v4 = vadd.f32 %v4729_v57, %v4728_v1  ;;  %v4744_v61 = vadd.f32 %v4743_v51, %v4742_v20  ;;  %v4751_v25 = vadd.f32 %v4750_v63, %v4749_v17  ;;  %v4098_v13 = vpop.permute.xlu1 %4097  ;;  %v4094_v56 = vpop.permute.xlu0 %4093  ;;  %v5407_v18 = vrot.slane %v5256_v24, 2 }
 0x3bb   : > { %v4442_v2 = vmul.f32 %v4098_v13, %v3802_v15  ;;  %v4441_v12 = vmul.f32 %v4094_v56, %v3801_v16  ;;  %v8286_v1 = vmul.f32 %v8282_v43, %v8922_v3  ;;  %v3807_v15 = vld [vmem:[#allocation4 + $0x1e0] sm:$0xff]  ;;  %v4737_v51 = vadd.f32 %v4736_v50, %v4735_v30  ;;  %v8924_v56 = vld [vmem:[#allocation95_spill] sm:$0xff] }
 0x3bc   : > { %v5257_v44 = vadd.f32 %v5134_v14, %v4730_v4  ;;  %v4752_v32 = vrot.slane %v4751_v25, 4  ;;  %4305 = vbcast.lane.b32.xlu1 %v8920_v31, 282  ;;  %4301 = vbcast.lane.b32.xlu0 %v8920_v31, 274  ;;  %v4745_v41 = vrot.slane %v4744_v61, 2  ;;  %v5408_v59 = vsel %vm5378_vm8, %v5407_v18, %v5406_v28  ;;  %v3809_v18 = vld [vmem:[#allocation4 + $0x1f0] sm:$0xff]  ;;  %v3811_v50 = vld [vmem:[#allocation4 + $0x200] sm:$0xff] }
 0x3bd   : > { %v4759_v60 = vsel %vm389_vm0, %v4442_v2, 0.0  ;;  %v4758_v6 = vsel %vm389_vm0, %v4441_v12, 0.0  ;;  %v5135_v10 = vrot.slane %v8286_v1, 1  ;;  %v5136_v2 = vrot.slane %v8286_v1, 2 }
 0x3be   : > { %v5409_v27 = vrot.slane %v5257_v44, 1  ;;  %v4753_v9 = vadd.f32 %v4752_v32, %v4751_v25  ;;  %v4760_v42 = vadd.f32 %v4759_v60, %v4758_v6  ;;  %v4106_v14 = vpop.permute.xlu1 %4105  ;;  %v4102_v37 = vpop.permute.xlu0 %4101  ;;  %v4746_v62 = vadd.f32 %v4745_v41, %v4744_v61 }
 0x3bf   : > { %v4444_v22 = vmul.f32 %v4106_v14, %v3804_v23  ;;  %v4443_v47 = vmul.f32 %v4102_v37, %v3803_v58  ;;  %v4738_v32 = vrot.slane %v4737_v51, 1 }
 0x3c0   : > { %v5410_v19 = vsel %vm5381_vm9, %v5409_v27, %v5408_v59  ;;  %v4754_v8 = vrot.slane %v4753_v9, 2  ;;  %v4761_v29 = vrot.slane %v4760_v42, 4  ;;  %4369 = vbcast.lane.b32.xlu1 %v8921_v7, 282  ;;  %4365 = vbcast.lane.b32.xlu0 %v8921_v7, 274  ;;  %v4747_v54 = vrot.slane %v4746_v62, 1  ;;  %v8925_v59 = vld [vmem:[#allocation104_spill] sm:$0xff] }
 0x3c1   : > { %5491 = vst.msk [vmem:[%s6286_s20 + $0x10] sm:$0xff] %vm389_vm0, %v5410_v19  ;;  %v4768_v49 = vsel %vm389_vm0, %v4444_v22, 0.0  ;;  %v4767_v33 = vsel %vm389_vm0, %v4443_v47, 0.0 }
 0x3c2   : > { %v4762_v55 = vadd.f32 %v4761_v29, %v4760_v42  ;;  %v4769_v11 = vadd.f32 %v4768_v49, %v4767_v33  ;;  %v4114_v40 = vpop.permute.xlu1 %4113  ;;  %v4110_v34 = vpop.permute.xlu0 %4109  ;;  %v4755_v20 = vadd.f32 %v4754_v8, %v4753_v9  ;;  %v4748_v31 = vadd.f32 %v4747_v54, %v4746_v62  ;;  %v3812_v49 = vld [vmem:[#allocation4 + $0x208] sm:$0xff] }
 0x3c3   : > { %v4446_v21 = vmul.f32 %v4114_v40, %v3806_v45  ;;  %v4445_v35 = vmul.f32 %v4110_v34, %v3805_v38  ;;  %v5137_v42 = vrot.slane %v8286_v1, 3  ;;  %v4739_v8 = vadd.f32 %v4738_v32, %v4737_v51 }
 0x3c4   : > { %v4763_v46 = vrot.slane %v4762_v55, 2  ;;  %v4770_v48 = vrot.slane %v4769_v11, 4  ;;  %4249 = vbcast.lane.b32.xlu1 %v8923_v0, 282  ;;  %4245 = vbcast.lane.b32.xlu0 %v8923_v0, 274  ;;  %v4756_v17 = vrot.slane %v4755_v20, 1  ;;  %v5259_v29 = vadd.f32 %v5135_v10, %v4748_v31 }
 0x3c5   : > { %v4777_v24 = vsel %vm389_vm0, %v4446_v21, 0.0  ;;  %v4776_v57 = vsel %vm389_vm0, %v4445_v35, 0.0  ;;  %v5139_v40 = vrot.slane %v8286_v1, 5  ;;  %v8926_v35 = vld [vmem:[#allocation52_spill] sm:$0xff] }
 0x3c6   : > { %v4764_v16 = vadd.f32 %v4763_v46, %v4762_v55  ;;  %v4771_v52 = vadd.f32 %v4770_v48, %v4769_v11  ;;  %v4122_v5 = vpop.permute.xlu1 %4121  ;;  %v4118_v63 = vpop.permute.xlu0 %4117  ;;  %v4778_v36 = vadd.f32 %v4777_v24, %v4776_v57  ;;  %v4757_v60 = vadd.f32 %v4756_v17, %v4755_v20  ;;  %v3814_v46 = vld [vmem:[#allocation4 + $0x218] sm:$0xff]  ;;  %v3813_v48 = vld [vmem:[#allocation4 + $0x210] sm:$0xff] }
 0x3c7   : > { %v4448_v4 = vmul.f32 %v4122_v5, %v3808_v26  ;;  %v4447_v61 = vmul.f32 %v4118_v63, %v3807_v15  ;;  %v5138_v55 = vrot.slane %v8286_v1, 4  ;;  %v5140_v26 = vrot.slane %v8286_v1, 6 }
 0x3c8   : > { %v4765_v25 = vrot.slane %v4764_v16, 1  ;;  %v4772_v13 = vrot.slane %v4771_v52, 2  ;;  %4313 = vbcast.lane.b32.xlu1 %v8924_v56, 282  ;;  %4309 = vbcast.lane.b32.xlu0 %v8924_v56, 274  ;;  %v4779_v12 = vrot.slane %v4778_v36, 4  ;;  %v5260_v62 = vadd.f32 %v5136_v2, %v4757_v60 }
 0x3c9   : > { %v4786_v53 = vsel %vm389_vm0, %v4448_v4, 0.0  ;;  %v4785_v44 = vsel %vm389_vm0, %v4447_v61, 0.0  ;;  %v5258_v24 = vadd.f32 %v8286_v1, %v4739_v8  ;;  %v5411_v57 = vrot.slane %v5259_v29, 7  ;;  %v3816_v4 = vld [vmem:[#allocation4 + $0x228] sm:$0xff] }
 0x3ca   : > { %v4773_v23 = vadd.f32 %v4772_v13, %v4771_v52  ;;  %v4787_v58 = vadd.f32 %v4786_v53, %v4785_v44  ;;  %v4130_v28 = vpop.permute.xlu1 %4129  ;;  %v4126_v30 = vpop.permute.xlu0 %4125  ;;  %v4780_v6 = vadd.f32 %v4779_v12, %v4778_v36  ;;  %v4766_v9 = vadd.f32 %v4765_v25, %v4764_v16 }
 0x3cb   : > { %v4450_v27 = vmul.f32 %v4130_v28, %v3810_v39  ;;  %v4449_v41 = vmul.f32 %v4126_v30, %v3809_v18  ;;  %v5413_v5 = vrot.slane %v5260_v62, 6  ;;  %v8927_v39 = vld [vmem:[#allocation98_spill] sm:$0xff]  ;;  %v3815_v18 = vld [vmem:[#allocation4 + $0x220] sm:$0xff]  ;;  %v5412_v60 = vsel %vm5363_vm3, %v5411_v57, %v5258_v24 }
 0x3cc   : > { %v4774_v14 = vrot.slane %v4773_v23, 1  ;;  %v4788_v37 = vrot.slane %v4787_v58, 4  ;;  %4377 = vbcast.lane.b32.xlu1 %v8925_v59, 282  ;;  %4373 = vbcast.lane.b32.xlu0 %v8925_v59, 274  ;;  %v4781_v22 = vrot.slane %v4780_v6, 2  ;;  %v5261_v34 = vadd.f32 %v5137_v42, %v4766_v9  ;;  %v8928_v59 = vld [vmem:[#allocation105_spill] sm:$0xff] }
 0x3cd   : > { %v4795_v47 = vsel %vm389_vm0, %v4450_v27, 0.0  ;;  %v4794_v19 = vsel %vm389_vm0, %v4449_v41, 0.0 }
 0x3ce   : > { %v4789_v7 = vadd.f32 %v4788_v37, %v4787_v58  ;;  %v4796_v45 = vadd.f32 %v4795_v47, %v4794_v19  ;;  %v4138_v38 = vpop.permute.xlu1 %4137  ;;  %v4134_v33 = vpop.permute.xlu0 %4133  ;;  %v4782_v11 = vadd.f32 %v4781_v22, %v4780_v6  ;;  %v4775_v3 = vadd.f32 %v4774_v14, %v4773_v23  ;;  %v3818_v22 = vld [vmem:[#allocation4 + $0x238] sm:$0xff]  ;;  %v3817_v47 = vld [vmem:[#allocation4 + $0x230] sm:$0xff] }
 0x3cf   : > { %v4452_v15 = vmul.f32 %v4138_v38, %v3812_v49  ;;  %v4451_v10 = vmul.f32 %v4134_v33, %v3811_v50  ;;  %v5415_v61 = vrot.slane %v5261_v34, 5  ;;  %v5141_v6 = vrot.slane %v8286_v1, 7 }
 0x3d0   : > { %v4790_v20 = vrot.slane %v4789_v7, 2  ;;  %v4797_v21 = vrot.slane %v4796_v45, 4  ;;  %4257 = vbcast.lane.b32.xlu1 %v8926_v35, 282  ;;  %4253 = vbcast.lane.b32.xlu0 %v8926_v35, 274  ;;  %v4783_v0 = vrot.slane %v4782_v11, 1  ;;  %v5262_v25 = vadd.f32 %v5138_v55, %v4775_v3 }
 0x3d1   : > { %v4804_v2 = vsel %vm389_vm0, %v4452_v15, 0.0  ;;  %v4803_v12 = vsel %vm389_vm0, %v4451_v10, 0.0  ;;  %v5414_v19 = vsel %vm5366_vm4, %v5413_v5, %v5412_v60 }
 0x3d2   : > { %v4791_v51 = vadd.f32 %v4790_v20, %v4789_v7  ;;  %v4798_v54 = vadd.f32 %v4797_v21, %v4796_v45  ;;  %v4146_v16 = vpop.permute.xlu1 %4145  ;;  %v4142_v52 = vpop.permute.xlu0 %4141  ;;  %v4784_v63 = vadd.f32 %v4783_v0, %v4782_v11  ;;  %v5417_v9 = vrot.slane %v5262_v25, 4  ;;  %v3820_v20 = vld [vmem:[#allocation4 + $0x248] sm:$0xff]  ;;  %v3819_v21 = vld [vmem:[#allocation4 + $0x240] sm:$0xff] }
 0x3d3   : > { %v4454_v17 = vmul.f32 %v4146_v16, %v3814_v46  ;;  %v4453_v36 = vmul.f32 %v4142_v52, %v3813_v48  ;;  %v4805_v37 = vadd.f32 %v4804_v2, %v4803_v12  ;;  %v5416_v1 = vsel %vm5369_vm5, %v5415_v61, %v5414_v19 }
 0x3d4   : > { %v4792_v13 = vrot.slane %v4791_v51, 1  ;;  %v4799_v56 = vrot.slane %v4798_v54, 2  ;;  %4321 = vbcast.lane.b32.xlu1 %v8927_v39, 282  ;;  %4317 = vbcast.lane.b32.xlu0 %v8927_v39, 274  ;;  %v5263_v32 = vadd.f32 %v5139_v40, %v4784_v63  ;;  %v5418_v40 = vsel %vm5372_vm6, %v5417_v9, %v5416_v1  ;;  %v3826_v1 = vld [vmem:[#allocation4 + $0x278] sm:$0xff] }
 0x3d5   : > { %v4813_v53 = vsel %vm389_vm0, %v4454_v17, 0.0  ;;  %v4812_v44 = vsel %vm389_vm0, %v4453_v36, 0.0  ;;  %v4806_v3 = vrot.slane %v4805_v37, 4  ;;  %v3822_v36 = vld [vmem:[#allocation4 + $0x258] sm:$0xff] }
 0x3d6   : > { %v4793_v31 = vadd.f32 %v4792_v13, %v4791_v51  ;;  %v4800_v23 = vadd.f32 %v4799_v56, %v4798_v54  ;;  %v4814_v58 = vadd.f32 %v4813_v53, %v4812_v44  ;;  %v4154_v28 = vpop.permute.xlu1 %4153  ;;  %v4150_v30 = vpop.permute.xlu0 %4149  ;;  %v5419_v45 = vrot.slane %v5263_v32, 3 }
 0x3d7   : > { %v4456_v27 = vmul.f32 %v4154_v28, %v3816_v4  ;;  %v4455_v41 = vmul.f32 %v4150_v30, %v3815_v18  ;;  %v4807_v63 = vadd.f32 %v4806_v3, %v4805_v37  ;;  %v3821_v4 = vld [vmem:[#allocation4 + $0x250] sm:$0xff]  ;;  %v3823_v28 = vld [vmem:[#allocation4 + $0x260] sm:$0xff] }
 0x3d8   : > { %v5264_v42 = vadd.f32 %v5140_v26, %v4793_v31  ;;  %v4801_v14 = vrot.slane %v4800_v23, 1  ;;  %4385 = vbcast.lane.b32.xlu1 %v8928_v59, 282  ;;  %4381 = vbcast.lane.b32.xlu0 %v8928_v59, 274  ;;  %v4815_v8 = vrot.slane %v4814_v58, 4  ;;  %v5420_v26 = vsel %vm5375_vm7, %v5419_v45, %v5418_v40  ;;  %v8929_v37 = vld [vmem:[#allocation9_spill] sm:$0xff]  ;;  %v3825_v45 = vld [vmem:[#allocation4 + $0x270] sm:$0xff] }
 0x3d9   : > { %v4822_v29 = vsel %vm389_vm0, %v4456_v27, 0.0  ;;  %v4821_v7 = vsel %vm389_vm0, %v4455_v41, 0.0  ;;  %v4808_v32 = vrot.slane %v4807_v63, 2  ;;  %v8337_v59 = vmul.f32 %v8282_v43, %v8929_v37 }
 0x3da   : > { %v4802_v38 = vadd.f32 %v4801_v14, %v4800_v23  ;;  %v4162_v49 = vpop.permute.xlu1 %4161  ;;  %v4158_v33 = vpop.permute.xlu0 %4157  ;;  %v5421_v50 = vrot.slane %v5264_v42, 2  ;;  %v4823_v62 = vadd.f32 %v4822_v29, %v4821_v7  ;;  %v4816_v35 = vadd.f32 %v4815_v8, %v4814_v58  ;;  %v3824_v58 = vld [vmem:[#allocation4 + $0x268] sm:$0xff] }
 0x3db   : > { %v4458_v55 = vmul.f32 %v4162_v49, %v3818_v22  ;;  %v4457_v11 = vmul.f32 %v4158_v33, %v3817_v47  ;;  %v4809_v19 = vadd.f32 %v4808_v32, %v4807_v63  ;;  %v5142_v49 = vrot.slane %v8337_v59, 1 }
 0x3dc   : > { %v5265_v34 = vadd.f32 %v5141_v6, %v4802_v38  ;;  %v4824_v46 = vrot.slane %v4823_v62, 4  ;;  %v5422_v51 = vsel %vm5378_vm8, %v5421_v50, %v5420_v26  ;;  %v4817_v61 = vrot.slane %v4816_v35, 2 }
 0x3dd   : > { %v4831_v48 = vsel %vm389_vm0, %v4458_v55, 0.0  ;;  %v4830_v0 = vsel %vm389_vm0, %v4457_v11, 0.0 }
 0x3de   : > { %v5423_v15 = vrot.slane %v5265_v34, 1  ;;  %v4832_v10 = vadd.f32 %v4831_v48, %v4830_v0  ;;  %v4170_v24 = vpop.permute.xlu1 %4169  ;;  %v4166_v57 = vpop.permute.xlu0 %4165  ;;  %v4825_v54 = vadd.f32 %v4824_v46, %v4823_v62  ;;  %v4818_v30 = vadd.f32 %v4817_v61, %v4816_v35 }
 0x3df   : > { %v4460_v16 = vmul.f32 %v4170_v24, %v3820_v20  ;;  %v4459_v52 = vmul.f32 %v4166_v57, %v3819_v21  ;;  %v5143_v20 = vrot.slane %v8337_v59, 2  ;;  %v5144_v21 = vrot.slane %v8337_v59, 3  ;;  %v3827_v24 = vld [vmem:[#allocation4 + $0x280] sm:$0xff] }
 0x3e0   : > { %v5424_v5 = vsel %vm5381_vm9, %v5423_v15, %v5422_v51  ;;  %v4833_v17 = vrot.slane %v4832_v10, 4  ;;  %v4826_v56 = vrot.slane %v4825_v54, 2  ;;  %v4819_v38 = vrot.slane %v4818_v30, 1 }
 0x3e1   : > { %5492 = vst.msk [vmem:[%s6286_s20 + $0x18] sm:$0xff] %vm389_vm0, %v5424_v5  ;;  %v4840_v25 = vsel %vm389_vm0, %v4460_v16, 0.0  ;;  %v4839_v13 = vsel %vm389_vm0, %v4459_v52, 0.0  ;;  %v4810_v48 = vrot.slane %v4809_v19, 1  ;;  %v5145_v51 = vrot.slane %v8337_v59, 4 }
 0x3e2   : > { %v4834_v39 = vadd.f32 %v4833_v17, %v4832_v10  ;;  %v4841_v18 = vadd.f32 %v4840_v25, %v4839_v13  ;;  %v4178_v2 = vpop.permute.xlu1 %4177  ;;  %v4174_v12 = vpop.permute.xlu0 %4173  ;;  %v4827_v27 = vadd.f32 %v4826_v56, %v4825_v54  ;;  %v3828_v10 = vld [vmem:[#allocation4 + $0x288] sm:$0xff]  ;;  %v4820_v57 = vadd.f32 %v4819_v38, %v4818_v30 }
 0x3e3   : > { %v4462_v53 = vmul.f32 %v4178_v2, %v3822_v36  ;;  %v4461_v44 = vmul.f32 %v4174_v12, %v3821_v4  ;;  %v5146_v61 = vrot.slane %v8337_v59, 5 }
 0x3e4   : > { %v4835_v31 = vrot.slane %v4834_v39, 2  ;;  %v4842_v23 = vrot.slane %v4841_v18, 4  ;;  %v4828_v62 = vrot.slane %v4827_v27, 1  ;;  %v5267_v32 = vadd.f32 %v5142_v49, %v4820_v57 }
 0x3e5   : > { %v4849_v60 = vsel %vm389_vm0, %v4462_v53, 0.0  ;;  %v4848_v6 = vsel %vm389_vm0, %v4461_v44, 0.0  ;;  %v3830_v53 = vld [vmem:[#allocation4 + $0x298] sm:$0xff]  ;;  %v3829_v44 = vld [vmem:[#allocation4 + $0x290] sm:$0xff] }
 0x3e6   : > { %v4843_v41 = vadd.f32 %v4842_v23, %v4841_v18  ;;  %v4850_v9 = vadd.f32 %v4849_v60, %v4848_v6  ;;  %v4186_v42 = vpop.permute.xlu1 %4185  ;;  %v4182_v14 = vpop.permute.xlu0 %4181  ;;  %v4836_v8 = vadd.f32 %v4835_v31, %v4834_v39  ;;  %v4829_v52 = vadd.f32 %v4828_v62, %v4827_v27 }
 0x3e7   : > { %v4464_v22 = vmul.f32 %v4186_v42, %v3824_v58  ;;  %v4463_v47 = vmul.f32 %v4182_v14, %v3823_v28  ;;  %v4811_v39 = vadd.f32 %v4810_v48, %v4809_v19  ;;  %v5147_v19 = vrot.slane %v8337_v59, 6 }
 0x3e8   : > { %v4844_v29 = vrot.slane %v4843_v41, 2  ;;  %v4851_v7 = vrot.slane %v4850_v9, 4  ;;  %v4837_v0 = vrot.slane %v4836_v8, 1  ;;  %v5268_v28 = vadd.f32 %v5143_v20, %v4829_v52 }
 0x3e9   : > { %v4858_v33 = vsel %vm389_vm0, %v4464_v22, 0.0  ;;  %v4857_v50 = vsel %vm389_vm0, %v4463_v47, 0.0 }
 0x3ea   : > { %v4845_v55 = vadd.f32 %v4844_v29, %v4843_v41  ;;  %v4852_v11 = vadd.f32 %v4851_v7, %v4850_v9  ;;  %v4859_v40 = vadd.f32 %v4858_v33, %v4857_v50  ;;  %v4194_v34 = vpop.permute.xlu1 %4193  ;;  %v4190_v3 = vpop.permute.xlu0 %4189  ;;  %v4838_v18 = vadd.f32 %v4837_v0, %v4836_v8  ;;  %v3846_v0 = vld [vmem:[#allocation4 + $0x318] sm:$0xff] }
 0x3eb   : > { %v4466_v35 = vmul.f32 %v4194_v34, %v3826_v1  ;;  %v4465_v46 = vmul.f32 %v4190_v3, %v3825_v45  ;;  %v5425_v29 = vrot.slane %v5267_v32, 7  ;;  %v5427_v34 = vrot.slane %v5268_v28, 6 }
 0x3ec   : > { %v4853_v26 = vrot.slane %v4852_v11, 2  ;;  %v4860_v15 = vrot.slane %v4859_v40, 4  ;;  %v4846_v5 = vrot.slane %v4845_v55, 1  ;;  %v5269_v22 = vadd.f32 %v5144_v21, %v4838_v18 }
 0x3ed   : > { %v4867_v54 = vsel %vm389_vm0, %v4466_v35, 0.0  ;;  %v4866_v16 = vsel %vm389_vm0, %v4465_v46, 0.0 }
 0x3ee   : > { %v4854_v63 = vadd.f32 %v4853_v26, %v4852_v11  ;;  %v4861_v17 = vadd.f32 %v4860_v15, %v4859_v40  ;;  %v4202_v36 = vpop.permute.xlu1 %4201  ;;  %v4198_v4 = vpop.permute.xlu0 %4197  ;;  %v4868_v25 = vadd.f32 %v4867_v54, %v4866_v16  ;;  %v4847_v30 = vadd.f32 %v4846_v5, %v4845_v55  ;;  %v3845_v55 = vld [vmem:[#allocation4 + $0x310] sm:$0xff] }
 0x3ef   : > { %v4468_v13 = vmul.f32 %v4202_v36, %v3828_v10  ;;  %v4467_v56 = vmul.f32 %v4198_v4, %v3827_v24  ;;  %v5266_v40 = vadd.f32 %v8337_v59, %v4811_v39  ;;  %v5429_v21 = vrot.slane %v5269_v22, 5  ;;  %v8930_v10 = vld [vmem:[#allocation10_spill] sm:$0xff] }
 0x3f0   : > { %v4855_v2 = vrot.slane %v4854_v63, 1  ;;  %v4862_v12 = vrot.slane %v4861_v17, 2  ;;  %v4869_v31 = vrot.slane %v4868_v25, 4  ;;  %v5270_v38 = vadd.f32 %v5145_v51, %v4847_v30  ;;  %v3831_v51 = vld [vmem:[#allocation4 + $0x2a0] sm:$0xff] }
 0x3f1   : > { %v4876_v23 = vsel %vm389_vm0, %v4468_v13, 0.0  ;;  %v4875_v58 = vsel %vm389_vm0, %v4467_v56, 0.0  ;;  %v5148_v15 = vrot.slane %v8337_v59, 7  ;;  %v8357_v24 = vmul.f32 %v8282_v43, %v8930_v10 }
 0x3f2   : > { %v4863_v60 = vadd.f32 %v4862_v12, %v4861_v17  ;;  %v4877_v6 = vadd.f32 %v4876_v23, %v4875_v58  ;;  %v4210_v27 = vpop.permute.xlu1 %4209  ;;  %v4206_v41 = vpop.permute.xlu0 %4205  ;;  %v4856_v9 = vadd.f32 %v4855_v2, %v4854_v63  ;;  %v4870_v42 = vadd.f32 %v4869_v31, %v4868_v25  ;;  %v3861_v17 = vld [vmem:[#allocation4 + $0x390] sm:$0xff]  ;;  %v3832_v2 = vld [vmem:[#allocation4 + $0x2a8] sm:$0xff]  ;;  %v3862_v12 = vld [vmem:[#allocation4 + $0x398] sm:$0xff] }
 0x3f3   : > { %v4470_v14 = vmul.f32 %v4210_v27, %v3830_v53  ;;  %v4469_v37 = vmul.f32 %v4206_v41, %v3829_v44  ;;  %v5426_v54 = vsel %vm5363_vm3, %v5425_v29, %v5266_v40  ;;  %v5431_v16 = vrot.slane %v5270_v38, 4 }
 0x3f4   : > { %v4864_v47 = vrot.slane %v4863_v60, 1  ;;  %v4878_v8 = vrot.slane %v4877_v6, 4  ;;  %v4871_v7 = vrot.slane %v4870_v42, 2  ;;  %v5271_v3 = vadd.f32 %v5146_v61, %v4856_v9 }
 0x3f5   : > { %v4885_v1 = vsel %vm389_vm0, %v4470_v14, 0.0  ;;  %v4884_v45 = vsel %vm389_vm0, %v4469_v37, 0.0  ;;  %v5428_v4 = vsel %vm5366_vm4, %v5427_v34, %v5426_v54  ;;  %v5149_v22 = vrot.slane %v8357_v24, 1 }
 0x3f6   : > { %v4865_v49 = vadd.f32 %v4864_v47, %v4863_v60  ;;  %v4879_v33 = vadd.f32 %v4878_v8, %v4877_v6  ;;  %v4886_v50 = vadd.f32 %v4885_v1, %v4884_v45  ;;  %v4270_v62 = vpop.permute.xlu1 %4269  ;;  %v4214_v11 = vpop.permute.xlu0 %4213  ;;  %v4872_v20 = vadd.f32 %v4871_v7, %v4870_v42  ;;  %v3847_v8 = vld [vmem:[#allocation4 + $0x320] sm:$0xff] }
 0x3f7   : > { %v4485_v57 = vmul.f32 %v4270_v62, %v3845_v55  ;;  %v5433_v61 = vrot.slane %v5271_v3, 3  ;;  %v5430_v59 = vsel %vm5369_vm5, %v5429_v21, %v5428_v4  ;;  %v4471_v18 = vmul.f32 %v4214_v11, %v3831_v51 }
 0x3f8   : > { %v5272_v35 = vadd.f32 %v5147_v19, %v4865_v49  ;;  %v4880_v46 = vrot.slane %v4879_v33, 2  ;;  %v4887_v48 = vrot.slane %v4886_v50, 4  ;;  %v4873_v26 = vrot.slane %v4872_v20, 1  ;;  %v3848_v19 = vld [vmem:[#allocation4 + $0x328] sm:$0xff] }
 0x3f9   : > { %v4956_v44 = vsel %vm389_vm0, %v4485_v57, 0.0  ;;  %v5432_v23 = vsel %vm5372_vm6, %v5431_v16, %v5430_v59  ;;  %v4893_v47 = vsel %vm389_vm0, %v4471_v18, 0.0 }
 0x3fa   : > { %v4881_v52 = vadd.f32 %v4880_v46, %v4879_v33  ;;  %v4888_v5 = vadd.f32 %v4887_v48, %v4886_v50  ;;  %v4334_v63 = vpop.permute.xlu1 %4333  ;;  %v4274_v36 = vpop.permute.xlu0 %4273  ;;  %v4874_v25 = vadd.f32 %v4873_v26, %v4872_v20  ;;  %v5435_v56 = vrot.slane %v5272_v35, 2 }
 0x3fb   : > { %v4486_v13 = vmul.f32 %v4274_v36, %v3846_v0  ;;  %v4501_v32 = vmul.f32 %v4334_v63, %v3861_v17  ;;  %v5434_v27 = vsel %vm5375_vm7, %v5433_v61, %v5432_v23  ;;  %v3833_v36 = vld [vmem:[#allocation4 + $0x2b0] sm:$0xff] }
 0x3fc   : > { %v4889_v39 = vrot.slane %v4888_v5, 2  ;;  %v5273_v53 = vadd.f32 %v5148_v15, %v4874_v25  ;;  %v4882_v58 = vrot.slane %v4881_v52, 1  ;;  %v5436_v14 = vsel %vm5378_vm8, %v5435_v56, %v5434_v27  ;;  %v3844_v56 = vld [vmem:[#allocation4 + $0x308] sm:$0xff] }
 0x3fd   : > { %v4957_v31 = vsel %vm389_vm0, %v4486_v13, 0.0  ;;  %v5028_v7 = vsel %vm389_vm0, %v4501_v32, 0.0  ;;  %v5150_v13 = vrot.slane %v8357_v24, 2 }
 0x3fe   : > { %v4890_v28 = vadd.f32 %v4889_v39, %v4888_v5  ;;  %v4958_v30 = vadd.f32 %v4957_v31, %v4956_v44  ;;  %v4218_v60 = vpop.permute.xlu1 %4217  ;;  %v4338_v6 = vpop.permute.xlu0 %4337  ;;  %v5437_v41 = vrot.slane %v5273_v53, 1  ;;  %v4883_v38 = vadd.f32 %v4882_v58, %v4881_v52  ;;  %v3834_v52 = vld [vmem:[#allocation4 + $0x2b8] sm:$0xff]  ;;  %v3843_v39 = vld [vmem:[#allocation4 + $0x300] sm:$0xff] }
 0x3ff   : > { %v4472_v9 = vmul.f32 %v4218_v60, %v3832_v2  ;;  %v4502_v42 = vmul.f32 %v4338_v6, %v3862_v12 }
 0x400   : > { %v4891_v37 = vrot.slane %v4890_v28, 1  ;;  %v5438_v29 = vsel %vm5381_vm9, %v5437_v41, %v5436_v14  ;;  %v4959_v3 = vrot.slane %v4958_v30, 4  ;;  %v5274_v46 = vadd.f32 %v8357_v24, %v4883_v38 }
 0x401   : > { %v4894_v1 = vsel %vm389_vm0, %v4472_v9, 0.0  ;;  %v5029_v45 = vsel %vm389_vm0, %v4502_v42, 0.0  ;;  %5493 = vst.msk [vmem:[%s6286_s20 + $0x20] sm:$0xff] %vm389_vm0, %v5438_v29 }
 0x402   : > { %v4892_v49 = vadd.f32 %v4891_v37, %v4890_v28  ;;  %v4895_v33 = vadd.f32 %v4894_v1, %v4893_v47  ;;  %v8375_v50 = vadd.f32 %v5029_v45, %v5028_v7  ;;  %v4282_v62 = vpop.permute.xlu1 %4281  ;;  %v4278_v55 = vpop.permute.xlu0 %4277  ;;  %v4960_v51 = vadd.f32 %v4959_v3, %v4958_v30  ;;  %v3864_v28 = vld [vmem:[#allocation4 + $0x3a8] sm:$0xff]  ;;  %v3863_v30 = vld [vmem:[#allocation4 + $0x3a0] sm:$0xff] }
 0x403   : > { %v4488_v11 = vmul.f32 %v4282_v62, %v3848_v19  ;;  %v4487_v40 = vmul.f32 %v4278_v55, %v3847_v8  ;;  %v3849_v19 = vld [vmem:[#allocation4 + $0x330] sm:$0xff] }
 0x404   : > { %v5275_v34 = vadd.f32 %v5149_v22, %v4892_v49  ;;  %v4896_v20 = vrot.slane %v4895_v33, 4  ;;  %v4961_v61 = vrot.slane %v4960_v51, 2  ;;  %v3850_v22 = vld [vmem:[#allocation4 + $0x338] sm:$0xff]  ;;  %v8931_v8 = vld [vmem:[#allocation11_spill] sm:$0xff] }
 0x405   : > { %v4966_v21 = vsel %vm389_vm0, %v4488_v11, 0.0  ;;  %v4965_v35 = vsel %vm389_vm0, %v4487_v40, 0.0  ;;  %v8388_v29 = vmul.f32 %v8282_v43, %v8931_v8  ;;  %v5031_v40 = vrot.slane %v8375_v50, 4 }
 0x406   : > { %v5439_v48 = vrot.slane %v5275_v34, 7  ;;  %v4897_v0 = vadd.f32 %v4896_v20, %v4895_v33  ;;  %v4346_v26 = vpop.permute.xlu1 %4345  ;;  %v4342_v15 = vpop.permute.xlu0 %4341  ;;  %v4967_v10 = vadd.f32 %v4966_v21, %v4965_v35  ;;  %v4962_v23 = vadd.f32 %v4961_v61, %v4960_v51 }
 0x407   : > { %v4504_v7 = vmul.f32 %v4346_v26, %v3864_v28  ;;  %v4503_v1 = vmul.f32 %v4342_v15, %v3863_v30  ;;  %v3860_v15 = vld [vmem:[#allocation4 + $0x388] sm:$0xff]  ;;  %v5157_v51 = vrot.slane %v8388_v29, 2 }
 0x408   : > { %v5440_v57 = vsel %vm5363_vm3, %v5439_v48, %v5274_v46  ;;  %v4898_v54 = vrot.slane %v4897_v0, 2  ;;  %v4968_v16 = vrot.slane %v4967_v10, 4  ;;  %v4963_v45 = vrot.slane %v4962_v23, 1 }
 0x409   : > { %v5038_v21 = vsel %vm389_vm0, %v4504_v7, 0.0  ;;  %v5037_v35 = vsel %vm389_vm0, %v4503_v1, 0.0  ;;  %v5156_v48 = vrot.slane %v8388_v29, 1 }
 0x40a   : > { %v4899_v5 = vadd.f32 %v4898_v54, %v4897_v0  ;;  %v4226_v63 = vpop.permute.xlu1 %4225  ;;  %v4222_v17 = vpop.permute.xlu0 %4221  ;;  %v4969_v4 = vadd.f32 %v4968_v16, %v4967_v10  ;;  %v4964_v46 = vadd.f32 %v4963_v45, %v4962_v23  ;;  %v3859_v10 = vld [vmem:[#allocation4 + $0x380] sm:$0xff]  ;;  %v3836_v45 = vld [vmem:[#allocation4 + $0x2c8] sm:$0xff] }
 0x40b   : > { %v4474_v59 = vmul.f32 %v4226_v63, %v3834_v52  ;;  %v4473_v2 = vmul.f32 %v4222_v17, %v3833_v36  ;;  %v5032_v52 = vadd.f32 %v5031_v40, %v8375_v50 }
 0x40c   : > { %v4900_v25 = vrot.slane %v4899_v5, 1  ;;  %v4970_v18 = vrot.slane %v4969_v4, 2 }
 0x40d   : > { %v4903_v60 = vsel %vm389_vm0, %v4474_v59, 0.0  ;;  %v4902_v27 = vsel %vm389_vm0, %v4473_v2, 0.0 }
 0x40e   : > { %v4901_v12 = vadd.f32 %v4900_v25, %v4899_v5  ;;  %v4266_v53 = vpop.permute.xlu1 %4265  ;;  %v4262_v44 = vpop.permute.xlu0 %4261  ;;  %v4971_v6 = vadd.f32 %v4970_v18, %v4969_v4  ;;  %v4904_v49 = vadd.f32 %v4903_v60, %v4902_v27  ;;  %v5039_v5 = vadd.f32 %v5038_v21, %v5037_v35 }
 0x40f   : > { %v4484_v32 = vmul.f32 %v4266_v53, %v3844_v56  ;;  %v4483_v31 = vmul.f32 %v4262_v44, %v3843_v39  ;;  %v5283_v25 = vadd.f32 %v5156_v48, %v4964_v46  ;;  %v5033_v18 = vrot.slane %v5032_v52, 2 }
 0x410   : > { %v5276_v58 = vadd.f32 %v5150_v13, %v4901_v12  ;;  %v4972_v62 = vrot.slane %v4971_v6, 1  ;;  %v4905_v0 = vrot.slane %v4904_v49, 4  ;;  %v5040_v2 = vrot.slane %v5039_v5, 4 }
 0x411   : > { %v4948_v41 = vsel %vm389_vm0, %v4484_v32, 0.0  ;;  %v4947_v9 = vsel %vm389_vm0, %v4483_v31, 0.0  ;;  %v8932_v32 = vld [vmem:[#allocation12_spill] sm:$0xff]  ;;  %v5034_v27 = vadd.f32 %v5033_v18, %v5032_v52 }
 0x412   : > { %v5441_v42 = vrot.slane %v5276_v58, 6  ;;  %v4949_v14 = vadd.f32 %v4948_v41, %v4947_v9  ;;  %v4290_v37 = vpop.permute.xlu1 %4289  ;;  %v4286_v47 = vpop.permute.xlu0 %4285  ;;  %v4906_v13 = vadd.f32 %v4905_v0, %v4904_v49  ;;  %v8403_v31 = vmul.f32 %v8282_v43, %v8932_v32  ;;  %v3835_v49 = vld [vmem:[#allocation4 + $0x2c0] sm:$0xff] }
 0x413   : > { %v4490_v55 = vmul.f32 %v4290_v37, %v3850_v22  ;;  %v4489_v11 = vmul.f32 %v4286_v47, %v3849_v19  ;;  %v5453_v58 = vrot.slane %v5283_v25, 7  ;;  %v5041_v41 = vadd.f32 %v5040_v2, %v5039_v5  ;;  %v3865_v37 = vld [vmem:[#allocation4 + $0x3b0] sm:$0xff] }
 0x414   : > { %v8391_v38 = vsel %vm5366_vm4, %v5441_v42, %v5440_v57  ;;  %v4950_v33 = vrot.slane %v4949_v14, 4  ;;  %v4973_v57 = vadd.f32 %v4972_v62, %v4971_v6  ;;  %v4907_v28 = vrot.slane %v4906_v13, 2 }
 0x415   : > { %v4975_v54 = vsel %vm389_vm0, %v4490_v55, 0.0  ;;  %v4974_v16 = vsel %vm389_vm0, %v4489_v11, 0.0  ;;  %v5163_v19 = vrot.slane %v8403_v31, 1  ;;  %v5164_v8 = vrot.slane %v8403_v31, 2 }
 0x416   : > { %v4951_v34 = vadd.f32 %v4950_v33, %v4949_v14  ;;  %v4330_v3 = vpop.permute.xlu1 %4329  ;;  %v4326_v20 = vpop.permute.xlu0 %4325  ;;  %v4976_v56 = vadd.f32 %v4975_v54, %v4974_v16  ;;  %v5284_v39 = vadd.f32 %v5157_v51, %v4973_v57  ;;  %v3866_v14 = vld [vmem:[#allocation4 + $0x3b8] sm:$0xff]  ;;  %v4908_v7 = vadd.f32 %v4907_v28, %v4906_v13  ;;  %v3837_v54 = vld [vmem:[#allocation4 + $0x2d0] sm:$0xff]  ;;  %v3851_v13 = vld [vmem:[#allocation4 + $0x340] sm:$0xff] }
 0x417   : > { %v4500_v4 = vmul.f32 %v4330_v3, %v3860_v15  ;;  %v4499_v61 = vmul.f32 %v4326_v20, %v3859_v10  ;;  %v5151_v33 = vrot.slane %v8357_v24, 3  ;;  %v5158_v62 = vrot.slane %v8388_v29, 3  ;;  %v3838_v51 = vld [vmem:[#allocation4 + $0x2d8] sm:$0xff]  ;;  %v3853_v28 = vld [vmem:[#allocation4 + $0x350] sm:$0xff] }
 0x418   : > { %v4952_v26 = vrot.slane %v4951_v34, 2  ;;  %v4977_v60 = vrot.slane %v4976_v56, 4  ;;  %v5455_v6 = vrot.slane %v5284_v39, 6  ;;  %v5035_v40 = vrot.slane %v5034_v27, 1 }
 0x419   : > { %v5020_v50 = vsel %vm389_vm0, %v4500_v4, 0.0  ;;  %v5019_v23 = vsel %vm389_vm0, %v4499_v61, 0.0  ;;  %v5165_v20 = vrot.slane %v8403_v31, 3  ;;  %v5152_v0 = vrot.slane %v8357_v24, 4 }
 0x41a   : > { %v4953_v63 = vadd.f32 %v4952_v26, %v4951_v34  ;;  %v4354_v17 = vpop.permute.xlu1 %4353  ;;  %v4350_v36 = vpop.permute.xlu0 %4349  ;;  %v5021_v42 = vadd.f32 %v5020_v50, %v5019_v23  ;;  %v4978_v1 = vadd.f32 %v4977_v60, %v4976_v56  ;;  %v5042_v34 = vrot.slane %v5041_v41, 2 }
 0x41b   : > { %v4506_v55 = vmul.f32 %v4354_v17, %v3866_v14  ;;  %v4505_v11 = vmul.f32 %v4350_v36, %v3865_v37  ;;  %v5159_v26 = vrot.slane %v8388_v29, 4  ;;  %v4909_v15 = vrot.slane %v4908_v7, 1  ;;  %v3867_v14 = vld [vmem:[#allocation4 + $0x3c0] sm:$0xff] }
 0x41c   : > { %v4954_v59 = vrot.slane %v4953_v63, 1  ;;  %v5022_v3 = vrot.slane %v5021_v42, 4  ;;  %v4979_v10 = vrot.slane %v4978_v1, 2  ;;  %v5166_v57 = vrot.slane %v8403_v31, 4 }
 0x41d   : > { %v5153_v16 = vrot.slane %v8357_v24, 5  ;;  %v5047_v52 = vsel %vm389_vm0, %v4506_v55, 0.0  ;;  %v5046_v5 = vsel %vm389_vm0, %v4505_v11, 0.0  ;;  %v5160_v17 = vrot.slane %v8388_v29, 5 }
 0x41e   : > { %v4955_v12 = vadd.f32 %v4954_v59, %v4953_v63  ;;  %v4234_v53 = vpop.permute.xlu1 %4233  ;;  %v4230_v44 = vpop.permute.xlu0 %4229  ;;  %v3852_v63 = vld [vmem:[#allocation4 + $0x348] sm:$0xff]  ;;  %v5167_v36 = vrot.slane %v8403_v31, 5  ;;  %v5036_v4 = vadd.f32 %v5035_v40, %v5034_v27  ;;  %v5043_v61 = vadd.f32 %v5042_v34, %v5041_v41 }
 0x41f   : > { %v4476_v46 = vmul.f32 %v4234_v53, %v3836_v45  ;;  %v4475_v48 = vmul.f32 %v4230_v44, %v3835_v49  ;;  %v5023_v25 = vadd.f32 %v5022_v3, %v5021_v42  ;;  %v5154_v39 = vrot.slane %v8357_v24, 6  ;;  %v3868_v42 = vld [vmem:[#allocation4 + $0x3c8] sm:$0xff] }
 0x420   : > { %v5282_v30 = vadd.f32 %v8388_v29, %v4955_v12  ;;  %v4910_v44 = vadd.f32 %v4909_v15, %v4908_v7  ;;  %v4980_v32 = vadd.f32 %v4979_v10, %v4978_v1  ;;  %v5048_v50 = vadd.f32 %v5047_v52, %v5046_v5 }
 0x421   : > { %v4912_v18 = vsel %vm389_vm0, %v4476_v46, 0.0  ;;  %v4911_v2 = vsel %vm389_vm0, %v4475_v48, 0.0  ;;  %v5161_v60 = vrot.slane %v8388_v29, 6  ;;  %v5155_v27 = vrot.slane %v8357_v24, 7  ;;  %v3870_v46 = vld [vmem:[#allocation4 + $0x3d8] sm:$0xff]  ;;  %v3869_v48 = vld [vmem:[#allocation4 + $0x3d0] sm:$0xff] }
 0x422   : > { %v5454_v9 = vsel %vm5363_vm3, %v5453_v58, %v5282_v30  ;;  %v4298_v22 = vpop.permute.xlu1 %4297  ;;  %v4294_v43 = vpop.permute.xlu0 %4293  ;;  %v3854_v58 = vld [vmem:[#allocation4 + $0x358] sm:$0xff]  ;;  %v5024_v41 = vrot.slane %v5023_v25, 2  ;;  %v5044_v49 = vrot.slane %v5043_v61, 1  ;;  %v5277_v11 = vadd.f32 %v5151_v33, %v4910_v44 }
 0x423   : > { %v8410_v47 = vsel %vm5366_vm4, %v5455_v6, %v5454_v9  ;;  %v4492_v23 = vmul.f32 %v4298_v22, %v3852_v63  ;;  %v4491_v30 = vmul.f32 %v4294_v43, %v3851_v13  ;;  %v5168_v6 = vrot.slane %v8403_v31, 6 }
 0x424   : > { %v4913_v9 = vadd.f32 %v4912_v18, %v4911_v2  ;;  %v8433_v22 = vadd.f32 %v5163_v19, %v5036_v4  ;;  %v4981_v40 = vrot.slane %v4980_v32, 1  ;;  %v5049_v34 = vrot.slane %v5048_v50, 4 }
 0x425   : > { %v4984_v3 = vsel %vm389_vm0, %v4492_v23, 0.0  ;;  %v4983_v15 = vsel %vm389_vm0, %v4491_v30, 0.0  ;;  %v5025_v52 = vadd.f32 %v5024_v41, %v5023_v25  ;;  %v5169_v18 = vrot.slane %v8403_v31, 7  ;;  %v3839_v25 = vld [vmem:[#allocation4 + $0x2e0] sm:$0xff] }
 0x426   : > { %v4362_v21 = vpop.permute.xlu1 %4361  ;;  %v4358_v35 = vpop.permute.xlu0 %4357  ;;  %v4914_v5 = vrot.slane %v4913_v9, 4  ;;  %v5467_v2 = vrot.slane %v8433_v22, 7  ;;  %v5443_v30 = vrot.slane %v5277_v11, 5 }
 0x427   : > { %v4508_v10 = vmul.f32 %v4362_v21, %v3868_v42  ;;  %v4982_v21 = vadd.f32 %v4981_v40, %v4980_v32  ;;  %v5026_v41 = vrot.slane %v5025_v52, 1  ;;  %v5050_v42 = vadd.f32 %v5049_v34, %v5048_v50  ;;  %v3856_v50 = vld [vmem:[#allocation4 + $0x368] sm:$0xff] }
 0x429   : > { %v5056_v44 = vsel %vm389_vm0, %v4508_v10, 0.0 }
 0x42a   : > { %v4242_v59 = vpop.permute.xlu1 %4241  ;;  %v4238_v56 = vpop.permute.xlu0 %4237 }
 0x42b   : > { %v4478_v12 = vmul.f32 %v4242_v59, %v3838_v51  ;;  %v4477_v53 = vmul.f32 %v4238_v56, %v3837_v54  ;;  %v4507_v51 = vmul.f32 %v4358_v35, %v3867_v14  ;;  %v5162_v56 = vrot.slane %v8388_v29, 7 }
 0x42c   : > { %v4985_v35 = vadd.f32 %v4984_v3, %v4983_v15  ;;  %v4915_v14 = vadd.f32 %v4914_v5, %v4913_v9  ;;  %v3855_v9 = vld [vmem:[#allocation4 + $0x360] sm:$0xff]  ;;  %v5027_v5 = vadd.f32 %v5026_v41, %v5025_v52 }
 0x42d   : > { %v4921_v37 = vsel %vm389_vm0, %v4478_v12, 0.0  ;;  %v4920_v7 = vsel %vm389_vm0, %v4477_v53, 0.0  ;;  %v5045_v12 = vadd.f32 %v5044_v49, %v5043_v61  ;;  %v3840_v53 = vld [vmem:[#allocation4 + $0x2e8] sm:$0xff]  ;;  %v5055_v23 = vsel %vm389_vm0, %v4507_v51, 0.0 }
 0x42e   : > { %v4306_v1 = vpop.permute.xlu1 %4305  ;;  %v4302_v45 = vpop.permute.xlu0 %4301  ;;  %v4922_v54 = vadd.f32 %v4921_v37, %v4920_v7  ;;  %v5057_v11 = vadd.f32 %v5056_v44, %v5055_v23 }
 0x42f   : > { %v4494_v43 = vmul.f32 %v4306_v1, %v3854_v58  ;;  %v4493_v55 = vmul.f32 %v4302_v45, %v3853_v28  ;;  %v8448_v49 = vadd.f32 %v5164_v8, %v5045_v12  ;;  %v5051_v8 = vrot.slane %v5050_v42, 2  ;;  %v3872_v12 = vld [vmem:[#allocation4 + $0x3e8] sm:$0xff] }
 0x430   : > { %v4923_v58 = vrot.slane %v4922_v54, 4 }
 0x431   : > { %v4993_v19 = vsel %vm389_vm0, %v4494_v43, 0.0  ;;  %v4992_v63 = vsel %vm389_vm0, %v4493_v55, 0.0  ;;  %v8452_v43 = vadd.f32 %v5158_v62, %v4982_v21  ;;  %v4986_v55 = vrot.slane %v4985_v35, 4  ;;  %v3871_v21 = vld [vmem:[#allocation4 + $0x3e0] sm:$0xff] }
 0x432   : > { %v4370_v4 = vpop.permute.xlu1 %4369  ;;  %v4366_v13 = vpop.permute.xlu0 %4365  ;;  %v4994_v28 = vadd.f32 %v4993_v19, %v4992_v63  ;;  %v4924_v40 = vadd.f32 %v4923_v58, %v4922_v54  ;;  %v4916_v19 = vrot.slane %v4915_v14, 2  ;;  %v8463_v23 = vadd.f32 %v5051_v8, %v5050_v42 }
 0x433   : > { %v4510_v33 = vmul.f32 %v4370_v4, %v3870_v46  ;;  %v4509_v59 = vmul.f32 %v4366_v13, %v3869_v48  ;;  %v8458_v48 = vsel %vm5369_vm5, %v5443_v30, %v8391_v38  ;;  %v5457_v54 = vrot.slane %v8452_v43, 5 }
 0x434   : > { %v4995_v34 = vrot.slane %v4994_v28, 4  ;;  %v4987_v13 = vadd.f32 %v4986_v55, %v4985_v35  ;;  %v4917_v35 = vadd.f32 %v4916_v19, %v4915_v14  ;;  %v5053_v19 = vrot.slane %v8463_v23, 1 }
 0x435   : > { %v5065_v1 = vsel %vm389_vm0, %v4510_v33, 0.0  ;;  %v5064_v61 = vsel %vm389_vm0, %v4509_v59, 0.0  ;;  %v5058_v33 = vrot.slane %v5057_v11, 4 }
 0x436   : > { %v4250_v37 = vpop.permute.xlu1 %4249  ;;  %v4246_v7 = vpop.permute.xlu0 %4245  ;;  %v5066_v15 = vadd.f32 %v5065_v1, %v5064_v61 }
 0x437   : > { %v4480_v32 = vmul.f32 %v4250_v37, %v3840_v53  ;;  %v4479_v45 = vmul.f32 %v4246_v7, %v3839_v25  ;;  %v4925_v53 = vrot.slane %v4924_v40, 2  ;;  %v4996_v25 = vadd.f32 %v4995_v34, %v4994_v28 }
 0x438   : > { %v5067_v58 = vrot.slane %v5066_v15, 4  ;;  %v5290_v7 = vadd.f32 %v8403_v31, %v5027_v5 }
 0x439   : > { %v4930_v3 = vsel %vm389_vm0, %v4480_v32, 0.0  ;;  %v4929_v46 = vsel %vm389_vm0, %v4479_v45, 0.0  ;;  %v4988_v32 = vrot.slane %v4987_v13, 2  ;;  %v5059_v45 = vadd.f32 %v5058_v33, %v5057_v11 }
 0x43a   : > { %v4931_v10 = vadd.f32 %v4930_v3, %v4929_v46  ;;  %v4314_v51 = vpop.permute.xlu1 %4313  ;;  %v4310_v62 = vpop.permute.xlu0 %4309  ;;  %v4926_v34 = vadd.f32 %v4925_v53, %v4924_v40  ;;  %v4997_v3 = vrot.slane %v4996_v25, 2  ;;  %v5068_v8 = vadd.f32 %v5067_v58, %v5066_v15  ;;  %v3857_v53 = vld [vmem:[#allocation4 + $0x370] sm:$0xff] }
 0x43b   : > { %v4496_v63 = vmul.f32 %v4314_v51, %v3856_v50  ;;  %v4495_v4 = vmul.f32 %v4310_v62, %v3855_v9  ;;  %v3842_v50 = vld [vmem:[#allocation4 + $0x2f8] sm:$0xff]  ;;  %v3841_v9 = vld [vmem:[#allocation4 + $0x2f0] sm:$0xff]  ;;  %v4989_v33 = vadd.f32 %v4988_v32, %v4987_v13  ;;  %v8474_v13 = vsel %vm5363_vm3, %v5467_v2, %v5290_v7 }
 0x43c   : > { %v4932_v59 = vrot.slane %v4931_v10, 4 }
 0x43d   : > { %v5002_v38 = vsel %vm389_vm0, %v4496_v63, 0.0  ;;  %v5001_v44 = vsel %vm389_vm0, %v4495_v4, 0.0  ;;  %v4918_v63 = vrot.slane %v4917_v35, 1 }
 0x43e   : > { %v4933_v52 = vadd.f32 %v4932_v59, %v4931_v10  ;;  %v5003_v30 = vadd.f32 %v5002_v38, %v5001_v44  ;;  %v4378_v41 = vpop.permute.xlu1 %4377  ;;  %v4374_v37 = vpop.permute.xlu0 %4373  ;;  %v5060_v59 = vrot.slane %v5059_v45, 2  ;;  %v4927_v38 = vrot.slane %v4926_v34, 1 }
 0x43f   : > { %v4512_v1 = vmul.f32 %v4378_v41, %v3872_v12  ;;  %v4511_v61 = vmul.f32 %v4374_v37, %v3871_v21  ;;  %v3858_v21 = vld [vmem:[#allocation4 + $0x378] sm:$0xff]  ;;  %v4998_v44 = vadd.f32 %v4997_v3, %v4996_v25  ;;  %v4919_v32 = vadd.f32 %v4918_v63, %v4917_v35 }
 0x440   : > { %v4934_v55 = vrot.slane %v4933_v52, 2  ;;  %v5004_v28 = vrot.slane %v5003_v30, 4 }
 0x441   : > { %v5074_v42 = vsel %vm389_vm0, %v4512_v1, 0.0  ;;  %v5073_v46 = vsel %vm389_vm0, %v4511_v61, 0.0 }
 0x442   : > { %v4935_v10 = vadd.f32 %v4934_v55, %v4933_v52  ;;  %v5005_v51 = vadd.f32 %v5004_v28, %v5003_v30  ;;  %v5075_v62 = vadd.f32 %v5074_v42, %v5073_v46  ;;  %v4258_v5 = vpop.permute.xlu1 %4257  ;;  %v4254_v14 = vpop.permute.xlu0 %4253  ;;  %v5069_v52 = vrot.slane %v5068_v8, 2  ;;  %v3874_v42 = vld [vmem:[#allocation4 + $0x3f8] sm:$0xff]  ;;  %v3873_v46 = vld [vmem:[#allocation4 + $0x3f0] sm:$0xff] }
 0x443   : > { %v4482_v11 = vmul.f32 %v4258_v5, %v3842_v50  ;;  %v4481_v4 = vmul.f32 %v4254_v14, %v3841_v9  ;;  %v4990_v50 = vrot.slane %v4989_v33, 1  ;;  %v5061_v5 = vadd.f32 %v5060_v59, %v5059_v45 }
 0x444   : > { %v5006_v12 = vrot.slane %v5005_v51, 2  ;;  %v5076_v40 = vrot.slane %v5075_v62, 4  ;;  %v4936_v30 = vrot.slane %v4935_v10, 1  ;;  %v4928_v14 = vadd.f32 %v4927_v38, %v4926_v34 }
 0x445   : > { %v4939_v15 = vsel %vm389_vm0, %v4482_v11, 0.0  ;;  %v4938_v58 = vsel %vm389_vm0, %v4481_v4, 0.0  ;;  %v4999_v4 = vrot.slane %v4998_v44, 1  ;;  %v5070_v22 = vadd.f32 %v5069_v52, %v5068_v8 }
 0x446   : > { %v5077_v41 = vadd.f32 %v5076_v40, %v5075_v62  ;;  %v4940_v37 = vadd.f32 %v4939_v15, %v4938_v58  ;;  %v4322_v1 = vpop.permute.xlu1 %4321  ;;  %v4318_v61 = vpop.permute.xlu0 %4317  ;;  %v5007_v25 = vadd.f32 %v5006_v12, %v5005_v51  ;;  %v4937_v40 = vadd.f32 %v4936_v30, %v4935_v10 }
 0x447   : > { %v4498_v55 = vmul.f32 %v4322_v1, %v3858_v21  ;;  %v4497_v28 = vmul.f32 %v4318_v61, %v3857_v53  ;;  %v5278_v12 = vadd.f32 %v5152_v0, %v4919_v32  ;;  %v4991_v15 = vadd.f32 %v4990_v50, %v4989_v33 }
 0x448   : > { %v5078_v9 = vrot.slane %v5077_v41, 2  ;;  %v4941_v3 = vrot.slane %v4940_v37, 4  ;;  %v5008_v45 = vrot.slane %v5007_v25, 1  ;;  %v5062_v59 = vrot.slane %v5061_v5, 1 }
 0x449   : > { %v5011_v62 = vsel %vm389_vm0, %v4498_v55, 0.0  ;;  %v5010_v11 = vsel %vm389_vm0, %v4497_v28, 0.0  ;;  %v5279_v10 = vadd.f32 %v5153_v16, %v4928_v14  ;;  %v5071_v52 = vrot.slane %v5070_v22, 1 }
 0x44a   : > { %v4942_v2 = vadd.f32 %v4941_v3, %v4940_v37  ;;  %v4386_v7 = vpop.permute.xlu1 %4385  ;;  %v4382_v35 = vpop.permute.xlu0 %4381  ;;  %v5079_v63 = vadd.f32 %v5078_v9, %v5077_v41  ;;  %v5012_v21 = vadd.f32 %v5011_v62, %v5010_v11  ;;  %v5000_v37 = vadd.f32 %v4999_v4, %v4998_v44 }
 0x44b   : > { %v4514_v53 = vmul.f32 %v4386_v7, %v3874_v42  ;;  %v4513_v51 = vmul.f32 %v4382_v35, %v3873_v46  ;;  %v5280_v1 = vadd.f32 %v5154_v39, %v4937_v40  ;;  %v5054_v61 = vadd.f32 %v5053_v19, %v8463_v23 }
 0x44c   : > { %v4943_v34 = vrot.slane %v4942_v2, 2  ;;  %v5013_v38 = vrot.slane %v5012_v21, 4  ;;  %v5080_v0 = vrot.slane %v5079_v63, 1  ;;  %v5009_v32 = vadd.f32 %v5008_v45, %v5007_v25 }
 0x44d   : > { %v5083_v58 = vsel %vm389_vm0, %v4514_v53, 0.0  ;;  %v5082_v8 = vsel %vm389_vm0, %v4513_v51, 0.0  ;;  %v5445_v50 = vrot.slane %v5278_v12, 4  ;;  %v5286_v9 = vadd.f32 %v5159_v26, %v4991_v15 }
 0x44e   : > { %v4944_v30 = vadd.f32 %v4943_v34, %v4942_v2  ;;  %v5084_v41 = vadd.f32 %v5083_v58, %v5082_v8  ;;  %v5014_v33 = vadd.f32 %v5013_v38, %v5012_v21  ;;  %v5063_v3 = vadd.f32 %v5062_v59, %v5061_v5 }
 0x44f   : > { %v5447_v42 = vrot.slane %v5279_v10, 3  ;;  %v5072_v46 = vadd.f32 %v5071_v52, %v5070_v22  ;;  %v5287_v39 = vadd.f32 %v5160_v17, %v5000_v37  ;;  %v5449_v62 = vrot.slane %v5280_v1, 2 }
 0x450   : > { %v4945_v55 = vrot.slane %v4944_v30, 1  ;;  %v5085_v28 = vrot.slane %v5084_v41, 4  ;;  %v5015_v16 = vrot.slane %v5014_v33, 2  ;;  %v5081_v11 = vadd.f32 %v5080_v0, %v5079_v63 }
 0x451   : > { %v5293_v23 = vadd.f32 %v5165_v20, %v5054_v61  ;;  %v5288_v19 = vadd.f32 %v5161_v60, %v5009_v32  ;;  %v5446_v5 = vsel %vm5372_vm6, %v5445_v50, %v8458_v48  ;;  %v5459_v22 = vrot.slane %v5286_v9, 4 }
 0x452   : > { %v4946_v14 = vadd.f32 %v4945_v55, %v4944_v30  ;;  %v5086_v44 = vadd.f32 %v5085_v28, %v5084_v41  ;;  %v5016_v4 = vadd.f32 %v5015_v16, %v5014_v33  ;;  %v5294_v17 = vadd.f32 %v5166_v57, %v5063_v3 }
 0x453   : > { %v5448_v2 = vsel %vm5375_vm7, %v5447_v42, %v5446_v5  ;;  %v5295_v20 = vadd.f32 %v5167_v36, %v5072_v46  ;;  %v5461_v35 = vrot.slane %v5287_v39, 3  ;;  %v5471_v63 = vrot.slane %v5293_v23, 5 }
 0x454   : > { %v5281_v26 = vadd.f32 %v5155_v27, %v4946_v14  ;;  %v5087_v25 = vrot.slane %v5086_v44, 2  ;;  %v5017_v40 = vrot.slane %v5016_v4, 1  ;;  %v5450_v24 = vsel %vm5378_vm8, %v5449_v62, %v5448_v2 }
 0x455   : > { %v5296_v27 = vadd.f32 %v5168_v6, %v5081_v11  ;;  %v5463_v21 = vrot.slane %v5288_v19, 2  ;;  %v5469_v51 = vrot.slane %v8448_v49, 6  ;;  %v5458_v36 = vsel %vm5369_vm5, %v5457_v54, %v8410_v47 }
 0x456   : > { %v5451_v7 = vrot.slane %v5281_v26, 1  ;;  %v5088_v60 = vadd.f32 %v5087_v25, %v5086_v44  ;;  %v5018_v48 = vadd.f32 %v5017_v40, %v5016_v4  ;;  %v5473_v12 = vrot.slane %v5294_v17, 4 }
 0x457   : > { %v5460_v15 = vsel %vm5372_vm6, %v5459_v22, %v5458_v36  ;;  %v5475_v45 = vrot.slane %v5295_v20, 3  ;;  %v5470_v49 = vsel %vm5366_vm4, %v5469_v51, %v8474_v13  ;;  %v5477_v43 = vrot.slane %v5296_v27, 2 }
 0x458   : > { %v5452_v57 = vsel %vm5381_vm9, %v5451_v7, %v5450_v24  ;;  %v5089_v53 = vrot.slane %v5088_v60, 1  ;;  %v5289_v6 = vadd.f32 %v5162_v56, %v5018_v48  ;;  %v5462_v59 = vsel %vm5375_vm7, %v5461_v35, %v5460_v15 }
 0x459   : > { %5494 = vst.msk [vmem:[%s6286_s20 + $0x28] sm:$0xff] %vm389_vm0, %v5452_v57  ;;  %v5472_v47 = vsel %vm5369_vm5, %v5471_v63, %v5470_v49  ;;  %v5464_v54 = vsel %vm5378_vm8, %v5463_v21, %v5462_v59 }
 0x45a   : > { %v5090_v34 = vadd.f32 %v5089_v53, %v5088_v60  ;;  %v5465_v38 = vrot.slane %v5289_v6, 1  ;;  %v5474_v56 = vsel %vm5372_vm6, %v5473_v12, %v5472_v47 }
 0x45b   : > { %v5476_v8 = vsel %vm5375_vm7, %v5475_v45, %v5474_v56 }
 0x45c   : > { %v5297_v29 = vadd.f32 %v5169_v18, %v5090_v34  ;;  %v5466_v58 = vsel %vm5381_vm9, %v5465_v38, %v5464_v54  ;;  %v5478_v10 = vsel %vm5378_vm8, %v5477_v43, %v5476_v8 }
 0x45d   : > { %5495 = vst.msk [vmem:[%s6286_s20 + $0x30] sm:$0xff] %vm389_vm0, %v5466_v58 }
 0x45e   : > { %v5479_v13 = vrot.slane %v5297_v29, 1 }
 0x460   : > { %v5480_v52 = vsel %vm5381_vm9, %v5479_v13, %v5478_v10 }
 0x461   : > { %5496 = vst.msk [vmem:[%s6286_s20 + $0x38] sm:$0xff] %vm389_vm0, %v5480_v52 }
 0x462 PF: > { %s16_s25 = sadd.s32 1, %s6185_s25   ;;  %s8933_s21 = smov %s6177_s23 }
 0x463   : > { %p13_p8 = scmp.ge.s32.totalorder %s16_s25, 18   ;;  %s8934_s22 = smov %s6181_s24 }
 0x464   : > { %s8935_s23 = smov %s8938_s26  ;;  %s8936_s24 = smov %s8942_s27 }
 0x465   :  { %15 = sbr.rel (!%p13_p8) target bundleno = 3 (0x3), region = 110 }

</bundles_post_ra>
